<compile_context>
chip_gen: v6e
topology: v6e:2x2x1
jax: 0.10.0
libtpu: 0.0.40
codegen_flags: <defaults>
</compile_context>

<pallas_src>
import numpy as np
import jax
import jax.numpy as jnp
from jax.experimental import pallas as pl
from jax.experimental.pallas import tpu as pltpu

# ----------------------------- configuration --------------------------------
IMG_SIZE = (64, 64)
INPUT_CHANNELS = 1
NUM_CLASSES = 2
OUT_INDEX = 1                      # depth of the CNN backbone
BASE_CH = 8                        # stem channels of simplenet
CNN_OUT_FEATURE = BASE_CH * (2 ** OUT_INDEX)              # 16
TRANS_INPUT = (IMG_SIZE[0] // 2 ** OUT_INDEX,
               IMG_SIZE[1] // 2 ** OUT_INDEX)             # (32, 32)
PATCH = (TRANS_INPUT[0] // 8, TRANS_INPUT[1] // 8)        # (4, 4)
assert min(PATCH) >= 4, "path size must be larger than 4!"
HIDDEN = 64
NUM_HEADS = 4
HEAD_DIM = HIDDEN // NUM_HEADS
MLP_DIM = 128
DEPTH = 2
GH = TRANS_INPUT[0] // PATCH[0]                           # 8
GW = TRANS_INPUT[1] // PATCH[1]                           # 8
N_PATCHES = GH * GW                                       # 64
SEQ = N_PATCHES + 1                                       # 65 (+1 cls token)
PATCH_DIM = PATCH[0] * PATCH[1] * CNN_OUT_FEATURE         # 256
SCALE = 1.0 / (HEAD_DIM ** 0.5)
LN_EPS = 1e-5

H, W = IMG_SIZE
OH, OW = TRANS_INPUT
STEM_COLS = W * BASE_CH                                   # 512 (w-major, c-minor)
CONV1_COLS = OW * CNN_OUT_FEATURE                         # 512
XCAT_COLS = 3 * (W + 2)                                   # 198 (3 row taps concat)
STEM_GROUPS = 2 * PATCH[0] + 1                            # 9 stride-2 tap groups
STEM_ROWS = STEM_GROUPS * GH                              # 72 scratch rows / image
# token layout per image: [cls, 7 x zero pad, 64 patch tokens (gw-major)]
T_PAD = 8 + N_PATCHES                                     # 72


def _build_stem_row_perm():
    """Spatial-row order fed to the stem matmul so that, for every stride-2 conv
    tap value t = -1..7, the required stem rows {8*gh + t} form one contiguous,
    sublane-aligned 8-row group of the stem scratch (group index g = t + 1)."""
    perm = []
    for g in range(STEM_GROUPS):
        t = g - 1
        for gh in range(GH):
            r = 8 * gh + t
            perm.append(0 if r < 0 else r)        # r == -1 -> dummy (zeroed in-kernel)
    return np.asarray(perm, dtype=np.int32)


_STEM_ROW_PERM = _build_stem_row_perm()           # (72,)


# ------------------------------ Pallas kernel --------------------------------
def _hybrid_kernel(xcat_ref, stemw_ref, convb_ref, conv1w_ref, pew_ref,
                   clspos_ref, blkwa_ref, blkwb_ref, blkb_ref, fin_ref,
                   headw_ref, out_ref, stem_scr):
    """Fused simplenet backbone + ViT head for BB images (one grid step)."""
    f32, bf16 = jnp.float32, jnp.bfloat16
    bb = out_ref.shape[1]

    def layernorm(x, g, b):
        mu = jnp.mean(x, axis=-1, keepdims=True)
        var = jnp.mean(jnp.square(x - mu), axis=-1, keepdims=True)
        return (x - mu) * jax.lax.rsqrt(var + LN_EPS) * g + b

    # ---- stem conv3x3 (stride 1, pad 1): ONE concatenated-K MXU matmul ------
    stem = jnp.dot(xcat_ref[...], stemw_ref[...], preferred_element_type=f32)
    stem = jnp.maximum(stem + convb_ref[0:1, :], 0.0)
    stem_scr[...] = stem.astype(bf16)
    for b in range(bb):                      # zero the stride-2 conv's top-pad row
        stem_scr[b * STEM_ROWS:b * STEM_ROWS + 1, :] = jnp.zeros((1, STEM_COLS), bf16)

    # ---- stage-1 conv3x3 (stride 2, pad 1): ONE concatenated-K matmul -------
    # Tap groups are contiguous aligned 8-row slices of the scratch (no strided
    # loads, no row-select matmuls).
    lhs_rows = []
    for ph in range(PATCH[0]):
        for b in range(bb):
            base = b * STEM_ROWS
            taps = [stem_scr[base + 8 * (2 * ph + i): base + 8 * (2 * ph + i) + 8, :]
                    for i in range(3)]
            lhs_rows.append(jnp.concatenate(taps, axis=1))        # (8, 1536)
    conv1_lhs = jnp.concatenate(lhs_rows, axis=0)                 # (bb*32, 1536) bf16
    fea = jnp.dot(conv1_lhs, conv1w_ref[...], preferred_element_type=f32)
    fea = jnp.maximum(fea + convb_ref[1:2, :], 0.0)               # rows (ph, b, gh)

    # ---- patch embedding: block-diagonal folded weight, ONE matmul ----------
    pe_rows = []
    for b in range(bb):
        blocks = [fea[(ph * bb + b) * 8:(ph * bb + b) * 8 + 8, :]
                  for ph in range(PATCH[0])]
        pe_rows.append(jnp.concatenate(blocks, axis=1))           # (8, 2048)
    pe_lhs = jnp.concatenate(pe_rows, axis=0).astype(bf16)        # (bb*8, 2048)
    ptok = jnp.dot(pe_lhs, pew_ref[...], preferred_element_type=f32)  # (bb*8, GW*HIDDEN)

    # ---- assemble tokens [cls, 7 x pad, patches(gw-major)] + pos + patch bias
    tok_blocks = []
    for b in range(bb):
        rows = [clspos_ref[0:8, :]]                               # cls row + 7 zero rows
        for gw in range(GW):
            blk = (ptok[b * 8:(b + 1) * 8, gw * HIDDEN:(gw + 1) * HIDDEN]
                   + clspos_ref[8 + gw * 8:16 + gw * 8, :])
            rows.append(blk)
        tok_blocks.append(jnp.concatenate(rows, axis=0))          # (T_PAD, HIDDEN)
    tok = jnp.concatenate(tok_blocks, axis=0)                     # (bb*T_PAD, HIDDEN) f32

    # additive key mask for the pad tokens (rows 1..7), computed once.
    col = jax.lax.broadcasted_iota(jnp.int32, (1, T_PAD), 1)
    kbias = jnp.where((col >= 1) & (col < 8),
                      jnp.float32(-1e30), jnp.float32(0.0))       # (1, T_PAD)

    # ---- transformer blocks (pre-LN), batch folded into the M dimension -----
    for d in range(DEPTH):
        ln1_g = blkb_ref[d, 0:1, 0:HIDDEN]
        ln1_b = blkb_ref[d, 1:2, 0:HIDDEN]
        qkv_b = blkb_ref[d, 2:3, 0:3 * HIDDEN]
        proj_b = blkb_ref[d, 3:4, 0:HIDDEN]
        ln2_g = blkb_ref[d, 4:5, 0:HIDDEN]
        ln2_b = blkb_ref[d, 5:6, 0:HIDDEN]
        fc1_b = blkb_ref[d, 6:7, 0:MLP_DIM]
        fc2_b = blkb_ref[d, 7:8, 0:HIDDEN]

        y = layernorm(tok, ln1_g, ln1_b)
        qkv = jnp.dot(y.astype(bf16), blkwa_ref[d, :, 0:3 * HIDDEN],
                      preferred_element_type=f32) + qkv_b         # (bb*T_PAD, 192)

        attn_rows = []
        for b in range(bb):
            r = qkv[b * T_PAD:(b + 1) * T_PAD, :]
            kt = jnp.transpose(r[:, HIDDEN:2 * HIDDEN]).astype(bf16)  # one T per layer/img
            heads = []
            for hh in range(NUM_HEADS):
                q = r[:, hh * HEAD_DIM:(hh + 1) * HEAD_DIM].astype(bf16)
                v = r[:, 2 * HIDDEN + hh * HEAD_DIM:
                      2 * HIDDEN + (hh + 1) * HEAD_DIM].astype(bf16)
                s = jnp.dot(q, kt[hh * HEAD_DIM:(hh + 1) * HEAD_DIM, :],
                            preferred_element_type=f32) * SCALE + kbias
                s = s - jnp.max(s, axis=-1, keepdims=True)
                p = jnp.exp(s)
                p = p * pl.reciprocal(jnp.sum(p, axis=-1, keepdims=True), approx=True)
                heads.append(jnp.dot(p.astype(bf16), v, preferred_element_type=f32))
            attn_rows.append(jnp.concatenate(heads, axis=1))      # (T_PAD, HIDDEN)
        attn = jnp.concatenate(attn_rows, axis=0)                 # (bb*T_PAD, HIDDEN)

        proj = jnp.dot(attn.astype(bf16), blkwa_ref[d, :, 256:256 + HIDDEN],
                       preferred_element_type=f32) + proj_b
        tok = tok + proj

        y2 = layernorm(tok, ln2_g, ln2_b)
        h1 = jnp.dot(y2.astype(bf16), blkwa_ref[d, :, 384:384 + MLP_DIM],
                     preferred_element_type=f32) + fc1_b
        # TODO(synk): PyTorch nn.GELU default is exact erf; tanh approximation here.
        h1 = jax.nn.gelu(h1, approximate=True)
        h2 = jnp.dot(h1.astype(bf16), blkwb_ref[d],
                     preferred_element_type=f32) + fc2_b
        tok = tok + h2

    # ---- final LayerNorm (cls rows only) + classification head --------------
    cls_rows = jnp.concatenate([tok[b * T_PAD:b * T_PAD + 1, :] for b in range(bb)],
                               axis=0)                            # (bb, HIDDEN)
    yf = layernorm(cls_rows, fin_ref[0:1, :], fin_ref[1:2, :])
    logits = jnp.dot(yf.astype(bf16), headw_ref[...], preferred_element_type=f32)
    out_ref[0] = logits + fin_ref[2:3, 0:NUM_CLASSES]


# ------------------------------ parameters -----------------------------------
def init_params(key):
    def nrm(key, shape, scale=0.02):
        return scale * jax.random.normal(key, shape, dtype=jnp.float32)

    keys = iter(jax.random.split(key, 64))
    p = {}
    # simplenet backbone (weights stored in im2col layout: (kh*kw*Cin, Cout)).
    cin, cout = INPUT_CHANNELS, BASE_CH
    p["conv_w"], p["conv_b"] = [], []
    p["conv_w"].append(nrm(next(keys), (3 * 3 * cin, cout)))
    p["conv_b"].append(jnp.zeros((cout,), jnp.float32))
    for _ in range(OUT_INDEX):
        cin, cout = cout, cout * 2
        p["conv_w"].append(nrm(next(keys), (3 * 3 * cin, cout)))
        p["conv_b"].append(jnp.zeros((cout,), jnp.float32))
    # ViT head.
    p["patch_w"] = nrm(next(keys), (PATCH_DIM, HIDDEN))
    p["patch_b"] = jnp.zeros((HIDDEN,), jnp.float32)
    p["cls"] = nrm(next(keys), (1, 1, HIDDEN))
    p["pos"] = nrm(next(keys), (1, SEQ, HIDDEN))
    p["blocks"] = []
    for _ in range(DEPTH):
        blk = {
            "ln1_g": jnp.ones((HIDDEN,), jnp.float32),
            "ln1_b": jnp.zeros((HIDDEN,), jnp.float32),
            "qkv_w": nrm(next(keys), (HIDDEN, 3 * HIDDEN)),
            "qkv_b": jnp.zeros((3 * HIDDEN,), jnp.float32),
            "proj_w": nrm(next(keys), (HIDDEN, HIDDEN)),
            "proj_b": jnp.zeros((HIDDEN,), jnp.float32),
            "ln2_g": jnp.ones((HIDDEN,), jnp.float32),
            "ln2_b": jnp.zeros((HIDDEN,), jnp.float32),
            "fc1_w": nrm(next(keys), (HIDDEN, MLP_DIM)),
            "fc1_b": jnp.zeros((MLP_DIM,), jnp.float32),
            "fc2_w": nrm(next(keys), (MLP_DIM, HIDDEN)),
            "fc2_b": jnp.zeros((HIDDEN,), jnp.float32),
        }
        p["blocks"].append(blk)
    p["ln_g"] = jnp.ones((HIDDEN,), jnp.float32)
    p["ln_b"] = jnp.zeros((HIDDEN,), jnp.float32)
    p["head_w"] = nrm(next(keys), (HIDDEN, NUM_CLASSES))
    p["head_b"] = jnp.zeros((NUM_CLASSES,), jnp.float32)
    return p


def prepare_params(params):
    """One-time folding of the conv / ViT parameters into kernel-friendly slabs.

    Run once, outside the jitted forward, so none of this re-executes per call.
    # TODO(synk): if real PyTorch weights are loaded, (Cout,Cin,kh,kw) conv and
    # (Cin,ph,pw) patch-embed layouts must be re-ordered into this im2col layout.
    """
    f32, bf16 = jnp.float32, jnp.bfloat16

    # stem conv3x3 folded into a (3*(W+2), W*BASE_CH) matmul weight.
    w0 = params["conv_w"][0].reshape(3, 3, BASE_CH)
    t0 = (jnp.arange(W + 2)[None, :, None] ==
          (jnp.arange(W)[None, None, :] + jnp.arange(3)[:, None, None])).astype(f32)
    stem_w = jnp.einsum("juw,ijc->iuwc", t0, w0).reshape(3 * (W + 2), STEM_COLS)
    stem_w = stem_w.astype(bf16)                                  # (198, 512)

    # stride-2 conv3x3 folded into a (3*512, 512) matmul weight (tap-major K).
    w1 = params["conv_w"][1].reshape(3, 3, BASE_CH, CNN_OUT_FEATURE)
    u1 = (jnp.arange(W)[None, :, None] ==
          (2 * jnp.arange(OW)[None, None, :] +
           jnp.arange(3)[:, None, None] - 1)).astype(f32)
    conv1_w = jnp.einsum("jmw,ijko->imkwo", u1, w1).reshape(3 * STEM_COLS, CONV1_COLS)
    conv1_w = conv1_w.astype(bf16)                                # (1536, 512)

    conv_b = jnp.stack([jnp.tile(params["conv_b"][0], W),
                        jnp.tile(params["conv_b"][1], OW)]).astype(f32)   # (2, 512)

    # patch embedding folded into a block-diagonal (ph-concat K, gw-block N) weight.
    pw4 = params["patch_w"].reshape(PATCH[0], PATCH[1] * CNN_OUT_FEATURE, HIDDEN)
    pe_w = jnp.einsum("pko,gh->pgkho", pw4, jnp.eye(GW, dtype=f32))
    pe_w = pe_w.reshape(PATCH[0] * GW * PATCH[1] * CNN_OUT_FEATURE,
                        GW * HIDDEN).astype(bf16)                 # (2048, 512)

    # cls token, positional embedding (permuted to the kernel's gw-major token
    # order) and the patch-embed bias folded into one (T_PAD, HIDDEN) slab.
    pos = params["pos"][0]
    pos_patch = pos[1:].reshape(GH, GW, HIDDEN).transpose(1, 0, 2)
    pos_patch = pos_patch.reshape(N_PATCHES, HIDDEN) + params["patch_b"][None, :]
    cls_row = params["cls"].reshape(1, HIDDEN) + pos[0:1]
    cls_pos = jnp.concatenate(
        [cls_row, jnp.zeros((7, HIDDEN), f32), pos_patch], axis=0).astype(f32)

    def _stack(name):
        return jnp.stack([blk[name] for blk in params["blocks"]])

    # transformer weight slabs (aligned lane offsets: qkv@0, proj@256, fc1@384).
    wa = jnp.zeros((DEPTH, HIDDEN, 512), f32)
    wa = wa.at[:, :, 0:3 * HIDDEN].set(_stack("qkv_w"))
    wa = wa.at[:, :, 256:256 + HIDDEN].set(_stack("proj_w"))
    wa = wa.at[:, :, 384:384 + MLP_DIM].set(_stack("fc1_w"))
    blk_wa = wa.astype(bf16)
    blk_wb = _stack("fc2_w").astype(bf16)                         # (DEPTH, 128, 64)

    blk_bias = jnp.zeros((DEPTH, 8, 3 * HIDDEN), f32)
    for i, name in enumerate(("ln1_g", "ln1_b", "qkv_b", "proj_b",
                              "ln2_g", "ln2_b", "fc1_b", "fc2_b")):
        v = _stack(name)
        blk_bias = blk_bias.at[:, i, :v.shape[-1]].set(v)

    fin = jnp.zeros((8, HIDDEN), f32)
    fin = fin.at[0, :].set(params["ln_g"])
    fin = fin.at[1, :].set(params["ln_b"])
    fin = fin.at[2, :NUM_CLASSES].set(params["head_b"])

    return {
        "stem_w": stem_w, "conv1_w": conv1_w, "conv_b": conv_b, "pe_w": pe_w,
        "cls_pos": cls_pos, "blk_wa": blk_wa, "blk_wb": blk_wb,
        "blk_bias": blk_bias, "fin": fin,
        "head_w": params["head_w"].astype(bf16),
    }


# ------------------------------ forward pass ---------------------------------
def _full_spec(a):
    zeros = (0,) * a.ndim
    return pl.BlockSpec(a.shape, lambda g, _z=zeros: _z)


def _pick_block_batch(B):
    # Keep >= 2 "parallel" grid steps when possible (so both v7x TensorCores get
    # work); otherwise fold more images per step to fatten the matmul M dim.
    for bb in (4, 3, 2):
        if B % bb == 0 and B // bb >= 2:
            return bb
    # TODO(synk): for B == 1 on v7x one TensorCore idles; a row-split grid axis
    # would be needed to use both cores at batch 1.
    return 1


def hybridnet_forward(prep, x_nchw):
    f32, bf16 = jnp.float32, jnp.bfloat16
    B = x_nchw.shape[0]
    assert x_nchw.shape[1:] == (INPUT_CHANNELS, H, W)
    BB = _pick_block_batch(B)
    grid_n = B // BB

    # Per-call prep (everything else is folded once in prepare_params): zero-pad,
    # gather stem rows in tap-group order and lane-concatenate the 3 row shifts
    # so the whole stem conv is one dense MXU matmul inside the kernel.
    xpad = jnp.pad(x_nchw[:, 0], ((0, 0), (1, 1), (1, 1)))        # (B, 66, 66) f32
    parts = [jnp.take(xpad, _STEM_ROW_PERM + i, axis=1) for i in range(3)]
    x_cat = jnp.concatenate(parts, axis=2).astype(bf16)
    x_cat = x_cat.reshape(B * STEM_ROWS, XCAT_COLS)               # (B*72, 198)

    args = [x_cat, prep["stem_w"], prep["conv_b"], prep["conv1_w"], prep["pe_w"],
            prep["cls_pos"], prep["blk_wa"], prep["blk_wb"], prep["blk_bias"],
            prep["fin"], prep["head_w"]]
    in_specs = ([pl.BlockSpec((BB * STEM_ROWS, XCAT_COLS), lambda g: (g, 0))] +
                [_full_spec(a) for a in args[1:]])

    macs = B * (
        STEM_ROWS * XCAT_COLS * STEM_COLS
        + OH * (3 * STEM_COLS) * CONV1_COLS
        + GH * (PATCH[0] * STEM_COLS) * (GW * HIDDEN)
        + DEPTH * (T_PAD * HIDDEN * 3 * HIDDEN
                   + NUM_HEADS * 2 * T_PAD * T_PAD * HEAD_DIM
                   + T_PAD * HIDDEN * HIDDEN
                   + 2 * T_PAD * HIDDEN * MLP_DIM))
    transc = B * DEPTH * (NUM_HEADS * T_PAD * T_PAD + T_PAD * MLP_DIM)
    bytes_accessed = (sum(int(a.size) * a.dtype.itemsize for a in args)
                      + B * NUM_CLASSES * 4)

    out = pl.pallas_call(
        _hybrid_kernel,
        out_shape=jax.ShapeDtypeStruct((grid_n, BB, NUM_CLASSES), f32),
        grid=(grid_n,),
        in_specs=in_specs,
        out_specs=pl.BlockSpec((1, BB, NUM_CLASSES), lambda g: (g, 0, 0)),
        scratch_shapes=[pltpu.VMEM((BB * STEM_ROWS, STEM_COLS), bf16)],
        compiler_params=pltpu.CompilerParams(dimension_semantics=("parallel",)),
        cost_estimate=pl.CostEstimate(flops=2 * macs, transcendentals=transc,
                                      bytes_accessed=bytes_accessed),
    )(*args)
    return out.reshape(B, NUM_CLASSES)


# --------------------------------- main ---------------------------------------
if __name__ == "__main__":
    key = jax.random.PRNGKey(0)
    k_param, k_x = jax.random.split(key)
    params = init_params(k_param)
    prep = prepare_params(params)        # one-time weight folding (hoisted out of forward)
    x = jax.random.normal(
        k_x, (2, INPUT_CHANNELS, IMG_SIZE[0], IMG_SIZE[1]), dtype=jnp.float32)

    out = jax.jit(hybridnet_forward)(prep, x)
    out = jax.block_until_ready(out)
    assert out.shape == (2, NUM_CLASSES), out.shape
    print("KERNEL_OK")
</pallas_src>

<mosaic_0001>
module attributes {stable_mosaic.version = 11 : i64} {
  func.func @_hybrid_kernel(%arg0: i32, %arg1: memref<72x198xbf16, #tpu.memory_space<vmem>>, %arg2: memref<198x512xbf16, #tpu.memory_space<vmem>>, %arg3: memref<2x512xf32, #tpu.memory_space<vmem>>, %arg4: memref<1536x512xbf16, #tpu.memory_space<vmem>>, %arg5: memref<2048x512xbf16, #tpu.memory_space<vmem>>, %arg6: memref<72x64xf32, #tpu.memory_space<vmem>>, %arg7: memref<2x64x512xbf16, #tpu.memory_space<vmem>>, %arg8: memref<2x128x64xbf16, #tpu.memory_space<vmem>>, %arg9: memref<2x8x192xf32, #tpu.memory_space<vmem>>, %arg10: memref<8x64xf32, #tpu.memory_space<vmem>>, %arg11: memref<64x2xbf16, #tpu.memory_space<vmem>>, %arg12: memref<1x1x2xf32, #tpu.memory_space<vmem>>, %arg13: memref<72x512xbf16, #tpu.memory_space<vmem>>) attributes {dimension_semantics = [#tpu.dimension_semantics<parallel>], iteration_bounds = array<i64: 2>, scalar_prefetch = 0 : i64, scratch_operands = 1 : i64, tpu.core_type = #tpu.core_type<tc>, window_params = [{transform_indices = @transform_0, window_bounds = array<i64: 72, 198>}, {pipeline_mode = #tpu.pipeline_mode<synchronous>, transform_indices = @transform_1, window_bounds = array<i64: 198, 512>}, {pipeline_mode = #tpu.pipeline_mode<synchronous>, transform_indices = @transform_2, window_bounds = array<i64: 2, 512>}, {pipeline_mode = #tpu.pipeline_mode<synchronous>, transform_indices = @transform_3, window_bounds = array<i64: 1536, 512>}, {pipeline_mode = #tpu.pipeline_mode<synchronous>, transform_indices = @transform_4, window_bounds = array<i64: 2048, 512>}, {pipeline_mode = #tpu.pipeline_mode<synchronous>, transform_indices = @transform_5, window_bounds = array<i64: 72, 64>}, {pipeline_mode = #tpu.pipeline_mode<synchronous>, transform_indices = @transform_6, window_bounds = array<i64: 2, 64, 512>}, {pipeline_mode = #tpu.pipeline_mode<synchronous>, transform_indices = @transform_7, window_bounds = array<i64: 2, 128, 64>}, {pipeline_mode = #tpu.pipeline_mode<synchronous>, transform_indices = @transform_8, window_bounds = array<i64: 2, 8, 192>}, {pipeline_mode = #tpu.pipeline_mode<synchronous>, transform_indices = @transform_9, window_bounds = array<i64: 8, 64>}, {pipeline_mode = #tpu.pipeline_mode<synchronous>, transform_indices = @transform_10, window_bounds = array<i64: 64, 2>}, {transform_indices = @transform_11, window_bounds = array<i64: 1, 1, 2>}]} {
    %c0 = arith.constant 0 : index
    %c0_0 = arith.constant 0 : index
    %0 = vector.load %arg1[%c0, %c0_0] : memref<72x198xbf16, #tpu.memory_space<vmem>>, vector<72x198xbf16>
    %c0_1 = arith.constant 0 : index
    %c0_2 = arith.constant 0 : index
    %1 = vector.load %arg2[%c0_1, %c0_2] : memref<198x512xbf16, #tpu.memory_space<vmem>>, vector<198x512xbf16>
    %cst = arith.constant dense<0.000000e+00> : vector<72x512xf32>
    %2 = tpu.matmul %0, %1, %cst {dimension_numbers = #tpu.dot_dimension_numbers<[1], [0], [0], [1], [0, 0, 1, 1], [], []>} : vector<72x198xbf16>, vector<198x512xbf16>, vector<72x512xf32> -> vector<72x512xf32>
    %c0_3 = arith.constant 0 : index
    %c0_4 = arith.constant 0 : index
    %3 = vector.load %arg3[%c0_3, %c0_4] : memref<2x512xf32, #tpu.memory_space<vmem>>, vector<1x512xf32>
    %4 = vector.broadcast %3 : vector<1x512xf32> to vector<72x512xf32>
    %5 = arith.addf %2, %4 : vector<72x512xf32>
    %cst_5 = arith.constant 0.000000e+00 : f32
    %6 = vector.broadcast %cst_5 : f32 to vector<72x512xf32>
    %7 = arith.maximumf %5, %6 : vector<72x512xf32>
    %8 = arith.truncf %7 : vector<72x512xf32> to vector<72x512xbf16>
    %c0_6 = arith.constant 0 : index
    %c0_7 = arith.constant 0 : index
    %9 = vector.load %arg13[%c0_6, %c0_7] : memref<72x512xbf16, #tpu.memory_space<vmem>>, vector<72x512xbf16>
    tpu.vector_store %arg13[%c0_6, %c0_7], %8 {strides = array<i32>} : memref<72x512xbf16, #tpu.memory_space<vmem>>, vector<72x512xbf16>,
    %cst_8 = arith.constant 0.000000e+00 : bf16
    %10 = vector.broadcast %cst_8 : bf16 to vector<1x512xbf16>
    %c0_9 = arith.constant 0 : index
    %c0_10 = arith.constant 0 : index
    %11 = vector.load %arg13[%c0_9, %c0_10] : memref<72x512xbf16, #tpu.memory_space<vmem>>, vector<1x512xbf16>
    tpu.vector_store %arg13[%c0_9, %c0_10], %10 {strides = array<i32>} : memref<72x512xbf16, #tpu.memory_space<vmem>>, vector<1x512xbf16>,
    %c0_11 = arith.constant 0 : index
    %c0_12 = arith.constant 0 : index
    %12 = vector.load %arg13[%c0_11, %c0_12] : memref<72x512xbf16, #tpu.memory_space<vmem>>, vector<8x512xbf16>
    %c8 = arith.constant 8 : index
    %c0_13 = arith.constant 0 : index
    %13 = vector.load %arg13[%c8, %c0_13] : memref<72x512xbf16, #tpu.memory_space<vmem>>, vector<8x512xbf16>
    %c16 = arith.constant 16 : index
    %c0_14 = arith.constant 0 : index
    %14 = vector.load %arg13[%c16, %c0_14] : memref<72x512xbf16, #tpu.memory_space<vmem>>, vector<8x512xbf16>
    %15 = tpu.concatenate %12, %13, %14 in 1 : vector<8x512xbf16>, vector<8x512xbf16>, vector<8x512xbf16> -> vector<8x1536xbf16>
    %c16_15 = arith.constant 16 : index
    %c0_16 = arith.constant 0 : index
    %16 = vector.load %arg13[%c16_15, %c0_16] : memref<72x512xbf16, #tpu.memory_space<vmem>>, vector<8x512xbf16>
    %c24 = arith.constant 24 : index
    %c0_17 = arith.constant 0 : index
    %17 = vector.load %arg13[%c24, %c0_17] : memref<72x512xbf16, #tpu.memory_space<vmem>>, vector<8x512xbf16>
    %c32 = arith.constant 32 : index
    %c0_18 = arith.constant 0 : index
    %18 = vector.load %arg13[%c32, %c0_18] : memref<72x512xbf16, #tpu.memory_space<vmem>>, vector<8x512xbf16>
    %19 = tpu.concatenate %16, %17, %18 in 1 : vector<8x512xbf16>, vector<8x512xbf16>, vector<8x512xbf16> -> vector<8x1536xbf16>
    %c32_19 = arith.constant 32 : index
    %c0_20 = arith.constant 0 : index
    %20 = vector.load %arg13[%c32_19, %c0_20] : memref<72x512xbf16, #tpu.memory_space<vmem>>, vector<8x512xbf16>
    %c40 = arith.constant 40 : index
    %c0_21 = arith.constant 0 : index
    %21 = vector.load %arg13[%c40, %c0_21] : memref<72x512xbf16, #tpu.memory_space<vmem>>, vector<8x512xbf16>
    %c48 = arith.constant 48 : index
    %c0_22 = arith.constant 0 : index
    %22 = vector.load %arg13[%c48, %c0_22] : memref<72x512xbf16, #tpu.memory_space<vmem>>, vector<8x512xbf16>
    %23 = tpu.concatenate %20, %21, %22 in 1 : vector<8x512xbf16>, vector<8x512xbf16>, vector<8x512xbf16> -> vector<8x1536xbf16>
    %c48_23 = arith.constant 48 : index
    %c0_24 = arith.constant 0 : index
    %24 = vector.load %arg13[%c48_23, %c0_24] : memref<72x512xbf16, #tpu.memory_space<vmem>>, vector<8x512xbf16>
    %c56 = arith.constant 56 : index
    %c0_25 = arith.constant 0 : index
    %25 = vector.load %arg13[%c56, %c0_25] : memref<72x512xbf16, #tpu.memory_space<vmem>>, vector<8x512xbf16>
    %c64 = arith.constant 64 : index
    %c0_26 = arith.constant 0 : index
    %26 = vector.load %arg13[%c64, %c0_26] : memref<72x512xbf16, #tpu.memory_space<vmem>>, vector<8x512xbf16>
    %27 = tpu.concatenate %24, %25, %26 in 1 : vector<8x512xbf16>, vector<8x512xbf16>, vector<8x512xbf16> -> vector<8x1536xbf16>
    %28 = tpu.concatenate %15, %19, %23, %27 in 0 : vector<8x1536xbf16>, vector<8x1536xbf16>, vector<8x1536xbf16>, vector<8x1536xbf16> -> vector<32x1536xbf16>
    %c0_27 = arith.constant 0 : index
    %c0_28 = arith.constant 0 : index
    %29 = vector.load %arg4[%c0_27, %c0_28] : memref<1536x512xbf16, #tpu.memory_space<vmem>>, vector<1536x512xbf16>
    %cst_29 = arith.constant dense<0.000000e+00> : vector<32x512xf32>
    %30 = tpu.matmul %28, %29, %cst_29 {dimension_numbers = #tpu.dot_dimension_numbers<[1], [0], [0], [1], [0, 0, 1, 1], [], []>} : vector<32x1536xbf16>, vector<1536x512xbf16>, vector<32x512xf32> -> vector<32x512xf32>
    %c1 = arith.constant 1 : index
    %c0_30 = arith.constant 0 : index
    %31 = vector.load %arg3[%c1, %c0_30] : memref<2x512xf32, #tpu.memory_space<vmem>>, vector<1x512xf32>
    %32 = vector.broadcast %31 : vector<1x512xf32> to vector<32x512xf32>
    %33 = arith.addf %30, %32 : vector<32x512xf32>
    %cst_31 = arith.constant 0.000000e+00 : f32
    %34 = vector.broadcast %cst_31 : f32 to vector<32x512xf32>
    %35 = arith.maximumf %33, %34 : vector<32x512xf32>
    %36 = vector.extract_strided_slice %35 {offsets = [0, 0], sizes = [8, 512], strides = [1, 1]} : vector<32x512xf32> to vector<8x512xf32>
    %37 = vector.extract_strided_slice %35 {offsets = [8, 0], sizes = [8, 512], strides = [1, 1]} : vector<32x512xf32> to vector<8x512xf32>
    %38 = vector.extract_strided_slice %35 {offsets = [16, 0], sizes = [8, 512], strides = [1, 1]} : vector<32x512xf32> to vector<8x512xf32>
    %39 = vector.extract_strided_slice %35 {offsets = [24, 0], sizes = [8, 512], strides = [1, 1]} : vector<32x512xf32> to vector<8x512xf32>
    %40 = tpu.concatenate %36, %37, %38, %39 in 1 : vector<8x512xf32>, vector<8x512xf32>, vector<8x512xf32>, vector<8x512xf32> -> vector<8x2048xf32>
    %41 = arith.truncf %40 : vector<8x2048xf32> to vector<8x2048xbf16>
    %c0_32 = arith.constant 0 : index
    %c0_33 = arith.constant 0 : index
    %42 = vector.load %arg5[%c0_32, %c0_33] : memref<2048x512xbf16, #tpu.memory_space<vmem>>, vector<2048x512xbf16>
    %cst_34 = arith.constant dense<0.000000e+00> : vector<8x512xf32>
    %43 = tpu.matmul %41, %42, %cst_34 {dimension_numbers = #tpu.dot_dimension_numbers<[1], [0], [0], [1], [0, 0, 1, 1], [], []>} : vector<8x2048xbf16>, vector<2048x512xbf16>, vector<8x512xf32> -> vector<8x512xf32>
    %c0_35 = arith.constant 0 : index
    %c0_36 = arith.constant 0 : index
    %44 = vector.load %arg6[%c0_35, %c0_36] : memref<72x64xf32, #tpu.memory_space<vmem>>, vector<8x64xf32>
    %45 = vector.extract_strided_slice %43 {offsets = [0, 0], sizes = [8, 64], strides = [1, 1]} : vector<8x512xf32> to vector<8x64xf32>
    %c8_37 = arith.constant 8 : index
    %c0_38 = arith.constant 0 : index
    %46 = vector.load %arg6[%c8_37, %c0_38] : memref<72x64xf32, #tpu.memory_space<vmem>>, vector<8x64xf32>
    %47 = arith.addf %45, %46 : vector<8x64xf32>
    %48 = vector.extract_strided_slice %43 {offsets = [0, 64], sizes = [8, 64], strides = [1, 1]} : vector<8x512xf32> to vector<8x64xf32>
    %c16_39 = arith.constant 16 : index
    %c0_40 = arith.constant 0 : index
    %49 = vector.load %arg6[%c16_39, %c0_40] : memref<72x64xf32, #tpu.memory_space<vmem>>, vector<8x64xf32>
    %50 = arith.addf %48, %49 : vector<8x64xf32>
    %51 = vector.extract_strided_slice %43 {offsets = [0, 128], sizes = [8, 64], strides = [1, 1]} : vector<8x512xf32> to vector<8x64xf32>
    %c24_41 = arith.constant 24 : index
    %c0_42 = arith.constant 0 : index
    %52 = vector.load %arg6[%c24_41, %c0_42] : memref<72x64xf32, #tpu.memory_space<vmem>>, vector<8x64xf32>
    %53 = arith.addf %51, %52 : vector<8x64xf32>
    %54 = vector.extract_strided_slice %43 {offsets = [0, 192], sizes = [8, 64], strides = [1, 1]} : vector<8x512xf32> to vector<8x64xf32>
    %c32_43 = arith.constant 32 : index
    %c0_44 = arith.constant 0 : index
    %55 = vector.load %arg6[%c32_43, %c0_44] : memref<72x64xf32, #tpu.memory_space<vmem>>, vector<8x64xf32>
    %56 = arith.addf %54, %55 : vector<8x64xf32>
    %57 = vector.extract_strided_slice %43 {offsets = [0, 256], sizes = [8, 64], strides = [1, 1]} : vector<8x512xf32> to vector<8x64xf32>
    %c40_45 = arith.constant 40 : index
    %c0_46 = arith.constant 0 : index
    %58 = vector.load %arg6[%c40_45, %c0_46] : memref<72x64xf32, #tpu.memory_space<vmem>>, vector<8x64xf32>
    %59 = arith.addf %57, %58 : vector<8x64xf32>
    %60 = vector.extract_strided_slice %43 {offsets = [0, 320], sizes = [8, 64], strides = [1, 1]} : vector<8x512xf32> to vector<8x64xf32>
    %c48_47 = arith.constant 48 : index
    %c0_48 = arith.constant 0 : index
    %61 = vector.load %arg6[%c48_47, %c0_48] : memref<72x64xf32, #tpu.memory_space<vmem>>, vector<8x64xf32>
    %62 = arith.addf %60, %61 : vector<8x64xf32>
    %63 = vector.extract_strided_slice %43 {offsets = [0, 384], sizes = [8, 64], strides = [1, 1]} : vector<8x512xf32> to vector<8x64xf32>
    %c56_49 = arith.constant 56 : index
    %c0_50 = arith.constant 0 : index
    %64 = vector.load %arg6[%c56_49, %c0_50] : memref<72x64xf32, #tpu.memory_space<vmem>>, vector<8x64xf32>
    %65 = arith.addf %63, %64 : vector<8x64xf32>
    %66 = vector.extract_strided_slice %43 {offsets = [0, 448], sizes = [8, 64], strides = [1, 1]} : vector<8x512xf32> to vector<8x64xf32>
    %c64_51 = arith.constant 64 : index
    %c0_52 = arith.constant 0 : index
    %67 = vector.load %arg6[%c64_51, %c0_52] : memref<72x64xf32, #tpu.memory_space<vmem>>, vector<8x64xf32>
    %68 = arith.addf %66, %67 : vector<8x64xf32>
    %69 = tpu.concatenate %44, %47, %50, %53, %56, %59, %62, %65, %68 in 0 : vector<8x64xf32>, vector<8x64xf32>, vector<8x64xf32>, vector<8x64xf32>, vector<8x64xf32>, vector<8x64xf32>, vector<8x64xf32>, vector<8x64xf32>, vector<8x64xf32> -> vector<72x64xf32>
    %70 = tpu.iota {dimensions = array<i32: 1>} : vector<1x72xi32>
    %c1_i32 = arith.constant 1 : i32
    %71 = vector.broadcast %c1_i32 : i32 to vector<1x72xi32>
    %72 = arith.cmpi sge, %70, %71 : vector<1x72xi32>
    %c8_i32 = arith.constant 8 : i32
    %73 = vector.broadcast %c8_i32 : i32 to vector<1x72xi32>
    %74 = arith.cmpi slt, %70, %73 : vector<1x72xi32>
    %75 = arith.andi %72, %74 : vector<1x72xi1>
    %cst_53 = arith.constant -1.000000e+30 : f32
    %cst_54 = arith.constant 0.000000e+00 : f32
    %76 = vector.broadcast %cst_53 : f32 to vector<1x72xf32>
    %77 = vector.broadcast %cst_54 : f32 to vector<1x72xf32>
    %78 = arith.select %75, %76, %77 : vector<1x72xi1>, vector<1x72xf32>
    %c0_55 = arith.constant 0 : index
    %c0_56 = arith.constant 0 : index
    %c0_57 = arith.constant 0 : index
    %79 = vector.load %arg9[%c0_55, %c0_56, %c0_57] : memref<2x8x192xf32, #tpu.memory_space<vmem>>, vector<1x1x64xf32>
    %80 = vector.shape_cast %79 : vector<1x1x64xf32> to vector<1x64xf32>
    %c0_58 = arith.constant 0 : index
    %c1_59 = arith.constant 1 : index
    %c0_60 = arith.constant 0 : index
    %81 = vector.load %arg9[%c0_58, %c1_59, %c0_60] : memref<2x8x192xf32, #tpu.memory_space<vmem>>, vector<1x1x64xf32>
    %82 = vector.shape_cast %81 : vector<1x1x64xf32> to vector<1x64xf32>
    %c0_61 = arith.constant 0 : index
    %c2 = arith.constant 2 : index
    %c0_62 = arith.constant 0 : index
    %83 = vector.load %arg9[%c0_61, %c2, %c0_62] : memref<2x8x192xf32, #tpu.memory_space<vmem>>, vector<1x1x192xf32>
    %84 = vector.shape_cast %83 : vector<1x1x192xf32> to vector<1x192xf32>
    %c0_63 = arith.constant 0 : index
    %c3 = arith.constant 3 : index
    %c0_64 = arith.constant 0 : index
    %85 = vector.load %arg9[%c0_63, %c3, %c0_64] : memref<2x8x192xf32, #tpu.memory_space<vmem>>, vector<1x1x64xf32>
    %86 = vector.shape_cast %85 : vector<1x1x64xf32> to vector<1x64xf32>
    %c0_65 = arith.constant 0 : index
    %c4 = arith.constant 4 : index
    %c0_66 = arith.constant 0 : index
    %87 = vector.load %arg9[%c0_65, %c4, %c0_66] : memref<2x8x192xf32, #tpu.memory_space<vmem>>, vector<1x1x64xf32>
    %88 = vector.shape_cast %87 : vector<1x1x64xf32> to vector<1x64xf32>
    %c0_67 = arith.constant 0 : index
    %c5 = arith.constant 5 : index
    %c0_68 = arith.constant 0 : index
    %89 = vector.load %arg9[%c0_67, %c5, %c0_68] : memref<2x8x192xf32, #tpu.memory_space<vmem>>, vector<1x1x64xf32>
    %90 = vector.shape_cast %89 : vector<1x1x64xf32> to vector<1x64xf32>
    %c0_69 = arith.constant 0 : index
    %c6 = arith.constant 6 : index
    %c0_70 = arith.constant 0 : index
    %91 = vector.load %arg9[%c0_69, %c6, %c0_70] : memref<2x8x192xf32, #tpu.memory_space<vmem>>, vector<1x1x128xf32>
    %92 = vector.shape_cast %91 : vector<1x1x128xf32> to vector<1x128xf32>
    %c0_71 = arith.constant 0 : index
    %c7 = arith.constant 7 : index
    %c0_72 = arith.constant 0 : index
    %93 = vector.load %arg9[%c0_71, %c7, %c0_72] : memref<2x8x192xf32, #tpu.memory_space<vmem>>, vector<1x1x64xf32>
    %94 = vector.shape_cast %93 : vector<1x1x64xf32> to vector<1x64xf32>
    %cst_73 = arith.constant dense<0.000000e+00> : vector<72xf32>
    %95 = vector.multi_reduction <add>, %69, %cst_73 [1] : vector<72x64xf32> to vector<72xf32>
    %96 = vector.shape_cast %95 : vector<72xf32> to vector<72x1xf32>
    %cst_74 = arith.constant 6.400000e+01 : f32
    %97 = vector.broadcast %cst_74 : f32 to vector<72x1xf32>
    %98 = arith.divf %96, %97 : vector<72x1xf32>
    %99 = vector.broadcast %98 : vector<72x1xf32> to vector<72x64xf32>
    %100 = arith.subf %69, %99 : vector<72x64xf32>
    %101 = arith.mulf %100, %100 : vector<72x64xf32>
    %cst_75 = arith.constant dense<0.000000e+00> : vector<72xf32>
    %102 = vector.multi_reduction <add>, %101, %cst_75 [1] : vector<72x64xf32> to vector<72xf32>
    %103 = vector.shape_cast %102 : vector<72xf32> to vector<72x1xf32>
    %cst_76 = arith.constant 6.400000e+01 : f32
    %104 = vector.broadcast %cst_76 : f32 to vector<72x1xf32>
    %105 = arith.divf %103, %104 : vector<72x1xf32>
    %106 = vector.broadcast %98 : vector<72x1xf32> to vector<72x64xf32>
    %107 = arith.subf %69, %106 : vector<72x64xf32>
    %cst_77 = arith.constant 9.99999974E-6 : f32
    %108 = vector.broadcast %cst_77 : f32 to vector<72x1xf32>
    %109 = arith.addf %105, %108 : vector<72x1xf32>
    %110 = math.rsqrt %109 : vector<72x1xf32>
    %111 = vector.broadcast %110 : vector<72x1xf32> to vector<72x64xf32>
    %112 = arith.mulf %107, %111 : vector<72x64xf32>
    %113 = vector.broadcast %80 : vector<1x64xf32> to vector<72x64xf32>
    %114 = arith.mulf %112, %113 : vector<72x64xf32>
    %115 = vector.broadcast %82 : vector<1x64xf32> to vector<72x64xf32>
    %116 = arith.addf %114, %115 : vector<72x64xf32>
    %117 = arith.truncf %116 : vector<72x64xf32> to vector<72x64xbf16>
    %c0_78 = arith.constant 0 : index
    %c0_79 = arith.constant 0 : index
    %c0_80 = arith.constant 0 : index
    %118 = vector.load %arg7[%c0_78, %c0_79, %c0_80] : memref<2x64x512xbf16, #tpu.memory_space<vmem>>, vector<1x64x192xbf16>
    %119 = vector.shape_cast %118 : vector<1x64x192xbf16> to vector<64x192xbf16>
    %cst_81 = arith.constant dense<0.000000e+00> : vector<72x192xf32>
    %120 = tpu.matmul %117, %119, %cst_81 {dimension_numbers = #tpu.dot_dimension_numbers<[1], [0], [0], [1], [0, 0, 1, 1], [], []>} : vector<72x64xbf16>, vector<64x192xbf16>, vector<72x192xf32> -> vector<72x192xf32>
    %121 = vector.broadcast %84 : vector<1x192xf32> to vector<72x192xf32>
    %122 = arith.addf %120, %121 : vector<72x192xf32>
    %123 = vector.extract_strided_slice %122 {offsets = [0, 64], sizes = [72, 64], strides = [1, 1]} : vector<72x192xf32> to vector<72x64xf32>
    %124 = tpu.transpose %123, [1, 0] : vector<72x64xf32> -> vector<64x72xf32>
    %125 = arith.truncf %124 : vector<64x72xf32> to vector<64x72xbf16>
    %126 = vector.extract_strided_slice %122 {offsets = [0, 0], sizes = [72, 16], strides = [1, 1]} : vector<72x192xf32> to vector<72x16xf32>
    %127 = arith.truncf %126 : vector<72x16xf32> to vector<72x16xbf16>
    %128 = vector.extract_strided_slice %122 {offsets = [0, 128], sizes = [72, 16], strides = [1, 1]} : vector<72x192xf32> to vector<72x16xf32>
    %129 = arith.truncf %128 : vector<72x16xf32> to vector<72x16xbf16>
    %130 = vector.extract_strided_slice %125 {offsets = [0, 0], sizes = [16, 72], strides = [1, 1]} : vector<64x72xbf16> to vector<16x72xbf16>
    %cst_82 = arith.constant dense<0.000000e+00> : vector<72x72xf32>
    %131 = tpu.matmul %127, %130, %cst_82 {dimension_numbers = #tpu.dot_dimension_numbers<[1], [0], [0], [1], [0, 0, 1, 1], [], []>} : vector<72x16xbf16>, vector<16x72xbf16>, vector<72x72xf32> -> vector<72x72xf32>
    %cst_83 = arith.constant 2.500000e-01 : f32
    %132 = vector.broadcast %cst_83 : f32 to vector<72x72xf32>
    %133 = arith.mulf %131, %132 : vector<72x72xf32>
    %134 = vector.broadcast %78 : vector<1x72xf32> to vector<72x72xf32>
    %135 = arith.addf %133, %134 : vector<72x72xf32>
    %cst_84 = arith.constant dense<0xFF800000> : vector<72xf32>
    %136 = vector.multi_reduction <maximumf>, %135, %cst_84 [1] : vector<72x72xf32> to vector<72xf32>
    %137 = vector.shape_cast %136 : vector<72xf32> to vector<72x1xf32>
    %138 = vector.broadcast %137 : vector<72x1xf32> to vector<72x72xf32>
    %139 = arith.subf %135, %138 : vector<72x72xf32>
    %140 = math.exp %139 : vector<72x72xf32>
    %cst_85 = arith.constant dense<0.000000e+00> : vector<72xf32>
    %141 = vector.multi_reduction <add>, %140, %cst_85 [1] : vector<72x72xf32> to vector<72xf32>
    %142 = vector.shape_cast %141 : vector<72xf32> to vector<72x1xf32>
    %143 = tpu.reciprocal %142 {approx = true} : vector<72x1xf32> -> vector<72x1xf32>
    %144 = vector.broadcast %143 : vector<72x1xf32> to vector<72x72xf32>
    %145 = arith.mulf %140, %144 : vector<72x72xf32>
    %146 = arith.truncf %145 : vector<72x72xf32> to vector<72x72xbf16>
    %cst_86 = arith.constant dense<0.000000e+00> : vector<72x16xf32>
    %147 = tpu.matmul %146, %129, %cst_86 {dimension_numbers = #tpu.dot_dimension_numbers<[1], [0], [0], [1], [0, 0, 1, 1], [], []>} : vector<72x72xbf16>, vector<72x16xbf16>, vector<72x16xf32> -> vector<72x16xf32>
    %148 = vector.extract_strided_slice %122 {offsets = [0, 16], sizes = [72, 16], strides = [1, 1]} : vector<72x192xf32> to vector<72x16xf32>
    %149 = arith.truncf %148 : vector<72x16xf32> to vector<72x16xbf16>
    %150 = vector.extract_strided_slice %122 {offsets = [0, 144], sizes = [72, 16], strides = [1, 1]} : vector<72x192xf32> to vector<72x16xf32>
    %151 = arith.truncf %150 : vector<72x16xf32> to vector<72x16xbf16>
    %152 = vector.extract_strided_slice %125 {offsets = [16, 0], sizes = [16, 72], strides = [1, 1]} : vector<64x72xbf16> to vector<16x72xbf16>
    %cst_87 = arith.constant dense<0.000000e+00> : vector<72x72xf32>
    %153 = tpu.matmul %149, %152, %cst_87 {dimension_numbers = #tpu.dot_dimension_numbers<[1], [0], [0], [1], [0, 0, 1, 1], [], []>} : vector<72x16xbf16>, vector<16x72xbf16>, vector<72x72xf32> -> vector<72x72xf32>
    %cst_88 = arith.constant 2.500000e-01 : f32
    %154 = vector.broadcast %cst_88 : f32 to vector<72x72xf32>
    %155 = arith.mulf %153, %154 : vector<72x72xf32>
    %156 = vector.broadcast %78 : vector<1x72xf32> to vector<72x72xf32>
    %157 = arith.addf %155, %156 : vector<72x72xf32>
    %cst_89 = arith.constant dense<0xFF800000> : vector<72xf32>
    %158 = vector.multi_reduction <maximumf>, %157, %cst_89 [1] : vector<72x72xf32> to vector<72xf32>
    %159 = vector.shape_cast %158 : vector<72xf32> to vector<72x1xf32>
    %160 = vector.broadcast %159 : vector<72x1xf32> to vector<72x72xf32>
    %161 = arith.subf %157, %160 : vector<72x72xf32>
    %162 = math.exp %161 : vector<72x72xf32>
    %cst_90 = arith.constant dense<0.000000e+00> : vector<72xf32>
    %163 = vector.multi_reduction <add>, %162, %cst_90 [1] : vector<72x72xf32> to vector<72xf32>
    %164 = vector.shape_cast %163 : vector<72xf32> to vector<72x1xf32>
    %165 = tpu.reciprocal %164 {approx = true} : vector<72x1xf32> -> vector<72x1xf32>
    %166 = vector.broadcast %165 : vector<72x1xf32> to vector<72x72xf32>
    %167 = arith.mulf %162, %166 : vector<72x72xf32>
    %168 = arith.truncf %167 : vector<72x72xf32> to vector<72x72xbf16>
    %cst_91 = arith.constant dense<0.000000e+00> : vector<72x16xf32>
    %169 = tpu.matmul %168, %151, %cst_91 {dimension_numbers = #tpu.dot_dimension_numbers<[1], [0], [0], [1], [0, 0, 1, 1], [], []>} : vector<72x72xbf16>, vector<72x16xbf16>, vector<72x16xf32> -> vector<72x16xf32>
    %170 = vector.extract_strided_slice %122 {offsets = [0, 32], sizes = [72, 16], strides = [1, 1]} : vector<72x192xf32> to vector<72x16xf32>
    %171 = arith.truncf %170 : vector<72x16xf32> to vector<72x16xbf16>
    %172 = vector.extract_strided_slice %122 {offsets = [0, 160], sizes = [72, 16], strides = [1, 1]} : vector<72x192xf32> to vector<72x16xf32>
    %173 = arith.truncf %172 : vector<72x16xf32> to vector<72x16xbf16>
    %174 = vector.extract_strided_slice %125 {offsets = [32, 0], sizes = [16, 72], strides = [1, 1]} : vector<64x72xbf16> to vector<16x72xbf16>
    %cst_92 = arith.constant dense<0.000000e+00> : vector<72x72xf32>
    %175 = tpu.matmul %171, %174, %cst_92 {dimension_numbers = #tpu.dot_dimension_numbers<[1], [0], [0], [1], [0, 0, 1, 1], [], []>} : vector<72x16xbf16>, vector<16x72xbf16>, vector<72x72xf32> -> vector<72x72xf32>
    %cst_93 = arith.constant 2.500000e-01 : f32
    %176 = vector.broadcast %cst_93 : f32 to vector<72x72xf32>
    %177 = arith.mulf %175, %176 : vector<72x72xf32>
    %178 = vector.broadcast %78 : vector<1x72xf32> to vector<72x72xf32>
    %179 = arith.addf %177, %178 : vector<72x72xf32>
    %cst_94 = arith.constant dense<0xFF800000> : vector<72xf32>
    %180 = vector.multi_reduction <maximumf>, %179, %cst_94 [1] : vector<72x72xf32> to vector<72xf32>
    %181 = vector.shape_cast %180 : vector<72xf32> to vector<72x1xf32>
    %182 = vector.broadcast %181 : vector<72x1xf32> to vector<72x72xf32>
    %183 = arith.subf %179, %182 : vector<72x72xf32>
    %184 = math.exp %183 : vector<72x72xf32>
    %cst_95 = arith.constant dense<0.000000e+00> : vector<72xf32>
    %185 = vector.multi_reduction <add>, %184, %cst_95 [1] : vector<72x72xf32> to vector<72xf32>
    %186 = vector.shape_cast %185 : vector<72xf32> to vector<72x1xf32>
    %187 = tpu.reciprocal %186 {approx = true} : vector<72x1xf32> -> vector<72x1xf32>
    %188 = vector.broadcast %187 : vector<72x1xf32> to vector<72x72xf32>
    %189 = arith.mulf %184, %188 : vector<72x72xf32>
    %190 = arith.truncf %189 : vector<72x72xf32> to vector<72x72xbf16>
    %cst_96 = arith.constant dense<0.000000e+00> : vector<72x16xf32>
    %191 = tpu.matmul %190, %173, %cst_96 {dimension_numbers = #tpu.dot_dimension_numbers<[1], [0], [0], [1], [0, 0, 1, 1], [], []>} : vector<72x72xbf16>, vector<72x16xbf16>, vector<72x16xf32> -> vector<72x16xf32>
    %192 = vector.extract_strided_slice %122 {offsets = [0, 48], sizes = [72, 16], strides = [1, 1]} : vector<72x192xf32> to vector<72x16xf32>
    %193 = arith.truncf %192 : vector<72x16xf32> to vector<72x16xbf16>
    %194 = vector.extract_strided_slice %122 {offsets = [0, 176], sizes = [72, 16], strides = [1, 1]} : vector<72x192xf32> to vector<72x16xf32>
    %195 = arith.truncf %194 : vector<72x16xf32> to vector<72x16xbf16>
    %196 = vector.extract_strided_slice %125 {offsets = [48, 0], sizes = [16, 72], strides = [1, 1]} : vector<64x72xbf16> to vector<16x72xbf16>
    %cst_97 = arith.constant dense<0.000000e+00> : vector<72x72xf32>
    %197 = tpu.matmul %193, %196, %cst_97 {dimension_numbers = #tpu.dot_dimension_numbers<[1], [0], [0], [1], [0, 0, 1, 1], [], []>} : vector<72x16xbf16>, vector<16x72xbf16>, vector<72x72xf32> -> vector<72x72xf32>
    %cst_98 = arith.constant 2.500000e-01 : f32
    %198 = vector.broadcast %cst_98 : f32 to vector<72x72xf32>
    %199 = arith.mulf %197, %198 : vector<72x72xf32>
    %200 = vector.broadcast %78 : vector<1x72xf32> to vector<72x72xf32>
    %201 = arith.addf %199, %200 : vector<72x72xf32>
    %cst_99 = arith.constant dense<0xFF800000> : vector<72xf32>
    %202 = vector.multi_reduction <maximumf>, %201, %cst_99 [1] : vector<72x72xf32> to vector<72xf32>
    %203 = vector.shape_cast %202 : vector<72xf32> to vector<72x1xf32>
    %204 = vector.broadcast %203 : vector<72x1xf32> to vector<72x72xf32>
    %205 = arith.subf %201, %204 : vector<72x72xf32>
    %206 = math.exp %205 : vector<72x72xf32>
    %cst_100 = arith.constant dense<0.000000e+00> : vector<72xf32>
    %207 = vector.multi_reduction <add>, %206, %cst_100 [1] : vector<72x72xf32> to vector<72xf32>
    %208 = vector.shape_cast %207 : vector<72xf32> to vector<72x1xf32>
    %209 = tpu.reciprocal %208 {approx = true} : vector<72x1xf32> -> vector<72x1xf32>
    %210 = vector.broadcast %209 : vector<72x1xf32> to vector<72x72xf32>
    %211 = arith.mulf %206, %210 : vector<72x72xf32>
    %212 = arith.truncf %211 : vector<72x72xf32> to vector<72x72xbf16>
    %cst_101 = arith.constant dense<0.000000e+00> : vector<72x16xf32>
    %213 = tpu.matmul %212, %195, %cst_101 {dimension_numbers = #tpu.dot_dimension_numbers<[1], [0], [0], [1], [0, 0, 1, 1], [], []>} : vector<72x72xbf16>, vector<72x16xbf16>, vector<72x16xf32> -> vector<72x16xf32>
    %214 = tpu.concatenate %147, %169, %191, %213 in 1 : vector<72x16xf32>, vector<72x16xf32>, vector<72x16xf32>, vector<72x16xf32> -> vector<72x64xf32>
    %215 = arith.truncf %214 : vector<72x64xf32> to vector<72x64xbf16>
    %c0_102 = arith.constant 0 : index
    %c0_103 = arith.constant 0 : index
    %c256 = arith.constant 256 : index
    %216 = vector.load %arg7[%c0_102, %c0_103, %c256] : memref<2x64x512xbf16, #tpu.memory_space<vmem>>, vector<1x64x64xbf16>
    %217 = vector.shape_cast %216 : vector<1x64x64xbf16> to vector<64x64xbf16>
    %cst_104 = arith.constant dense<0.000000e+00> : vector<72x64xf32>
    %218 = tpu.matmul %215, %217, %cst_104 {dimension_numbers = #tpu.dot_dimension_numbers<[1], [0], [0], [1], [0, 0, 1, 1], [], []>} : vector<72x64xbf16>, vector<64x64xbf16>, vector<72x64xf32> -> vector<72x64xf32>
    %219 = vector.broadcast %86 : vector<1x64xf32> to vector<72x64xf32>
    %220 = arith.addf %218, %219 : vector<72x64xf32>
    %221 = arith.addf %69, %220 : vector<72x64xf32>
    %cst_105 = arith.constant dense<0.000000e+00> : vector<72xf32>
    %222 = vector.multi_reduction <add>, %221, %cst_105 [1] : vector<72x64xf32> to vector<72xf32>
    %223 = vector.shape_cast %222 : vector<72xf32> to vector<72x1xf32>
    %cst_106 = arith.constant 6.400000e+01 : f32
    %224 = vector.broadcast %cst_106 : f32 to vector<72x1xf32>
    %225 = arith.divf %223, %224 : vector<72x1xf32>
    %226 = vector.broadcast %225 : vector<72x1xf32> to vector<72x64xf32>
    %227 = arith.subf %221, %226 : vector<72x64xf32>
    %228 = arith.mulf %227, %227 : vector<72x64xf32>
    %cst_107 = arith.constant dense<0.000000e+00> : vector<72xf32>
    %229 = vector.multi_reduction <add>, %228, %cst_107 [1] : vector<72x64xf32> to vector<72xf32>
    %230 = vector.shape_cast %229 : vector<72xf32> to vector<72x1xf32>
    %cst_108 = arith.constant 6.400000e+01 : f32
    %231 = vector.broadcast %cst_108 : f32 to vector<72x1xf32>
    %232 = arith.divf %230, %231 : vector<72x1xf32>
    %233 = vector.broadcast %225 : vector<72x1xf32> to vector<72x64xf32>
    %234 = arith.subf %221, %233 : vector<72x64xf32>
    %cst_109 = arith.constant 9.99999974E-6 : f32
    %235 = vector.broadcast %cst_109 : f32 to vector<72x1xf32>
    %236 = arith.addf %232, %235 : vector<72x1xf32>
    %237 = math.rsqrt %236 : vector<72x1xf32>
    %238 = vector.broadcast %237 : vector<72x1xf32> to vector<72x64xf32>
    %239 = arith.mulf %234, %238 : vector<72x64xf32>
    %240 = vector.broadcast %88 : vector<1x64xf32> to vector<72x64xf32>
    %241 = arith.mulf %239, %240 : vector<72x64xf32>
    %242 = vector.broadcast %90 : vector<1x64xf32> to vector<72x64xf32>
    %243 = arith.addf %241, %242 : vector<72x64xf32>
    %244 = arith.truncf %243 : vector<72x64xf32> to vector<72x64xbf16>
    %c0_110 = arith.constant 0 : index
    %c0_111 = arith.constant 0 : index
    %c384 = arith.constant 384 : index
    %245 = vector.load %arg7[%c0_110, %c0_111, %c384] : memref<2x64x512xbf16, #tpu.memory_space<vmem>>, vector<1x64x128xbf16>
    %246 = vector.shape_cast %245 : vector<1x64x128xbf16> to vector<64x128xbf16>
    %cst_112 = arith.constant dense<0.000000e+00> : vector<72x128xf32>
    %247 = tpu.matmul %244, %246, %cst_112 {dimension_numbers = #tpu.dot_dimension_numbers<[1], [0], [0], [1], [0, 0, 1, 1], [], []>} : vector<72x64xbf16>, vector<64x128xbf16>, vector<72x128xf32> -> vector<72x128xf32>
    %248 = vector.broadcast %92 : vector<1x128xf32> to vector<72x128xf32>
    %249 = arith.addf %247, %248 : vector<72x128xf32>
    %250 = arith.mulf %249, %249 : vector<72x128xf32>
    %251 = arith.mulf %249, %250 : vector<72x128xf32>
    %cst_113 = arith.constant 4.471500e-02 : f32
    %252 = vector.broadcast %cst_113 : f32 to vector<72x128xf32>
    %253 = arith.mulf %252, %251 : vector<72x128xf32>
    %254 = arith.addf %249, %253 : vector<72x128xf32>
    %cst_114 = arith.constant 0.797884583 : f32
    %255 = vector.broadcast %cst_114 : f32 to vector<72x128xf32>
    %256 = arith.mulf %255, %254 : vector<72x128xf32>
    %257 = math.tanh %256 : vector<72x128xf32>
    %cst_115 = arith.constant 1.000000e+00 : f32
    %258 = vector.broadcast %cst_115 : f32 to vector<72x128xf32>
    %259 = arith.addf %258, %257 : vector<72x128xf32>
    %cst_116 = arith.constant 5.000000e-01 : f32
    %260 = vector.broadcast %cst_116 : f32 to vector<72x128xf32>
    %261 = arith.mulf %260, %259 : vector<72x128xf32>
    %262 = arith.mulf %249, %261 : vector<72x128xf32>
    %263 = arith.truncf %262 : vector<72x128xf32> to vector<72x128xbf16>
    %c0_117 = arith.constant 0 : index
    %c0_118 = arith.constant 0 : index
    %c0_119 = arith.constant 0 : index
    %264 = vector.load %arg8[%c0_117, %c0_118, %c0_119] : memref<2x128x64xbf16, #tpu.memory_space<vmem>>, vector<1x128x64xbf16>
    %265 = vector.shape_cast %264 : vector<1x128x64xbf16> to vector<128x64xbf16>
    %cst_120 = arith.constant dense<0.000000e+00> : vector<72x64xf32>
    %266 = tpu.matmul %263, %265, %cst_120 {dimension_numbers = #tpu.dot_dimension_numbers<[1], [0], [0], [1], [0, 0, 1, 1], [], []>} : vector<72x128xbf16>, vector<128x64xbf16>, vector<72x64xf32> -> vector<72x64xf32>
    %267 = vector.broadcast %94 : vector<1x64xf32> to vector<72x64xf32>
    %268 = arith.addf %266, %267 : vector<72x64xf32>
    %269 = arith.addf %221, %268 : vector<72x64xf32>
    %c1_121 = arith.constant 1 : index
    %c0_122 = arith.constant 0 : index
    %c0_123 = arith.constant 0 : index
    %270 = vector.load %arg9[%c1_121, %c0_122, %c0_123] : memref<2x8x192xf32, #tpu.memory_space<vmem>>, vector<1x1x64xf32>
    %271 = vector.shape_cast %270 : vector<1x1x64xf32> to vector<1x64xf32>
    %c1_124 = arith.constant 1 : index
    %c1_125 = arith.constant 1 : index
    %c0_126 = arith.constant 0 : index
    %272 = vector.load %arg9[%c1_124, %c1_125, %c0_126] : memref<2x8x192xf32, #tpu.memory_space<vmem>>, vector<1x1x64xf32>
    %273 = vector.shape_cast %272 : vector<1x1x64xf32> to vector<1x64xf32>
    %c1_127 = arith.constant 1 : index
    %c2_128 = arith.constant 2 : index
    %c0_129 = arith.constant 0 : index
    %274 = vector.load %arg9[%c1_127, %c2_128, %c0_129] : memref<2x8x192xf32, #tpu.memory_space<vmem>>, vector<1x1x192xf32>
    %275 = vector.shape_cast %274 : vector<1x1x192xf32> to vector<1x192xf32>
    %c1_130 = arith.constant 1 : index
    %c3_131 = arith.constant 3 : index
    %c0_132 = arith.constant 0 : index
    %276 = vector.load %arg9[%c1_130, %c3_131, %c0_132] : memref<2x8x192xf32, #tpu.memory_space<vmem>>, vector<1x1x64xf32>
    %277 = vector.shape_cast %276 : vector<1x1x64xf32> to vector<1x64xf32>
    %c1_133 = arith.constant 1 : index
    %c4_134 = arith.constant 4 : index
    %c0_135 = arith.constant 0 : index
    %278 = vector.load %arg9[%c1_133, %c4_134, %c0_135] : memref<2x8x192xf32, #tpu.memory_space<vmem>>, vector<1x1x64xf32>
    %279 = vector.shape_cast %278 : vector<1x1x64xf32> to vector<1x64xf32>
    %c1_136 = arith.constant 1 : index
    %c5_137 = arith.constant 5 : index
    %c0_138 = arith.constant 0 : index
    %280 = vector.load %arg9[%c1_136, %c5_137, %c0_138] : memref<2x8x192xf32, #tpu.memory_space<vmem>>, vector<1x1x64xf32>
    %281 = vector.shape_cast %280 : vector<1x1x64xf32> to vector<1x64xf32>
    %c1_139 = arith.constant 1 : index
    %c6_140 = arith.constant 6 : index
    %c0_141 = arith.constant 0 : index
    %282 = vector.load %arg9[%c1_139, %c6_140, %c0_141] : memref<2x8x192xf32, #tpu.memory_space<vmem>>, vector<1x1x128xf32>
    %283 = vector.shape_cast %282 : vector<1x1x128xf32> to vector<1x128xf32>
    %c1_142 = arith.constant 1 : index
    %c7_143 = arith.constant 7 : index
    %c0_144 = arith.constant 0 : index
    %284 = vector.load %arg9[%c1_142, %c7_143, %c0_144] : memref<2x8x192xf32, #tpu.memory_space<vmem>>, vector<1x1x64xf32>
    %285 = vector.shape_cast %284 : vector<1x1x64xf32> to vector<1x64xf32>
    %cst_145 = arith.constant dense<0.000000e+00> : vector<72xf32>
    %286 = vector.multi_reduction <add>, %269, %cst_145 [1] : vector<72x64xf32> to vector<72xf32>
    %287 = vector.shape_cast %286 : vector<72xf32> to vector<72x1xf32>
    %cst_146 = arith.constant 6.400000e+01 : f32
    %288 = vector.broadcast %cst_146 : f32 to vector<72x1xf32>
    %289 = arith.divf %287, %288 : vector<72x1xf32>
    %290 = vector.broadcast %289 : vector<72x1xf32> to vector<72x64xf32>
    %291 = arith.subf %269, %290 : vector<72x64xf32>
    %292 = arith.mulf %291, %291 : vector<72x64xf32>
    %cst_147 = arith.constant dense<0.000000e+00> : vector<72xf32>
    %293 = vector.multi_reduction <add>, %292, %cst_147 [1] : vector<72x64xf32> to vector<72xf32>
    %294 = vector.shape_cast %293 : vector<72xf32> to vector<72x1xf32>
    %cst_148 = arith.constant 6.400000e+01 : f32
    %295 = vector.broadcast %cst_148 : f32 to vector<72x1xf32>
    %296 = arith.divf %294, %295 : vector<72x1xf32>
    %297 = vector.broadcast %289 : vector<72x1xf32> to vector<72x64xf32>
    %298 = arith.subf %269, %297 : vector<72x64xf32>
    %cst_149 = arith.constant 9.99999974E-6 : f32
    %299 = vector.broadcast %cst_149 : f32 to vector<72x1xf32>
    %300 = arith.addf %296, %299 : vector<72x1xf32>
    %301 = math.rsqrt %300 : vector<72x1xf32>
    %302 = vector.broadcast %301 : vector<72x1xf32> to vector<72x64xf32>
    %303 = arith.mulf %298, %302 : vector<72x64xf32>
    %304 = vector.broadcast %271 : vector<1x64xf32> to vector<72x64xf32>
    %305 = arith.mulf %303, %304 : vector<72x64xf32>
    %306 = vector.broadcast %273 : vector<1x64xf32> to vector<72x64xf32>
    %307 = arith.addf %305, %306 : vector<72x64xf32>
    %308 = arith.truncf %307 : vector<72x64xf32> to vector<72x64xbf16>
    %c1_150 = arith.constant 1 : index
    %c0_151 = arith.constant 0 : index
    %c0_152 = arith.constant 0 : index
    %309 = vector.load %arg7[%c1_150, %c0_151, %c0_152] : memref<2x64x512xbf16, #tpu.memory_space<vmem>>, vector<1x64x192xbf16>
    %310 = vector.shape_cast %309 : vector<1x64x192xbf16> to vector<64x192xbf16>
    %cst_153 = arith.constant dense<0.000000e+00> : vector<72x192xf32>
    %311 = tpu.matmul %308, %310, %cst_153 {dimension_numbers = #tpu.dot_dimension_numbers<[1], [0], [0], [1], [0, 0, 1, 1], [], []>} : vector<72x64xbf16>, vector<64x192xbf16>, vector<72x192xf32> -> vector<72x192xf32>
    %312 = vector.broadcast %275 : vector<1x192xf32> to vector<72x192xf32>
    %313 = arith.addf %311, %312 : vector<72x192xf32>
    %314 = vector.extract_strided_slice %313 {offsets = [0, 64], sizes = [72, 64], strides = [1, 1]} : vector<72x192xf32> to vector<72x64xf32>
    %315 = tpu.transpose %314, [1, 0] : vector<72x64xf32> -> vector<64x72xf32>
    %316 = arith.truncf %315 : vector<64x72xf32> to vector<64x72xbf16>
    %317 = vector.extract_strided_slice %313 {offsets = [0, 0], sizes = [72, 16], strides = [1, 1]} : vector<72x192xf32> to vector<72x16xf32>
    %318 = arith.truncf %317 : vector<72x16xf32> to vector<72x16xbf16>
    %319 = vector.extract_strided_slice %313 {offsets = [0, 128], sizes = [72, 16], strides = [1, 1]} : vector<72x192xf32> to vector<72x16xf32>
    %320 = arith.truncf %319 : vector<72x16xf32> to vector<72x16xbf16>
    %321 = vector.extract_strided_slice %316 {offsets = [0, 0], sizes = [16, 72], strides = [1, 1]} : vector<64x72xbf16> to vector<16x72xbf16>
    %cst_154 = arith.constant dense<0.000000e+00> : vector<72x72xf32>
    %322 = tpu.matmul %318, %321, %cst_154 {dimension_numbers = #tpu.dot_dimension_numbers<[1], [0], [0], [1], [0, 0, 1, 1], [], []>} : vector<72x16xbf16>, vector<16x72xbf16>, vector<72x72xf32> -> vector<72x72xf32>
    %cst_155 = arith.constant 2.500000e-01 : f32
    %323 = vector.broadcast %cst_155 : f32 to vector<72x72xf32>
    %324 = arith.mulf %322, %323 : vector<72x72xf32>
    %325 = vector.broadcast %78 : vector<1x72xf32> to vector<72x72xf32>
    %326 = arith.addf %324, %325 : vector<72x72xf32>
    %cst_156 = arith.constant dense<0xFF800000> : vector<72xf32>
    %327 = vector.multi_reduction <maximumf>, %326, %cst_156 [1] : vector<72x72xf32> to vector<72xf32>
    %328 = vector.shape_cast %327 : vector<72xf32> to vector<72x1xf32>
    %329 = vector.broadcast %328 : vector<72x1xf32> to vector<72x72xf32>
    %330 = arith.subf %326, %329 : vector<72x72xf32>
    %331 = math.exp %330 : vector<72x72xf32>
    %cst_157 = arith.constant dense<0.000000e+00> : vector<72xf32>
    %332 = vector.multi_reduction <add>, %331, %cst_157 [1] : vector<72x72xf32> to vector<72xf32>
    %333 = vector.shape_cast %332 : vector<72xf32> to vector<72x1xf32>
    %334 = tpu.reciprocal %333 {approx = true} : vector<72x1xf32> -> vector<72x1xf32>
    %335 = vector.broadcast %334 : vector<72x1xf32> to vector<72x72xf32>
    %336 = arith.mulf %331, %335 : vector<72x72xf32>
    %337 = arith.truncf %336 : vector<72x72xf32> to vector<72x72xbf16>
    %cst_158 = arith.constant dense<0.000000e+00> : vector<72x16xf32>
    %338 = tpu.matmul %337, %320, %cst_158 {dimension_numbers = #tpu.dot_dimension_numbers<[1], [0], [0], [1], [0, 0, 1, 1], [], []>} : vector<72x72xbf16>, vector<72x16xbf16>, vector<72x16xf32> -> vector<72x16xf32>
    %339 = vector.extract_strided_slice %313 {offsets = [0, 16], sizes = [72, 16], strides = [1, 1]} : vector<72x192xf32> to vector<72x16xf32>
    %340 = arith.truncf %339 : vector<72x16xf32> to vector<72x16xbf16>
    %341 = vector.extract_strided_slice %313 {offsets = [0, 144], sizes = [72, 16], strides = [1, 1]} : vector<72x192xf32> to vector<72x16xf32>
    %342 = arith.truncf %341 : vector<72x16xf32> to vector<72x16xbf16>
    %343 = vector.extract_strided_slice %316 {offsets = [16, 0], sizes = [16, 72], strides = [1, 1]} : vector<64x72xbf16> to vector<16x72xbf16>
    %cst_159 = arith.constant dense<0.000000e+00> : vector<72x72xf32>
    %344 = tpu.matmul %340, %343, %cst_159 {dimension_numbers = #tpu.dot_dimension_numbers<[1], [0], [0], [1], [0, 0, 1, 1], [], []>} : vector<72x16xbf16>, vector<16x72xbf16>, vector<72x72xf32> -> vector<72x72xf32>
    %cst_160 = arith.constant 2.500000e-01 : f32
    %345 = vector.broadcast %cst_160 : f32 to vector<72x72xf32>
    %346 = arith.mulf %344, %345 : vector<72x72xf32>
    %347 = vector.broadcast %78 : vector<1x72xf32> to vector<72x72xf32>
    %348 = arith.addf %346, %347 : vector<72x72xf32>
    %cst_161 = arith.constant dense<0xFF800000> : vector<72xf32>
    %349 = vector.multi_reduction <maximumf>, %348, %cst_161 [1] : vector<72x72xf32> to vector<72xf32>
    %350 = vector.shape_cast %349 : vector<72xf32> to vector<72x1xf32>
    %351 = vector.broadcast %350 : vector<72x1xf32> to vector<72x72xf32>
    %352 = arith.subf %348, %351 : vector<72x72xf32>
    %353 = math.exp %352 : vector<72x72xf32>
    %cst_162 = arith.constant dense<0.000000e+00> : vector<72xf32>
    %354 = vector.multi_reduction <add>, %353, %cst_162 [1] : vector<72x72xf32> to vector<72xf32>
    %355 = vector.shape_cast %354 : vector<72xf32> to vector<72x1xf32>
    %356 = tpu.reciprocal %355 {approx = true} : vector<72x1xf32> -> vector<72x1xf32>
    %357 = vector.broadcast %356 : vector<72x1xf32> to vector<72x72xf32>
    %358 = arith.mulf %353, %357 : vector<72x72xf32>
    %359 = arith.truncf %358 : vector<72x72xf32> to vector<72x72xbf16>
    %cst_163 = arith.constant dense<0.000000e+00> : vector<72x16xf32>
    %360 = tpu.matmul %359, %342, %cst_163 {dimension_numbers = #tpu.dot_dimension_numbers<[1], [0], [0], [1], [0, 0, 1, 1], [], []>} : vector<72x72xbf16>, vector<72x16xbf16>, vector<72x16xf32> -> vector<72x16xf32>
    %361 = vector.extract_strided_slice %313 {offsets = [0, 32], sizes = [72, 16], strides = [1, 1]} : vector<72x192xf32> to vector<72x16xf32>
    %362 = arith.truncf %361 : vector<72x16xf32> to vector<72x16xbf16>
    %363 = vector.extract_strided_slice %313 {offsets = [0, 160], sizes = [72, 16], strides = [1, 1]} : vector<72x192xf32> to vector<72x16xf32>
    %364 = arith.truncf %363 : vector<72x16xf32> to vector<72x16xbf16>
    %365 = vector.extract_strided_slice %316 {offsets = [32, 0], sizes = [16, 72], strides = [1, 1]} : vector<64x72xbf16> to vector<16x72xbf16>
    %cst_164 = arith.constant dense<0.000000e+00> : vector<72x72xf32>
    %366 = tpu.matmul %362, %365, %cst_164 {dimension_numbers = #tpu.dot_dimension_numbers<[1], [0], [0], [1], [0, 0, 1, 1], [], []>} : vector<72x16xbf16>, vector<16x72xbf16>, vector<72x72xf32> -> vector<72x72xf32>
    %cst_165 = arith.constant 2.500000e-01 : f32
    %367 = vector.broadcast %cst_165 : f32 to vector<72x72xf32>
    %368 = arith.mulf %366, %367 : vector<72x72xf32>
    %369 = vector.broadcast %78 : vector<1x72xf32> to vector<72x72xf32>
    %370 = arith.addf %368, %369 : vector<72x72xf32>
    %cst_166 = arith.constant dense<0xFF800000> : vector<72xf32>
    %371 = vector.multi_reduction <maximumf>, %370, %cst_166 [1] : vector<72x72xf32> to vector<72xf32>
    %372 = vector.shape_cast %371 : vector<72xf32> to vector<72x1xf32>
    %373 = vector.broadcast %372 : vector<72x1xf32> to vector<72x72xf32>
    %374 = arith.subf %370, %373 : vector<72x72xf32>
    %375 = math.exp %374 : vector<72x72xf32>
    %cst_167 = arith.constant dense<0.000000e+00> : vector<72xf32>
    %376 = vector.multi_reduction <add>, %375, %cst_167 [1] : vector<72x72xf32> to vector<72xf32>
    %377 = vector.shape_cast %376 : vector<72xf32> to vector<72x1xf32>
    %378 = tpu.reciprocal %377 {approx = true} : vector<72x1xf32> -> vector<72x1xf32>
    %379 = vector.broadcast %378 : vector<72x1xf32> to vector<72x72xf32>
    %380 = arith.mulf %375, %379 : vector<72x72xf32>
    %381 = arith.truncf %380 : vector<72x72xf32> to vector<72x72xbf16>
    %cst_168 = arith.constant dense<0.000000e+00> : vector<72x16xf32>
    %382 = tpu.matmul %381, %364, %cst_168 {dimension_numbers = #tpu.dot_dimension_numbers<[1], [0], [0], [1], [0, 0, 1, 1], [], []>} : vector<72x72xbf16>, vector<72x16xbf16>, vector<72x16xf32> -> vector<72x16xf32>
    %383 = vector.extract_strided_slice %313 {offsets = [0, 48], sizes = [72, 16], strides = [1, 1]} : vector<72x192xf32> to vector<72x16xf32>
    %384 = arith.truncf %383 : vector<72x16xf32> to vector<72x16xbf16>
    %385 = vector.extract_strided_slice %313 {offsets = [0, 176], sizes = [72, 16], strides = [1, 1]} : vector<72x192xf32> to vector<72x16xf32>
    %386 = arith.truncf %385 : vector<72x16xf32> to vector<72x16xbf16>
    %387 = vector.extract_strided_slice %316 {offsets = [48, 0], sizes = [16, 72], strides = [1, 1]} : vector<64x72xbf16> to vector<16x72xbf16>
    %cst_169 = arith.constant dense<0.000000e+00> : vector<72x72xf32>
    %388 = tpu.matmul %384, %387, %cst_169 {dimension_numbers = #tpu.dot_dimension_numbers<[1], [0], [0], [1], [0, 0, 1, 1], [], []>} : vector<72x16xbf16>, vector<16x72xbf16>, vector<72x72xf32> -> vector<72x72xf32>
    %cst_170 = arith.constant 2.500000e-01 : f32
    %389 = vector.broadcast %cst_170 : f32 to vector<72x72xf32>
    %390 = arith.mulf %388, %389 : vector<72x72xf32>
    %391 = vector.broadcast %78 : vector<1x72xf32> to vector<72x72xf32>
    %392 = arith.addf %390, %391 : vector<72x72xf32>
    %cst_171 = arith.constant dense<0xFF800000> : vector<72xf32>
    %393 = vector.multi_reduction <maximumf>, %392, %cst_171 [1] : vector<72x72xf32> to vector<72xf32>
    %394 = vector.shape_cast %393 : vector<72xf32> to vector<72x1xf32>
    %395 = vector.broadcast %394 : vector<72x1xf32> to vector<72x72xf32>
    %396 = arith.subf %392, %395 : vector<72x72xf32>
    %397 = math.exp %396 : vector<72x72xf32>
    %cst_172 = arith.constant dense<0.000000e+00> : vector<72xf32>
    %398 = vector.multi_reduction <add>, %397, %cst_172 [1] : vector<72x72xf32> to vector<72xf32>
    %399 = vector.shape_cast %398 : vector<72xf32> to vector<72x1xf32>
    %400 = tpu.reciprocal %399 {approx = true} : vector<72x1xf32> -> vector<72x1xf32>
    %401 = vector.broadcast %400 : vector<72x1xf32> to vector<72x72xf32>
    %402 = arith.mulf %397, %401 : vector<72x72xf32>
    %403 = arith.truncf %402 : vector<72x72xf32> to vector<72x72xbf16>
    %cst_173 = arith.constant dense<0.000000e+00> : vector<72x16xf32>
    %404 = tpu.matmul %403, %386, %cst_173 {dimension_numbers = #tpu.dot_dimension_numbers<[1], [0], [0], [1], [0, 0, 1, 1], [], []>} : vector<72x72xbf16>, vector<72x16xbf16>, vector<72x16xf32> -> vector<72x16xf32>
    %405 = tpu.concatenate %338, %360, %382, %404 in 1 : vector<72x16xf32>, vector<72x16xf32>, vector<72x16xf32>, vector<72x16xf32> -> vector<72x64xf32>
    %406 = arith.truncf %405 : vector<72x64xf32> to vector<72x64xbf16>
    %c1_174 = arith.constant 1 : index
    %c0_175 = arith.constant 0 : index
    %c256_176 = arith.constant 256 : index
    %407 = vector.load %arg7[%c1_174, %c0_175, %c256_176] : memref<2x64x512xbf16, #tpu.memory_space<vmem>>, vector<1x64x64xbf16>
    %408 = vector.shape_cast %407 : vector<1x64x64xbf16> to vector<64x64xbf16>
    %cst_177 = arith.constant dense<0.000000e+00> : vector<72x64xf32>
    %409 = tpu.matmul %406, %408, %cst_177 {dimension_numbers = #tpu.dot_dimension_numbers<[1], [0], [0], [1], [0, 0, 1, 1], [], []>} : vector<72x64xbf16>, vector<64x64xbf16>, vector<72x64xf32> -> vector<72x64xf32>
    %410 = vector.broadcast %277 : vector<1x64xf32> to vector<72x64xf32>
    %411 = arith.addf %409, %410 : vector<72x64xf32>
    %412 = arith.addf %269, %411 : vector<72x64xf32>
    %cst_178 = arith.constant dense<0.000000e+00> : vector<72xf32>
    %413 = vector.multi_reduction <add>, %412, %cst_178 [1] : vector<72x64xf32> to vector<72xf32>
    %414 = vector.shape_cast %413 : vector<72xf32> to vector<72x1xf32>
    %cst_179 = arith.constant 6.400000e+01 : f32
    %415 = vector.broadcast %cst_179 : f32 to vector<72x1xf32>
    %416 = arith.divf %414, %415 : vector<72x1xf32>
    %417 = vector.broadcast %416 : vector<72x1xf32> to vector<72x64xf32>
    %418 = arith.subf %412, %417 : vector<72x64xf32>
    %419 = arith.mulf %418, %418 : vector<72x64xf32>
    %cst_180 = arith.constant dense<0.000000e+00> : vector<72xf32>
    %420 = vector.multi_reduction <add>, %419, %cst_180 [1] : vector<72x64xf32> to vector<72xf32>
    %421 = vector.shape_cast %420 : vector<72xf32> to vector<72x1xf32>
    %cst_181 = arith.constant 6.400000e+01 : f32
    %422 = vector.broadcast %cst_181 : f32 to vector<72x1xf32>
    %423 = arith.divf %421, %422 : vector<72x1xf32>
    %424 = vector.broadcast %416 : vector<72x1xf32> to vector<72x64xf32>
    %425 = arith.subf %412, %424 : vector<72x64xf32>
    %cst_182 = arith.constant 9.99999974E-6 : f32
    %426 = vector.broadcast %cst_182 : f32 to vector<72x1xf32>
    %427 = arith.addf %423, %426 : vector<72x1xf32>
    %428 = math.rsqrt %427 : vector<72x1xf32>
    %429 = vector.broadcast %428 : vector<72x1xf32> to vector<72x64xf32>
    %430 = arith.mulf %425, %429 : vector<72x64xf32>
    %431 = vector.broadcast %279 : vector<1x64xf32> to vector<72x64xf32>
    %432 = arith.mulf %430, %431 : vector<72x64xf32>
    %433 = vector.broadcast %281 : vector<1x64xf32> to vector<72x64xf32>
    %434 = arith.addf %432, %433 : vector<72x64xf32>
    %435 = arith.truncf %434 : vector<72x64xf32> to vector<72x64xbf16>
    %c1_183 = arith.constant 1 : index
    %c0_184 = arith.constant 0 : index
    %c384_185 = arith.constant 384 : index
    %436 = vector.load %arg7[%c1_183, %c0_184, %c384_185] : memref<2x64x512xbf16, #tpu.memory_space<vmem>>, vector<1x64x128xbf16>
    %437 = vector.shape_cast %436 : vector<1x64x128xbf16> to vector<64x128xbf16>
    %cst_186 = arith.constant dense<0.000000e+00> : vector<72x128xf32>
    %438 = tpu.matmul %435, %437, %cst_186 {dimension_numbers = #tpu.dot_dimension_numbers<[1], [0], [0], [1], [0, 0, 1, 1], [], []>} : vector<72x64xbf16>, vector<64x128xbf16>, vector<72x128xf32> -> vector<72x128xf32>
    %439 = vector.broadcast %283 : vector<1x128xf32> to vector<72x128xf32>
    %440 = arith.addf %438, %439 : vector<72x128xf32>
    %441 = arith.mulf %440, %440 : vector<72x128xf32>
    %442 = arith.mulf %440, %441 : vector<72x128xf32>
    %cst_187 = arith.constant 4.471500e-02 : f32
    %443 = vector.broadcast %cst_187 : f32 to vector<72x128xf32>
    %444 = arith.mulf %443, %442 : vector<72x128xf32>
    %445 = arith.addf %440, %444 : vector<72x128xf32>
    %cst_188 = arith.constant 0.797884583 : f32
    %446 = vector.broadcast %cst_188 : f32 to vector<72x128xf32>
    %447 = arith.mulf %446, %445 : vector<72x128xf32>
    %448 = math.tanh %447 : vector<72x128xf32>
    %cst_189 = arith.constant 1.000000e+00 : f32
    %449 = vector.broadcast %cst_189 : f32 to vector<72x128xf32>
    %450 = arith.addf %449, %448 : vector<72x128xf32>
    %cst_190 = arith.constant 5.000000e-01 : f32
    %451 = vector.broadcast %cst_190 : f32 to vector<72x128xf32>
    %452 = arith.mulf %451, %450 : vector<72x128xf32>
    %453 = arith.mulf %440, %452 : vector<72x128xf32>
    %454 = arith.truncf %453 : vector<72x128xf32> to vector<72x128xbf16>
    %c1_191 = arith.constant 1 : index
    %c0_192 = arith.constant 0 : index
    %c0_193 = arith.constant 0 : index
    %455 = vector.load %arg8[%c1_191, %c0_192, %c0_193] : memref<2x128x64xbf16, #tpu.memory_space<vmem>>, vector<1x128x64xbf16>
    %456 = vector.shape_cast %455 : vector<1x128x64xbf16> to vector<128x64xbf16>
    %cst_194 = arith.constant dense<0.000000e+00> : vector<72x64xf32>
    %457 = tpu.matmul %454, %456, %cst_194 {dimension_numbers = #tpu.dot_dimension_numbers<[1], [0], [0], [1], [0, 0, 1, 1], [], []>} : vector<72x128xbf16>, vector<128x64xbf16>, vector<72x64xf32> -> vector<72x64xf32>
    %458 = vector.broadcast %285 : vector<1x64xf32> to vector<72x64xf32>
    %459 = arith.addf %457, %458 : vector<72x64xf32>
    %460 = arith.addf %412, %459 : vector<72x64xf32>
    %461 = vector.extract_strided_slice %460 {offsets = [0, 0], sizes = [1, 64], strides = [1, 1]} : vector<72x64xf32> to vector<1x64xf32>
    %c0_195 = arith.constant 0 : index
    %c0_196 = arith.constant 0 : index
    %462 = vector.load %arg10[%c0_195, %c0_196] : memref<8x64xf32, #tpu.memory_space<vmem>>, vector<1x64xf32>
    %c1_197 = arith.constant 1 : index
    %c0_198 = arith.constant 0 : index
    %463 = vector.load %arg10[%c1_197, %c0_198] : memref<8x64xf32, #tpu.memory_space<vmem>>, vector<1x64xf32>
    %cst_199 = arith.constant dense<0.000000e+00> : vector<1xf32>
    %464 = vector.multi_reduction <add>, %461, %cst_199 [1] : vector<1x64xf32> to vector<1xf32>
    %465 = vector.shape_cast %464 : vector<1xf32> to vector<1x1xf32>
    %cst_200 = arith.constant 6.400000e+01 : f32
    %466 = vector.broadcast %cst_200 : f32 to vector<1x1xf32>
    %467 = arith.divf %465, %466 : vector<1x1xf32>
    %468 = vector.broadcast %467 : vector<1x1xf32> to vector<1x64xf32>
    %469 = arith.subf %461, %468 : vector<1x64xf32>
    %470 = arith.mulf %469, %469 : vector<1x64xf32>
    %cst_201 = arith.constant dense<0.000000e+00> : vector<1xf32>
    %471 = vector.multi_reduction <add>, %470, %cst_201 [1] : vector<1x64xf32> to vector<1xf32>
    %472 = vector.shape_cast %471 : vector<1xf32> to vector<1x1xf32>
    %cst_202 = arith.constant 6.400000e+01 : f32
    %473 = vector.broadcast %cst_202 : f32 to vector<1x1xf32>
    %474 = arith.divf %472, %473 : vector<1x1xf32>
    %475 = vector.broadcast %467 : vector<1x1xf32> to vector<1x64xf32>
    %476 = arith.subf %461, %475 : vector<1x64xf32>
    %cst_203 = arith.constant 9.99999974E-6 : f32
    %477 = vector.broadcast %cst_203 : f32 to vector<1x1xf32>
    %478 = arith.addf %474, %477 : vector<1x1xf32>
    %479 = math.rsqrt %478 : vector<1x1xf32>
    %480 = vector.broadcast %479 : vector<1x1xf32> to vector<1x64xf32>
    %481 = arith.mulf %476, %480 : vector<1x64xf32>
    %482 = arith.mulf %481, %462 : vector<1x64xf32>
    %483 = arith.addf %482, %463 : vector<1x64xf32>
    %484 = arith.truncf %483 : vector<1x64xf32> to vector<1x64xbf16>
    %c0_204 = arith.constant 0 : index
    %c0_205 = arith.constant 0 : index
    %485 = vector.load %arg11[%c0_204, %c0_205] : memref<64x2xbf16, #tpu.memory_space<vmem>>, vector<64x2xbf16>
    %cst_206 = arith.constant dense<0.000000e+00> : vector<1x2xf32>
    %486 = tpu.matmul %484, %485, %cst_206 {dimension_numbers = #tpu.dot_dimension_numbers<[1], [0], [0], [1], [0, 0, 1, 1], [], []>} : vector<1x64xbf16>, vector<64x2xbf16>, vector<1x2xf32> -> vector<1x2xf32>
    %c2_207 = arith.constant 2 : index
    %c0_208 = arith.constant 0 : index
    %487 = vector.load %arg10[%c2_207, %c0_208] : memref<8x64xf32, #tpu.memory_space<vmem>>, vector<1x2xf32>
    %488 = arith.addf %486, %487 : vector<1x2xf32>
    %c0_209 = arith.constant 0 : index
    %c0_210 = arith.constant 0 : index
    %c0_211 = arith.constant 0 : index
    %489 = vector.load %arg12[%c0_209, %c0_210, %c0_211] : memref<1x1x2xf32, #tpu.memory_space<vmem>>, vector<1x1x2xf32>
    %490 = vector.shape_cast %489 : vector<1x1x2xf32> to vector<1x2xf32>
    %491 = vector.shape_cast %488 : vector<1x2xf32> to vector<1x1x2xf32>
    tpu.vector_store %arg12[%c0_209, %c0_210, %c0_211], %491 {strides = array<i32>} : memref<1x1x2xf32, #tpu.memory_space<vmem>>, vector<1x1x2xf32>,
    return
  }
  func.func @transform_0(%arg0: i32) -> (i32, i32) {
    %c0_i32 = arith.constant 0 : i32
    %c0_i32_0 = arith.constant 0 : i32
    return %arg0, %c0_i32 : i32, i32
  }
  func.func @transform_1(%arg0: i32) -> (i32, i32) {
    %c0_i32 = arith.constant 0 : i32
    %c0_i32_0 = arith.constant 0 : i32
    %c0_i32_1 = arith.constant 0 : i32
    return %c0_i32, %c0_i32_0 : i32, i32
  }
  func.func @transform_2(%arg0: i32) -> (i32, i32) {
    %c0_i32 = arith.constant 0 : i32
    %c0_i32_0 = arith.constant 0 : i32
    %c0_i32_1 = arith.constant 0 : i32
    return %c0_i32, %c0_i32_0 : i32, i32
  }
  func.func @transform_3(%arg0: i32) -> (i32, i32) {
    %c0_i32 = arith.constant 0 : i32
    %c0_i32_0 = arith.constant 0 : i32
    %c0_i32_1 = arith.constant 0 : i32
    return %c0_i32, %c0_i32_0 : i32, i32
  }
  func.func @transform_4(%arg0: i32) -> (i32, i32) {
    %c0_i32 = arith.constant 0 : i32
    %c0_i32_0 = arith.constant 0 : i32
    %c0_i32_1 = arith.constant 0 : i32
    return %c0_i32, %c0_i32_0 : i32, i32
  }
  func.func @transform_5(%arg0: i32) -> (i32, i32) {
    %c0_i32 = arith.constant 0 : i32
    %c0_i32_0 = arith.constant 0 : i32
    %c0_i32_1 = arith.constant 0 : i32
    return %c0_i32, %c0_i32_0 : i32, i32
  }
  func.func @transform_6(%arg0: i32) -> (i32, i32, i32) {
    %c0_i32 = arith.constant 0 : i32
    %c0_i32_0 = arith.constant 0 : i32
    %c0_i32_1 = arith.constant 0 : i32
    %c0_i32_2 = arith.constant 0 : i32
    return %c0_i32, %c0_i32_0, %c0_i32_1 : i32, i32, i32
  }
  func.func @transform_7(%arg0: i32) -> (i32, i32, i32) {
    %c0_i32 = arith.constant 0 : i32
    %c0_i32_0 = arith.constant 0 : i32
    %c0_i32_1 = arith.constant 0 : i32
    %c0_i32_2 = arith.constant 0 : i32
    return %c0_i32, %c0_i32_0, %c0_i32_1 : i32, i32, i32
  }
  func.func @transform_8(%arg0: i32) -> (i32, i32, i32) {
    %c0_i32 = arith.constant 0 : i32
    %c0_i32_0 = arith.constant 0 : i32
    %c0_i32_1 = arith.constant 0 : i32
    %c0_i32_2 = arith.constant 0 : i32
    return %c0_i32, %c0_i32_0, %c0_i32_1 : i32, i32, i32
  }
  func.func @transform_9(%arg0: i32) -> (i32, i32) {
    %c0_i32 = arith.constant 0 : i32
    %c0_i32_0 = arith.constant 0 : i32
    %c0_i32_1 = arith.constant 0 : i32
    return %c0_i32, %c0_i32_0 : i32, i32
  }
  func.func @transform_10(%arg0: i32) -> (i32, i32) {
    %c0_i32 = arith.constant 0 : i32
    %c0_i32_0 = arith.constant 0 : i32
    %c0_i32_1 = arith.constant 0 : i32
    return %c0_i32, %c0_i32_0 : i32, i32
  }
  func.func @transform_11(%arg0: i32) -> (i32, i32, i32) {
    %c0_i32 = arith.constant 0 : i32
    %c0_i32_0 = arith.constant 0 : i32
    %c0_i32_1 = arith.constant 0 : i32
    return %arg0, %c0_i32, %c0_i32_0 : i32, i32, i32
  }
}

</mosaic_0001>

<bundles_post_ra>
// kernel: hybridnet_forward.1
= control target key start
LH: loop header
LB: loop body
LE: loop exit
PB: predicated region body
PF: predicated region fallthrough
CT: control target
= control target key end

     0   :  { %s21130_s0 = inlined_call_operand.vmem [shape: bf16[144,198], index: 0, kind: input, shape index: {}]   ;;  %s21131_s1 = inlined_call_operand.hbm [shape: bf16[198,512], index: 1, kind: input, shape index: {}]   ;;  %s21132_s2 = inlined_call_operand.hbm [shape: f32[2,512], index: 2, kind: input, shape index: {}]   ;;  %s21133_s3 = inlined_call_operand.hbm [shape: bf16[1536,512], index: 3, kind: input, shape index: {}]   ;;  %s21134_s4 = inlined_call_operand.hbm [shape: bf16[2048,512], index: 4, kind: input, shape index: {}]   ;;  %s21135_s5 = inlined_call_operand.vmem [shape: f32[72,64], index: 5, kind: input, shape index: {}]   ;;  %s21136_s6 = inlined_call_operand.hbm [shape: bf16[2,64,512], index: 6, kind: input, shape index: {}]   ;;  %s21137_s7 = inlined_call_operand.vmem [shape: bf16[2,128,64], index: 7, kind: input, shape index: {}]   ;;  %s21138_s8 = inlined_call_operand.hbm [shape: f32[2,8,192], index: 8, kind: input, shape index: {}]   ;;  %s21139_s9 = inlined_call_operand.hbm [shape: f32[8,64], index: 9, kind: input, shape index: {}]   ;;  %s21140_s10 = inlined_call_operand.vmem [shape: bf16[64,2], index: 10, kind: input, shape index: {}]   ;;  %s21141_s11 = inlined_call_operand.hbm [shape: f32[2,1,2], index: 11, kind: output, shape index: {}]  }
   0x1   :  { %21176 = sst [smem:[#allocation41_spill]] %s21132_s2 }
   0x2   :  { %21177 = sst [smem:[#allocation42_spill]] %s21134_s4 }
   0x3   :  { %16 = vsyncpa [#allocation4], 0 }
   0x4   :  { %17 = vsyncpa [#allocation7], 0 }
   0x5   :  { %18 = vsyncpa [#allocation10], 0 }
   0x6   :  { %19 = vsyncpa [#allocation13], 0 }
   0x7   :  { %20 = vsyncpa [#allocation5], 0 }
   0x8   :  { %22 = vsyncpa [#allocation5 + $0x1], 0  ;;  %s17874_s17 = smov 0   ;;  %s17876_s18 = smov 0  }
   0x9   :  { %s17878_s19 = smov 0   ;;  %s17880_s20 = smov 0  }
   0xa LB: > { %21178 = sst [smem:[#allocation21_spill]] %s17788_s19  ;;  %s17895_s21 = sadd.s32 4294967295, %s17792_s20   ;;  %s17792_s20 = sphi %s17880_s20, %s21265_s20   ;;  %s17788_s19 = sphi %s17878_s19, %s21262_s19   ;;  %s17784_s18 = sphi %s17876_s18, %s21264_s18   ;;  %s17780_s17 = sphi %s17874_s17, %s21263_s17  }
   0xb   : > { %s13310_s22 = sadd.s32 4294967294, %s17792_s20   ;;  %s17899_s23 = sadd.s32 1, %s17792_s20  }
   0xc   : > { %s271_s24 = sadd.s32 1, %s17788_s19  ;;  %s268_s25 = ssub.s32 %s17792_s20, %s17899_s23 }
   0xd   : > { %p281_p0 = scmp.ne.s32.totalorder %s17788_s19, %s17784_s18  ;;  %p269_p1 = scmp.eq.s32.totalorder %s268_s25, 0 }
   0xe   : > { %p282_p2 = scmp.eq.s32.totalorder %s17895_s21, 1  ;;  %p287_p3 = scmp.ne.s32.totalorder %s17784_s18, %s17780_s17 }
   0xf   : > { %p288_p4 = scmp.eq.s32.totalorder %s13310_s22, 1  ;;  %p13311_p7 = scmp.ge.s32.totalorder %s17792_s20, 1 }
  0x10   : > { %s17910_s26 = scalar_select %p269_p1, %s17788_s19, %s271_s24  }
  0x11   : > { %p17912_p5 = por %p282_p2, %p281_p0  ;;  %p17916_p6 = por %p288_p4, %p287_p3 }
  0x12   : > { %21179 = sst [smem:[#allocation22_spill]] %s17910_s26  ;;  %p295_p8 = scmp.lt.s32.totalorder %s17792_s20, 3 }
  0x13   : > { %s21180_s27 = scalar_select %p17912_p5, 1, 0 }
  0x14   : > { %s21181_s28 = scalar_select %p17916_p6, 1, 0 }
  0x15   : > { %p21142_p9 = scmp.eq.s32.totalorder %s17895_s21, 0  ;;  %p17923_p10 = pnand %p13311_p7, %p295_p8 }
  0x16   : > { %s17794_s30 = smov [#allocation6]   ;;  %s17795_s14 = smov [#allocation9]  }
  0x17   : > { %s21182_s29 = scalar_select %p17923_p10, 1, 0 }
  0x18   : > { %s321_s12 = sshll.u32 %s17794_s30, 4  ;;  %p15392_p11 = pneg %p17923_p10  ;;  %s322_s12 = int_to_ptr.vmem [resolvable:$true] %s321_s12 }
  0x19   : > { %s344_s15 = sshll.u32 %s17795_s14, 4  ;;  %s17796_s16 = smov [#allocation12]   ;;  %s345_s15 = int_to_ptr.vmem [resolvable:$true] %s344_s15 }
  0x1a   : > { %p17931_p12 = pnand %p21142_p9, %p15392_p11  ;;  %s376_s22 = sshll.u32 %s17796_s16, 4  ;;  %s377_s22 = int_to_ptr.vmem [resolvable:$true] %s376_s22 }
  0x1b   : > { %s17545_s25 = scalar_lea.vmem %s322_s12, 128  ;;  %p17553_p3 = scmp.lt.s32.totalorder %s322_s12, %s322_s12 }
  0x1c   : > { %p17937_p13 = pneg %p17931_p12  ;;  %p17546_p0 = scmp.ne.s32.totalorder %s322_s12, %s17545_s25 }
  0x1d   : > { %p17554_p4 = scmp.lt.s32.totalorder %s17545_s25, %s17545_s25 }
  0x1e   : > { %p17548_p1 = pnand %p17546_p0, %p17937_p13 }
  0x1f   : > { %p17555_p7 = por %p17554_p4, %p17553_p3 }
  0x20   : > { %p17549_p2 = pneg %p17548_p1 }
  0x22   : > { %p17556_p8 = pnand %p17555_p7, %p17549_p2 }
  0x24   : > { %17559 = shalt.err (!%p17556_p8)
}
  0x25   : > { %s21185_s2 = sld [smem:[#allocation41_spill]]  ;;  %s17571_s16 = scalar_lea.vmem %s345_s15, 65536 }
  0x26   : > { %p17572_p11 = scmp.ne.s32.totalorder %s345_s15, %s17571_s16  ;;  %p17579_p5 = scmp.lt.s32.totalorder %s345_s15, %s345_s15 }
  0x27   : > { %p17580_p0 = scmp.lt.s32.totalorder %s17571_s16, %s17571_s16 }
  0x28   : > { %p17574_p9 = pnand %p17572_p11, %p17937_p13 }
  0x29   : > { %p17581_p1 = por %p17580_p0, %p17579_p5 }
  0x2a   : > { %p17575_p6 = pneg %p17574_p9 }
  0x2b   : > { %15398 = dma.hbm_to_vmem [thread:$0]  (!%p17931_p12), %s21185_s2, 128, %s322_s12, [#allocation7]  }
  0x2c   : > { %p17582_p10 = pnand %p17581_p1, %p17575_p6 }
  0x2e   : > { %17585 = shalt.err (!%p17582_p10)
}
  0x2f   : > { %s17797_s25 = smov 256   ;;  %s17798_s26 = smov 16  }
  0x30   : > { %s21186_s4 = sld [smem:[#allocation42_spill]]  ;;  %s17597_s14 = scalar_lea.vmem %s377_s22, 512 }
  0x31   : > { %p17598_p9 = scmp.ne.s32.totalorder %s377_s22, %s17597_s14  ;;  %p17605_p6 = scmp.lt.s32.totalorder %s377_s22, %s377_s22 }
  0x32   : > { %p17606_p10 = scmp.lt.s32.totalorder %s17597_s14, %s17597_s14 }
  0x33   : > { %p17600_p2 = pnand %p17598_p9, %p17937_p13 }
  0x34   : > { %p17607_p3 = por %p17606_p10, %p17605_p6 }
  0x35   : > { %p17601_p5 = pneg %p17600_p2 }
  0x36   : > { %15404 = dma.hbm_to_vmem [thread:$0]  (!%p17931_p12), %s21186_s4, 65536, %s345_s15, [#allocation10], %s17797_s25, %s17797_s25, %s17798_s26  }
  0x37   : > { %p17608_p4 = pnand %p17607_p3, %p17601_p5 }
  0x39   : > { %17611 = shalt.err (!%p17608_p4)
}
  0x3a   : > { %15410 = dma.hbm_to_vmem [thread:$0]  (!%p17931_p12), %s21138_s8, 512, %s377_s22, [#allocation13], %s17797_s25, %s17797_s25, %s17798_s26  }
  0x3b   : > { %s17799_s15 = smov [#allocation3]   ;;  %s17800_s12 = smov [#allocation8]  }
  0x3c   : > { %s307_s30 = sshll.u32 %s17799_s15, 4  ;;  %s331_s4 = sshll.u32 %s17800_s12, 4  ;;  %s308_s30 = int_to_ptr.vmem [resolvable:$true] %s307_s30  ;;  %s332_s4 = int_to_ptr.vmem [resolvable:$true] %s331_s4 }
  0x3d   : > { %s17623_s19 = scalar_lea.vmem %s308_s30, 6400  ;;  %p17631_p0 = scmp.lt.s32.totalorder %s308_s30, %s308_s30 }
  0x3e   : > { %p17624_p7 = scmp.ne.s32.totalorder %s308_s30, %s17623_s19  ;;  %p17632_p1 = scmp.lt.s32.totalorder %s17623_s19, %s17623_s19 }
  0x40   : > { %p17626_p8 = pnand %p17624_p7, %p17937_p13  ;;  %p17633_p9 = por %p17632_p1, %p17631_p0 }
  0x42   : > { %p17627_p11 = pneg %p17626_p8 }
  0x44   : > { %p17634_p2 = pnand %p17633_p9, %p17627_p11 }
  0x46   : > { %17637 = shalt.err (!%p17634_p2)
}
  0x47   : > { %15395 = dma.hbm_to_vmem [thread:$0]  (!%p17931_p12), %s21131_s1, 6400, %s308_s30, [#allocation4], %s17797_s25, %s17797_s25, %s17798_s26  }
  0x48   : > { %s17649_s14 = scalar_lea.vmem %s332_s4, 49152  ;;  %p17657_p3 = scmp.lt.s32.totalorder %s332_s4, %s332_s4 }
  0x49   : > { %p17650_p5 = scmp.ne.s32.totalorder %s332_s4, %s17649_s14  ;;  %p17658_p4 = scmp.lt.s32.totalorder %s17649_s14, %s17649_s14 }
  0x4b   : > { %p17652_p6 = pnand %p17650_p5, %p17937_p13  ;;  %p17659_p7 = por %p17658_p4, %p17657_p3 }
  0x4d   : > { %p17653_p10 = pneg %p17652_p6 }
  0x4f   : > { %p17660_p8 = pnand %p17659_p7, %p17653_p10 }
  0x51   : > { %17663 = shalt.err (!%p17660_p8)
}
  0x52   : > { %15401 = dma.hbm_to_vmem [thread:$0]  (!%p17931_p12), %s21133_s3, 49152, %s332_s4, [#allocation7], %s17797_s25, %s17797_s25, %s17798_s26  }
  0x53   : > { %s17801_s15 = smov [#allocation11]   ;;  %s17802_s12 = smov [#allocation14]  }
  0x54   : > { %s360_s30 = sshll.u32 %s17801_s15, 4  ;;  %s390_s2 = sshll.u32 %s17802_s12, 4  ;;  %s361_s30 = int_to_ptr.vmem [resolvable:$true] %s360_s30  ;;  %s391_s2 = int_to_ptr.vmem [resolvable:$true] %s390_s2 }
  0x55   : > { %s17675_s22 = scalar_lea.vmem %s361_s30, 4096  ;;  %p17683_p9 = scmp.lt.s32.totalorder %s361_s30, %s361_s30 }
  0x56   : > { %p17676_p11 = scmp.ne.s32.totalorder %s361_s30, %s17675_s22  ;;  %p17684_p2 = scmp.lt.s32.totalorder %s17675_s22, %s17675_s22 }
  0x58   : > { %p17678_p0 = pnand %p17676_p11, %p17937_p13  ;;  %p17685_p5 = por %p17684_p2, %p17683_p9 }
  0x5a   : > { %p17679_p1 = pneg %p17678_p0 }
  0x5c   : > { %p17686_p6 = pnand %p17685_p5, %p17679_p1 }
  0x5e   : > { %17689 = shalt.err (!%p17686_p6)
}
  0x5f   : > { %15407 = dma.hbm_to_vmem [thread:$0]  (!%p17931_p12), %s21136_s6, 4096, %s361_s30, [#allocation10], %s17797_s25, %s17797_s25, %s17798_s26  }
  0x60   : > { %s17701_s19 = scalar_lea.vmem %s391_s2, 128  ;;  %p17709_p7 = scmp.lt.s32.totalorder %s391_s2, %s391_s2 }
  0x61   : > { %p17702_p10 = scmp.ne.s32.totalorder %s391_s2, %s17701_s19  ;;  %p17710_p8 = scmp.lt.s32.totalorder %s17701_s19, %s17701_s19 }
  0x63   : > { %p17704_p3 = pnand %p17702_p10, %p17937_p13  ;;  %p17711_p11 = por %p17710_p8, %p17709_p7 }
  0x65   : > { %p17705_p4 = pneg %p17704_p3 }
  0x67   : > { %p17712_p0 = pnand %p17711_p11, %p17705_p4 }
  0x69   : > { %17715 = shalt.err (!%p17712_p0)
}
  0x6a   : > { %15413 = dma.hbm_to_vmem [thread:$0]  (!%p17931_p12), %s21139_s9, 128, %s391_s2, [#allocation13]  }
  0x6b   : > { %p21187_p1 = scmp.ne.s32.totalorder %s21182_s29, 0 }
  0x6d   : > { %416 = sbr.rel (%p21187_p1) target bundleno = 7651 (0x1de3), region = 64 }
  0x72   : > { %p21188_p9 = scmp.eq.s32.totalorder %s17895_s21, 0 }
  0x74   : > { %17759 = dma.done.wait (%p21188_p9), [#allocation4], 6400   ;;  %p21189_p13 = pmov %p21188_p9 }
  0x75   : > { %p21190_p2 = pmov %p21188_p9 }
  0x76   : > { %17761 = vsyncadd (%p21189_p13), [#allocation4], 4294960896 }
  0x77   : > { %17763 = dma.done.wait (%p21190_p2), [#allocation7], 49280   ;;  %p21191_p5 = pmov %p21190_p2 }
  0x78   : > { %p21192_p6 = pmov %p21190_p2 }
  0x79   : > { %17765 = vsyncadd (%p21191_p5), [#allocation7], 4294918016 }
  0x7a   : > { %17767 = dma.done.wait (%p21192_p6), [#allocation10], 69632   ;;  %p21193_p12 = pmov %p21190_p2 }
  0x7b   : > { %p21194_p10 = pmov %p21190_p2 }
  0x7c   : > { %17769 = vsyncadd (%p21193_p12), [#allocation10], 4294897664 }
  0x7d   : > { %17771 = dma.done.wait (%p21194_p10), [#allocation13], 640   ;;  %p21195_p3 = pmov %p21190_p2 }
  0x7e   : > { %v15604_v0 = vld [vmem:[#allocation3 + $0xe4] ss:$16 sps:$4 sm:$0xff]   ;;  %v15606_v1 = vld [vmem:[#allocation3 + $0xec] ss:$16 sps:$4 sm:$0xff]   ;;  %v15608_v2 = vld [vmem:[#allocation3 + $0xe0] ss:$16 sps:$4 sm:$0xff]  }
  0x7f   : > { %17773 = vsyncadd (%p21195_p3), [#allocation13], 4294966656  ;;  %890 = vmatprep.subr.bf16.mxu0 %v15604_v0  ;;  %v15609_v3 = vld [vmem:[#allocation3 + $0xe8] ss:$16 sps:$4 sm:$0xff]   ;;  %971 = vmatprep.subr.bf16.mxu1 %v15606_v1  ;;  %v15610_v4 = vld [vmem:[#allocation3 + $0xc4] ss:$16 sps:$4 sm:$0xff]  }
  0x80   : > { %891 = vmatpush1.bf16.msra.mxu0 %v15608_v2  ;;  %972 = vmatpush1.bf16.msra.mxu1 %v15609_v3  ;;  %v15612_v5 = vld [vmem:[#allocation3 + $0xcc] ss:$16 sps:$4 sm:$0xff]   ;;  %v15614_v6 = vld [vmem:[#allocation3 + $0xc0] ss:$16 sps:$4 sm:$0xff]   ;;  %v15615_v7 = vld [vmem:[#allocation3 + $0xc8] ss:$16 sps:$4 sm:$0xff]  }
  0x81   : > { %892 = vmatprep.subr.bf16.mxu0 %v15610_v4  ;;  %973 = vmatprep.subr.bf16.mxu1 %v15612_v5  ;;  %v15616_v8 = vld [vmem:[#allocation3 + $0xa4] ss:$16 sps:$4 sm:$0xff]   ;;  %v15618_v9 = vld [vmem:[#allocation3 + $0xac] ss:$16 sps:$4 sm:$0xff]   ;;  %v15620_v10 = vld [vmem:[#allocation3 + $0xa0] ss:$16 sps:$4 sm:$0xff]  }
  0x82   : > { %v15621_v11 = vld [vmem:[#allocation3 + $0xa8] ss:$16 sps:$4 sm:$0xff]   ;;  %v15622_v12 = vld [vmem:[#allocation3 + $0x84] ss:$16 sps:$4 sm:$0xff]   ;;  %v15624_v13 = vld [vmem:[#allocation3 + $0x8c] ss:$16 sps:$4 sm:$0xff]  }
  0x83   : > { %v15626_v14 = vld [vmem:[#allocation3 + $0x80] ss:$16 sps:$4 sm:$0xff]   ;;  %v15627_v15 = vld [vmem:[#allocation3 + $0x88] ss:$16 sps:$4 sm:$0xff]   ;;  %v15628_v16 = vld [vmem:[#allocation3 + $0x64] ss:$16 sps:$4 sm:$0xff]  }
  0x84   : > { %893 = vmatpush1.bf16.msra.mxu0 %v15614_v6  ;;  %974 = vmatpush1.bf16.msra.mxu1 %v15615_v7  ;;  %v15630_v17 = vld [vmem:[#allocation3 + $0x6c] ss:$16 sps:$4 sm:$0xff]   ;;  %v15632_v18 = vld [vmem:[#allocation3 + $0x60] ss:$16 sps:$4 sm:$0xff]   ;;  %v15633_v19 = vld [vmem:[#allocation3 + $0x68] ss:$16 sps:$4 sm:$0xff]  }
  0x85   : > { %894 = vmatprep.subr.bf16.mxu0 %v15616_v8  ;;  %975 = vmatprep.subr.bf16.mxu1 %v15618_v9  ;;  %s480_s26 = smul.u32 9, %s17895_s21  ;;  %v15634_v20 = vld [vmem:[#allocation3 + $0x44] ss:$16 sps:$4 sm:$0xff]   ;;  %v15636_v21 = vld [vmem:[#allocation3 + $0x4c] ss:$16 sps:$4 sm:$0xff]   ;;  %vm877_vm0 = vcmask 1042432  }
  0x86   : > { %v15638_v22 = vld [vmem:[#allocation3 + $0x40] ss:$16 sps:$4 sm:$0xff]   ;;  %v15639_v23 = vld [vmem:[#allocation3 + $0x48] ss:$16 sps:$4 sm:$0xff]   ;;  %v15640_v24 = vld [vmem:[#allocation3 + $0x24] ss:$16 sps:$4 sm:$0xff]  }
  0x87   : > { %p481_p4 = scmp.lt.s32.totalorder %s480_s26, 17  ;;  %v15642_v25 = vld [vmem:[#allocation3 + $0x2c] ss:$16 sps:$4 sm:$0xff]   ;;  %v15644_v26 = vld [vmem:[#allocation3 + $0x20] ss:$16 sps:$4 sm:$0xff]   ;;  %vm861_vm1 = vcmask 572416  }
  0x88   : > { %895 = vmatpush1.bf16.msra.mxu0 %v15620_v10  ;;  %976 = vmatpush1.bf16.msra.mxu1 %v15621_v11  ;;  %v15645_v27 = vld [vmem:[#allocation3 + $0x28] ss:$16 sps:$4 sm:$0xff]   ;;  %v15646_v28 = vld [vmem:[#allocation3 + $0x4] ss:$16 sps:$4 sm:$0xff]   ;;  %v15648_v29 = vld [vmem:[#allocation3 + $0xc] ss:$16 sps:$4 sm:$0xff]  }
  0x89   : > { %896 = vmatprep.subr.bf16.mxu0 %v15622_v12  ;;  %977 = vmatprep.subr.bf16.mxu1 %v15624_v13  ;;  %s21267_s26 = smov (!%p481_p4, %s480_s26), 17  ;;  %v545_v30 = vld [vmem:[#allocation3 + $0x180] sm:$0x77]  ;;  %v546_v31 = vld [vmem:[#allocation3 + $0x188] sm:$0x77]  ;;  %vm1218_vm2 = vcmask 1040384  }
  0x8a   : > { %v15650_v32 = vld [vmem:[#allocation3] ss:$16 sps:$4 sm:$0xff]   ;;  %v15651_v33 = vld [vmem:[#allocation3 + $0x8] ss:$16 sps:$4 sm:$0xff]   ;;  %v13389_v34 = vcombine.high %v545_v30, %v545_v30  ;;  %s14536_s29 = sshll.u32 %s21267_s26, 3  ;;  %v13391_v35 = vcombine.high %v546_v31, %v546_v31  ;;  %v13388_v36 = vcombine.low %v545_v30, %v545_v30  ;;  %v13390_v37 = vcombine.low %v546_v31, %v546_v31  ;;  %s17803_s2 = smov 64  }
  0x8b   : > { %s18027_s25 = scalar_lea.vmem %s21130_s0, %s14536_s29  ;;  %v15656_v38 = vld [vmem:[#allocation3 + $0x164] ss:$16 sps:$4 sm:$0xff]   ;;  %v15658_v41 = vld [vmem:[#allocation3 + $0x16c] ss:$16 sps:$4 sm:$0xff]   ;;  %v15660_v43 = vld [vmem:[#allocation3 + $0x160] ss:$16 sps:$4 sm:$0xff]  }
  0x8c   : > { %897 = vmatpush1.bf16.msra.mxu0 %v15626_v14  ;;  %978 = vmatpush1.bf16.msra.mxu1 %v15627_v15  ;;  %v879_v39 = vsel %vm877_vm0, %v13388_v36, 0  ;;  %v885_v40 = vsel %vm877_vm0, %v13390_v37, 0  ;;  %v15682_v42 = vld [vmem:[%s18027_s25 + $0x4] ss:$8 sps:$4 sm:$0xff]   ;;  %v15661_v44 = vld [vmem:[#allocation3 + $0x168] ss:$16 sps:$4 sm:$0xff]  }
  0x8d   : > { %898 = vmatprep.subr.bf16.mxu0 %v15628_v16  ;;  %979 = vmatprep.subr.bf16.mxu1 %v15630_v17  ;;  %v15662_v45 = vld [vmem:[#allocation3 + $0x144] ss:$16 sps:$4 sm:$0xff]   ;;  %v15664_v46 = vld [vmem:[#allocation3 + $0x14c] ss:$16 sps:$4 sm:$0xff]   ;;  %v15666_v47 = vld [vmem:[#allocation3 + $0x140] ss:$16 sps:$4 sm:$0xff]  }
  0x8e   : > { %13393 = vmatprep.mubr.msk.bf16.mxu0 %vm861_vm1, %v15682_v42  ;;  %13399 = vmatprep.mubr.msk.bf16.mxu1 %vm861_vm1, %v15682_v42  ;;  %v15667_v48 = vld [vmem:[#allocation3 + $0x148] ss:$16 sps:$4 sm:$0xff]   ;;  %v15668_v49 = vld [vmem:[#allocation3 + $0x124] ss:$16 sps:$4 sm:$0xff]   ;;  %v15670_v50 = vld [vmem:[#allocation3 + $0x12c] ss:$16 sps:$4 sm:$0xff]  }
  0x8f   : > { %v15672_v51 = vld [vmem:[#allocation3 + $0x120] ss:$16 sps:$4 sm:$0xff]   ;;  %v15673_v52 = vld [vmem:[#allocation3 + $0x128] ss:$16 sps:$4 sm:$0xff]   ;;  %v15674_v53 = vld [vmem:[#allocation3 + $0x104] ss:$16 sps:$4 sm:$0xff]  }
  0x90   : > { %899 = vmatpush1.bf16.msra.mxu0 %v15632_v18  ;;  %980 = vmatpush1.bf16.msra.mxu1 %v15633_v19  ;;  %v15676_v54 = vld [vmem:[#allocation3 + $0x10c] ss:$16 sps:$4 sm:$0xff]   ;;  %v15678_v55 = vld [vmem:[#allocation3 + $0x100] ss:$16 sps:$4 sm:$0xff]   ;;  %v15679_v56 = vld [vmem:[#allocation3 + $0x108] ss:$16 sps:$4 sm:$0xff]  }
  0x91   : > { %900 = vmatprep.subr.bf16.mxu0 %v15634_v20  ;;  %981 = vmatprep.subr.bf16.mxu1 %v15636_v21  ;;  %v15696_v57 = vld [vmem:[#allocation8 + $0xe4] ss:$16 sps:$4 sm:$0xff]   ;;  %v15680_v59 = vld [vmem:[%s18027_s25] ss:$8 sps:$4 sm:$0xff]   ;;  %v15685_v5 = vld [vmem:[%s18027_s25 + $0x10] ss:$8 sps:$4 sm:$0xff]  }
  0x92   : > { %v15699_v58 = vld [vmem:[#allocation8 + $0x2e4] ss:$16 sps:$4 sm:$0xff]   ;;  %v15694_v61 = vld [vmem:[#allocation8 + $0xe0] ss:$16 sps:$4 sm:$0xff]   ;;  %v496_v21 = vld [vmem:[%s18027_s25 + $0x40] sm:$0xff]  ;;  %vm1221_vm4 = vcmask 1044484  }
  0x93   : > { %v15683_v60 = vld [vmem:[%s18027_s25 + $0x14] ss:$8 sps:$4 sm:$0xff]   ;;  %v15697_v62 = vld [vmem:[#allocation8 + $0x2e0] ss:$16 sps:$4 sm:$0xff]   ;;  %v15686_v6 = vld [vmem:[%s18027_s25 + $0x24] ss:$8 sps:$4 sm:$0xff]   ;;  %v13338_v36 = vcombine.low %v496_v21, %v496_v21 }
  0x94   : > { %901 = vmatpush1.bf16.msra.mxu0 %v15638_v22  ;;  %982 = vmatpush1.bf16.msra.mxu1 %v15639_v23  ;;  %v15702_v63 = vld [vmem:[#allocation8 + $0xc4] ss:$16 sps:$4 sm:$0xff]   ;;  %v15700_v1 = vld [vmem:[#allocation8 + $0xc0] ss:$16 sps:$4 sm:$0xff]   ;;  %vm1219_vm3 = vsmask.f32 256 }
  0x95   : > { %902 = vmatprep.subr.bf16.mxu0 %v15640_v24  ;;  %983 = vmatprep.subr.bf16.mxu1 %v15642_v25  ;;  %v15705_v0 = vld [vmem:[#allocation8 + $0x2c4] ss:$16 sps:$4 sm:$0xff]   ;;  %v15703_v2 = vld [vmem:[#allocation8 + $0x2c0] ss:$16 sps:$4 sm:$0xff]   ;;  %vm1222_vm5 = vsmask.f32 4352  ;;  %vm18087_vm6 = vmand %vm1218_vm2, %vm1219_vm3 }
  0x96   : > { %v15708_v3 = vld [vmem:[#allocation8 + $0xa4] ss:$16 sps:$4 sm:$0xff]   ;;  %v15706_v7 = vld [vmem:[#allocation8 + $0xa0] ss:$16 sps:$4 sm:$0xff]   ;;  %vm18095_vm7 = vmand %vm1221_vm4, %vm1222_vm5  ;;  %vm1363_vm9 = vcmask 1043456   ;;  %vm8247_vm10 = vcmask 523264  }
  0x97   : > { %v15711_v4 = vld [vmem:[#allocation8 + $0x2a4] ss:$16 sps:$4 sm:$0xff]   ;;  %v15709_v8 = vld [vmem:[#allocation8 + $0x2a0] ss:$16 sps:$4 sm:$0xff]   ;;  %vm1224_vm8 = vmor %vm18095_vm7, %vm18087_vm6  ;;  %s17806_s19 = smov 112   ;;  %s17807_s16 = smov 96  }
  0x98   : > { %903 = vmatpush1.bf16.msra.mxu0 %v15644_v26  ;;  %984 = vmatpush1.bf16.msra.mxu1 %v15645_v27  ;;  %v15714_v9 = vld [vmem:[#allocation8 + $0x84] ss:$16 sps:$4 sm:$0xff]   ;;  %v15712_v11 = vld [vmem:[#allocation8 + $0x80] ss:$16 sps:$4 sm:$0xff]   ;;  %s17808_s15 = smov 80   ;;  %vm17809_vm11 = vmmov 0  }
  0x99   : > { %904 = vmatprep.subr.bf16.mxu0 %v15646_v28  ;;  %985 = vmatprep.subr.bf16.mxu1 %v15648_v29  ;;  %v15717_v10 = vld [vmem:[#allocation8 + $0x284] ss:$16 sps:$4 sm:$0xff]   ;;  %v15715_v12 = vld [vmem:[#allocation8 + $0x280] ss:$16 sps:$4 sm:$0xff]   ;;  %v13339_v29 = vcombine.high %v496_v21, %v496_v21  ;;  %vm8626_vm12 = vcmask 130048   ;;  %s17810_s26 = smov 16  }
  0x9a   : > { %v15720_v13 = vld [vmem:[#allocation8 + $0x64] ss:$16 sps:$4 sm:$0xff]   ;;  %v15688_v15 = vld [vmem:[%s18027_s25 + $0x20] ss:$8 sps:$4 sm:$0xff]   ;;  %v15691_v26 = vld [vmem:[%s18027_s25 + $0x30] ss:$8 sps:$4 sm:$0xff]  }
  0x9b   : > { %v15723_v14 = vld [vmem:[#allocation8 + $0x264] ss:$16 sps:$4 sm:$0xff]   ;;  %v15718_v17 = vld [vmem:[#allocation8 + $0x60] ss:$16 sps:$4 sm:$0xff]   ;;  %s17811_s29 = smov 32   ;;  %s17812_s13 = smov 48  }
  0x9c   : > { %905 = vmatpush1.bf16.msra.mxu0 %v15650_v32  ;;  %986 = vmatpush1.bf16.msra.mxu1 %v15651_v33  ;;  %v15689_v16 = vld [vmem:[%s18027_s25 + $0x34] ss:$8 sps:$4 sm:$0xff]   ;;  %v15721_v18 = vld [vmem:[#allocation8 + $0x260] ss:$16 sps:$4 sm:$0xff]   ;;  %vm10033_vm2 = vcmask 392192   ;;  %vm13077_vm3 = vcmask 516096  }
  0x9d   : > { %13392 = vmatprep.subr.msk.bf16.mxu0 %vm877_vm0, %v13389_v34  ;;  %13398 = vmatprep.subr.msk.bf16.mxu1 %vm877_vm0, %v13391_v35  ;;  %v15726_v19 = vld [vmem:[#allocation8 + $0x44] ss:$16 sps:$4 sm:$0xff]   ;;  %v15724_v22 = vld [vmem:[#allocation8 + $0x40] ss:$16 sps:$4 sm:$0xff]   ;;  %vm8732_vm0 = vcmask 588800   ;;  %s478_s24 = sand.u32 1, %s17784_s18  }
  0x9e   : > { %v15729_v20 = vld [vmem:[#allocation8 + $0x244] ss:$16 sps:$4 sm:$0xff]   ;;  %v15727_v23 = vld [vmem:[#allocation8 + $0x240] ss:$16 sps:$4 sm:$0xff]   ;;  %s14533_s25 = sshll.u32 %s17895_s21, 4  ;;  %s479_s30 = scalar_lea.vmem [#allocation15], %s478_s24 }
  0x9f   : > { %v15732_v24 = vld [vmem:[#allocation8 + $0x24] ss:$16 sps:$4 sm:$0xff]   ;;  %v15730_v27 = vld [vmem:[#allocation8 + $0x20] ss:$16 sps:$4 sm:$0xff]   ;;  %s13185_s12 = sshll.u32 %s479_s30, 4  ;;  %vm13170_vm4 = vcmask 8192   ;;  %s21091_s12 = int_to_ptr.vmem [resolvable:$true] %s13185_s12 }
  0xa0   : > { %913 = vmatpush2.bf16.msra.mxu0 %v879_v39  ;;  %994 = vmatpush2.bf16.msra.mxu1 %v885_v40  ;;  %v15735_v25 = vld [vmem:[#allocation8 + $0x224] ss:$16 sps:$4 sm:$0xff]   ;;  %v15733_v28 = vld [vmem:[#allocation8 + $0x220] ss:$16 sps:$4 sm:$0xff]   ;;  %s17716_s21 = scalar_lea.vmem %s21091_s12, 16  ;;  %p21259_p8 = scmp.ne.s32.totalorder %s21180_s27, 0 }
  0xa1   : > { %914 = vmatprep.subr.bf16.mxu0 %v15656_v38  ;;  %995 = vmatprep.subr.bf16.mxu1 %v15658_v41  ;;  %v15738_v30 = vld [vmem:[#allocation8 + $0x4] ss:$16 sps:$4 sm:$0xff]   ;;  %v15736_v32 = vld [vmem:[#allocation8] ss:$16 sps:$4 sm:$0xff]   ;;  %p17717_p7 = scmp.ne.s32.totalorder %s21091_s12, %s17716_s21 }
  0xa2   : > { %v15741_v31 = vld [vmem:[#allocation8 + $0x204] ss:$16 sps:$4 sm:$0xff]   ;;  %v15739_v33 = vld [vmem:[#allocation8 + $0x200] ss:$16 sps:$4 sm:$0xff]  }
  0xa3   : > { %v15744_v34 = vld [vmem:[#allocation8 + $0x1e4] ss:$16 sps:$4 sm:$0xff]   ;;  %v15742_v37 = vld [vmem:[#allocation8 + $0x1e0] ss:$16 sps:$4 sm:$0xff]   ;;  %p17718_p11 = pnand %p17717_p7, %p21259_p8 }
  0xa4   : > { %915 = vmatpush2.bf16.msra.mxu0 %v15660_v43  ;;  %996 = vmatpush2.bf16.msra.mxu1 %v15661_v44  ;;  %v15747_v35 = vld [vmem:[#allocation8 + $0x3e4] ss:$16 sps:$4 sm:$0xff]   ;;  %v15745_v38 = vld [vmem:[#allocation8 + $0x3e0] ss:$16 sps:$4 sm:$0xff]  }
  0xa5   : > { %916 = vmatprep.subr.bf16.mxu0 %v15662_v45  ;;  %997 = vmatprep.subr.bf16.mxu1 %v15664_v46  ;;  %v15750_v39 = vld [vmem:[#allocation8 + $0x1c4] ss:$16 sps:$4 sm:$0xff]   ;;  %v15748_v41 = vld [vmem:[#allocation8 + $0x1c0] ss:$16 sps:$4 sm:$0xff]   ;;  %p17719_p0 = pneg %p17718_p11 }
  0xa6   : > { %v15753_v40 = vld [vmem:[#allocation8 + $0x3c4] ss:$16 sps:$4 sm:$0xff]   ;;  %v15751_v42 = vld [vmem:[#allocation8 + $0x3c0] ss:$16 sps:$4 sm:$0xff]  }
  0xa7   : > { %v15756_v43 = vld [vmem:[#allocation8 + $0x1a4] ss:$16 sps:$4 sm:$0xff]   ;;  %v15754_v45 = vld [vmem:[#allocation8 + $0x1a0] ss:$16 sps:$4 sm:$0xff]  }
  0xa8   : > { %917 = vmatpush2.bf16.msra.mxu0 %v15666_v47  ;;  %998 = vmatpush2.bf16.msra.mxu1 %v15667_v48  ;;  %v15759_v44 = vld [vmem:[#allocation8 + $0x3a4] ss:$16 sps:$4 sm:$0xff]   ;;  %v15757_v46 = vld [vmem:[#allocation8 + $0x3a0] ss:$16 sps:$4 sm:$0xff]  }
  0xa9   : > { %918 = vmatprep.subr.bf16.mxu0 %v15668_v49  ;;  %999 = vmatprep.subr.bf16.mxu1 %v15670_v50  ;;  %v15762_v47 = vld [vmem:[#allocation8 + $0x184] ss:$16 sps:$4 sm:$0xff]   ;;  %v15760_v49 = vld [vmem:[#allocation8 + $0x180] ss:$16 sps:$4 sm:$0xff]  }
  0xaa   : > { %v15765_v48 = vld [vmem:[#allocation8 + $0x384] ss:$16 sps:$4 sm:$0xff]   ;;  %v15763_v50 = vld [vmem:[#allocation8 + $0x380] ss:$16 sps:$4 sm:$0xff]  }
  0xac   : > { %919 = vmatpush2.bf16.msra.mxu0 %v15672_v51  ;;  %1000 = vmatpush2.bf16.msra.mxu1 %v15673_v52  ;;  %v15768_v51 = vld [vmem:[#allocation8 + $0x164] ss:$16 sps:$4 sm:$0xff]  }
  0xad   : > { %920 = vmatprep.subr.bf16.mxu0 %v15674_v53  ;;  %1001 = vmatprep.subr.bf16.mxu1 %v15676_v54  ;;  %v15771_v52 = vld [vmem:[#allocation8 + $0x364] ss:$16 sps:$4 sm:$0xff]   ;;  %v15766_v53 = vld [vmem:[#allocation8 + $0x160] ss:$16 sps:$4 sm:$0xff]  }
  0xae   : > { %v15769_v54 = vld [vmem:[#allocation8 + $0x360] ss:$16 sps:$4 sm:$0xff]  }
  0xb0   : > { %921 = vmatpush2.bf16.msra.mxu0 %v15678_v55  ;;  %1002 = vmatpush2.bf16.msra.mxu1 %v15679_v56  ;;  %v15774_v55 = vld [vmem:[#allocation8 + $0x144] ss:$16 sps:$4 sm:$0xff]  }
  0xb1   : > { %3787 = vmatprep.subr.bf16.mxu0 %v15696_v57  ;;  %3840 = vmatprep.subr.bf16.mxu1 %v15699_v58  ;;  %v15777_v56 = vld [vmem:[#allocation8 + $0x344] ss:$16 sps:$4 sm:$0xff]   ;;  %v15772_v57 = vld [vmem:[#allocation8 + $0x140] ss:$16 sps:$4 sm:$0xff]  }
  0xb2   : > { %v15775_v58 = vld [vmem:[#allocation8 + $0x340] ss:$16 sps:$4 sm:$0xff]  }
  0xb3   : > { %923 = vmatmul.mubr.bf16.vlgmr.msra.gmra.mxu0 %v15680_v59  ;;  %1004 = vmatmul.mubr.bf16.vlgmr.msra.gmra.mxu1 %v15680_v59  ;;  %v15780_v59 = vld [vmem:[#allocation8 + $0x124] ss:$16 sps:$4 sm:$0xff]  }
  0xb4   : > { %13394 = vmatprep.mubr.msk.bf16.mxu0 %vm861_vm1, %v15683_v60  ;;  %13400 = vmatprep.mubr.msk.bf16.mxu1 %vm861_vm1, %v15683_v60  ;;  %v15783_v60 = vld [vmem:[#allocation8 + $0x324] ss:$16 sps:$4 sm:$0xff]  }
  0xb5   : > { %3788 = vmatpush1.bf16.msra.mxu0 %v15694_v61  ;;  %3841 = vmatpush1.bf16.msra.mxu1 %v15697_v62  ;;  %v15778_v61 = vld [vmem:[#allocation8 + $0x120] ss:$16 sps:$4 sm:$0xff]  }
  0xb6   : > { %3789 = vmatprep.subr.bf16.mxu0 %v15702_v63  ;;  %3842 = vmatprep.subr.bf16.mxu1 %v15705_v0  ;;  %v15781_v62 = vld [vmem:[#allocation8 + $0x320] ss:$16 sps:$4 sm:$0xff]   ;;  %v15786_v63 = vld [vmem:[#allocation8 + $0x104] ss:$16 sps:$4 sm:$0xff]  }
  0xb7   : > { %v15789_v0 = vld [vmem:[#allocation8 + $0x304] ss:$16 sps:$4 sm:$0xff]  }
  0xb9   : > { %3790 = vmatpush1.bf16.msra.mxu0 %v15700_v1  ;;  %3843 = vmatpush1.bf16.msra.mxu1 %v15703_v2  ;;  %v15784_v1 = vld [vmem:[#allocation8 + $0x100] ss:$16 sps:$4 sm:$0xff]  }
  0xba   : > { %3791 = vmatprep.subr.bf16.mxu0 %v15708_v3  ;;  %3844 = vmatprep.subr.bf16.mxu1 %v15711_v4  ;;  %v15787_v2 = vld [vmem:[#allocation8 + $0x300] ss:$16 sps:$4 sm:$0xff]   ;;  %v15796_v3 = vld [vmem:[#allocation8 + $0x4e4] ss:$16 sps:$4 sm:$0xff]  }
  0xbb   : > { %933 = vmatmul.mubr.bf16.gmra.mxu0 %v15685_v5  ;;  %1014 = vmatmul.mubr.bf16.gmra.mxu1 %v15685_v5  ;;  %v15799_v4 = vld [vmem:[#allocation8 + $0x6e4] ss:$16 sps:$4 sm:$0xff]   ;;  %v21146_v5 = vlaneseq }
  0xbc   : > { %13395 = vmatprep.mubr.msk.bf16.mxu0 %vm861_vm1, %v15686_v6  ;;  %13401 = vmatprep.mubr.msk.bf16.mxu1 %vm861_vm1, %v15686_v6 }
  0xbd   : > { %3792 = vmatpush1.bf16.msra.mxu0 %v15706_v7  ;;  %3845 = vmatpush1.bf16.msra.mxu1 %v15709_v8  ;;  %v18049_v6 = vshrl.u32 %v21146_v5, 7 }
  0xbe   : > { %3793 = vmatprep.subr.bf16.mxu0 %v15714_v9  ;;  %3846 = vmatprep.subr.bf16.mxu1 %v15717_v10  ;;  %v547_v9 = vld [vmem:[#allocation6] ss:$2 sm:$0xf] }
  0xbf   : > { %v18052_v7 = vsub.s32 0, %v18049_v6  ;;  %v21148_v8 = vsub.s32 2, %v18049_v6  ;;  %v18056_v10 = vsub.s32 1, %v18049_v6 }
  0xc1   : > { %3794 = vmatpush1.bf16.msra.mxu0 %v15712_v11  ;;  %3847 = vmatpush1.bf16.msra.mxu1 %v15715_v12  ;;  %21196 = vst [vmem:[#allocation23_spill] sm:$0xff] %v18052_v7  ;;  %21197 = vst [vmem:[#allocation24_spill] sm:$0xff] %v18056_v10  ;;  %v21147_v11 = vsub.s32 3, %v18049_v6  ;;  %v18060_v12 = vrot.slane %v547_v9, %v18052_v7 }
  0xc2   : > { %3795 = vmatprep.subr.bf16.mxu0 %v15720_v13  ;;  %3848 = vmatprep.subr.bf16.mxu1 %v15723_v14  ;;  %v18064_v13 = vrot.slane %v547_v9, %v21148_v8  ;;  %v18067_v14 = vrot.slane %v547_v9, %v18056_v10  ;;  %v15812_v8 = vld [vmem:[#allocation8 + $0x480] ss:$16 sps:$4 sm:$0xff]  }
  0xc3   : > { %943 = vmatmul.mubr.bf16.gmra.mxu0 %v15688_v15  ;;  %1024 = vmatmul.mubr.bf16.gmra.mxu1 %v15688_v15  ;;  %v18071_v15 = vrot.slane %v547_v9, %v21147_v11 }
  0xc4   : > { %13396 = vmatprep.mubr.msk.bf16.mxu0 %vm861_vm1, %v15689_v16  ;;  %13402 = vmatprep.mubr.msk.bf16.mxu1 %vm861_vm1, %v15689_v16 }
  0xc5   : > { %3796 = vmatpush1.bf16.msra.mxu0 %v15718_v17  ;;  %3849 = vmatpush1.bf16.msra.mxu1 %v15721_v18 }
  0xc6   : > { %3797 = vmatprep.subr.bf16.mxu0 %v15726_v19  ;;  %3850 = vmatprep.subr.bf16.mxu1 %v15729_v20 }
  0xc9   : > { %3798 = vmatpush1.bf16.msra.mxu0 %v15724_v22  ;;  %3851 = vmatpush1.bf16.msra.mxu1 %v15727_v23 }
  0xca   : > { %3799 = vmatprep.subr.bf16.mxu0 %v15732_v24  ;;  %3852 = vmatprep.subr.bf16.mxu1 %v15735_v25 }
  0xcb   : > { %953 = vmatmul.mubr.bf16.gmra.mxu0 %v15691_v26  ;;  %1034 = vmatmul.mubr.bf16.gmra.mxu1 %v15691_v26 }
  0xcc   : > { %13397 = vmatprep.mubr.msk.bf16.mxu0 %vm861_vm1, %v13339_v29  ;;  %13403 = vmatprep.mubr.msk.bf16.mxu1 %vm861_vm1, %v13339_v29  ;;  %vm10023_vm1 = vcmask 261120  }
  0xcd   : > { %3800 = vmatpush1.bf16.msra.mxu0 %v15730_v27  ;;  %3853 = vmatpush1.bf16.msra.mxu1 %v15733_v28 }
  0xce   : > { %3801 = vmatprep.subr.bf16.mxu0 %v15738_v30  ;;  %3854 = vmatprep.subr.bf16.mxu1 %v15741_v31 }
  0xd1   : > { %3802 = vmatpush1.bf16.msra.mxu0 %v15736_v32  ;;  %3855 = vmatpush1.bf16.msra.mxu1 %v15739_v33 }
  0xd2   : > { %3803 = vmatprep.subr.bf16.mxu0 %v15744_v34  ;;  %3856 = vmatprep.subr.bf16.mxu1 %v15747_v35 }
  0xd3   : > { %963 = vmatmul.mubr.bf16.gmra.mxu0 %v13338_v36  ;;  %1044 = vmatmul.mubr.bf16.gmra.mxu1 %v13338_v36 }
  0xd5   : > { %3804 = vmatpush2.bf16.msra.mxu0 %v15742_v37  ;;  %3857 = vmatpush2.bf16.msra.mxu1 %v15745_v38 }
  0xd6   : > { %3805 = vmatprep.subr.bf16.mxu0 %v15750_v39  ;;  %3858 = vmatprep.subr.bf16.mxu1 %v15753_v40 }
  0xd9   : > { %3806 = vmatpush2.bf16.msra.mxu0 %v15748_v41  ;;  %3859 = vmatpush2.bf16.msra.mxu1 %v15751_v42 }
  0xda   : > { %3807 = vmatprep.subr.bf16.mxu0 %v15756_v43  ;;  %3860 = vmatprep.subr.bf16.mxu1 %v15759_v44 }
  0xdd   : > { %3808 = vmatpush2.bf16.msra.mxu0 %v15754_v45  ;;  %3861 = vmatpush2.bf16.msra.mxu1 %v15757_v46 }
  0xde   : > { %3809 = vmatprep.subr.bf16.mxu0 %v15762_v47  ;;  %3862 = vmatprep.subr.bf16.mxu1 %v15765_v48 }
  0xe1   : > { %3810 = vmatpush2.bf16.msra.mxu0 %v15760_v49  ;;  %3863 = vmatpush2.bf16.msra.mxu1 %v15763_v50 }
  0xe2   : > { %3811 = vmatprep.subr.bf16.mxu0 %v15768_v51  ;;  %3864 = vmatprep.subr.bf16.mxu1 %v15771_v52 }
  0xe5   : > { %3812 = vmatpush2.bf16.msra.mxu0 %v15766_v53  ;;  %3865 = vmatpush2.bf16.msra.mxu1 %v15769_v54 }
  0xe6   : > { %3813 = vmatprep.subr.bf16.mxu0 %v15774_v55  ;;  %3866 = vmatprep.subr.bf16.mxu1 %v15777_v56 }
  0xe9   : > { %3814 = vmatpush2.bf16.msra.mxu0 %v15772_v57  ;;  %3867 = vmatpush2.bf16.msra.mxu1 %v15775_v58 }
  0xea   : > { %3815 = vmatprep.subr.bf16.mxu0 %v15780_v59  ;;  %3868 = vmatprep.subr.bf16.mxu1 %v15783_v60 }
  0xed   : > { %3816 = vmatpush2.bf16.msra.mxu0 %v15778_v61  ;;  %3869 = vmatpush2.bf16.msra.mxu1 %v15781_v62 }
  0xee   : > { %3817 = vmatprep.subr.bf16.mxu0 %v15786_v63  ;;  %3870 = vmatprep.subr.bf16.mxu1 %v15789_v0 }
  0xf1   : > { %3818 = vmatpush2.bf16.msra.mxu0 %v15784_v1  ;;  %3871 = vmatpush2.bf16.msra.mxu1 %v15787_v2 }
  0xf2   : > { %3893 = vmatprep.subr.bf16.mxu0 %v15796_v3  ;;  %3946 = vmatprep.subr.bf16.mxu1 %v15799_v4 }
 0x173   : > { %v924_v16 = vpop.f32.mrf.mxu0  ;;  %v1005_v17 = vpop.f32.mrf.mxu1 }
 0x174   : > { %v925_v18 = vadd.f32 %v924_v16, %v18060_v12  ;;  %v1006_v19 = vadd.f32 %v1005_v17, %v18064_v13 }
 0x175   : > { %v926_v20 = vpop.f32.mrf.mxu0  ;;  %v1007_v21 = vpop.f32.mrf.mxu1 }
 0x176   : > { %v1054_v22 = vmax.f32 %v1006_v19, 0.0  ;;  %v927_v23 = vadd.f32 %v926_v20, %v18067_v14  ;;  %v1008_v24 = vadd.f32 %v1007_v21, %v18071_v15  ;;  %v1052_v27 = vmax.f32 %v925_v18, 0.0 }
 0x177   : > { %v928_v25 = vpop.f32.mrf.mxu0  ;;  %v1009_v26 = vpop.f32.mrf.mxu1 }
 0x178   : > { %v1053_v28 = vmax.f32 %v927_v23, 0.0  ;;  %v1055_v29 = vmax.f32 %v1008_v24, 0.0  ;;  %v929_v30 = vadd.f32 %v928_v25, %v18060_v12  ;;  %v18079_v31 = vadd.f32 %v1009_v26, %v18064_v13 }
 0x179   : > { %v930_v32 = vpop.f32.mrf.mxu0  ;;  %v1011_v33 = vpop.f32.mrf.mxu1 }
 0x17a   : > { %v14537_v34 = vpack.c.bf16 %v1053_v28, %v1052_v27  ;;  %v14538_v35 = vpack.c.bf16 %v1055_v29, %v1054_v22  ;;  %v931_v36 = vadd.f32 %v930_v32, %v18067_v14  ;;  %v18083_v37 = vadd.f32 %v1011_v33, %v18071_v15 }
 0x17b   : > { %v934_v38 = vpop.f32.mrf.mxu0  ;;  %v1015_v39 = vpop.f32.mrf.mxu1  ;;  %v1056_v43 = vmax.f32 %v929_v30, 0.0  ;;  %v1058_v44 = vmax.f32 %v18079_v31, 0.0 }
 0x17c   : > { %1200 = vst [vmem:[#allocation2] sm:$0xff] %v14537_v34  ;;  %1201 = vst [vmem:[#allocation2 + $0x38] sm:$0xff] %v14538_v35  ;;  %v935_v40 = vadd.f32 %v934_v38, %v18060_v12  ;;  %v1016_v41 = vadd.f32 %v1015_v39, %v18064_v13  ;;  %v1057_v45 = vmax.f32 %v931_v36, 0.0  ;;  %v1059_v46 = vmax.f32 %v18083_v37, 0.0 }
 0x17d   : > { %v936_v47 = vpop.f32.mrf.mxu0  ;;  %v1017_v48 = vpop.f32.mrf.mxu1  ;;  %v18115_v24 = vpack.c.bf16 %v1056_v43, %v1056_v43  ;;  %v18125_v33 = vpack.c.bf16 %v1058_v44, %v1058_v44 }
 0x17e   : > { %v1060_v50 = vmax.f32 %v935_v40, 0.0  ;;  %v1062_v51 = vmax.f32 %v1016_v41, 0.0  ;;  %v937_v52 = vadd.f32 %v936_v47, %v18067_v14  ;;  %v1018_v53 = vadd.f32 %v1017_v48, %v18071_v15 }
 0x17f   : > { %v938_v54 = vpop.f32.mrf.mxu0  ;;  %v1019_v55 = vpop.f32.mrf.mxu1  ;;  %v18117_v25 = vpack.c.bf16 %v1057_v45, %v1057_v45 }
 0x180   : > { %v1061_v56 = vmax.f32 %v937_v52, 0.0  ;;  %v1063_v57 = vmax.f32 %v1018_v53, 0.0  ;;  %v939_v58 = vadd.f32 %v938_v54, %v18060_v12  ;;  %v1020_v59 = vadd.f32 %v1019_v55, %v18064_v13 }
 0x181   : > { %v940_v60 = vpop.f32.mrf.mxu0  ;;  %v1021_v61 = vpop.f32.mrf.mxu1  ;;  %v18123_v32 = vpack.c.bf16 %v1060_v50, %v1060_v50  ;;  %v18135_v42 = vpack.c.bf16 %v1062_v51, %v1062_v51 }
 0x182   : > { %v1064_v62 = vmax.f32 %v939_v58, 0.0  ;;  %v1066_v1 = vmax.f32 %v1020_v59, 0.0  ;;  %v941_v2 = vadd.f32 %v940_v60, %v18067_v14  ;;  %v1022_v3 = vadd.f32 %v1021_v61, %v18071_v15 }
 0x183   : > { %v1225_v63 = vld [vmem:[#allocation2] sm:$0x11]  ;;  %v1228_v0 = vld [vmem:[#allocation2 + $0x38] sm:$0x11]  ;;  %v944_v4 = vpop.f32.mrf.mxu0  ;;  %v1025_v9 = vpop.f32.mrf.mxu1  ;;  %v18133_v41 = vpack.c.bf16 %v1061_v56, %v1061_v56  ;;  %v18137_v43 = vpack.c.bf16 %v1063_v57, %v1063_v57 }
 0x184   : > { %v1226_v16 = vsel %vm1224_vm8, 0, %v1225_v63  ;;  %v1229_v17 = vsel %vm1224_vm8, 0, %v1228_v0  ;;  %v18110_v18 = vadd.f32 %v944_v4, %v18060_v12  ;;  %v18113_v19 = vadd.f32 %v1025_v9, %v18064_v13 }
 0x185   : > { %1227 = vst [vmem:[#allocation2] sm:$0x11] %v1226_v16  ;;  %1230 = vst [vmem:[#allocation2 + $0x38] sm:$0x11] %v1229_v17  ;;  %v1065_v20 = vmax.f32 %v941_v2, 0.0  ;;  %v1067_v21 = vmax.f32 %v1022_v3, 0.0  ;;  %v946_v22 = vpop.f32.mrf.mxu0  ;;  %v1027_v23 = vpop.f32.mrf.mxu1  ;;  %v17509_v45 = vpack.c.bf16 %v1064_v62, %v1064_v62  ;;  %v18141_v44 = vpack.c.bf16 %v1066_v1, %v1066_v1 }
 0x186   : > { %v1068_v26 = vmax.f32 %v18110_v18, 0.0  ;;  %v1070_v27 = vmax.f32 %v18113_v19, 0.0  ;;  %v947_v28 = vadd.f32 %v946_v22, %v18067_v14  ;;  %v1028_v29 = vadd.f32 %v1027_v23, %v18071_v15  ;;  %v15794_v16 = vld [vmem:[#allocation8 + $0x4e0] ss:$16 sps:$4 sm:$0xff]   ;;  %v15802_v17 = vld [vmem:[#allocation8 + $0x4c4] ss:$16 sps:$4 sm:$0xff]  }
 0x187   : > { %v948_v30 = vpop.f32.mrf.mxu0  ;;  %v1029_v31 = vpop.f32.mrf.mxu1  ;;  %v18139_v47 = vpack.c.bf16 %v1065_v20, %v1065_v20  ;;  %v18155_v59 = vpack.c.bf16 %v1067_v21, %v1067_v21  ;;  %v15797_v21 = vld [vmem:[#allocation8 + $0x6e0] ss:$16 sps:$4 sm:$0xff]   ;;  %v18240_v61 = vsel %vm1363_vm9, %v18125_v33, %v18141_v44  ;;  %v15820_v19 = vld [vmem:[#allocation8 + $0x464] ss:$16 sps:$4 sm:$0xff]  }
 0x188   : > { %v1069_v34 = vmax.f32 %v947_v28, 0.0  ;;  %v1071_v35 = vmax.f32 %v1028_v29, 0.0  ;;  %v18128_v36 = vadd.f32 %v948_v30, %v18060_v12  ;;  %v18131_v38 = vadd.f32 %v1029_v31, %v18064_v13 }
 0x189   : > { %v950_v39 = vpop.f32.mrf.mxu0  ;;  %v1031_v40 = vpop.f32.mrf.mxu1 }
 0x18a   : > { %v1074_v49 = vmax.f32 %v18131_v38, 0.0  ;;  %v18146_v50 = vadd.f32 %v950_v39, %v18067_v14  ;;  %v18149_v52 = vadd.f32 %v1031_v40, %v18071_v15  ;;  %v18153_v58 = vpack.c.bf16 %v1069_v34, %v1069_v34  ;;  %v15800_v34 = vld [vmem:[#allocation8 + $0x4c0] ss:$16 sps:$4 sm:$0xff]   ;;  %v15805_v39 = vld [vmem:[#allocation8 + $0x6c4] ss:$16 sps:$4 sm:$0xff]  }
 0x18b   : > { %v954_v53 = vpop.f32.mrf.mxu0  ;;  %v1035_v51 = vpop.f32.mrf.mxu1 }
 0x18c   : > { %v955_v54 = vadd.f32 %v954_v53, %v18060_v12  ;;  %v1036_v55 = vadd.f32 %v1035_v51, %v18064_v13  ;;  %v1231_v56 = vld [vmem:[#allocation2] sm:$0xff]  ;;  %v1232_v57 = vld [vmem:[#allocation2 + $0x38] sm:$0xff]  ;;  %v1073_v60 = vmax.f32 %v18146_v50, 0.0  ;;  %v18175_v51 = vpack.c.bf16 %v1071_v35, %v1071_v35 }
 0x18d   : > { %v956_v62 = vpop.f32.mrf.mxu0  ;;  %v1037_v63 = vpop.f32.mrf.mxu1  ;;  %v13422_v0 = vcombine.low %v1231_v56, %v1231_v56  ;;  %v13423_v1 = vcombine.high %v1231_v56, %v1231_v56  ;;  %v13424_v20 = vcombine.low %v1232_v57, %v1232_v57  ;;  %v13425_v30 = vcombine.high %v1232_v57, %v1232_v57  ;;  %v15808_v53 = vld [vmem:[#allocation8 + $0x4a4] ss:$16 sps:$4 sm:$0xff]  }
 0x18e   : > { %v1076_v2 = vmax.f32 %v955_v54, 0.0  ;;  %v1078_v3 = vmax.f32 %v1036_v55, 0.0  ;;  %v957_v4 = vadd.f32 %v956_v62, %v18067_v14  ;;  %v1038_v9 = vadd.f32 %v1037_v63, %v18071_v15  ;;  %v15817_v35 = vld [vmem:[#allocation8 + $0x684] ss:$16 sps:$4 sm:$0xff]  }
 0x18f   : > { %v18163_v18 = vsel %vm1363_vm9, %v13423_v1, %v18133_v41  ;;  %v958_v22 = vpop.f32.mrf.mxu0  ;;  %v1039_v23 = vpop.f32.mrf.mxu1  ;;  %v18168_v31 = vsel %vm1363_vm9, %v13422_v0, %v18123_v32  ;;  %v18173_v40 = vsel %vm1363_vm9, %v13424_v20, %v18135_v42  ;;  %v18177_v54 = vpack.c.bf16 %v1068_v26, %v1068_v26  ;;  %v15901_v50 = vld [vmem:[#allocation8 + $0xac4] ss:$16 sps:$4 sm:$0xff]  }
 0x190   : > { %v1077_v28 = vmax.f32 %v957_v4, 0.0  ;;  %v1079_v29 = vmax.f32 %v1038_v9, 0.0  ;;  %3819 = vmatprep.mubr.bf16.mxu0 %v18163_v18  ;;  %v18180_v55 = vadd.f32 %v958_v22, %v18060_v12  ;;  %v18184_v62 = vsel %vm1363_vm9, %v13425_v30, %v18137_v43 }
 0x191   : > { %3820 = vmatmul.mubr.bf16.vlgmr.msra.gmra.mxu0 %v18168_v31  ;;  %v960_v56 = vpop.f32.mrf.mxu0  ;;  %v1041_v57 = vpop.f32.mrf.mxu1  ;;  %3872 = vmatprep.mubr.bf16.mxu1 %v18184_v62  ;;  %v18192_v26 = vadd.f32 %v1039_v23, %v18064_v13  ;;  %v18199_v9 = vsel %vm1363_vm9, %v18115_v24, %v17509_v45  ;;  %v18208_v22 = vpack.c.bf16 %v1078_v3, %v1078_v3  ;;  %v15803_v23 = vld [vmem:[#allocation8 + $0x6c0] ss:$16 sps:$4 sm:$0xff]  }
 0x192   : > { %3894 = vmatpush1.bf16.msra.mxu0 %v15794_v16  ;;  %v18187_v63 = vadd.f32 %v960_v56, %v18067_v14  ;;  %v18195_v0 = vadd.f32 %v1041_v57, %v18071_v15  ;;  %3873 = vmatmul.mubr.bf16.vlgmr.msra.gmra.mxu1 %v18173_v40  ;;  %v18202_v16 = vpack.c.bf16 %v1077_v28, %v1077_v28  ;;  %v15806_v28 = vld [vmem:[#allocation8 + $0x4a0] ss:$16 sps:$4 sm:$0xff]  }
 0x193   : > { %3895 = vmatprep.subr.bf16.mxu0 %v15802_v17  ;;  %v964_v1 = vpop.f32.mrf.mxu0  ;;  %v1045_v4 = vpop.f32.mrf.mxu1  ;;  %v18204_v20 = vpack.c.bf16 %v1079_v29, %v1079_v29  ;;  %v18206_v17 = vpack.c.bf16 %v1076_v2, %v1076_v2  ;;  %3947 = vmatpush1.bf16.msra.mxu1 %v15797_v21  ;;  %v1082_v56 = vmax.f32 %v18192_v26, 0.0  ;;  %v15811_v29 = vld [vmem:[#allocation8 + $0x6a4] ss:$16 sps:$4 sm:$0xff]   ;;  %v15809_v21 = vld [vmem:[#allocation8 + $0x6a0] ss:$16 sps:$4 sm:$0xff]   ;;  %v18273_v38 = vsel %vm1363_vm9, %v18137_v43, %v18175_v51 }
 0x194   : > { %v1081_v30 = vmax.f32 %v18187_v63, 0.0  ;;  %v965_v24 = vadd.f32 %v964_v1, %v18060_v12  ;;  %3948 = vmatprep.subr.bf16.mxu1 %v15805_v39  ;;  %v18217_v2 = vsel %vm1363_vm9, %v18153_v58, %v18202_v16  ;;  %v17520_v39 = vpack.c.bf16 %v1070_v27, %v1070_v27  ;;  %v15821_v43 = vld [vmem:[#allocation8 + $0x660] ss:$16 sps:$4 sm:$0xff]  }
 0x195   : > { %v966_v45 = vpop.f32.mrf.mxu0  ;;  %v1047_v5 = vpop.f32.mrf.mxu1  ;;  %v18222_v3 = vsel %vm1363_vm9, %v18175_v51, %v18204_v20  ;;  %v18227_v12 = vsel %vm1363_vm9, %v18177_v54, %v18206_v17  ;;  %3829 = vmatprep.mubr.bf16.mxu0 %v18217_v2  ;;  %v1046_v57 = vadd.f32 %v1045_v4, %v18064_v13  ;;  %v15815_v4 = vld [vmem:[#allocation8 + $0x680] ss:$16 sps:$4 sm:$0xff]  }
 0x196   : > { %3896 = vmatpush1.bf16.msra.mxu0 %v15800_v34  ;;  %v15814_v34 = vld [vmem:[#allocation8 + $0x484] ss:$16 sps:$4 sm:$0xff]   ;;  %v1084_v26 = vmax.f32 %v965_v24, 0.0  ;;  %3882 = vmatprep.mubr.bf16.mxu1 %v18222_v3  ;;  %v967_v48 = vadd.f32 %v966_v45, %v18067_v14  ;;  %v17521_v14 = vpack.c.bf16 %v1059_v46, %v1059_v46  ;;  %v17522_v46 = vpack.c.bf16 %v1074_v49, %v1074_v49  ;;  %v15824_v51 = vld [vmem:[#allocation8 + $0x440] ss:$16 sps:$4 sm:$0xff]  }
 0x197   : > { %3897 = vmatprep.subr.bf16.mxu0 %v15808_v53  ;;  %v968_v1 = vpop.f32.mrf.mxu0  ;;  %v1049_v11 = vpop.f32.mrf.mxu1  ;;  %v1048_v53 = vadd.f32 %v1047_v5, %v18071_v15  ;;  %3949 = vmatpush1.bf16.msra.mxu1 %v15803_v23  ;;  %v18253_v5 = vsel %vm1363_vm9, %v18117_v25, %v18139_v47  ;;  %v1086_v33 = vmax.f32 %v1046_v57, 0.0  ;;  %v15818_v25 = vld [vmem:[#allocation8 + $0x460] ss:$16 sps:$4 sm:$0xff]   ;;  %v17523_v47 = vpack.c.bf16 %v1082_v56, %v1082_v56  ;;  %v15823_v23 = vld [vmem:[#allocation8 + $0x664] ss:$16 sps:$4 sm:$0xff]  }
 0x198   : > { %v18245_v11 = vsel %vm1363_vm9, %v17520_v39, %v18208_v22  ;;  %3950 = vmatprep.subr.bf16.mxu1 %v15811_v29  ;;  %v1085_v15 = vmax.f32 %v967_v48, 0.0  ;;  %v18259_v37 = vsel %vm1363_vm9, %v17521_v14, %v18155_v59  ;;  %v18268_v48 = vsel %vm1363_vm9, %v18133_v41, %v18153_v58  ;;  %v15826_v59 = vld [vmem:[#allocation8 + $0x444] ss:$16 sps:$4 sm:$0xff]   ;;  %v15827_v29 = vld [vmem:[#allocation8 + $0x640] ss:$16 sps:$4 sm:$0xff]  }
 0x199   : > { %3830 = vmatmul.mubr.bf16.gmra.mxu0 %v18227_v12  ;;  %v969_v13 = vpop.f32.mrf.mxu0  ;;  %v1050_v27 = vpop.f32.mrf.mxu1  ;;  %v1087_v44 = vmax.f32 %v1048_v53, 0.0  ;;  %v18278_v49 = vsel %vm1363_vm9, %v18123_v32, %v18177_v54  ;;  %v18282_v56 = vsel %vm1363_vm9, %v18135_v42, %v17520_v39  ;;  %v18285_v41 = vsel %vm1363_vm9, %v17522_v46, %v17523_v47  ;;  %v15829_v24 = vld [vmem:[#allocation8 + $0x644] ss:$16 sps:$4 sm:$0xff]   ;;  %v15842_v1 = vld [vmem:[#allocation8 + $0x5e0] ss:$16 sps:$4 sm:$0xff]  }
 0x19a   : > { %3898 = vmatpush1.bf16.msra.mxu0 %v15806_v28  ;;  %3925 = vmatprep.mubr.bf16.mxu0 %v18253_v5  ;;  %v17527_v57 = vpack.c.bf16 %v1086_v33, %v1086_v33  ;;  %v15832_v45 = vld [vmem:[#allocation8 + $0x424] ss:$16 sps:$4 sm:$0xff]   ;;  %v15845_v14 = vld [vmem:[#allocation8 + $0x7e0] ss:$16 sps:$4 sm:$0xff]  }
 0x19b   : > { %3899 = vmatprep.subr.bf16.mxu0 %v15814_v34  ;;  %3883 = vmatmul.mubr.bf16.gmra.mxu1 %v18245_v11  ;;  %v17525_v58 = vpack.c.bf16 %v1087_v44, %v1087_v44  ;;  %v15833_v34 = vld [vmem:[#allocation8 + $0x620] ss:$16 sps:$4 sm:$0xff]   ;;  %v15841_v39 = vld [vmem:[#allocation8 + $0x604] ss:$16 sps:$4 sm:$0xff]  }
 0x19c   : > { %3951 = vmatpush1.bf16.msra.mxu1 %v15809_v21  ;;  %3978 = vmatprep.mubr.bf16.mxu1 %v18259_v37  ;;  %v18301_v28 = vsel %vm1363_vm9, %v18208_v22, %v17527_v57  ;;  %v15835_v21 = vld [vmem:[#allocation8 + $0x624] ss:$16 sps:$4 sm:$0xff]   ;;  %v15839_v22 = vld [vmem:[#allocation8 + $0x600] ss:$16 sps:$4 sm:$0xff]  }
 0x19d   : > { %3952 = vmatprep.subr.bf16.mxu1 %v15817_v35  ;;  %v17526_v35 = vpack.c.bf16 %v1084_v26, %v1084_v26  ;;  %v18293_v42 = vsel %vm1363_vm9, %v18204_v20, %v17525_v58  ;;  %v15838_v20 = vld [vmem:[#allocation8 + $0x404] ss:$16 sps:$4 sm:$0xff]   ;;  %v15848_v13 = vld [vmem:[#allocation8 + $0x5c0] ss:$16 sps:$4 sm:$0xff]  }
 0x19e   : > { %3900 = vmatpush1.bf16.msra.mxu0 %v15812_v8  ;;  %v17524_v8 = vpack.c.bf16 %v1085_v15, %v1085_v15  ;;  %v15844_v26 = vld [vmem:[#allocation8 + $0x5e4] ss:$16 sps:$4 sm:$0xff]   ;;  %v15851_v33 = vld [vmem:[#allocation8 + $0x7c0] ss:$16 sps:$4 sm:$0xff]  }
 0x19f   : > { %3901 = vmatprep.subr.bf16.mxu0 %v15820_v19  ;;  %v18297_v54 = vsel %vm1363_vm9, %v18206_v17, %v17526_v35  ;;  %v15836_v17 = vld [vmem:[#allocation8 + $0x400] ss:$16 sps:$4 sm:$0xff]   ;;  %v15847_v53 = vld [vmem:[#allocation8 + $0x7e4] ss:$16 sps:$4 sm:$0xff]  }
 0x1a0   : > { %3953 = vmatpush1.bf16.msra.mxu1 %v15815_v4  ;;  %v18289_v32 = vsel %vm1363_vm9, %v18202_v16, %v17524_v8  ;;  %v15830_v16 = vld [vmem:[#allocation8 + $0x420] ss:$16 sps:$4 sm:$0xff]   ;;  %v15850_v19 = vld [vmem:[#allocation8 + $0x5c4] ss:$16 sps:$4 sm:$0xff]  }
 0x1a1   : > { %3954 = vmatprep.subr.bf16.mxu1 %v15823_v23  ;;  %v15853_v27 = vld [vmem:[#allocation8 + $0x7c4] ss:$16 sps:$4 sm:$0xff]   ;;  %v15854_v44 = vld [vmem:[#allocation8 + $0x5a0] ss:$16 sps:$4 sm:$0xff]  }
 0x1a2   : > { %3902 = vmatpush1.bf16.msra.mxu0 %v15818_v25  ;;  %v15856_v15 = vld [vmem:[#allocation8 + $0x5a4] ss:$16 sps:$4 sm:$0xff]   ;;  %v15857_v25 = vld [vmem:[#allocation8 + $0x7a0] ss:$16 sps:$4 sm:$0xff]  }
 0x1a3   : > { %3903 = vmatprep.subr.bf16.mxu0 %v15826_v59  ;;  %v15859_v46 = vld [vmem:[#allocation8 + $0x7a4] ss:$16 sps:$4 sm:$0xff]   ;;  %v15860_v47 = vld [vmem:[#allocation8 + $0x580] ss:$16 sps:$4 sm:$0xff]  }
 0x1a4   : > { %3955 = vmatpush1.bf16.msra.mxu1 %v15821_v43  ;;  %v15862_v4 = vld [vmem:[#allocation8 + $0x584] ss:$16 sps:$4 sm:$0xff]   ;;  %v15863_v8 = vld [vmem:[#allocation8 + $0x780] ss:$16 sps:$4 sm:$0xff]  }
 0x1a5   : > { %3956 = vmatprep.subr.bf16.mxu1 %v15829_v24  ;;  %v15865_v23 = vld [vmem:[#allocation8 + $0x784] ss:$16 sps:$4 sm:$0xff]   ;;  %v15866_v58 = vld [vmem:[#allocation8 + $0x560] ss:$16 sps:$4 sm:$0xff]  }
 0x1a6   : > { %3904 = vmatpush1.bf16.msra.mxu0 %v15824_v51  ;;  %v15868_v59 = vld [vmem:[#allocation8 + $0x564] ss:$16 sps:$4 sm:$0xff]   ;;  %v15869_v43 = vld [vmem:[#allocation8 + $0x760] ss:$16 sps:$4 sm:$0xff]  }
 0x1a7   : > { %3905 = vmatprep.subr.bf16.mxu0 %v15832_v45  ;;  %v15871_v35 = vld [vmem:[#allocation8 + $0x764] ss:$16 sps:$4 sm:$0xff]   ;;  %v15872_v51 = vld [vmem:[#allocation8 + $0x540] ss:$16 sps:$4 sm:$0xff]  }
 0x1a8   : > { %3957 = vmatpush1.bf16.msra.mxu1 %v15827_v29  ;;  %v15874_v57 = vld [vmem:[#allocation8 + $0x544] ss:$16 sps:$4 sm:$0xff]   ;;  %v15875_v29 = vld [vmem:[#allocation8 + $0x740] ss:$16 sps:$4 sm:$0xff]  }
 0x1a9   : > { %3958 = vmatprep.subr.bf16.mxu1 %v15835_v21  ;;  %v15877_v24 = vld [vmem:[#allocation8 + $0x744] ss:$16 sps:$4 sm:$0xff]   ;;  %v15896_v63 = vld [vmem:[#allocation8 + $0x8c0] ss:$16 sps:$4 sm:$0xff]  }
 0x1aa   : > { %3906 = vmatpush1.bf16.msra.mxu0 %v15830_v16  ;;  %v15880_v45 = vld [vmem:[#allocation8 + $0x524] ss:$16 sps:$4 sm:$0xff]   ;;  %v15878_v16 = vld [vmem:[#allocation8 + $0x520] ss:$16 sps:$4 sm:$0xff]  }
 0x1ab   : > { %3907 = vmatprep.subr.bf16.mxu0 %v15838_v20  ;;  %v15883_v21 = vld [vmem:[#allocation8 + $0x724] ss:$16 sps:$4 sm:$0xff]  }
 0x1ac   : > { %3959 = vmatpush1.bf16.msra.mxu1 %v15833_v34  ;;  %v15886_v20 = vld [vmem:[#allocation8 + $0x504] ss:$16 sps:$4 sm:$0xff]   ;;  %v15881_v34 = vld [vmem:[#allocation8 + $0x720] ss:$16 sps:$4 sm:$0xff]  }
 0x1ad   : > { %3960 = vmatprep.subr.bf16.mxu1 %v15841_v39  ;;  %v15889_v39 = vld [vmem:[#allocation8 + $0x704] ss:$16 sps:$4 sm:$0xff]  }
 0x1ae   : > { %3908 = vmatpush1.bf16.msra.mxu0 %v15836_v17  ;;  %v15884_v17 = vld [vmem:[#allocation8 + $0x500] ss:$16 sps:$4 sm:$0xff]  }
 0x1af   : > { %3909 = vmatprep.subr.bf16.mxu0 %v15844_v26  ;;  %v15892_v26 = vld [vmem:[#allocation8 + $0x8e4] ss:$16 sps:$4 sm:$0xff]  }
 0x1b0   : > { %3961 = vmatpush1.bf16.msra.mxu1 %v15839_v22  ;;  %v15887_v22 = vld [vmem:[#allocation8 + $0x700] ss:$16 sps:$4 sm:$0xff]  }
 0x1b1   : > { %3962 = vmatprep.subr.bf16.mxu1 %v15847_v53  ;;  %v15895_v53 = vld [vmem:[#allocation8 + $0xae4] ss:$16 sps:$4 sm:$0xff]  }
 0x1b2   : > { %3910 = vmatpush2.bf16.msra.mxu0 %v15842_v1  ;;  %v15890_v1 = vld [vmem:[#allocation8 + $0x8e0] ss:$16 sps:$4 sm:$0xff]  }
 0x1b3   : > { %3911 = vmatprep.subr.bf16.mxu0 %v15850_v19  ;;  %v17528_v19 = vpack.c.bf16 %v1073_v60, %v1073_v60 }
 0x1b4   : > { %3963 = vmatpush2.bf16.msra.mxu1 %v15845_v14  ;;  %v17529_v14 = vpack.c.bf16 %v1081_v30, %v1081_v30 }
 0x1b5   : > { %3964 = vmatprep.subr.bf16.mxu1 %v15853_v27  ;;  %v15893_v27 = vld [vmem:[#allocation8 + $0xae0] ss:$16 sps:$4 sm:$0xff]  }
 0x1b6   : > { %3912 = vmatpush2.bf16.msra.mxu0 %v15848_v13  ;;  %v15898_v13 = vld [vmem:[#allocation8 + $0x8c4] ss:$16 sps:$4 sm:$0xff]   ;;  %v18317_v60 = vsel %vm1363_vm9, %v17528_v19, %v17529_v14 }
 0x1b7   : > { %3913 = vmatprep.subr.bf16.mxu0 %v15856_v15  ;;  %v21202_v15 = vmax.f32 %v18149_v52, 0.0  ;;  %v15937_v19 = vld [vmem:[#allocation8 + $0xa04] ss:$16 sps:$4 sm:$0xff]  }
 0x1b8   : > { %3965 = vmatpush2.bf16.msra.mxu1 %v15851_v33  ;;  %v15940_v14 = vld [vmem:[#allocation8 + $0x9e4] ss:$16 sps:$4 sm:$0xff]  }
 0x1b9   : > { %3966 = vmatprep.subr.bf16.mxu1 %v15859_v46  ;;  %v17530_v33 = vpack.c.bf16 %v21202_v15, %v21202_v15  ;;  %v15943_v15 = vld [vmem:[#allocation8 + $0xbe4] ss:$16 sps:$4 sm:$0xff]  }
 0x1ba   : > { %3914 = vmatpush2.bf16.msra.mxu0 %v15854_v44  ;;  %v21203_v44 = vmax.f32 %v18195_v0, 0.0  ;;  %v21204_v0 = vmax.f32 %v18128_v36, 0.0  ;;  %v15913_v36 = vld [vmem:[#allocation8 + $0xa84] ss:$16 sps:$4 sm:$0xff]  }
 0x1bb   : > { %3915 = vmatprep.subr.bf16.mxu0 %v15862_v4  ;;  %v21205_v4 = vmax.f32 %v18180_v55, 0.0  ;;  %v15908_v55 = vld [vmem:[#allocation8 + $0x880] ss:$16 sps:$4 sm:$0xff]  }
 0x1bc   : > { %3967 = vmatpush2.bf16.msra.mxu1 %v15857_v25  ;;  %v17531_v46 = vpack.c.bf16 %v21203_v44, %v21203_v44  ;;  %v17532_v30 = vpack.c.bf16 %v21204_v0, %v21204_v0  ;;  %v15941_v44 = vld [vmem:[#allocation8 + $0xbe0] ss:$16 sps:$4 sm:$0xff]  }
 0x1bd   : > { %3968 = vmatprep.subr.bf16.mxu1 %v15865_v23  ;;  %v17533_v25 = vpack.c.bf16 %v21205_v4, %v21205_v4  ;;  %v15899_v23 = vld [vmem:[#allocation8 + $0xac0] ss:$16 sps:$4 sm:$0xff]   ;;  %v15955_v4 = vld [vmem:[#allocation8 + $0xba4] ss:$16 sps:$4 sm:$0xff]  }
 0x1be   : > { %3916 = vmatpush2.bf16.msra.mxu0 %v15860_v47  ;;  %v18322_v52 = vsel %vm1363_vm9, %v17530_v33, %v17531_v46  ;;  %v15904_v47 = vld [vmem:[#allocation8 + $0x8a4] ss:$16 sps:$4 sm:$0xff]   ;;  %v15944_v46 = vld [vmem:[#allocation8 + $0x9c0] ss:$16 sps:$4 sm:$0xff]  }
 0x1bf   : > { %3917 = vmatprep.subr.bf16.mxu0 %v15868_v59  ;;  %v15907_v59 = vld [vmem:[#allocation8 + $0xaa4] ss:$16 sps:$4 sm:$0xff]   ;;  %v15947_v0 = vld [vmem:[#allocation8 + $0xbc0] ss:$16 sps:$4 sm:$0xff]  }
 0x1c0   : > { %3969 = vmatpush2.bf16.msra.mxu1 %v15863_v8  ;;  %v15902_v8 = vld [vmem:[#allocation8 + $0x8a0] ss:$16 sps:$4 sm:$0xff]   ;;  %v15946_v33 = vld [vmem:[#allocation8 + $0x9c4] ss:$16 sps:$4 sm:$0xff]  }
 0x1c1   : > { %3970 = vmatprep.subr.bf16.mxu1 %v15871_v35  ;;  %v15910_v35 = vld [vmem:[#allocation8 + $0x884] ss:$16 sps:$4 sm:$0xff]  }
 0x1c2   : > { %3918 = vmatpush2.bf16.msra.mxu0 %v15866_v58  ;;  %v15905_v58 = vld [vmem:[#allocation8 + $0xaa0] ss:$16 sps:$4 sm:$0xff]  }
 0x1c3   : > { %3919 = vmatprep.subr.bf16.mxu0 %v15874_v57  ;;  %v18332_v57 = vsel %vm1363_vm9, %v17532_v30, %v17533_v25  ;;  %v15950_v30 = vld [vmem:[#allocation8 + $0x9a0] ss:$16 sps:$4 sm:$0xff]   ;;  %v15958_v25 = vld [vmem:[#allocation8 + $0x984] ss:$16 sps:$4 sm:$0xff]  }
 0x1c4   : > { %3971 = vmatpush2.bf16.msra.mxu1 %v15869_v43  ;;  %v15916_v43 = vld [vmem:[#allocation8 + $0x864] ss:$16 sps:$4 sm:$0xff]  }
 0x1c5   : > { %3972 = vmatprep.subr.bf16.mxu1 %v15877_v24  ;;  %v15914_v24 = vld [vmem:[#allocation8 + $0x860] ss:$16 sps:$4 sm:$0xff]  }
 0x1c6   : > { %3920 = vmatpush2.bf16.msra.mxu0 %v15872_v51  ;;  %v15911_v51 = vld [vmem:[#allocation8 + $0xa80] ss:$16 sps:$4 sm:$0xff]  }
 0x1c7   : > { %3921 = vmatprep.subr.bf16.mxu0 %v15880_v45  ;;  %v15919_v45 = vld [vmem:[#allocation8 + $0xa64] ss:$16 sps:$4 sm:$0xff]  }
 0x1c8   : > { %3973 = vmatpush2.bf16.msra.mxu1 %v15875_v29  ;;  %v15922_v29 = vld [vmem:[#allocation8 + $0x844] ss:$16 sps:$4 sm:$0xff]  }
 0x1c9   : > { %3974 = vmatprep.subr.bf16.mxu1 %v15883_v21  ;;  %v15920_v21 = vld [vmem:[#allocation8 + $0x840] ss:$16 sps:$4 sm:$0xff]  }
 0x1ca   : > { %3922 = vmatpush2.bf16.msra.mxu0 %v15878_v16  ;;  %v15917_v16 = vld [vmem:[#allocation8 + $0xa60] ss:$16 sps:$4 sm:$0xff]  }
 0x1cb   : > { %3923 = vmatprep.subr.bf16.mxu0 %v15886_v20  ;;  %v15925_v20 = vld [vmem:[#allocation8 + $0xa44] ss:$16 sps:$4 sm:$0xff]  }
 0x1cc   : > { %3975 = vmatpush2.bf16.msra.mxu1 %v15881_v34  ;;  %v15928_v34 = vld [vmem:[#allocation8 + $0x824] ss:$16 sps:$4 sm:$0xff]  }
 0x1cd   : > { %3976 = vmatprep.subr.bf16.mxu1 %v15889_v39  ;;  %v15926_v39 = vld [vmem:[#allocation8 + $0x820] ss:$16 sps:$4 sm:$0xff]  }
 0x1ce   : > { %3924 = vmatpush2.bf16.msra.mxu0 %v15884_v17  ;;  %v15923_v17 = vld [vmem:[#allocation8 + $0xa40] ss:$16 sps:$4 sm:$0xff]  }
 0x1cf   : > { %3999 = vmatprep.subr.bf16.mxu0 %v15892_v26  ;;  %v15931_v26 = vld [vmem:[#allocation8 + $0xa24] ss:$16 sps:$4 sm:$0xff]  }
 0x1d0   : > { %3977 = vmatpush2.bf16.msra.mxu1 %v15887_v22  ;;  %v15934_v22 = vld [vmem:[#allocation8 + $0x804] ss:$16 sps:$4 sm:$0xff]  }
 0x1d1   : > { %3926 = vmatmul.mubr.bf16.vlgmr.msra.gmra.mxu0 %v18199_v9  ;;  %4052 = vmatprep.subr.bf16.mxu1 %v15895_v53  ;;  %v15932_v53 = vld [vmem:[#allocation8 + $0x800] ss:$16 sps:$4 sm:$0xff]  }
 0x1d2   : > { %3935 = vmatprep.mubr.bf16.mxu0 %v18317_v60  ;;  %4000 = vmatpush1.bf16.msra.mxu0 %v15890_v1  ;;  %v15929_v1 = vld [vmem:[#allocation8 + $0xa20] ss:$16 sps:$4 sm:$0xff]  }
 0x1d3   : > { %3979 = vmatmul.mubr.bf16.vlgmr.msra.gmra.mxu1 %v18240_v61  ;;  %4001 = vmatprep.subr.bf16.mxu0 %v15898_v13  ;;  %v15935_v13 = vld [vmem:[#allocation8 + $0xa00] ss:$16 sps:$4 sm:$0xff]  }
 0x1d4   : > { %3988 = vmatprep.mubr.bf16.mxu1 %v18322_v52  ;;  %4053 = vmatpush1.bf16.msra.mxu1 %v15893_v27  ;;  %v15938_v27 = vld [vmem:[#allocation8 + $0x9e0] ss:$16 sps:$4 sm:$0xff]  }
 0x1d5   : > { %4054 = vmatprep.subr.bf16.mxu1 %v15901_v50  ;;  %v15949_v50 = vld [vmem:[#allocation8 + $0xbc4] ss:$16 sps:$4 sm:$0xff]  }
 0x1d6   : > { %4002 = vmatpush1.bf16.msra.mxu0 %v15896_v63  ;;  %v15952_v63 = vld [vmem:[#allocation8 + $0x9a4] ss:$16 sps:$4 sm:$0xff]  }
 0x1d7   : > { %4003 = vmatprep.subr.bf16.mxu0 %v15904_v47  ;;  %v15953_v47 = vld [vmem:[#allocation8 + $0xba0] ss:$16 sps:$4 sm:$0xff]  }
 0x1d8   : > { %4055 = vmatpush1.bf16.msra.mxu1 %v15899_v23  ;;  %v15956_v23 = vld [vmem:[#allocation8 + $0x980] ss:$16 sps:$4 sm:$0xff]  }
 0x1d9   : > { %3936 = vmatmul.mubr.bf16.gmra.mxu0 %v18332_v57  ;;  %4056 = vmatprep.subr.bf16.mxu1 %v15907_v59  ;;  %v15961_v59 = vld [vmem:[#allocation8 + $0xb84] ss:$16 sps:$4 sm:$0xff]  }
 0x1da   : > { %4031 = vmatprep.mubr.bf16.mxu0 %v18268_v48  ;;  %4004 = vmatpush1.bf16.msra.mxu0 %v15902_v8  ;;  %v15964_v8 = vld [vmem:[#allocation8 + $0x964] ss:$16 sps:$4 sm:$0xff]  }
 0x1db   : > { %3989 = vmatmul.mubr.bf16.gmra.mxu1 %v18285_v41  ;;  %4005 = vmatprep.subr.bf16.mxu0 %v15910_v35  ;;  %v15962_v35 = vld [vmem:[#allocation8 + $0x960] ss:$16 sps:$4 sm:$0xff]  }
 0x1dc   : > { %4057 = vmatpush1.bf16.msra.mxu1 %v15905_v58  ;;  %4084 = vmatprep.mubr.bf16.mxu1 %v18273_v38  ;;  %v15959_v58 = vld [vmem:[#allocation8 + $0xb80] ss:$16 sps:$4 sm:$0xff]  }
 0x1dd   : > { %4058 = vmatprep.subr.bf16.mxu1 %v15913_v36  ;;  %v15967_v36 = vld [vmem:[#allocation8 + $0xb64] ss:$16 sps:$4 sm:$0xff]  }
 0x1de   : > { %4006 = vmatpush1.bf16.msra.mxu0 %v15908_v55  ;;  %v15970_v55 = vld [vmem:[#allocation8 + $0x944] ss:$16 sps:$4 sm:$0xff]  }
 0x1df   : > { %4007 = vmatprep.subr.bf16.mxu0 %v15916_v43  ;;  %v15965_v43 = vld [vmem:[#allocation8 + $0xb60] ss:$16 sps:$4 sm:$0xff]  }
 0x1e0   : > { %4059 = vmatpush1.bf16.msra.mxu1 %v15911_v51  ;;  %v15968_v51 = vld [vmem:[#allocation8 + $0x940] ss:$16 sps:$4 sm:$0xff]  }
 0x1e1   : > { %4060 = vmatprep.subr.bf16.mxu1 %v15919_v45  ;;  %v15976_v45 = vld [vmem:[#allocation8 + $0x924] ss:$16 sps:$4 sm:$0xff]  }
 0x1e2   : > { %4008 = vmatpush1.bf16.msra.mxu0 %v15914_v24  ;;  %v15973_v24 = vld [vmem:[#allocation8 + $0xb44] ss:$16 sps:$4 sm:$0xff]  }
 0x1e3   : > { %4009 = vmatprep.subr.bf16.mxu0 %v15922_v29  ;;  %v15971_v29 = vld [vmem:[#allocation8 + $0xb40] ss:$16 sps:$4 sm:$0xff]  }
 0x1e4   : > { %4061 = vmatpush1.bf16.msra.mxu1 %v15917_v16  ;;  %v15974_v16 = vld [vmem:[#allocation8 + $0x920] ss:$16 sps:$4 sm:$0xff]  }
 0x1e5   : > { %4062 = vmatprep.subr.bf16.mxu1 %v15925_v20  ;;  %v15982_v20 = vld [vmem:[#allocation8 + $0x904] ss:$16 sps:$4 sm:$0xff]  }
 0x1e6   : > { %4010 = vmatpush1.bf16.msra.mxu0 %v15920_v21  ;;  %v15979_v21 = vld [vmem:[#allocation8 + $0xb24] ss:$16 sps:$4 sm:$0xff]  }
 0x1e7   : > { %4011 = vmatprep.subr.bf16.mxu0 %v15928_v34  ;;  %v15977_v34 = vld [vmem:[#allocation8 + $0xb20] ss:$16 sps:$4 sm:$0xff]  }
 0x1e8   : > { %4063 = vmatpush1.bf16.msra.mxu1 %v15923_v17  ;;  %v15980_v17 = vld [vmem:[#allocation8 + $0x900] ss:$16 sps:$4 sm:$0xff]  }
 0x1e9   : > { %4064 = vmatprep.subr.bf16.mxu1 %v15931_v26  ;;  %v15988_v26 = vld [vmem:[#allocation8 + $0xec] ss:$16 sps:$4 sm:$0xff]  }
 0x1ea   : > { %4012 = vmatpush1.bf16.msra.mxu0 %v15926_v39  ;;  %v15985_v39 = vld [vmem:[#allocation8 + $0xb04] ss:$16 sps:$4 sm:$0xff]  }
 0x1eb   : > { %4013 = vmatprep.subr.bf16.mxu0 %v15934_v22  ;;  %v15983_v22 = vld [vmem:[#allocation8 + $0xb00] ss:$16 sps:$4 sm:$0xff]  }
 0x1ec   : > { %4065 = vmatpush1.bf16.msra.mxu1 %v15929_v1  ;;  %v15986_v1 = vld [vmem:[#allocation8 + $0xe8] ss:$16 sps:$4 sm:$0xff]  }
 0x1ed   : > { %4066 = vmatprep.subr.bf16.mxu1 %v15937_v19  ;;  %v15994_v19 = vld [vmem:[#allocation8 + $0xcc] ss:$16 sps:$4 sm:$0xff]  }
 0x1ee   : > { %4014 = vmatpush1.bf16.msra.mxu0 %v15932_v53  ;;  %v15991_v53 = vld [vmem:[#allocation8 + $0x2ec] ss:$16 sps:$4 sm:$0xff]  }
 0x1ef   : > { %4015 = vmatprep.subr.bf16.mxu0 %v15940_v14  ;;  %v15989_v14 = vld [vmem:[#allocation8 + $0x2e8] ss:$16 sps:$4 sm:$0xff]  }
 0x1f0   : > { %4067 = vmatpush1.bf16.msra.mxu1 %v15935_v13  ;;  %v15997_v13 = vld [vmem:[#allocation8 + $0x2cc] ss:$16 sps:$4 sm:$0xff]  }
 0x1f1   : > { %4068 = vmatprep.subr.bf16.mxu1 %v15943_v15  ;;  %v16000_v15 = vld [vmem:[#allocation8 + $0xac] ss:$16 sps:$4 sm:$0xff]  }
 0x1f2   : > { %4016 = vmatpush2.bf16.msra.mxu0 %v15938_v27  ;;  %v15992_v27 = vld [vmem:[#allocation8 + $0xc8] ss:$16 sps:$4 sm:$0xff]  }
 0x1f3   : > { %4017 = vmatprep.subr.bf16.mxu0 %v15946_v33  ;;  %v15995_v33 = vld [vmem:[#allocation8 + $0x2c8] ss:$16 sps:$4 sm:$0xff]  }
 0x1f4   : > { %4069 = vmatpush2.bf16.msra.mxu1 %v15941_v44  ;;  %v15998_v44 = vld [vmem:[#allocation8 + $0xa8] ss:$16 sps:$4 sm:$0xff]  }
 0x1f5   : > { %4070 = vmatprep.subr.bf16.mxu1 %v15949_v50  ;;  %v16006_v50 = vld [vmem:[#allocation8 + $0x8c] ss:$16 sps:$4 sm:$0xff]  }
 0x1f6   : > { %4018 = vmatpush2.bf16.msra.mxu0 %v15944_v46  ;;  %v16003_v46 = vld [vmem:[#allocation8 + $0x2ac] ss:$16 sps:$4 sm:$0xff]  }
 0x1f7   : > { %4019 = vmatprep.subr.bf16.mxu0 %v15952_v63  ;;  %v16001_v63 = vld [vmem:[#allocation8 + $0x2a8] ss:$16 sps:$4 sm:$0xff]  }
 0x1f8   : > { %4071 = vmatpush2.bf16.msra.mxu1 %v15947_v0  ;;  %v16004_v0 = vld [vmem:[#allocation8 + $0x88] ss:$16 sps:$4 sm:$0xff]  }
 0x1f9   : > { %4072 = vmatprep.subr.bf16.mxu1 %v15955_v4  ;;  %v16012_v4 = vld [vmem:[#allocation8 + $0x6c] ss:$16 sps:$4 sm:$0xff]  }
 0x1fa   : > { %4020 = vmatpush2.bf16.msra.mxu0 %v15950_v30  ;;  %v16009_v30 = vld [vmem:[#allocation8 + $0x28c] ss:$16 sps:$4 sm:$0xff]  }
 0x1fb   : > { %4021 = vmatprep.subr.bf16.mxu0 %v15958_v25  ;;  %v16007_v25 = vld [vmem:[#allocation8 + $0x288] ss:$16 sps:$4 sm:$0xff]  }
 0x1fc   : > { %4073 = vmatpush2.bf16.msra.mxu1 %v15953_v47  ;;  %v16010_v47 = vld [vmem:[#allocation8 + $0x68] ss:$16 sps:$4 sm:$0xff]  }
 0x1fd   : > { %4074 = vmatprep.subr.bf16.mxu1 %v15961_v59  ;;  %v16018_v59 = vld [vmem:[#allocation8 + $0x4c] ss:$16 sps:$4 sm:$0xff]  }
 0x1fe   : > { %4022 = vmatpush2.bf16.msra.mxu0 %v15956_v23  ;;  %v16015_v23 = vld [vmem:[#allocation8 + $0x26c] ss:$16 sps:$4 sm:$0xff]  }
 0x1ff   : > { %4023 = vmatprep.subr.bf16.mxu0 %v15964_v8  ;;  %v16013_v8 = vld [vmem:[#allocation8 + $0x268] ss:$16 sps:$4 sm:$0xff]  }
 0x200   : > { %4075 = vmatpush2.bf16.msra.mxu1 %v15959_v58  ;;  %v16021_v58 = vld [vmem:[#allocation8 + $0x24c] ss:$16 sps:$4 sm:$0xff]  }
 0x201   : > { %4076 = vmatprep.subr.bf16.mxu1 %v15967_v36  ;;  %v16019_v36 = vld [vmem:[#allocation8 + $0x248] ss:$16 sps:$4 sm:$0xff]  }
 0x202   : > { %4024 = vmatpush2.bf16.msra.mxu0 %v15962_v35  ;;  %v16016_v35 = vld [vmem:[#allocation8 + $0x48] ss:$16 sps:$4 sm:$0xff]  }
 0x203   : > { %4025 = vmatprep.subr.bf16.mxu0 %v15970_v55  ;;  %v16022_v55 = vld [vmem:[#allocation8 + $0x28] ss:$16 sps:$4 sm:$0xff]  }
 0x204   : > { %4077 = vmatpush2.bf16.msra.mxu1 %v15965_v43  ;;  %v16027_v43 = vld [vmem:[#allocation8 + $0x22c] ss:$16 sps:$4 sm:$0xff]  }
 0x205   : > { %4078 = vmatprep.subr.bf16.mxu1 %v15973_v24  ;;  %v16028_v24 = vld [vmem:[#allocation8 + $0x8] ss:$16 sps:$4 sm:$0xff]  }
 0x206   : > { %4026 = vmatpush2.bf16.msra.mxu0 %v15968_v51  ;;  %v16025_v51 = vld [vmem:[#allocation8 + $0x228] ss:$16 sps:$4 sm:$0xff]  }
 0x207   : > { %4027 = vmatprep.subr.bf16.mxu0 %v15976_v45  ;;  %v16033_v45 = vld [vmem:[#allocation8 + $0x20c] ss:$16 sps:$4 sm:$0xff]  }
 0x208   : > { %4079 = vmatpush2.bf16.msra.mxu1 %v15971_v29  ;;  %v16036_v29 = vld [vmem:[#allocation8 + $0x1ec] ss:$16 sps:$4 sm:$0xff]  }
 0x209   : > { %4080 = vmatprep.subr.bf16.mxu1 %v15979_v21  ;;  %v16034_v21 = vld [vmem:[#allocation8 + $0x1e8] ss:$16 sps:$4 sm:$0xff]  }
 0x20a   : > { %4028 = vmatpush2.bf16.msra.mxu0 %v15974_v16  ;;  %v16031_v16 = vld [vmem:[#allocation8 + $0x208] ss:$16 sps:$4 sm:$0xff]  }
 0x20b   : > { %4029 = vmatprep.subr.bf16.mxu0 %v15982_v20  ;;  %v16039_v20 = vld [vmem:[#allocation8 + $0x3ec] ss:$16 sps:$4 sm:$0xff]  }
 0x20c   : > { %4081 = vmatpush2.bf16.msra.mxu1 %v15977_v34  ;;  %v16042_v34 = vld [vmem:[#allocation8 + $0x1cc] ss:$16 sps:$4 sm:$0xff]  }
 0x20d   : > { %4082 = vmatprep.subr.bf16.mxu1 %v15985_v39  ;;  %v16040_v39 = vld [vmem:[#allocation8 + $0x1c8] ss:$16 sps:$4 sm:$0xff]  }
 0x20e   : > { %4030 = vmatpush2.bf16.msra.mxu0 %v15980_v17  ;;  %v16037_v17 = vld [vmem:[#allocation8 + $0x3e8] ss:$16 sps:$4 sm:$0xff]  }
 0x20f   : > { %4105 = vmatprep.subr.bf16.mxu0 %v15988_v26  ;;  %v16045_v26 = vld [vmem:[#allocation8 + $0x3cc] ss:$16 sps:$4 sm:$0xff]  }
 0x210   : > { %4083 = vmatpush2.bf16.msra.mxu1 %v15983_v22  ;;  %v16048_v22 = vld [vmem:[#allocation8 + $0x1ac] ss:$16 sps:$4 sm:$0xff]  }
 0x211   : > { %4032 = vmatmul.mubr.bf16.vlgmr.msra.gmra.mxu0 %v18278_v49  ;;  %4158 = vmatprep.subr.bf16.mxu1 %v15991_v53  ;;  %v16046_v53 = vld [vmem:[#allocation8 + $0x1a8] ss:$16 sps:$4 sm:$0xff]  }
 0x212   : > { %4041 = vmatprep.mubr.bf16.mxu0 %v18289_v32  ;;  %4106 = vmatpush1.bf16.msra.mxu0 %v15986_v1  ;;  %v16043_v1 = vld [vmem:[#allocation8 + $0x3c8] ss:$16 sps:$4 sm:$0xff]  }
 0x213   : > { %4085 = vmatmul.mubr.bf16.vlgmr.msra.gmra.mxu1 %v18282_v56  ;;  %4107 = vmatprep.subr.bf16.mxu0 %v15994_v19  ;;  %v16051_v19 = vld [vmem:[#allocation8 + $0x3ac] ss:$16 sps:$4 sm:$0xff]  }
 0x214   : > { %4094 = vmatprep.mubr.bf16.mxu1 %v18293_v42  ;;  %4159 = vmatpush1.bf16.msra.mxu1 %v15989_v14  ;;  %v16054_v14 = vld [vmem:[#allocation8 + $0x18c] ss:$16 sps:$4 sm:$0xff]  }
 0x215   : > { %4160 = vmatprep.subr.bf16.mxu1 %v15997_v13  ;;  %v16049_v13 = vld [vmem:[#allocation8 + $0x3a8] ss:$16 sps:$4 sm:$0xff]  }
 0x216   : > { %4108 = vmatpush1.bf16.msra.mxu0 %v15992_v27  ;;  %v16052_v27 = vld [vmem:[#allocation8 + $0x188] ss:$16 sps:$4 sm:$0xff]  }
 0x217   : > { %4109 = vmatprep.subr.bf16.mxu0 %v16000_v15  ;;  %v16057_v15 = vld [vmem:[#allocation8 + $0x38c] ss:$16 sps:$4 sm:$0xff]  }
 0x218   : > { %4161 = vmatpush1.bf16.msra.mxu1 %v15995_v33  ;;  %v16060_v33 = vld [vmem:[#allocation8 + $0x16c] ss:$16 sps:$4 sm:$0xff]  }
 0x219   : > { %4042 = vmatmul.mubr.bf16.gmra.mxu0 %v18297_v54  ;;  %4162 = vmatprep.subr.bf16.mxu1 %v16003_v46  ;;  %v16058_v46 = vld [vmem:[#allocation8 + $0x168] ss:$16 sps:$4 sm:$0xff]  }
 0x21a   : > { %4110 = vmatpush1.bf16.msra.mxu0 %v15998_v44  ;;  %4137 = vmatprep.mubr.bf16.mxu0 %v18163_v18  ;;  %v16024_v18 = vld [vmem:[#allocation8 + $0x2c] ss:$16 sps:$4 sm:$0xff]   ;;  %v16055_v44 = vld [vmem:[#allocation8 + $0x388] ss:$16 sps:$4 sm:$0xff]  }
 0x21b   : > { %4095 = vmatmul.mubr.bf16.gmra.mxu1 %v18301_v28  ;;  %4111 = vmatprep.subr.bf16.mxu0 %v16006_v50  ;;  %v16063_v50 = vld [vmem:[#allocation8 + $0x36c] ss:$16 sps:$4 sm:$0xff]  }
 0x21c   : > { %4163 = vmatpush1.bf16.msra.mxu1 %v16001_v63  ;;  %4190 = vmatprep.mubr.bf16.mxu1 %v18184_v62  ;;  %v16030_v62 = vld [vmem:[#allocation8 + $0xc] ss:$16 sps:$4 sm:$0xff]  }
 0x21d   : > { %4164 = vmatprep.subr.bf16.mxu1 %v16009_v30  ;;  %v16066_v63 = vld [vmem:[#allocation8 + $0x14c] ss:$16 sps:$4 sm:$0xff]   ;;  %v16064_v30 = vld [vmem:[#allocation8 + $0x148] ss:$16 sps:$4 sm:$0xff]  }
 0x21e   : > { %4112 = vmatpush1.bf16.msra.mxu0 %v16004_v0  ;;  %v16061_v0 = vld [vmem:[#allocation8 + $0x368] ss:$16 sps:$4 sm:$0xff]  }
 0x21f   : > { %4113 = vmatprep.subr.bf16.mxu0 %v16012_v4  ;;  %v16069_v4 = vld [vmem:[#allocation8 + $0x34c] ss:$16 sps:$4 sm:$0xff]  }
 0x220   : > { %4165 = vmatpush1.bf16.msra.mxu1 %v16007_v25  ;;  %v16072_v25 = vld [vmem:[#allocation8 + $0x12c] ss:$16 sps:$4 sm:$0xff]  }
 0x221   : > { %4166 = vmatprep.subr.bf16.mxu1 %v16015_v23  ;;  %v16070_v23 = vld [vmem:[#allocation8 + $0x128] ss:$16 sps:$4 sm:$0xff]  }
 0x222   : > { %4114 = vmatpush1.bf16.msra.mxu0 %v16010_v47  ;;  %v16067_v47 = vld [vmem:[#allocation8 + $0x348] ss:$16 sps:$4 sm:$0xff]  }
 0x223   : > { %4115 = vmatprep.subr.bf16.mxu0 %v16018_v59  ;;  %v16075_v59 = vld [vmem:[#allocation8 + $0x32c] ss:$16 sps:$4 sm:$0xff]  }
 0x224   : > { %4167 = vmatpush1.bf16.msra.mxu1 %v16013_v8  ;;  %v16078_v8 = vld [vmem:[#allocation8 + $0x10c] ss:$16 sps:$4 sm:$0xff]  }
 0x225   : > { %4168 = vmatprep.subr.bf16.mxu1 %v16021_v58  ;;  %v16073_v58 = vld [vmem:[#allocation8 + $0x328] ss:$16 sps:$4 sm:$0xff]  }
 0x226   : > { %4116 = vmatpush1.bf16.msra.mxu0 %v16016_v35  ;;  %v16076_v35 = vld [vmem:[#allocation8 + $0x108] ss:$16 sps:$4 sm:$0xff]  }
 0x227   : > { %4117 = vmatprep.subr.bf16.mxu0 %v16024_v18  ;;  %v16081_v18 = vld [vmem:[#allocation8 + $0x30c] ss:$16 sps:$4 sm:$0xff]  }
 0x228   : > { %4169 = vmatpush1.bf16.msra.mxu1 %v16019_v36  ;;  %v16084_v36 = vld [vmem:[#allocation8 + $0x4ec] ss:$16 sps:$4 sm:$0xff]  }
 0x229   : > { %4170 = vmatprep.subr.bf16.mxu1 %v16027_v43  ;;  %v16079_v43 = vld [vmem:[#allocation8 + $0x308] ss:$16 sps:$4 sm:$0xff]  }
 0x22a   : > { %4118 = vmatpush1.bf16.msra.mxu0 %v16022_v55  ;;  %v1845_v55 = vld [vmem:[#allocation6 + $0x1] ss:$2 sm:$0xf] }
 0x22b   : > { %4119 = vmatprep.subr.bf16.mxu0 %v16030_v62  ;;  %v16082_v62 = vld [vmem:[#allocation8 + $0x4e8] ss:$16 sps:$4 sm:$0xff]  }
 0x22c   : > { %4171 = vmatpush1.bf16.msra.mxu1 %v16025_v51  ;;  %v16087_v51 = vld [vmem:[#allocation8 + $0x6ec] ss:$16 sps:$4 sm:$0xff]  }
 0x22d   : > { %4172 = vmatprep.subr.bf16.mxu1 %v16033_v45  ;;  %v16090_v45 = vld [vmem:[#allocation8 + $0x4cc] ss:$16 sps:$4 sm:$0xff]  }
 0x22e   : > { %4120 = vmatpush1.bf16.msra.mxu0 %v16028_v24  ;;  %v1850_v24 = vrot.slane %v1845_v55, %v18052_v7 }
 0x22f   : > { %4121 = vmatprep.subr.bf16.mxu0 %v16036_v29  ;;  %v16085_v29 = vld [vmem:[#allocation8 + $0x6e8] ss:$16 sps:$4 sm:$0xff]  }
 0x230   : > { %4173 = vmatpush1.bf16.msra.mxu1 %v16031_v16  ;;  %v16093_v16 = vld [vmem:[#allocation8 + $0x6cc] ss:$16 sps:$4 sm:$0xff]  }
 0x231   : > { %4174 = vmatprep.subr.bf16.mxu1 %v16039_v20  ;;  %v16088_v20 = vld [vmem:[#allocation8 + $0x4c8] ss:$16 sps:$4 sm:$0xff]  }
 0x232   : > { %4122 = vmatpush2.bf16.msra.mxu0 %v16034_v21 }
 0x233   : > { %4123 = vmatprep.subr.bf16.mxu0 %v16042_v34 }
 0x234   : > { %4175 = vmatpush2.bf16.msra.mxu1 %v16037_v17  ;;  %v16096_v17 = vld [vmem:[#allocation8 + $0x4ac] ss:$16 sps:$4 sm:$0xff]  }
 0x235   : > { %4176 = vmatprep.subr.bf16.mxu1 %v16045_v26  ;;  %v16091_v26 = vld [vmem:[#allocation8 + $0x6c8] ss:$16 sps:$4 sm:$0xff]  }
 0x236   : > { %4124 = vmatpush2.bf16.msra.mxu0 %v16040_v39 }
 0x237   : > { %4125 = vmatprep.subr.bf16.mxu0 %v16048_v22 }
 0x238   : > { %4177 = vmatpush2.bf16.msra.mxu1 %v16043_v1  ;;  %v16099_v1 = vld [vmem:[#allocation8 + $0x6ac] ss:$16 sps:$4 sm:$0xff]  }
 0x239   : > { %4178 = vmatprep.subr.bf16.mxu1 %v16051_v19  ;;  %v16094_v19 = vld [vmem:[#allocation8 + $0x4a8] ss:$16 sps:$4 sm:$0xff]  }
 0x23a   : > { %4126 = vmatpush2.bf16.msra.mxu0 %v16046_v53 }
 0x23b   : > { %4127 = vmatprep.subr.bf16.mxu0 %v16054_v14 }
 0x23c   : > { %4179 = vmatpush2.bf16.msra.mxu1 %v16049_v13  ;;  %v16102_v13 = vld [vmem:[#allocation8 + $0x48c] ss:$16 sps:$4 sm:$0xff]  }
 0x23d   : > { %4180 = vmatprep.subr.bf16.mxu1 %v16057_v15  ;;  %v16097_v15 = vld [vmem:[#allocation8 + $0x6a8] ss:$16 sps:$4 sm:$0xff]  }
 0x23e   : > { %4128 = vmatpush2.bf16.msra.mxu0 %v16052_v27 }
 0x23f   : > { %4129 = vmatprep.subr.bf16.mxu0 %v16060_v33 }
 0x240   : > { %4181 = vmatpush2.bf16.msra.mxu1 %v16055_v44  ;;  %v16100_v44 = vld [vmem:[#allocation8 + $0x488] ss:$16 sps:$4 sm:$0xff]  }
 0x241   : > { %4182 = vmatprep.subr.bf16.mxu1 %v16063_v50  ;;  %v18362_v50 = vrot.slane %v1845_v55, %v18056_v10 }
 0x242   : > { %4130 = vmatpush2.bf16.msra.mxu0 %v16058_v46  ;;  %v16105_v46 = vld [vmem:[#allocation8 + $0x68c] ss:$16 sps:$4 sm:$0xff]  }
 0x243   : > { %4131 = vmatprep.subr.bf16.mxu0 %v16066_v63 }
 0x244   : > { %4183 = vmatpush2.bf16.msra.mxu1 %v16061_v0  ;;  %v16108_v0 = vld [vmem:[#allocation8 + $0x46c] ss:$16 sps:$4 sm:$0xff]  }
 0x245   : > { %4184 = vmatprep.subr.bf16.mxu1 %v16069_v4  ;;  %v16103_v4 = vld [vmem:[#allocation8 + $0x688] ss:$16 sps:$4 sm:$0xff]  }
 0x246   : > { %4132 = vmatpush2.bf16.msra.mxu0 %v16064_v30 }
 0x247   : > { %4133 = vmatprep.subr.bf16.mxu0 %v16072_v25 }
 0x248   : > { %4185 = vmatpush2.bf16.msra.mxu1 %v16067_v47 }
 0x249   : > { %4186 = vmatprep.subr.bf16.mxu1 %v16075_v59  ;;  %v16106_v59 = vld [vmem:[#allocation8 + $0x468] ss:$16 sps:$4 sm:$0xff]  }
 0x24a   : > { %4134 = vmatpush2.bf16.msra.mxu0 %v16070_v23 }
 0x24b   : > { %4135 = vmatprep.subr.bf16.mxu0 %v16078_v8  ;;  %v16111_v8 = vld [vmem:[#allocation8 + $0x66c] ss:$16 sps:$4 sm:$0xff]  }
 0x24c   : > { %4187 = vmatpush2.bf16.msra.mxu1 %v16073_v58 }
 0x24d   : > { %4188 = vmatprep.subr.bf16.mxu1 %v16081_v18 }
 0x24e   : > { %4136 = vmatpush2.bf16.msra.mxu0 %v16076_v35  ;;  %v16114_v35 = vld [vmem:[#allocation8 + $0x44c] ss:$16 sps:$4 sm:$0xff]  }
 0x24f   : > { %4211 = vmatprep.subr.bf16.mxu0 %v16084_v36  ;;  %v16109_v36 = vld [vmem:[#allocation8 + $0x668] ss:$16 sps:$4 sm:$0xff]  }
 0x250   : > { %4189 = vmatpush2.bf16.msra.mxu1 %v16079_v43  ;;  %v16112_v43 = vld [vmem:[#allocation8 + $0x448] ss:$16 sps:$4 sm:$0xff]  }
 0x251   : > { %v3821_v21 = vpop.f32.mrf.mxu0  ;;  %4138 = vmatmul.mubr.bf16.vlgmr.msra.gmra.mxu0 %v18168_v31  ;;  %4264 = vmatprep.subr.bf16.mxu1 %v16087_v51 }
 0x252   : > { %v3822_v34 = vadd.f32 %v3821_v21, %v1850_v24  ;;  %4147 = vmatprep.mubr.bf16.mxu0 %v18217_v2  ;;  %4212 = vmatpush1.bf16.msra.mxu0 %v16082_v62  ;;  %v3874_v22 = vpop.f32.mrf.mxu1  ;;  %v16117_v62 = vld [vmem:[#allocation8 + $0x64c] ss:$16 sps:$4 sm:$0xff]  }
 0x253   : > { %v18349_v39 = vpop.f32.mrf.mxu0  ;;  %4191 = vmatmul.mubr.bf16.vlgmr.msra.gmra.mxu1 %v18173_v40  ;;  %4213 = vmatprep.subr.bf16.mxu0 %v16090_v45  ;;  %v16115_v45 = vld [vmem:[#allocation8 + $0x648] ss:$16 sps:$4 sm:$0xff]   ;;  %v16126_v21 = vld [vmem:[#allocation8 + $0x40c] ss:$16 sps:$4 sm:$0xff]  }
 0x254   : > { %v18352_v53 = vadd.f32 %v3874_v22, %v3822_v34  ;;  %4200 = vmatprep.mubr.bf16.mxu1 %v18222_v3  ;;  %4265 = vmatpush1.bf16.msra.mxu1 %v16085_v29  ;;  %v18355_v14 = vpop.f32.mrf.mxu1  ;;  %v16123_v29 = vld [vmem:[#allocation8 + $0x62c] ss:$16 sps:$4 sm:$0xff]   ;;  %v16124_v34 = vld [vmem:[#allocation8 + $0x408] ss:$16 sps:$4 sm:$0xff]  }
 0x255   : > { %v3825_v31 = vpop.f32.mrf.mxu0  ;;  %4266 = vmatprep.subr.bf16.mxu1 %v16093_v16  ;;  %v16121_v16 = vld [vmem:[#allocation8 + $0x628] ss:$16 sps:$4 sm:$0xff]   ;;  %v16135_v22 = vld [vmem:[#allocation8 + $0x7ec] ss:$16 sps:$4 sm:$0xff]  }
 0x256   : > { %v3826_v2 = vadd.f32 %v3825_v31, %v1850_v24  ;;  %4214 = vmatpush1.bf16.msra.mxu0 %v16088_v20  ;;  %v3878_v40 = vpop.f32.mrf.mxu1  ;;  %v16129_v20 = vld [vmem:[#allocation8 + $0x60c] ss:$16 sps:$4 sm:$0xff]   ;;  %v16133_v31 = vld [vmem:[#allocation8 + $0x7e8] ss:$16 sps:$4 sm:$0xff]  }
 0x257   : > { %v18357_v27 = vpop.f32.mrf.mxu0  ;;  %4215 = vmatprep.subr.bf16.mxu0 %v16096_v17  ;;  %v16127_v17 = vld [vmem:[#allocation8 + $0x608] ss:$16 sps:$4 sm:$0xff]  }
 0x258   : > { %v18359_v33 = vadd.f32 %v3878_v40, %v3826_v2  ;;  %4267 = vmatpush1.bf16.msra.mxu1 %v16091_v26  ;;  %v18364_v63 = vpop.f32.mrf.mxu1  ;;  %v16132_v26 = vld [vmem:[#allocation8 + $0x5ec] ss:$16 sps:$4 sm:$0xff]  }
 0x259   : > { %v3831_v3 = vpop.f32.mrf.mxu0  ;;  %4148 = vmatmul.mubr.bf16.gmra.mxu0 %v18227_v12  ;;  %4268 = vmatprep.subr.bf16.mxu1 %v16099_v1  ;;  %v16130_v1 = vld [vmem:[#allocation8 + $0x5e8] ss:$16 sps:$4 sm:$0xff]   ;;  %v16141_v2 = vld [vmem:[#allocation8 + $0x7cc] ss:$16 sps:$4 sm:$0xff]  }
 0x25a   : > { %v3832_v30 = vadd.f32 %v3831_v3, %v1850_v24  ;;  %4216 = vmatpush1.bf16.msra.mxu0 %v16094_v19  ;;  %4243 = vmatprep.mubr.bf16.mxu0 %v18253_v5  ;;  %v16138_v19 = vld [vmem:[#allocation8 + $0x5cc] ss:$16 sps:$4 sm:$0xff]  }
 0x25b   : > { %v3833_v25 = vpop.f32.mrf.mxu0  ;;  %4201 = vmatmul.mubr.bf16.gmra.mxu1 %v18245_v11  ;;  %4217 = vmatprep.subr.bf16.mxu0 %v16102_v13  ;;  %v3884_v23 = vpop.f32.mrf.mxu1  ;;  %v16136_v13 = vld [vmem:[#allocation8 + $0x5c8] ss:$16 sps:$4 sm:$0xff]   ;;  %v16144_v40 = vld [vmem:[#allocation8 + $0x5ac] ss:$16 sps:$4 sm:$0xff]  }
 0x25c   : > { %v3834_v47 = vadd.f32 %v3833_v25, %v18362_v50  ;;  %4269 = vmatpush1.bf16.msra.mxu1 %v16097_v15  ;;  %4296 = vmatprep.mubr.bf16.mxu1 %v18259_v37  ;;  %v18371_v12 = vadd.f32 %v3884_v23, %v3832_v30  ;;  %v16120_v37 = vld [vmem:[#allocation8 + $0x42c] ss:$16 sps:$4 sm:$0xff]   ;;  %v16139_v15 = vld [vmem:[#allocation8 + $0x7c8] ss:$16 sps:$4 sm:$0xff]  }
 0x25d   : > { %v3835_v58 = vpop.f32.mrf.mxu0  ;;  %4270 = vmatprep.subr.bf16.mxu1 %v16105_v46  ;;  %v3886_v5 = vpop.f32.mrf.mxu1  ;;  %v16142_v46 = vld [vmem:[#allocation8 + $0x5a8] ss:$16 sps:$4 sm:$0xff]   ;;  %v16150_v3 = vld [vmem:[#allocation8 + $0x58c] ss:$16 sps:$4 sm:$0xff]  }
 0x25e   : > { %v3836_v18 = vadd.f32 %v3835_v58, %v1850_v24  ;;  %4218 = vmatpush1.bf16.msra.mxu0 %v16100_v44  ;;  %v18373_v55 = vadd.f32 %v3886_v5, %v3834_v47  ;;  %v16118_v24 = vld [vmem:[#allocation8 + $0x428] ss:$16 sps:$4 sm:$0xff]   ;;  %v16147_v44 = vld [vmem:[#allocation8 + $0x7ac] ss:$16 sps:$4 sm:$0xff]  }
 0x25f   : > { %4219 = vmatprep.subr.bf16.mxu0 %v16108_v0  ;;  %v3888_v11 = vpop.f32.mrf.mxu1  ;;  %v16145_v0 = vld [vmem:[#allocation8 + $0x7a8] ss:$16 sps:$4 sm:$0xff]   ;;  %v16153_v30 = vld [vmem:[#allocation8 + $0x78c] ss:$16 sps:$4 sm:$0xff]  }
 0x260   : > { %4271 = vmatpush1.bf16.msra.mxu1 %v16103_v4  ;;  %v18375_v51 = vadd.f32 %v3888_v11, %v3836_v18  ;;  %v16148_v4 = vld [vmem:[#allocation8 + $0x588] ss:$16 sps:$4 sm:$0xff]   ;;  %v16156_v25 = vld [vmem:[#allocation8 + $0x56c] ss:$16 sps:$4 sm:$0xff]  }
 0x261   : > { %4272 = vmatprep.subr.bf16.mxu1 %v16111_v8  ;;  %v16151_v47 = vld [vmem:[#allocation8 + $0x788] ss:$16 sps:$4 sm:$0xff]   ;;  %v16159_v23 = vld [vmem:[#allocation8 + $0x76c] ss:$16 sps:$4 sm:$0xff]  }
 0x262   : > { %4220 = vmatpush1.bf16.msra.mxu0 %v16106_v59  ;;  %v16154_v59 = vld [vmem:[#allocation8 + $0x568] ss:$16 sps:$4 sm:$0xff]   ;;  %v16162_v8 = vld [vmem:[#allocation8 + $0x54c] ss:$16 sps:$4 sm:$0xff]  }
 0x263   : > { %4221 = vmatprep.subr.bf16.mxu0 %v16114_v35  ;;  %v16157_v58 = vld [vmem:[#allocation8 + $0x768] ss:$16 sps:$4 sm:$0xff]   ;;  %v16165_v35 = vld [vmem:[#allocation8 + $0x74c] ss:$16 sps:$4 sm:$0xff]  }
 0x264   : > { %4273 = vmatpush1.bf16.msra.mxu1 %v16109_v36  ;;  %v16160_v18 = vld [vmem:[#allocation8 + $0x548] ss:$16 sps:$4 sm:$0xff]   ;;  %v16168_v5 = vld [vmem:[#allocation8 + $0x52c] ss:$16 sps:$4 sm:$0xff]  }
 0x265   : > { %4274 = vmatprep.subr.bf16.mxu1 %v16117_v62  ;;  %v16163_v36 = vld [vmem:[#allocation8 + $0x748] ss:$16 sps:$4 sm:$0xff]   ;;  %v16171_v11 = vld [vmem:[#allocation8 + $0x72c] ss:$16 sps:$4 sm:$0xff]  }
 0x266   : > { %4222 = vmatpush1.bf16.msra.mxu0 %v16112_v43  ;;  %v16166_v43 = vld [vmem:[#allocation8 + $0x528] ss:$16 sps:$4 sm:$0xff]   ;;  %v16174_v62 = vld [vmem:[#allocation8 + $0x50c] ss:$16 sps:$4 sm:$0xff]  }
 0x267   : > { %4223 = vmatprep.subr.bf16.mxu0 %v16120_v37  ;;  %v16169_v37 = vld [vmem:[#allocation8 + $0x728] ss:$16 sps:$4 sm:$0xff]  }
 0x268   : > { %4275 = vmatpush1.bf16.msra.mxu1 %v16115_v45  ;;  %v16177_v45 = vld [vmem:[#allocation8 + $0x70c] ss:$16 sps:$4 sm:$0xff]  }
 0x269   : > { %4276 = vmatprep.subr.bf16.mxu1 %v16123_v29  ;;  %v16172_v29 = vld [vmem:[#allocation8 + $0x508] ss:$16 sps:$4 sm:$0xff]  }
 0x26a   : > { %4224 = vmatpush1.bf16.msra.mxu0 %v16118_v24  ;;  %v16180_v24 = vld [vmem:[#allocation8 + $0x8ec] ss:$16 sps:$4 sm:$0xff]  }
 0x26b   : > { %4225 = vmatprep.subr.bf16.mxu0 %v16126_v21  ;;  %v16183_v21 = vld [vmem:[#allocation8 + $0xaec] ss:$16 sps:$4 sm:$0xff]  }
 0x26c   : > { %4277 = vmatpush1.bf16.msra.mxu1 %v16121_v16  ;;  %v16175_v16 = vld [vmem:[#allocation8 + $0x708] ss:$16 sps:$4 sm:$0xff]  }
 0x26d   : > { %4278 = vmatprep.subr.bf16.mxu1 %v16129_v20  ;;  %v18377_v20 = vpop.f32.mrf.mxu0 }
 0x26e   : > { %4226 = vmatpush1.bf16.msra.mxu0 %v16124_v34  ;;  %v16178_v34 = vld [vmem:[#allocation8 + $0x8e8] ss:$16 sps:$4 sm:$0xff]  }
 0x26f   : > { %4227 = vmatprep.subr.bf16.mxu0 %v16132_v26 }
 0x270   : > { %4279 = vmatpush1.bf16.msra.mxu1 %v16127_v17  ;;  %v16186_v17 = vld [vmem:[#allocation8 + $0x8cc] ss:$16 sps:$4 sm:$0xff]  }
 0x271   : > { %4280 = vmatprep.subr.bf16.mxu1 %v16135_v22  ;;  %v16181_v22 = vld [vmem:[#allocation8 + $0xae8] ss:$16 sps:$4 sm:$0xff]  }
 0x272   : > { %4228 = vmatpush2.bf16.msra.mxu0 %v16130_v1  ;;  %v18379_v1 = vpop.f32.mrf.mxu1 }
 0x273   : > { %4229 = vmatprep.subr.bf16.mxu0 %v16138_v19  ;;  %v16189_v19 = vld [vmem:[#allocation8 + $0xacc] ss:$16 sps:$4 sm:$0xff]  }
 0x274   : > { %4281 = vmatpush2.bf16.msra.mxu1 %v16133_v31 }
 0x275   : > { %4282 = vmatprep.subr.bf16.mxu1 %v16141_v2 }
 0x276   : > { %4230 = vmatpush2.bf16.msra.mxu0 %v16136_v13  ;;  %v16184_v13 = vld [vmem:[#allocation8 + $0x8c8] ss:$16 sps:$4 sm:$0xff]  }
 0x277   : > { %4231 = vmatprep.subr.bf16.mxu0 %v16144_v40  ;;  %v16192_v40 = vld [vmem:[#allocation8 + $0x8ac] ss:$16 sps:$4 sm:$0xff]  }
 0x278   : > { %4283 = vmatpush2.bf16.msra.mxu1 %v16139_v15 }
 0x279   : > { %4284 = vmatprep.subr.bf16.mxu1 %v16147_v44 }
 0x27a   : > { %4232 = vmatpush2.bf16.msra.mxu0 %v16142_v46 }
 0x27b   : > { %4233 = vmatprep.subr.bf16.mxu0 %v16150_v3  ;;  %v16195_v3 = vld [vmem:[#allocation8 + $0xaac] ss:$16 sps:$4 sm:$0xff]  }
 0x27c   : > { %4285 = vmatpush2.bf16.msra.mxu1 %v16145_v0 }
 0x27d   : > { %4286 = vmatprep.subr.bf16.mxu1 %v16153_v30  ;;  %v16190_v30 = vld [vmem:[#allocation8 + $0x8a8] ss:$16 sps:$4 sm:$0xff]  }
 0x27e   : > { %4234 = vmatpush2.bf16.msra.mxu0 %v16148_v4  ;;  %v16198_v4 = vld [vmem:[#allocation8 + $0x88c] ss:$16 sps:$4 sm:$0xff]  }
 0x27f   : > { %4235 = vmatprep.subr.bf16.mxu0 %v16156_v25 }
 0x280   : > { %4287 = vmatpush2.bf16.msra.mxu1 %v16151_v47  ;;  %v16193_v47 = vld [vmem:[#allocation8 + $0xaa8] ss:$16 sps:$4 sm:$0xff]  }
 0x281   : > { %4288 = vmatprep.subr.bf16.mxu1 %v16159_v23 }
 0x282   : > { %4236 = vmatpush2.bf16.msra.mxu0 %v16154_v59 }
 0x283   : > { %4237 = vmatprep.subr.bf16.mxu0 %v16162_v8 }
 0x284   : > { %4289 = vmatpush2.bf16.msra.mxu1 %v16157_v58  ;;  %v16196_v58 = vld [vmem:[#allocation8 + $0x888] ss:$16 sps:$4 sm:$0xff]  }
 0x285   : > { %4290 = vmatprep.subr.bf16.mxu1 %v16165_v35 }
 0x286   : > { %4238 = vmatpush2.bf16.msra.mxu0 %v16160_v18 }
 0x287   : > { %4239 = vmatprep.subr.bf16.mxu0 %v16168_v5  ;;  %v16204_v5 = vld [vmem:[#allocation8 + $0x86c] ss:$16 sps:$4 sm:$0xff]  }
 0x288   : > { %4291 = vmatpush2.bf16.msra.mxu1 %v16163_v36 }
 0x289   : > { %4292 = vmatprep.subr.bf16.mxu1 %v16171_v11 }
 0x28a   : > { %4240 = vmatpush2.bf16.msra.mxu0 %v16166_v43 }
 0x28b   : > { %4241 = vmatprep.subr.bf16.mxu0 %v16174_v62 }
 0x28c   : > { %4293 = vmatpush2.bf16.msra.mxu1 %v16169_v37 }
 0x28d   : > { %4294 = vmatprep.subr.bf16.mxu1 %v16177_v45 }
 0x28e   : > { %4242 = vmatpush2.bf16.msra.mxu0 %v16172_v29  ;;  %v16205_v29 = vld [vmem:[#allocation8 + $0xa68] ss:$16 sps:$4 sm:$0xff]  }
 0x28f   : > { %4317 = vmatprep.subr.bf16.mxu0 %v16180_v24  ;;  %v16208_v24 = vld [vmem:[#allocation8 + $0x848] ss:$16 sps:$4 sm:$0xff]  }
 0x290   : > { %4295 = vmatpush2.bf16.msra.mxu1 %v16175_v16  ;;  %v16216_v16 = vld [vmem:[#allocation8 + $0x82c] ss:$16 sps:$4 sm:$0xff]  }
 0x291   : > { %v3927_v26 = vpop.f32.mrf.mxu0  ;;  %4244 = vmatmul.mubr.bf16.vlgmr.msra.gmra.mxu0 %v18199_v9  ;;  %4370 = vmatprep.subr.bf16.mxu1 %v16183_v21  ;;  %v16187_v9 = vld [vmem:[#allocation8 + $0xac8] ss:$16 sps:$4 sm:$0xff]   ;;  %v16219_v21 = vld [vmem:[#allocation8 + $0xa2c] ss:$16 sps:$4 sm:$0xff]  }
 0x292   : > { %v3928_v31 = vadd.f32 %v3927_v26, %v18352_v53  ;;  %4253 = vmatprep.mubr.bf16.mxu0 %v18317_v60  ;;  %4318 = vmatpush1.bf16.msra.mxu0 %v16178_v34  ;;  %v16214_v34 = vld [vmem:[#allocation8 + $0x828] ss:$16 sps:$4 sm:$0xff]  }
 0x293   : > { %v18384_v2 = vpop.f32.mrf.mxu0  ;;  %v3980_v15 = vpop.f32.mrf.mxu1  ;;  %4297 = vmatmul.mubr.bf16.vlgmr.msra.gmra.mxu1 %v18240_v61  ;;  %4319 = vmatprep.subr.bf16.mxu0 %v16186_v17  ;;  %v16222_v17 = vld [vmem:[#allocation8 + $0x80c] ss:$16 sps:$4 sm:$0xff]   ;;  %v16217_v26 = vld [vmem:[#allocation8 + $0xa28] ss:$16 sps:$4 sm:$0xff]  }
 0x294   : > { %v18387_v44 = vadd.f32 %v3980_v15, %v3928_v31  ;;  %4306 = vmatprep.mubr.bf16.mxu1 %v18322_v52  ;;  %4371 = vmatpush1.bf16.msra.mxu1 %v16181_v22  ;;  %v16225_v22 = vld [vmem:[#allocation8 + $0xa0c] ss:$16 sps:$4 sm:$0xff]   ;;  %v16220_v31 = vld [vmem:[#allocation8 + $0x808] ss:$16 sps:$4 sm:$0xff]  }
 0x295   : > { %v3931_v53 = vpop.f32.mrf.mxu0  ;;  %v18390_v46 = vpop.f32.mrf.mxu1  ;;  %4372 = vmatprep.subr.bf16.mxu1 %v16189_v19  ;;  %v16228_v19 = vld [vmem:[#allocation8 + $0x9ec] ss:$16 sps:$4 sm:$0xff]  }
 0x296   : > { %v3932_v60 = vadd.f32 %v3931_v53, %v18359_v33  ;;  %4320 = vmatpush1.bf16.msra.mxu0 %v16184_v13  ;;  %v16201_v33 = vld [vmem:[#allocation8 + $0xa8c] ss:$16 sps:$4 sm:$0xff]   ;;  %v16223_v13 = vld [vmem:[#allocation8 + $0xa08] ss:$16 sps:$4 sm:$0xff]  }
 0x297   : > { %v18393_v0 = vpop.f32.mrf.mxu0  ;;  %v3984_v61 = vpop.f32.mrf.mxu1  ;;  %4321 = vmatprep.subr.bf16.mxu0 %v16192_v40  ;;  %v16231_v15 = vld [vmem:[#allocation8 + $0xbec] ss:$16 sps:$4 sm:$0xff]   ;;  %v16226_v40 = vld [vmem:[#allocation8 + $0x9e8] ss:$16 sps:$4 sm:$0xff]  }
 0x298   : > { %v18395_v25 = vadd.f32 %v3984_v61, %v3932_v60  ;;  %4373 = vmatpush1.bf16.msra.mxu1 %v16187_v9  ;;  %v16234_v53 = vld [vmem:[#allocation8 + $0x9cc] ss:$16 sps:$4 sm:$0xff]   ;;  %v16229_v9 = vld [vmem:[#allocation8 + $0xbe8] ss:$16 sps:$4 sm:$0xff]  }
 0x299   : > { %v3937_v52 = vpop.f32.mrf.mxu0  ;;  %v18397_v23 = vpop.f32.mrf.mxu1  ;;  %4254 = vmatmul.mubr.bf16.gmra.mxu0 %v18332_v57  ;;  %4374 = vmatprep.subr.bf16.mxu1 %v16195_v3  ;;  %v16237_v60 = vld [vmem:[#allocation8 + $0xbcc] ss:$16 sps:$4 sm:$0xff]   ;;  %v16232_v3 = vld [vmem:[#allocation8 + $0x9c8] ss:$16 sps:$4 sm:$0xff]  }
 0x29a   : > { %v3938_v59 = vadd.f32 %v3937_v52, %v18371_v12  ;;  %4322 = vmatpush1.bf16.msra.mxu0 %v16190_v30  ;;  %4349 = vmatprep.mubr.bf16.mxu0 %v18268_v48  ;;  %v16199_v12 = vld [vmem:[#allocation8 + $0xa88] ss:$16 sps:$4 sm:$0xff]   ;;  %v16207_v48 = vld [vmem:[#allocation8 + $0xa6c] ss:$16 sps:$4 sm:$0xff]  }
 0x29b   : > { %v3939_v8 = vpop.f32.mrf.mxu0  ;;  %v3990_v35 = vpop.f32.mrf.mxu1  ;;  %4307 = vmatmul.mubr.bf16.gmra.mxu1 %v18285_v41  ;;  %4323 = vmatprep.subr.bf16.mxu0 %v16198_v4  ;;  %v16202_v41 = vld [vmem:[#allocation8 + $0x868] ss:$16 sps:$4 sm:$0xff]   ;;  %v16240_v30 = vld [vmem:[#allocation8 + $0x9ac] ss:$16 sps:$4 sm:$0xff]  }
 0x29c   : > { %v3940_v18 = vadd.f32 %v3939_v8, %v18373_v55  ;;  %v18404_v36 = vadd.f32 %v3990_v35, %v3938_v59  ;;  %4375 = vmatpush1.bf16.msra.mxu1 %v16193_v47  ;;  %4402 = vmatprep.mubr.bf16.mxu1 %v18273_v38  ;;  %v16210_v55 = vld [vmem:[#allocation8 + $0x84c] ss:$16 sps:$4 sm:$0xff]   ;;  %v16235_v61 = vld [vmem:[#allocation8 + $0xbc8] ss:$16 sps:$4 sm:$0xff]  }
 0x29d   : > { %v3941_v57 = vpop.f32.mrf.mxu0  ;;  %v3992_v11 = vpop.f32.mrf.mxu1  ;;  %4376 = vmatprep.subr.bf16.mxu1 %v16201_v33  ;;  %v16213_v38 = vld [vmem:[#allocation8 + $0xa4c] ss:$16 sps:$4 sm:$0xff]   ;;  %v16238_v52 = vld [vmem:[#allocation8 + $0x9a8] ss:$16 sps:$4 sm:$0xff]  }
 0x29e   : > { %v3942_v43 = vadd.f32 %v3941_v57, %v18375_v51  ;;  %v18408_v62 = vadd.f32 %v3992_v11, %v3940_v18  ;;  %4324 = vmatpush1.bf16.msra.mxu0 %v16196_v58  ;;  %v16211_v51 = vld [vmem:[#allocation8 + $0xa48] ss:$16 sps:$4 sm:$0xff]   ;;  %v16243_v4 = vld [vmem:[#allocation8 + $0xbac] ss:$16 sps:$4 sm:$0xff]  }
 0x29f   : > { %v3994_v37 = vpop.f32.mrf.mxu1  ;;  %4325 = vmatprep.subr.bf16.mxu0 %v16204_v5  ;;  %v16246_v47 = vld [vmem:[#allocation8 + $0x98c] ss:$16 sps:$4 sm:$0xff]   ;;  %v16241_v59 = vld [vmem:[#allocation8 + $0xba8] ss:$16 sps:$4 sm:$0xff]  }
 0x2a0   : > { %v18410_v45 = vadd.f32 %v3994_v37, %v3942_v43  ;;  %4377 = vmatpush1.bf16.msra.mxu1 %v16199_v12  ;;  %v16249_v33 = vld [vmem:[#allocation8 + $0xb8c] ss:$16 sps:$4 sm:$0xff]   ;;  %v16244_v8 = vld [vmem:[#allocation8 + $0x988] ss:$16 sps:$4 sm:$0xff]  }
 0x2a1   : > { %4378 = vmatprep.subr.bf16.mxu1 %v16207_v48  ;;  %v16252_v58 = vld [vmem:[#allocation8 + $0x96c] ss:$16 sps:$4 sm:$0xff]   ;;  %v16247_v35 = vld [vmem:[#allocation8 + $0xb88] ss:$16 sps:$4 sm:$0xff]  }
 0x2a2   : > { %4326 = vmatpush1.bf16.msra.mxu0 %v16202_v41  ;;  %v16255_v18 = vld [vmem:[#allocation8 + $0xb6c] ss:$16 sps:$4 sm:$0xff]   ;;  %v16250_v5 = vld [vmem:[#allocation8 + $0x968] ss:$16 sps:$4 sm:$0xff]  }
 0x2a3   : > { %4327 = vmatprep.subr.bf16.mxu0 %v16210_v55  ;;  %v16258_v57 = vld [vmem:[#allocation8 + $0x94c] ss:$16 sps:$4 sm:$0xff]   ;;  %v16253_v12 = vld [vmem:[#allocation8 + $0xb68] ss:$16 sps:$4 sm:$0xff]  }
 0x2a4   : > { %4379 = vmatpush1.bf16.msra.mxu1 %v16205_v29  ;;  %v16261_v11 = vld [vmem:[#allocation8 + $0xb4c] ss:$16 sps:$4 sm:$0xff]   ;;  %v16256_v43 = vld [vmem:[#allocation8 + $0x948] ss:$16 sps:$4 sm:$0xff]  }
 0x2a5   : > { %4380 = vmatprep.subr.bf16.mxu1 %v16213_v38  ;;  %v16264_v48 = vld [vmem:[#allocation8 + $0x92c] ss:$16 sps:$4 sm:$0xff]   ;;  %v16259_v41 = vld [vmem:[#allocation8 + $0xb48] ss:$16 sps:$4 sm:$0xff]   ;;  %v3824_v38 = vadd.f32 %v18349_v39, %v18362_v50  ;;  %v16279_v39 = vld [vmem:[#allocation9 + $0xc4] ss:$16 sps:$4 sm:$0xff]  }
 0x2a6   : > { %4328 = vmatpush1.bf16.msra.mxu0 %v16208_v24  ;;  %v16267_v37 = vld [vmem:[#allocation8 + $0xb2c] ss:$16 sps:$4 sm:$0xff]   ;;  %v16262_v55 = vld [vmem:[#allocation8 + $0x928] ss:$16 sps:$4 sm:$0xff]  }
 0x2a7   : > { %4329 = vmatprep.subr.bf16.mxu0 %v16216_v16  ;;  %v16270_v29 = vld [vmem:[#allocation8 + $0x90c] ss:$16 sps:$4 sm:$0xff]   ;;  %v16265_v24 = vld [vmem:[#allocation8 + $0xb28] ss:$16 sps:$4 sm:$0xff]  }
 0x2a8   : > { %4381 = vmatpush1.bf16.msra.mxu1 %v16211_v51  ;;  %v16273_v16 = vld [vmem:[#allocation8 + $0xb0c] ss:$16 sps:$4 sm:$0xff]   ;;  %v16268_v51 = vld [vmem:[#allocation8 + $0x908] ss:$16 sps:$4 sm:$0xff]  }
 0x2a9   : > { %4382 = vmatprep.subr.bf16.mxu1 %v16219_v21  ;;  %v16276_v21 = vld [vmem:[#allocation9 + $0xe4] ss:$16 sps:$4 sm:$0xff]  }
 0x2aa   : > { %4330 = vmatpush1.bf16.msra.mxu0 %v16214_v34  ;;  %v3877_v34 = vadd.f32 %v18355_v14, %v3824_v38  ;;  %v16393_v38 = vld [vmem:[#allocation9 + $0x2a4] ss:$16 sps:$4 sm:$0xff]  }
 0x2ab   : > { %4331 = vmatprep.subr.bf16.mxu0 %v16222_v17  ;;  %v16271_v17 = vld [vmem:[#allocation8 + $0xb08] ss:$16 sps:$4 sm:$0xff]  }
 0x2ac   : > { %4383 = vmatpush1.bf16.msra.mxu1 %v16217_v26  ;;  %v3930_v26 = vadd.f32 %v18384_v2, %v3877_v34  ;;  %v16295_v34 = vld [vmem:[#allocation9] ss:$16 sps:$4 sm:$0xff]  }
 0x2ad   : > { %4384 = vmatprep.subr.bf16.mxu1 %v16225_v22  ;;  %v16274_v22 = vld [vmem:[#allocation9 + $0xe0] ss:$16 sps:$4 sm:$0xff]  }
 0x2ae   : > { %4332 = vmatpush1.bf16.msra.mxu0 %v16220_v31  ;;  %v18416_v31 = vpop.f32.mrf.mxu0  ;;  %v3983_v14 = vadd.f32 %v18390_v46, %v3930_v26  ;;  %v16280_v46 = vld [vmem:[#allocation9 + $0xa0] ss:$16 sps:$4 sm:$0xff]   ;;  %v16300_v26 = vld [vmem:[#allocation9 + $0x1e4] ss:$16 sps:$4 sm:$0xff]  }
 0x2af   : > { %4333 = vmatprep.subr.bf16.mxu0 %v16228_v19  ;;  %v18418_v19 = vpop.f32.mrf.mxu1 }
 0x2b0   : > { %4385 = vmatpush1.bf16.msra.mxu1 %v16223_v13 }
 0x2b1   : > { %4386 = vmatprep.subr.bf16.mxu1 %v16231_v15  ;;  %v16277_v15 = vld [vmem:[#allocation9 + $0xc0] ss:$16 sps:$4 sm:$0xff]  }
 0x2b2   : > { %4334 = vmatpush2.bf16.msra.mxu0 %v16226_v40 }
 0x2b3   : > { %4335 = vmatprep.subr.bf16.mxu0 %v16234_v53  ;;  %v16282_v53 = vld [vmem:[#allocation9 + $0xa4] ss:$16 sps:$4 sm:$0xff]  }
 0x2b4   : > { %4387 = vmatpush2.bf16.msra.mxu1 %v16229_v9 }
 0x2b5   : > { %4388 = vmatprep.subr.bf16.mxu1 %v16237_v60 }
 0x2b6   : > { %4336 = vmatpush2.bf16.msra.mxu0 %v16232_v3 }
 0x2b7   : > { %4337 = vmatprep.subr.bf16.mxu0 %v16240_v30 }
 0x2b8   : > { %4389 = vmatpush2.bf16.msra.mxu1 %v16235_v61 }
 0x2b9   : > { %4390 = vmatprep.subr.bf16.mxu1 %v16243_v4  ;;  %v16285_v4 = vld [vmem:[#allocation9 + $0x84] ss:$16 sps:$4 sm:$0xff]  }
 0x2ba   : > { %4338 = vmatpush2.bf16.msra.mxu0 %v16238_v52 }
 0x2bb   : > { %4339 = vmatprep.subr.bf16.mxu0 %v16246_v47 }
 0x2bc   : > { %4391 = vmatpush2.bf16.msra.mxu1 %v16241_v59 }
 0x2bd   : > { %4392 = vmatprep.subr.bf16.mxu1 %v16249_v33 }
 0x2be   : > { %4340 = vmatpush2.bf16.msra.mxu0 %v16244_v8 }
 0x2bf   : > { %4341 = vmatprep.subr.bf16.mxu0 %v16252_v58 }
 0x2c0   : > { %4393 = vmatpush2.bf16.msra.mxu1 %v16247_v35  ;;  %v16288_v35 = vld [vmem:[#allocation9 + $0x64] ss:$16 sps:$4 sm:$0xff]  }
 0x2c1   : > { %4394 = vmatprep.subr.bf16.mxu1 %v16255_v18 }
 0x2c2   : > { %4342 = vmatpush2.bf16.msra.mxu0 %v16250_v5 }
 0x2c3   : > { %4343 = vmatprep.subr.bf16.mxu0 %v16258_v57 }
 0x2c4   : > { %4395 = vmatpush2.bf16.msra.mxu1 %v16253_v12  ;;  %v16379_v12 = vld [vmem:[#allocation9 + $0x2e0] ss:$16 sps:$4 sm:$0xff]  }
 0x2c5   : > { %4396 = vmatprep.subr.bf16.mxu1 %v16261_v11  ;;  %v16381_v11 = vld [vmem:[#allocation9 + $0x2e4] ss:$16 sps:$4 sm:$0xff]  }
 0x2c6   : > { %4344 = vmatpush2.bf16.msra.mxu0 %v16256_v43 }
 0x2c7   : > { %4345 = vmatprep.subr.bf16.mxu0 %v16264_v48 }
 0x2c8   : > { %4397 = vmatpush2.bf16.msra.mxu1 %v16259_v41  ;;  %v16289_v41 = vld [vmem:[#allocation9 + $0x40] ss:$16 sps:$4 sm:$0xff]  }
 0x2c9   : > { %4398 = vmatprep.subr.bf16.mxu1 %v16267_v37  ;;  %v16385_v37 = vld [vmem:[#allocation9 + $0x2c0] ss:$16 sps:$4 sm:$0xff]  }
 0x2ca   : > { %4346 = vmatpush2.bf16.msra.mxu0 %v16262_v55  ;;  %v16387_v55 = vld [vmem:[#allocation9 + $0x2c4] ss:$16 sps:$4 sm:$0xff]  }
 0x2cb   : > { %4347 = vmatprep.subr.bf16.mxu0 %v16270_v29  ;;  %v16294_v29 = vld [vmem:[#allocation9 + $0x24] ss:$16 sps:$4 sm:$0xff]  }
 0x2cc   : > { %4399 = vmatpush2.bf16.msra.mxu1 %v16265_v24  ;;  %v16292_v24 = vld [vmem:[#allocation9 + $0x20] ss:$16 sps:$4 sm:$0xff]  }
 0x2cd   : > { %4400 = vmatprep.subr.bf16.mxu1 %v16273_v16  ;;  %v16399_v16 = vld [vmem:[#allocation9 + $0x284] ss:$16 sps:$4 sm:$0xff]  }
 0x2ce   : > { %4348 = vmatpush2.bf16.msra.mxu0 %v16268_v51  ;;  %v16297_v51 = vld [vmem:[#allocation9 + $0x4] ss:$16 sps:$4 sm:$0xff]  }
 0x2cf   : > { %7527 = vmatprep.subr.bf16.mxu0 %v16276_v21  ;;  %v16397_v21 = vld [vmem:[#allocation9 + $0x280] ss:$16 sps:$4 sm:$0xff]  }
 0x2d0   : > { %4401 = vmatpush2.bf16.msra.mxu1 %v16271_v17  ;;  %v16405_v17 = vld [vmem:[#allocation9 + $0x264] ss:$16 sps:$4 sm:$0xff]  }
 0x2d1   : > { %v18420_v13 = vpop.f32.mrf.mxu0  ;;  %4350 = vmatmul.mubr.bf16.vlgmr.msra.gmra.mxu0 %v18278_v49  ;;  %7568 = vmatprep.subr.bf16.mxu1 %v16381_v11  ;;  %v16313_v11 = vld [vmem:[#allocation9 + $0x140] ss:$16 sps:$4 sm:$0xff]  }
 0x2d2   : > { %4359 = vmatprep.mubr.bf16.mxu0 %v18289_v32  ;;  %7528 = vmatpush1.bf16.msra.mxu0 %v16274_v22  ;;  %v16403_v22 = vld [vmem:[#allocation9 + $0x260] ss:$16 sps:$4 sm:$0xff]  }
 0x2d3   : > { %v18425_v2 = vpop.f32.mrf.mxu1  ;;  %4403 = vmatmul.mubr.bf16.vlgmr.msra.gmra.mxu1 %v18282_v56  ;;  %v4035_v40 = vpop.f32.mrf.mxu0  ;;  %7529 = vmatprep.subr.bf16.mxu0 %v16279_v39  ;;  %v16298_v39 = vld [vmem:[#allocation9 + $0x1e0] ss:$16 sps:$4 sm:$0xff]  }
 0x2d4   : > { %4412 = vmatprep.mubr.bf16.mxu1 %v18293_v42  ;;  %v4036_v9 = vadd.f32 %v4035_v40, %v3983_v14  ;;  %7569 = vmatpush1.bf16.msra.mxu1 %v16379_v12  ;;  %v16411_v14 = vld [vmem:[#allocation9 + $0x244] ss:$16 sps:$4 sm:$0xff]   ;;  %v16409_v40 = vld [vmem:[#allocation9 + $0x240] ss:$16 sps:$4 sm:$0xff]  }
 0x2d5   : > { %v4088_v60 = vpop.f32.mrf.mxu1  ;;  %v4037_v3 = vpop.f32.mrf.mxu0  ;;  %7570 = vmatprep.subr.bf16.mxu1 %v16387_v55  ;;  %v16447_v55 = vld [vmem:[#allocation9 + $0x384] ss:$16 sps:$4 sm:$0xff]  }
 0x2d6   : > { %v4089_v30 = vadd.f32 %v4088_v60, %v4036_v9  ;;  %v4038_v49 = vadd.f32 %v4037_v3, %v18395_v25  ;;  %7530 = vmatpush1.bf16.msra.mxu0 %v16277_v15  ;;  %v16283_v25 = vld [vmem:[#allocation9 + $0x80] ss:$16 sps:$4 sm:$0xff]   ;;  %v16303_v15 = vld [vmem:[#allocation9 + $0x1c4] ss:$16 sps:$4 sm:$0xff]  }
 0x2d7   : > { %v4090_v32 = vpop.f32.mrf.mxu1  ;;  %v18430_v61 = vpop.f32.mrf.mxu0  ;;  %7531 = vmatprep.subr.bf16.mxu0 %v16282_v53  ;;  %v16301_v53 = vld [vmem:[#allocation9 + $0x1c0] ss:$16 sps:$4 sm:$0xff]   ;;  %v16417_v9 = vld [vmem:[#allocation9 + $0x224] ss:$16 sps:$4 sm:$0xff]  }
 0x2d8   : > { %v4424_v52 = vmax.f32 %v4089_v30, 0.0  ;;  %v18432_v56 = vadd.f32 %v4090_v32, %v4038_v49  ;;  %7571 = vmatpush1.bf16.msra.mxu1 %v16385_v37  ;;  %v16306_v60 = vld [vmem:[#allocation9 + $0x1a4] ss:$16 sps:$4 sm:$0xff]   ;;  %v16415_v3 = vld [vmem:[#allocation9 + $0x220] ss:$16 sps:$4 sm:$0xff]   ;;  %v3828_v32 = vadd.f32 %v18357_v27, %v18362_v50 }
 0x2d9   : > { %v18434_v47 = vpop.f32.mrf.mxu1  ;;  %v4043_v59 = vpop.f32.mrf.mxu0  ;;  %4360 = vmatmul.mubr.bf16.gmra.mxu0 %v18297_v54  ;;  %7572 = vmatprep.subr.bf16.mxu1 %v16393_v38  ;;  %v16304_v30 = vld [vmem:[#allocation9 + $0x1a0] ss:$16 sps:$4 sm:$0xff]   ;;  %v16423_v49 = vld [vmem:[#allocation9 + $0x204] ss:$16 sps:$4 sm:$0xff]  }
 0x2da   : > { %v18437_v42 = vpack.c.bf16 %v4424_v52, %v4424_v52  ;;  %v4044_v33 = vadd.f32 %v4043_v59, %v18404_v36  ;;  %7532 = vmatpush1.bf16.msra.mxu0 %v16280_v46  ;;  %v16286_v36 = vld [vmem:[#allocation9 + $0x60] ss:$16 sps:$4 sm:$0xff]   ;;  %v16309_v46 = vld [vmem:[#allocation9 + $0x184] ss:$16 sps:$4 sm:$0xff]  }
 0x2db   : > { %v4096_v8 = vpop.f32.mrf.mxu1  ;;  %4413 = vmatmul.mubr.bf16.gmra.mxu1 %v18301_v28  ;;  %v18441_v58 = vpop.f32.mrf.mxu0  ;;  %7533 = vmatprep.subr.bf16.mxu0 %v16285_v4  ;;  %v16291_v28 = vld [vmem:[#allocation9 + $0x44] ss:$16 sps:$4 sm:$0xff]   ;;  %v16421_v4 = vld [vmem:[#allocation9 + $0x200] ss:$16 sps:$4 sm:$0xff]  }
 0x2dc   : > { %v18443_v18 = vadd.f32 %v4096_v8, %v4044_v33  ;;  %7559 = vmatprep.mubr.bf16.mxu0 %v18437_v42  ;;  %v16307_v52 = vld [vmem:[#allocation9 + $0x180] ss:$16 sps:$4 sm:$0xff]   ;;  %v16429_v59 = vld [vmem:[#allocation9 + $0x3e4] ss:$16 sps:$4 sm:$0xff]  }
 0x2dd   : > { %v18446_v5 = vpop.f32.mrf.mxu1  ;;  %v4047_v54 = vpop.f32.mrf.mxu0  ;;  %v16312_v33 = vld [vmem:[#allocation9 + $0x164] ss:$16 sps:$4 sm:$0xff]   ;;  %v16427_v8 = vld [vmem:[#allocation9 + $0x3e0] ss:$16 sps:$4 sm:$0xff]  }
 0x2de   : > { %v4048_v57 = vadd.f32 %v4047_v54, %v18410_v45  ;;  %7534 = vmatpush1.bf16.msra.mxu0 %v16283_v25  ;;  %v16391_v45 = vld [vmem:[#allocation9 + $0x2a0] ss:$16 sps:$4 sm:$0xff]   ;;  %v3881_v25 = vadd.f32 %v18364_v63, %v3828_v32  ;;  %v16315_v27 = vld [vmem:[#allocation9 + $0x144] ss:$16 sps:$4 sm:$0xff]   ;;  %v4034_v63 = vadd.f32 %v18420_v13, %v18387_v44 }
 0x2df   : > { %v4100_v43 = vpop.f32.mrf.mxu1  ;;  %7535 = vmatprep.subr.bf16.mxu0 %v16288_v35  ;;  %7573 = vmatpush1.bf16.msra.mxu1 %v16391_v45  ;;  %v16310_v54 = vld [vmem:[#allocation9 + $0x160] ss:$16 sps:$4 sm:$0xff]   ;;  %v16453_v13 = vld [vmem:[#allocation9 + $0x364] ss:$16 sps:$4 sm:$0xff]  }
 0x2e0   : > { %v18449_v48 = vadd.f32 %v4100_v43, %v4048_v57  ;;  %7574 = vmatprep.subr.bf16.mxu1 %v16399_v16  ;;  %v3934_v35 = vadd.f32 %v18393_v0, %v3881_v25  ;;  %v16435_v57 = vld [vmem:[#allocation9 + $0x3c4] ss:$16 sps:$4 sm:$0xff]   ;;  %v16316_v37 = vld [vmem:[#allocation9 + $0x120] ss:$16 sps:$4 sm:$0xff]  }
 0x2e1   : > { %v16441_v43 = vld [vmem:[#allocation9 + $0x3a4] ss:$16 sps:$4 sm:$0xff]   ;;  %v16445_v45 = vld [vmem:[#allocation9 + $0x380] ss:$16 sps:$4 sm:$0xff]  }
 0x2e2   : > { %7536 = vmatpush1.bf16.msra.mxu0 %v16286_v36  ;;  %v16433_v36 = vld [vmem:[#allocation9 + $0x3c0] ss:$16 sps:$4 sm:$0xff]   ;;  %v3987_v12 = vadd.f32 %v18397_v23, %v3934_v35  ;;  %v16321_v23 = vld [vmem:[#allocation9 + $0x104] ss:$16 sps:$4 sm:$0xff]  }
 0x2e3   : > { %7537 = vmatprep.subr.bf16.mxu0 %v16291_v28  ;;  %7575 = vmatpush1.bf16.msra.mxu1 %v16397_v21  ;;  %v16318_v28 = vld [vmem:[#allocation9 + $0x124] ss:$16 sps:$4 sm:$0xff]   ;;  %v16319_v44 = vld [vmem:[#allocation9 + $0x100] ss:$16 sps:$4 sm:$0xff]  }
 0x2e4   : > { %7576 = vmatprep.subr.bf16.mxu1 %v16405_v17  ;;  %v4040_v0 = vadd.f32 %v18430_v61, %v3987_v12  ;;  %v16324_v61 = vld [vmem:[#allocation9 + $0x4e4] ss:$16 sps:$4 sm:$0xff]   ;;  %v16322_v21 = vld [vmem:[#allocation9 + $0x4e0] ss:$16 sps:$4 sm:$0xff]  }
 0x2e5   : > { %v16459_v17 = vld [vmem:[#allocation9 + $0x344] ss:$16 sps:$4 sm:$0xff]   ;;  %v16463_v12 = vld [vmem:[#allocation9 + $0x320] ss:$16 sps:$4 sm:$0xff]  }
 0x2e6   : > { %7538 = vmatpush1.bf16.msra.mxu0 %v16289_v41  ;;  %v16439_v41 = vld [vmem:[#allocation9 + $0x3a0] ss:$16 sps:$4 sm:$0xff]   ;;  %v4093_v38 = vadd.f32 %v18434_v47, %v4040_v0  ;;  %v16327_v47 = vld [vmem:[#allocation9 + $0x4c4] ss:$16 sps:$4 sm:$0xff]  }
 0x2e7   : > { %7539 = vmatprep.subr.bf16.mxu0 %v16294_v29  ;;  %7577 = vmatpush1.bf16.msra.mxu1 %v16403_v22  ;;  %v4087_v29 = vadd.f32 %v18425_v2, %v4034_v63  ;;  %v18467_v22 = vpop.f32.mrf.mxu1 }
 0x2e8   : > { %7578 = vmatprep.subr.bf16.mxu1 %v16411_v14  ;;  %v4428_v16 = vmax.f32 %v4093_v38, 0.0  ;;  %v16457_v14 = vld [vmem:[#allocation9 + $0x340] ss:$16 sps:$4 sm:$0xff]  }
 0x2e9   : > { %v16469_v38 = vld [vmem:[#allocation9 + $0x300] ss:$16 sps:$4 sm:$0xff]  }
 0x2ea   : > { %7540 = vmatpush1.bf16.msra.mxu0 %v16292_v24  ;;  %v4423_v24 = vmax.f32 %v4087_v29, 0.0 }
 0x2eb   : > { %7541 = vmatprep.subr.bf16.mxu0 %v16297_v51  ;;  %7579 = vmatpush1.bf16.msra.mxu1 %v16409_v40  ;;  %v16451_v51 = vld [vmem:[#allocation9 + $0x360] ss:$16 sps:$4 sm:$0xff]  }
 0x2ec   : > { %7580 = vmatprep.subr.bf16.mxu1 %v16417_v9  ;;  %v18461_v2 = vpack.c.bf16 %v4423_v24, %v4423_v24  ;;  %v16330_v9 = vld [vmem:[#allocation9 + $0x4a4] ss:$16 sps:$4 sm:$0xff]  }
 0x2ee   : > { %7542 = vmatpush1.bf16.msra.mxu0 %v16295_v34  ;;  %v18463_v34 = vpop.f32.mrf.mxu0 }
 0x2ef   : > { %7543 = vmatprep.subr.bf16.mxu0 %v16300_v26  ;;  %7581 = vmatpush1.bf16.msra.mxu1 %v16415_v3  ;;  %v18465_v26 = vpack.c.bf16 %v4428_v16, %v4428_v16  ;;  %v21206_v3 = vsub.s32 2, %v18049_v6  ;;  %v16477_v16 = vld [vmem:[#allocation9 + $0x6e4] ss:$16 sps:$4 sm:$0xff]  }
 0x2f0   : > { %7582 = vmatprep.subr.bf16.mxu1 %v16423_v49 }
 0x2f2   : > { %7544 = vmatpush2.bf16.msra.mxu0 %v16298_v39 }
 0x2f3   : > { %7545 = vmatprep.subr.bf16.mxu0 %v16303_v15  ;;  %7583 = vmatpush1.bf16.msra.mxu1 %v16421_v4  ;;  %v16325_v15 = vld [vmem:[#allocation9 + $0x4c0] ss:$16 sps:$4 sm:$0xff]  }
 0x2f4   : > { %7584 = vmatprep.subr.bf16.mxu1 %v16429_v59  ;;  %v16328_v4 = vld [vmem:[#allocation9 + $0x4a0] ss:$16 sps:$4 sm:$0xff]  }
 0x2f6   : > { %7546 = vmatpush2.bf16.msra.mxu0 %v16301_v53 }
 0x2f7   : > { %7547 = vmatprep.subr.bf16.mxu0 %v16306_v60  ;;  %7585 = vmatpush2.bf16.msra.mxu1 %v16427_v8  ;;  %v17500_v60 = vld [vmem:[#allocation6 + $0x1] ss:$2 sm:$0xf] }
 0x2f8   : > { %7586 = vmatprep.subr.bf16.mxu1 %v16435_v57 }
 0x2fa   : > { %7548 = vmatpush2.bf16.msra.mxu0 %v16304_v30  ;;  %v18479_v30 = vrot.slane %v17500_v60, %v21206_v3  ;;  %v16354_v3 = vld [vmem:[#allocation9 + $0x5a4] ss:$16 sps:$4 sm:$0xff]  }
 0x2fb   : > { %7549 = vmatprep.subr.bf16.mxu0 %v16309_v46  ;;  %7587 = vmatpush2.bf16.msra.mxu1 %v16433_v36  ;;  %v16331_v36 = vld [vmem:[#allocation9 + $0x480] ss:$16 sps:$4 sm:$0xff]  }
 0x2fc   : > { %7588 = vmatprep.subr.bf16.mxu1 %v16441_v43 }
 0x2fe   : > { %7550 = vmatpush2.bf16.msra.mxu0 %v16307_v52 }
 0x2ff   : > { %7551 = vmatprep.subr.bf16.mxu0 %v16312_v33  ;;  %7589 = vmatpush2.bf16.msra.mxu1 %v16439_v41  ;;  %v16333_v33 = vld [vmem:[#allocation9 + $0x484] ss:$16 sps:$4 sm:$0xff]  }
 0x300   : > { %7590 = vmatprep.subr.bf16.mxu1 %v16447_v55 }
 0x302   : > { %7552 = vmatpush2.bf16.msra.mxu0 %v16310_v54  ;;  %v21207_v54 = vsub.s32 3, %v18049_v6 }
 0x303   : > { %7553 = vmatprep.subr.bf16.mxu0 %v16315_v27  ;;  %7591 = vmatpush2.bf16.msra.mxu1 %v16445_v45  ;;  %v16471_v45 = vld [vmem:[#allocation9 + $0x304] ss:$16 sps:$4 sm:$0xff]  }
 0x304   : > { %7592 = vmatprep.subr.bf16.mxu1 %v16453_v13  ;;  %v18492_v57 = vrot.slane %v17500_v60, %v21207_v54  ;;  %v16339_v13 = vld [vmem:[#allocation9 + $0x444] ss:$16 sps:$4 sm:$0xff]   ;;  %v16349_v60 = vld [vmem:[#allocation9 + $0x5c0] ss:$16 sps:$4 sm:$0xff]  }
 0x305   : > { %v16361_v54 = vld [vmem:[#allocation9 + $0x540] ss:$16 sps:$4 sm:$0xff]  }
 0x306   : > { %7554 = vmatpush2.bf16.msra.mxu0 %v16313_v11  ;;  %v16465_v11 = vld [vmem:[#allocation9 + $0x324] ss:$16 sps:$4 sm:$0xff]  }
 0x307   : > { %7555 = vmatprep.subr.bf16.mxu0 %v16318_v28  ;;  %7593 = vmatpush2.bf16.msra.mxu1 %v16451_v51  ;;  %v16336_v28 = vld [vmem:[#allocation9 + $0x464] ss:$16 sps:$4 sm:$0xff]  }
 0x308   : > { %7594 = vmatprep.subr.bf16.mxu1 %v16459_v17  ;;  %v16342_v51 = vld [vmem:[#allocation9 + $0x424] ss:$16 sps:$4 sm:$0xff]   ;;  %v16343_v17 = vld [vmem:[#allocation9 + $0x400] ss:$16 sps:$4 sm:$0xff]  }
 0x30a   : > { %7556 = vmatpush2.bf16.msra.mxu0 %v16316_v37 }
 0x30b   : > { %7557 = vmatprep.subr.bf16.mxu0 %v16321_v23  ;;  %7595 = vmatpush2.bf16.msra.mxu1 %v16457_v14  ;;  %v16334_v23 = vld [vmem:[#allocation9 + $0x460] ss:$16 sps:$4 sm:$0xff]   ;;  %v16348_v14 = vld [vmem:[#allocation9 + $0x5e4] ss:$16 sps:$4 sm:$0xff]  }
 0x30c   : > { %7596 = vmatprep.subr.bf16.mxu1 %v16465_v11  ;;  %v16369_v11 = vld [vmem:[#allocation9 + $0x504] ss:$16 sps:$4 sm:$0xff]  }
 0x30e   : > { %7558 = vmatpush2.bf16.msra.mxu0 %v16319_v44 }
 0x30f   : > { %7609 = vmatprep.subr.bf16.mxu0 %v16324_v61  ;;  %7597 = vmatpush2.bf16.msra.mxu1 %v16463_v12  ;;  %v16337_v61 = vld [vmem:[#allocation9 + $0x440] ss:$16 sps:$4 sm:$0xff]  }
 0x310   : > { %7598 = vmatprep.subr.bf16.mxu1 %v16471_v45  ;;  %v16364_v12 = vld [vmem:[#allocation9 + $0x520] ss:$16 sps:$4 sm:$0xff]  }
 0x311   : > { %v18469_v39 = vpop.f32.mrf.mxu0  ;;  %7560 = vmatmul.mubr.bf16.vlgmr.msra.gmra.mxu0 %v18461_v2 }
 0x312   : > { %7610 = vmatpush1.bf16.msra.mxu0 %v16322_v21  ;;  %7641 = vmatprep.mubr.bf16.mxu0 %v18465_v26  ;;  %v16340_v21 = vld [vmem:[#allocation9 + $0x420] ss:$16 sps:$4 sm:$0xff]  }
 0x313   : > { %v18473_v40 = vpop.f32.mrf.mxu1  ;;  %v18475_v53 = vpop.f32.mrf.mxu0  ;;  %7611 = vmatprep.subr.bf16.mxu0 %v16327_v47  ;;  %7599 = vmatpush2.bf16.msra.mxu1 %v16469_v38  ;;  %v16345_v47 = vld [vmem:[#allocation9 + $0x404] ss:$16 sps:$4 sm:$0xff]  }
 0x314   : > { %7650 = vmatprep.subr.bf16.mxu1 %v16477_v16 }
 0x315   : > { %v18481_v49 = vpop.f32.mrf.mxu1  ;;  %v4143_v46 = vpop.f32.mrf.mxu0 }
 0x316   : > { %v4144_v32 = vadd.f32 %v4143_v46, %v18479_v30  ;;  %7612 = vmatpush1.bf16.msra.mxu0 %v16325_v15  ;;  %v16346_v15 = vld [vmem:[#allocation9 + $0x5e0] ss:$16 sps:$4 sm:$0xff]  }
 0x317   : > { %v4196_v52 = vpop.f32.mrf.mxu1  ;;  %v18484_v59 = vpop.f32.mrf.mxu0  ;;  %7613 = vmatprep.subr.bf16.mxu0 %v16330_v9  ;;  %v16351_v9 = vld [vmem:[#allocation9 + $0x5c4] ss:$16 sps:$4 sm:$0xff]   ;;  %v16352_v46 = vld [vmem:[#allocation9 + $0x5a0] ss:$16 sps:$4 sm:$0xff]  }
 0x318   : > { %v18486_v25 = vadd.f32 %v4196_v52, %v4144_v32  ;;  %v16357_v32 = vld [vmem:[#allocation9 + $0x584] ss:$16 sps:$4 sm:$0xff]  }
 0x319   : > { %v18488_v8 = vpop.f32.mrf.mxu1  ;;  %v4149_v35 = vpop.f32.mrf.mxu0  ;;  %v16360_v52 = vld [vmem:[#allocation9 + $0x564] ss:$16 sps:$4 sm:$0xff]  }
 0x31a   : > { %v4150_v27 = vadd.f32 %v4149_v35, %v18479_v30  ;;  %7614 = vmatpush1.bf16.msra.mxu0 %v16328_v4  ;;  %v16355_v4 = vld [vmem:[#allocation9 + $0x580] ss:$16 sps:$4 sm:$0xff]   ;;  %v16363_v35 = vld [vmem:[#allocation9 + $0x544] ss:$16 sps:$4 sm:$0xff]  }
 0x31b   : > { %v4202_v43 = vpop.f32.mrf.mxu1  ;;  %v4151_v63 = vpop.f32.mrf.mxu0  ;;  %7615 = vmatprep.subr.bf16.mxu0 %v16333_v33  ;;  %v16358_v33 = vld [vmem:[#allocation9 + $0x560] ss:$16 sps:$4 sm:$0xff]  }
 0x31c   : > { %v18495_v0 = vadd.f32 %v4202_v43, %v4150_v27  ;;  %v4152_v41 = vadd.f32 %v4151_v63, %v18492_v57  ;;  %v16366_v27 = vld [vmem:[#allocation9 + $0x524] ss:$16 sps:$4 sm:$0xff]   ;;  %v16367_v63 = vld [vmem:[#allocation9 + $0x500] ss:$16 sps:$4 sm:$0xff]  }
 0x31d   : > { %v4204_v37 = vpop.f32.mrf.mxu1  ;;  %v4153_v55 = vpop.f32.mrf.mxu0 }
 0x31e   : > { %v18498_v6 = vadd.f32 %v4204_v37, %v4152_v41  ;;  %v4154_v29 = vadd.f32 %v4153_v55, %v18479_v30  ;;  %7616 = vmatpush1.bf16.msra.mxu0 %v16331_v36  ;;  %v4046_v36 = vadd.f32 %v18441_v58, %v18408_v62  ;;  %v16372_v41 = vld [vmem:[#allocation9 + $0x8e4] ss:$16 sps:$4 sm:$0xff]   ;;  %v16370_v55 = vld [vmem:[#allocation9 + $0x8e0] ss:$16 sps:$4 sm:$0xff]  }
 0x31f   : > { %v4206_v44 = vpop.f32.mrf.mxu1  ;;  %7617 = vmatprep.subr.bf16.mxu0 %v16336_v28  ;;  %v4427_v28 = vmax.f32 %v18432_v56, 0.0  ;;  %v16375_v62 = vld [vmem:[#allocation9 + $0x8c4] ss:$16 sps:$4 sm:$0xff]   ;;  %v16373_v56 = vld [vmem:[#allocation9 + $0x8c0] ss:$16 sps:$4 sm:$0xff]  }
 0x320   : > { %v18501_v24 = vadd.f32 %v4206_v44, %v4154_v29  ;;  %v4099_v43 = vadd.f32 %v18446_v5, %v4046_v36 }
 0x321   : > { %v18507_v29 = vpack.c.bf16 %v4427_v28, %v4427_v28  ;;  %v18513_v38 = vpop.f32.mrf.mxu1  ;;  %v16402_v28 = vld [vmem:[#allocation9 + $0x824] ss:$16 sps:$4 sm:$0xff]  }
 0x322   : > { %7618 = vmatpush1.bf16.msra.mxu0 %v16334_v23  ;;  %v4432_v37 = vmax.f32 %v4099_v43, 0.0  ;;  %v18509_v23 = vpop.f32.mrf.mxu0 }
 0x323   : > { %7619 = vmatprep.subr.bf16.mxu0 %v16339_v13  ;;  %v16378_v13 = vld [vmem:[#allocation9 + $0x8a4] ss:$16 sps:$4 sm:$0xff]  }
 0x324   : > { %v18511_v58 = vpack.c.bf16 %v4432_v37, %v4432_v37  ;;  %v16406_v37 = vld [vmem:[#allocation9 + $0x800] ss:$16 sps:$4 sm:$0xff]  }
 0x326   : > { %7620 = vmatpush1.bf16.msra.mxu0 %v16337_v61 }
 0x327   : > { %7621 = vmatprep.subr.bf16.mxu0 %v16342_v51 }
 0x32a   : > { %7622 = vmatpush1.bf16.msra.mxu0 %v16340_v21  ;;  %v16376_v21 = vld [vmem:[#allocation9 + $0x8a0] ss:$16 sps:$4 sm:$0xff]  }
 0x32b   : > { %7623 = vmatprep.subr.bf16.mxu0 %v16345_v47 }
 0x32e   : > { %7624 = vmatpush1.bf16.msra.mxu0 %v16343_v17 }
 0x32f   : > { %7625 = vmatprep.subr.bf16.mxu0 %v16348_v14  ;;  %v16384_v14 = vld [vmem:[#allocation9 + $0x884] ss:$16 sps:$4 sm:$0xff]  }
 0x332   : > { %7626 = vmatpush2.bf16.msra.mxu0 %v16346_v15 }
 0x333   : > { %7627 = vmatprep.subr.bf16.mxu0 %v16351_v9 }
 0x336   : > { %7628 = vmatpush2.bf16.msra.mxu0 %v16349_v60 }
 0x337   : > { %7629 = vmatprep.subr.bf16.mxu0 %v16354_v3 }
 0x33a   : > { %7630 = vmatpush2.bf16.msra.mxu0 %v16352_v46  ;;  %v16382_v46 = vld [vmem:[#allocation9 + $0x880] ss:$16 sps:$4 sm:$0xff]  }
 0x33b   : > { %7631 = vmatprep.subr.bf16.mxu0 %v16357_v32 }
 0x33e   : > { %7632 = vmatpush2.bf16.msra.mxu0 %v16355_v4 }
 0x33f   : > { %7633 = vmatprep.subr.bf16.mxu0 %v16360_v52 }
 0x342   : > { %7634 = vmatpush2.bf16.msra.mxu0 %v16358_v33 }
 0x343   : > { %7635 = vmatprep.subr.bf16.mxu0 %v16363_v35 }
 0x346   : > { %7636 = vmatpush2.bf16.msra.mxu0 %v16361_v54 }
 0x347   : > { %7637 = vmatprep.subr.bf16.mxu0 %v16366_v27 }
 0x34a   : > { %7638 = vmatpush2.bf16.msra.mxu0 %v16364_v12  ;;  %v16388_v12 = vld [vmem:[#allocation9 + $0x860] ss:$16 sps:$4 sm:$0xff]  }
 0x34b   : > { %7639 = vmatprep.subr.bf16.mxu0 %v16369_v11 }
 0x34e   : > { %7640 = vmatpush2.bf16.msra.mxu0 %v16367_v63  ;;  %v16394_v63 = vld [vmem:[#allocation9 + $0x840] ss:$16 sps:$4 sm:$0xff]  }
 0x34f   : > { %7691 = vmatprep.subr.bf16.mxu0 %v16372_v41  ;;  %v16400_v41 = vld [vmem:[#allocation9 + $0x820] ss:$16 sps:$4 sm:$0xff]  }
 0x351   : > { %v18515_v5 = vpop.f32.mrf.mxu0  ;;  %7642 = vmatmul.mubr.bf16.vlgmr.msra.gmra.mxu0 %v18507_v29 }
 0x352   : > { %7692 = vmatpush1.bf16.msra.mxu0 %v16370_v55  ;;  %7723 = vmatprep.mubr.bf16.mxu0 %v18511_v58  ;;  %v16414_v55 = vld [vmem:[#allocation9 + $0x9e4] ss:$16 sps:$4 sm:$0xff]  }
 0x353   : > { %v18519_v45 = vpop.f32.mrf.mxu1  ;;  %v18521_v44 = vpop.f32.mrf.mxu0  ;;  %7693 = vmatprep.subr.bf16.mxu0 %v16375_v62  ;;  %v16420_v62 = vld [vmem:[#allocation9 + $0x9c4] ss:$16 sps:$4 sm:$0xff]  }
 0x355   : > { %v18523_v61 = vpop.f32.mrf.mxu1  ;;  %v4249_v16 = vpop.f32.mrf.mxu0 }
 0x356   : > { %v4250_v51 = vadd.f32 %v4249_v16, %v18486_v25  ;;  %7694 = vmatpush1.bf16.msra.mxu0 %v16373_v56  ;;  %v16390_v25 = vld [vmem:[#allocation9 + $0x864] ss:$16 sps:$4 sm:$0xff]   ;;  %v16418_v56 = vld [vmem:[#allocation9 + $0x9c0] ss:$16 sps:$4 sm:$0xff]  }
 0x357   : > { %v4302_v47 = vpop.f32.mrf.mxu1  ;;  %v18526_v17 = vpop.f32.mrf.mxu0  ;;  %7695 = vmatprep.subr.bf16.mxu0 %v16378_v13  ;;  %v16426_v13 = vld [vmem:[#allocation9 + $0x9a4] ss:$16 sps:$4 sm:$0xff]   ;;  %v16424_v16 = vld [vmem:[#allocation9 + $0x9a0] ss:$16 sps:$4 sm:$0xff]  }
 0x358   : > { %v18528_v15 = vadd.f32 %v4302_v47, %v4250_v51  ;;  %v16432_v51 = vld [vmem:[#allocation9 + $0x984] ss:$16 sps:$4 sm:$0xff]   ;;  %v16430_v47 = vld [vmem:[#allocation9 + $0x980] ss:$16 sps:$4 sm:$0xff]  }
 0x359   : > { %v18530_v9 = vpop.f32.mrf.mxu1  ;;  %v4255_v60 = vpop.f32.mrf.mxu0 }
 0x35a   : > { %v4256_v3 = vadd.f32 %v4255_v60, %v18495_v0  ;;  %7696 = vmatpush1.bf16.msra.mxu0 %v16376_v21  ;;  %v16396_v0 = vld [vmem:[#allocation9 + $0x844] ss:$16 sps:$4 sm:$0xff]   ;;  %v3838_v21 = vadd.f32 %v18377_v20, %v18362_v50  ;;  %v4140_v20 = vadd.f32 %v18469_v39, %v18479_v30  ;;  %v4146_v30 = vadd.f32 %v18484_v59, %v18492_v57 }
 0x35b   : > { %v4308_v32 = vpop.f32.mrf.mxu1  ;;  %v4257_v4 = vpop.f32.mrf.mxu0  ;;  %7697 = vmatprep.subr.bf16.mxu0 %v16384_v14  ;;  %v16438_v14 = vld [vmem:[#allocation9 + $0x964] ss:$16 sps:$4 sm:$0xff]  }
 0x35c   : > { %v18533_v52 = vadd.f32 %v4308_v32, %v4256_v3  ;;  %v4258_v33 = vadd.f32 %v4257_v4, %v18498_v6  ;;  %v16408_v6 = vld [vmem:[#allocation9 + $0x804] ss:$16 sps:$4 sm:$0xff]   ;;  %v3891_v60 = vadd.f32 %v18379_v1, %v3838_v21 }
 0x35d   : > { %v4310_v35 = vpop.f32.mrf.mxu1  ;;  %v4259_v54 = vpop.f32.mrf.mxu0  ;;  %v16444_v32 = vld [vmem:[#allocation9 + $0x944] ss:$16 sps:$4 sm:$0xff]  }
 0x35e   : > { %v18536_v27 = vadd.f32 %v4310_v35, %v4258_v33  ;;  %v4260_v36 = vadd.f32 %v4259_v54, %v18501_v24  ;;  %7698 = vmatpush1.bf16.msra.mxu0 %v16382_v46  ;;  %v16412_v24 = vld [vmem:[#allocation9 + $0x9e0] ss:$16 sps:$4 sm:$0xff]   ;;  %v3944_v3 = vadd.f32 %v18416_v31, %v3891_v60  ;;  %v16450_v33 = vld [vmem:[#allocation9 + $0x924] ss:$16 sps:$4 sm:$0xff]   ;;  %v4142_v54 = vadd.f32 %v18475_v53, %v18492_v57 }
 0x35f   : > { %v4312_v11 = vpop.f32.mrf.mxu1  ;;  %7699 = vmatprep.subr.bf16.mxu0 %v16390_v25  ;;  %v16436_v46 = vld [vmem:[#allocation9 + $0x960] ss:$16 sps:$4 sm:$0xff]   ;;  %v16456_v1 = vld [vmem:[#allocation9 + $0x904] ss:$16 sps:$4 sm:$0xff]  }
 0x360   : > { %v18539_v43 = vadd.f32 %v4312_v11, %v4260_v36  ;;  %v3997_v4 = vadd.f32 %v18418_v19, %v3944_v3  ;;  %v16442_v25 = vld [vmem:[#allocation9 + $0x940] ss:$16 sps:$4 sm:$0xff]   ;;  %v4193_v19 = vadd.f32 %v18473_v40, %v4140_v20  ;;  %v4195_v39 = vadd.f32 %v18481_v49, %v4142_v54  ;;  %v18561_v40 = vpop.f32.mrf.mxu0  ;;  %v16480_v60 = vld [vmem:[#allocation9 + $0xc84] ss:$16 sps:$4 sm:$0xff]  }
 0x361   : > { %v16448_v35 = vld [vmem:[#allocation9 + $0x920] ss:$16 sps:$4 sm:$0xff]   ;;  %v16483_v54 = vld [vmem:[#allocation9 + $0x6c4] ss:$16 sps:$4 sm:$0xff]  }
 0x362   : > { %7700 = vmatpush1.bf16.msra.mxu0 %v16388_v12  ;;  %v4050_v50 = vadd.f32 %v18463_v34, %v3997_v4  ;;  %v16454_v36 = vld [vmem:[#allocation9 + $0x900] ss:$16 sps:$4 sm:$0xff]   ;;  %v4431_v12 = vmax.f32 %v18443_v18, 0.0  ;;  %v16462_v34 = vld [vmem:[#allocation9 + $0xce4] ss:$16 sps:$4 sm:$0xff]  }
 0x363   : > { %7701 = vmatprep.subr.bf16.mxu0 %v16396_v0  ;;  %v4246_v0 = vadd.f32 %v18515_v5, %v4193_v19  ;;  %v16460_v53 = vld [vmem:[#allocation9 + $0xce0] ss:$16 sps:$4 sm:$0xff]   ;;  %v16468_v18 = vld [vmem:[#allocation9 + $0xcc4] ss:$16 sps:$4 sm:$0xff]  }
 0x364   : > { %v4103_v31 = vadd.f32 %v18467_v22, %v4050_v50  ;;  %v4248_v22 = vadd.f32 %v18521_v44, %v4195_v39  ;;  %v16478_v20 = vld [vmem:[#allocation9 + $0xc80] ss:$16 sps:$4 sm:$0xff]   ;;  %v16486_v19 = vld [vmem:[#allocation9 + $0xc64] ss:$16 sps:$4 sm:$0xff]  }
 0x365   : > { %v4299_v49 = vadd.f32 %v18519_v45, %v4246_v0  ;;  %v16484_v0 = vld [vmem:[#allocation9 + $0xc60] ss:$16 sps:$4 sm:$0xff]  }
 0x366   : > { %7702 = vmatpush1.bf16.msra.mxu0 %v16394_v63  ;;  %v4436_v11 = vmax.f32 %v4103_v31, 0.0  ;;  %v18559_v63 = vpack.c.bf16 %v4431_v12, %v4431_v12  ;;  %v4301_v5 = vadd.f32 %v18523_v61, %v4248_v22  ;;  %v16472_v61 = vld [vmem:[#allocation9 + $0xca0] ss:$16 sps:$4 sm:$0xff]  }
 0x367   : > { %7703 = vmatprep.subr.bf16.mxu0 %v16402_v28 }
 0x368   : > { %v18563_v28 = vpack.c.bf16 %v4436_v11, %v4436_v11 }
 0x36a   : > { %7704 = vmatpush1.bf16.msra.mxu0 %v16400_v41  ;;  %v4199_v41 = vadd.f32 %v18488_v8, %v4146_v30  ;;  %v16474_v8 = vld [vmem:[#allocation9 + $0xca4] ss:$16 sps:$4 sm:$0xff]   ;;  %v16481_v30 = vld [vmem:[#allocation9 + $0x6c0] ss:$16 sps:$4 sm:$0xff]  }
 0x36b   : > { %7705 = vmatprep.subr.bf16.mxu0 %v16408_v6  ;;  %v18567_v6 = vpop.f32.mrf.mxu1 }
 0x36c   : > { %v4252_v44 = vadd.f32 %v18526_v17, %v4199_v41 }
 0x36e   : > { %7706 = vmatpush1.bf16.msra.mxu0 %v16406_v37 }
 0x36f   : > { %7707 = vmatprep.subr.bf16.mxu0 %v16414_v55  ;;  %v16466_v55 = vld [vmem:[#allocation9 + $0xcc0] ss:$16 sps:$4 sm:$0xff]  }
 0x372   : > { %7708 = vmatpush2.bf16.msra.mxu0 %v16412_v24 }
 0x373   : > { %7709 = vmatprep.subr.bf16.mxu0 %v16420_v62 }
 0x376   : > { %7710 = vmatpush2.bf16.msra.mxu0 %v16418_v56 }
 0x377   : > { %7711 = vmatprep.subr.bf16.mxu0 %v16426_v13 }
 0x37a   : > { %7712 = vmatpush2.bf16.msra.mxu0 %v16424_v16 }
 0x37b   : > { %7713 = vmatprep.subr.bf16.mxu0 %v16432_v51  ;;  %v4305_v51 = vadd.f32 %v18530_v9, %v4252_v44  ;;  %v16475_v9 = vld [vmem:[#allocation9 + $0x6e0] ss:$16 sps:$4 sm:$0xff]  }
 0x37c   : > { %v16493_v44 = vld [vmem:[#allocation9 + $0x680] ss:$16 sps:$4 sm:$0xff]  }
 0x37e   : > { %7714 = vmatpush2.bf16.msra.mxu0 %v16430_v47 }
 0x37f   : > { %7715 = vmatprep.subr.bf16.mxu0 %v16438_v14 }
 0x382   : > { %7716 = vmatpush2.bf16.msra.mxu0 %v16436_v46 }
 0x383   : > { %7717 = vmatprep.subr.bf16.mxu0 %v16444_v32 }
 0x386   : > { %7718 = vmatpush2.bf16.msra.mxu0 %v16442_v25 }
 0x387   : > { %7719 = vmatprep.subr.bf16.mxu0 %v16450_v33 }
 0x38a   : > { %7720 = vmatpush2.bf16.msra.mxu0 %v16448_v35 }
 0x38b   : > { %7721 = vmatprep.subr.bf16.mxu0 %v16456_v1 }
 0x38e   : > { %7722 = vmatpush2.bf16.msra.mxu0 %v16454_v36 }
 0x38f   : > { %7773 = vmatprep.subr.bf16.mxu0 %v16462_v34 }
 0x391   : > { %v4351_v59 = vpop.f32.mrf.mxu0  ;;  %7724 = vmatmul.mubr.bf16.vlgmr.msra.gmra.mxu0 %v18559_v63 }
 0x392   : > { %v4352_v37 = vadd.f32 %v4351_v59, %v4299_v49  ;;  %7774 = vmatpush1.bf16.msra.mxu0 %v16460_v53  ;;  %7805 = vmatprep.mubr.bf16.mxu0 %v18563_v28  ;;  %v16489_v53 = vld [vmem:[#allocation9 + $0x6a4] ss:$16 sps:$4 sm:$0xff]   ;;  %v16487_v49 = vld [vmem:[#allocation9 + $0x6a0] ss:$16 sps:$4 sm:$0xff]  }
 0x393   : > { %v4404_v24 = vpop.f32.mrf.mxu1  ;;  %v4353_v62 = vpop.f32.mrf.mxu0  ;;  %7775 = vmatprep.subr.bf16.mxu0 %v16468_v18  ;;  %v16492_v18 = vld [vmem:[#allocation9 + $0xc44] ss:$16 sps:$4 sm:$0xff]   ;;  %v16490_v59 = vld [vmem:[#allocation9 + $0xc40] ss:$16 sps:$4 sm:$0xff]  }
 0x394   : > { %v4405_v56 = vadd.f32 %v4404_v24, %v4352_v37  ;;  %v4354_v45 = vadd.f32 %v4353_v62, %v4301_v5  ;;  %v16498_v5 = vld [vmem:[#allocation9 + $0xc24] ss:$16 sps:$4 sm:$0xff]   ;;  %v16496_v37 = vld [vmem:[#allocation9 + $0xc20] ss:$16 sps:$4 sm:$0xff]  }
 0x395   : > { %v4406_v13 = vpop.f32.mrf.mxu1  ;;  %v18573_v16 = vpop.f32.mrf.mxu0  ;;  %v16504_v24 = vld [vmem:[#allocation9 + $0xc04] ss:$16 sps:$4 sm:$0xff]   ;;  %v16499_v62 = vld [vmem:[#allocation9 + $0x660] ss:$16 sps:$4 sm:$0xff]  }
 0x396   : > { %v4407_v21 = vadd.f32 %v4406_v13, %v4354_v45  ;;  %7776 = vmatpush1.bf16.msra.mxu0 %v16466_v55  ;;  %v4425_v17 = vmax.f32 %v4405_v56, 0.0  ;;  %v16501_v55 = vld [vmem:[#allocation9 + $0x664] ss:$16 sps:$4 sm:$0xff]   ;;  %v16505_v13 = vld [vmem:[#allocation9 + $0x640] ss:$16 sps:$4 sm:$0xff]  }
 0x397   : > { %v18576_v47 = vpop.f32.mrf.mxu1  ;;  %v4357_v14 = vpop.f32.mrf.mxu0  ;;  %7777 = vmatprep.subr.bf16.mxu0 %v16474_v8  ;;  %v16502_v8 = vld [vmem:[#allocation9 + $0xc00] ss:$16 sps:$4 sm:$0xff]   ;;  %v16507_v56 = vld [vmem:[#allocation9 + $0x644] ss:$16 sps:$4 sm:$0xff]  }
 0x398   : > { %v4426_v3 = vmax.f32 %v4407_v21, 0.0  ;;  %v4358_v46 = vadd.f32 %v4357_v14, %v4305_v51  ;;  %v18581_v35 = vpack.c.bf16 %v4425_v17, %v4425_v17  ;;  %v16510_v45 = vld [vmem:[#allocation9 + $0xde4] ss:$16 sps:$4 sm:$0xff]   ;;  %v16508_v51 = vld [vmem:[#allocation9 + $0xde0] ss:$16 sps:$4 sm:$0xff]  }
 0x399   : > { %v4410_v32 = vpop.f32.mrf.mxu1  ;;  %v4361_v4 = vpop.f32.mrf.mxu0  ;;  %v16513_v21 = vld [vmem:[#allocation9 + $0x624] ss:$16 sps:$4 sm:$0xff]   ;;  %v16511_v17 = vld [vmem:[#allocation9 + $0x620] ss:$16 sps:$4 sm:$0xff]  }
 0x39a   : > { %v18578_v25 = vpack.c.bf16 %v4426_v3, %v4426_v3  ;;  %v4411_v33 = vadd.f32 %v4410_v32, %v4358_v46  ;;  %v4362_v50 = vadd.f32 %v4361_v4, %v18533_v52  ;;  %7778 = vmatpush1.bf16.msra.mxu0 %v16472_v61  ;;  %v16516_v61 = vld [vmem:[#allocation9 + $0xdc4] ss:$16 sps:$4 sm:$0xff]   ;;  %v16514_v14 = vld [vmem:[#allocation9 + $0xdc0] ss:$16 sps:$4 sm:$0xff]  }
 0x39b   : > { %v4414_v1 = vpop.f32.mrf.mxu1  ;;  %v18583_v31 = vpop.f32.mrf.mxu0  ;;  %7779 = vmatprep.subr.bf16.mxu0 %v16480_v60  ;;  %v16519_v60 = vld [vmem:[#allocation9 + $0x604] ss:$16 sps:$4 sm:$0xff]   ;;  %v16517_v46 = vld [vmem:[#allocation9 + $0x600] ss:$16 sps:$4 sm:$0xff]  }
 0x39c   : > { %v4430_v36 = vmax.f32 %v4411_v33, 0.0  ;;  %v18585_v12 = vadd.f32 %v4414_v1, %v4362_v50  ;;  %7600 = vmatprep.mubr.bf16.mxu1 %v18578_v25  ;;  %v16522_v3 = vld [vmem:[#allocation9 + $0xda4] ss:$16 sps:$4 sm:$0xff]   ;;  %v16520_v32 = vld [vmem:[#allocation9 + $0xda0] ss:$16 sps:$4 sm:$0xff]  }
 0x39d   : > { %v18588_v34 = vpop.f32.mrf.mxu1  ;;  %v4365_v11 = vpop.f32.mrf.mxu0  ;;  %7601 = vmatmul.mubr.bf16.vlgmr.msra.gmra.mxu1 %v18581_v35  ;;  %v16525_v4 = vld [vmem:[#allocation9 + $0x7e4] ss:$16 sps:$4 sm:$0xff]   ;;  %v16523_v50 = vld [vmem:[#allocation9 + $0x7e0] ss:$16 sps:$4 sm:$0xff]  }
 0x39e   : > { %v18591_v52 = vpack.c.bf16 %v4430_v36, %v4430_v36  ;;  %v4366_v39 = vadd.f32 %v4365_v11, %v18539_v43  ;;  %7651 = vmatpush1.bf16.msra.mxu1 %v16475_v9  ;;  %7780 = vmatpush1.bf16.msra.mxu0 %v16478_v20  ;;  %v16495_v43 = vld [vmem:[#allocation9 + $0x684] ss:$16 sps:$4 sm:$0xff]   ;;  %v16526_v9 = vld [vmem:[#allocation9 + $0xd80] ss:$16 sps:$4 sm:$0xff]  }
 0x39f   : > { %v4418_v22 = vpop.f32.mrf.mxu1  ;;  %7652 = vmatprep.subr.bf16.mxu1 %v16483_v54  ;;  %7781 = vmatprep.subr.bf16.mxu0 %v16486_v19  ;;  %v16528_v33 = vld [vmem:[#allocation9 + $0xd84] ss:$16 sps:$4 sm:$0xff]   ;;  %v16529_v54 = vld [vmem:[#allocation9 + $0x7c0] ss:$16 sps:$4 sm:$0xff]  }
 0x3a0   : > { %v18594_v41 = vadd.f32 %v4418_v22, %v4366_v39  ;;  %7682 = vmatprep.mubr.bf16.mxu1 %v18591_v52  ;;  %v16531_v20 = vld [vmem:[#allocation9 + $0x7c4] ss:$16 sps:$4 sm:$0xff]   ;;  %v16532_v19 = vld [vmem:[#allocation9 + $0xd60] ss:$16 sps:$4 sm:$0xff]  }
 0x3a1   : > { %v16534_v1 = vld [vmem:[#allocation9 + $0xd64] ss:$16 sps:$4 sm:$0xff]   ;;  %v16535_v39 = vld [vmem:[#allocation9 + $0x7a0] ss:$16 sps:$4 sm:$0xff]  }
 0x3a2   : > { %7653 = vmatpush1.bf16.msra.mxu1 %v16481_v30  ;;  %7782 = vmatpush1.bf16.msra.mxu0 %v16484_v0  ;;  %v16537_v36 = vld [vmem:[#allocation9 + $0x7a4] ss:$16 sps:$4 sm:$0xff]   ;;  %v16538_v30 = vld [vmem:[#allocation9 + $0xd40] ss:$16 sps:$4 sm:$0xff]  }
 0x3a3   : > { %7654 = vmatprep.subr.bf16.mxu1 %v16489_v53  ;;  %7783 = vmatprep.subr.bf16.mxu0 %v16492_v18  ;;  %v16540_v11 = vld [vmem:[#allocation9 + $0xd44] ss:$16 sps:$4 sm:$0xff]   ;;  %v16541_v53 = vld [vmem:[#allocation9 + $0x780] ss:$16 sps:$4 sm:$0xff]  }
 0x3a4   : > { %v16543_v0 = vld [vmem:[#allocation9 + $0x784] ss:$16 sps:$4 sm:$0xff]   ;;  %v16544_v18 = vld [vmem:[#allocation9 + $0xd20] ss:$16 sps:$4 sm:$0xff]  }
 0x3a5   : > { %v16546_v22 = vld [vmem:[#allocation9 + $0xd24] ss:$16 sps:$4 sm:$0xff]  }
 0x3a6   : > { %7655 = vmatpush1.bf16.msra.mxu1 %v16487_v49  ;;  %7784 = vmatpush1.bf16.msra.mxu0 %v16490_v59  ;;  %v16549_v49 = vld [vmem:[#allocation9 + $0x764] ss:$16 sps:$4 sm:$0xff]  }
 0x3a7   : > { %7656 = vmatprep.subr.bf16.mxu1 %v16495_v43  ;;  %7785 = vmatprep.subr.bf16.mxu0 %v16498_v5  ;;  %v16552_v59 = vld [vmem:[#allocation9 + $0xd04] ss:$16 sps:$4 sm:$0xff]   ;;  %v16547_v43 = vld [vmem:[#allocation9 + $0x760] ss:$16 sps:$4 sm:$0xff]  }
 0x3a8   : > { %v16550_v5 = vld [vmem:[#allocation9 + $0xd00] ss:$16 sps:$4 sm:$0xff]  }
 0x3aa   : > { %7657 = vmatpush1.bf16.msra.mxu1 %v16493_v44  ;;  %7786 = vmatpush1.bf16.msra.mxu0 %v16496_v37  ;;  %v4435_v44 = vmax.f32 %v18449_v48, 0.0  ;;  %v16555_v37 = vld [vmem:[#allocation9 + $0x744] ss:$16 sps:$4 sm:$0xff]   ;;  %v4364_v48 = vadd.f32 %v18583_v31, %v18536_v27 }
 0x3ab   : > { %7658 = vmatprep.subr.bf16.mxu1 %v16501_v55  ;;  %7787 = vmatprep.subr.bf16.mxu0 %v16504_v24  ;;  %v16558_v55 = vld [vmem:[#allocation9 + $0xec] ss:$16 sps:$4 sm:$0xff]   ;;  %v16553_v24 = vld [vmem:[#allocation9 + $0x740] ss:$16 sps:$4 sm:$0xff]  }
 0x3ac   : > { %v4417_v27 = vadd.f32 %v18588_v34, %v4364_v48  ;;  %v16574_v34 = vld [vmem:[#allocation9 + $0x88] ss:$16 sps:$4 sm:$0xff]   ;;  %v16607_v48 = vld [vmem:[#allocation9 + $0xa20] ss:$16 sps:$4 sm:$0xff]  }
 0x3ae   : > { %7659 = vmatpush1.bf16.msra.mxu1 %v16499_v62  ;;  %7788 = vmatpush1.bf16.msra.mxu0 %v16502_v8  ;;  %v16556_v62 = vld [vmem:[#allocation9 + $0xe8] ss:$16 sps:$4 sm:$0xff]   ;;  %v18598_v8 = vpack.c.bf16 %v4435_v44, %v4435_v44 }
 0x3af   : > { %7660 = vmatprep.subr.bf16.mxu1 %v16507_v56  ;;  %7789 = vmatprep.subr.bf16.mxu0 %v16510_v45  ;;  %v4356_v56 = vadd.f32 %v18573_v16, %v18528_v15  ;;  %v18602_v45 = vpop.f32.mrf.mxu0  ;;  %v16567_v16 = vld [vmem:[#allocation9 + $0x704] ss:$16 sps:$4 sm:$0xff]   ;;  %v16598_v44 = vld [vmem:[#allocation9 + $0x8] ss:$16 sps:$4 sm:$0xff]  }
 0x3b2   : > { %7661 = vmatpush1.bf16.msra.mxu1 %v16505_v13  ;;  %7790 = vmatpush2.bf16.msra.mxu0 %v16508_v51  ;;  %v16561_v13 = vld [vmem:[#allocation9 + $0x724] ss:$16 sps:$4 sm:$0xff]   ;;  %v16564_v51 = vld [vmem:[#allocation9 + $0xcc] ss:$16 sps:$4 sm:$0xff]  }
 0x3b3   : > { %7662 = vmatprep.subr.bf16.mxu1 %v16513_v21  ;;  %7791 = vmatprep.subr.bf16.mxu0 %v16516_v61  ;;  %v16559_v61 = vld [vmem:[#allocation9 + $0x720] ss:$16 sps:$4 sm:$0xff]  }
 0x3b6   : > { %7663 = vmatpush1.bf16.msra.mxu1 %v16511_v17  ;;  %7792 = vmatpush2.bf16.msra.mxu0 %v16514_v14  ;;  %v16562_v17 = vld [vmem:[#allocation9 + $0xc8] ss:$16 sps:$4 sm:$0xff]   ;;  %v4409_v14 = vadd.f32 %v18576_v47, %v4356_v56  ;;  %v16573_v47 = vld [vmem:[#allocation9 + $0xae4] ss:$16 sps:$4 sm:$0xff]  }
 0x3b7   : > { %7664 = vmatprep.subr.bf16.mxu1 %v16519_v60  ;;  %7793 = vmatprep.subr.bf16.mxu0 %v16522_v3  ;;  %v16570_v60 = vld [vmem:[#allocation9 + $0xac] ss:$16 sps:$4 sm:$0xff]   ;;  %v16565_v3 = vld [vmem:[#allocation9 + $0x700] ss:$16 sps:$4 sm:$0xff]   ;;  %v16609_v56 = vld [vmem:[#allocation9 + $0xa24] ss:$16 sps:$4 sm:$0xff]  }
 0x3ba   : > { %7665 = vmatpush1.bf16.msra.mxu1 %v16517_v46  ;;  %7794 = vmatpush2.bf16.msra.mxu0 %v16520_v32  ;;  %v16568_v46 = vld [vmem:[#allocation9 + $0xa8] ss:$16 sps:$4 sm:$0xff]   ;;  %v4429_v32 = vmax.f32 %v4409_v14, 0.0  ;;  %v16613_v14 = vld [vmem:[#allocation9 + $0xa00] ss:$16 sps:$4 sm:$0xff]  }
 0x3bb   : > { %7666 = vmatprep.subr.bf16.mxu1 %v16525_v4  ;;  %7795 = vmatprep.subr.bf16.mxu0 %v16528_v33  ;;  %v16576_v33 = vld [vmem:[#allocation9 + $0x8c] ss:$16 sps:$4 sm:$0xff]  }
 0x3be   : > { %7667 = vmatpush2.bf16.msra.mxu1 %v16523_v50  ;;  %7796 = vmatpush2.bf16.msra.mxu0 %v16526_v9  ;;  %v16571_v50 = vld [vmem:[#allocation9 + $0xae0] ss:$16 sps:$4 sm:$0xff]   ;;  %v18614_v9 = vpack.c.bf16 %v4429_v32, %v4429_v32  ;;  %v16630_v32 = vld [vmem:[#allocation9 + $0x16c] ss:$16 sps:$4 sm:$0xff]  }
 0x3bf   : > { %7668 = vmatprep.subr.bf16.mxu1 %v16531_v20  ;;  %7797 = vmatprep.subr.bf16.mxu0 %v16534_v1  ;;  %v16579_v20 = vld [vmem:[#allocation9 + $0xac4] ss:$16 sps:$4 sm:$0xff]  }
 0x3c2   : > { %7669 = vmatpush2.bf16.msra.mxu1 %v16529_v54  ;;  %7798 = vmatpush2.bf16.msra.mxu0 %v16532_v19  ;;  %v16582_v54 = vld [vmem:[#allocation9 + $0x6c] ss:$16 sps:$4 sm:$0xff]   ;;  %v16577_v19 = vld [vmem:[#allocation9 + $0xac0] ss:$16 sps:$4 sm:$0xff]  }
 0x3c3   : > { %7670 = vmatprep.subr.bf16.mxu1 %v16537_v36  ;;  %7799 = vmatprep.subr.bf16.mxu0 %v16540_v11  ;;  %v16580_v36 = vld [vmem:[#allocation9 + $0x68] ss:$16 sps:$4 sm:$0xff]   ;;  %v16585_v11 = vld [vmem:[#allocation9 + $0xaa4] ss:$16 sps:$4 sm:$0xff]  }
 0x3c6   : > { %7671 = vmatpush2.bf16.msra.mxu1 %v16535_v39  ;;  %7800 = vmatpush2.bf16.msra.mxu0 %v16538_v30  ;;  %v16588_v39 = vld [vmem:[#allocation9 + $0x4c] ss:$16 sps:$4 sm:$0xff]   ;;  %v16583_v30 = vld [vmem:[#allocation9 + $0xaa0] ss:$16 sps:$4 sm:$0xff]  }
 0x3c7   : > { %7672 = vmatprep.subr.bf16.mxu1 %v16543_v0  ;;  %7801 = vmatprep.subr.bf16.mxu0 %v16546_v22  ;;  %v16586_v0 = vld [vmem:[#allocation9 + $0x48] ss:$16 sps:$4 sm:$0xff]   ;;  %v16591_v22 = vld [vmem:[#allocation9 + $0xa84] ss:$16 sps:$4 sm:$0xff]  }
 0x3ca   : > { %7673 = vmatpush2.bf16.msra.mxu1 %v16541_v53  ;;  %7802 = vmatpush2.bf16.msra.mxu0 %v16544_v18  ;;  %v16594_v53 = vld [vmem:[#allocation9 + $0x2c] ss:$16 sps:$4 sm:$0xff]   ;;  %v16589_v18 = vld [vmem:[#allocation9 + $0xa80] ss:$16 sps:$4 sm:$0xff]  }
 0x3cb   : > { %7674 = vmatprep.subr.bf16.mxu1 %v16549_v49  ;;  %7803 = vmatprep.subr.bf16.mxu0 %v16552_v59  ;;  %v16592_v49 = vld [vmem:[#allocation9 + $0x28] ss:$16 sps:$4 sm:$0xff]   ;;  %v16597_v59 = vld [vmem:[#allocation9 + $0xa64] ss:$16 sps:$4 sm:$0xff]  }
 0x3ce   : > { %7675 = vmatpush2.bf16.msra.mxu1 %v16547_v43  ;;  %7804 = vmatpush2.bf16.msra.mxu0 %v16550_v5  ;;  %v16600_v43 = vld [vmem:[#allocation9 + $0xc] ss:$16 sps:$4 sm:$0xff]   ;;  %v16595_v5 = vld [vmem:[#allocation9 + $0xa60] ss:$16 sps:$4 sm:$0xff]  }
 0x3cf   : > { %7676 = vmatprep.subr.bf16.mxu1 %v16555_v37  ;;  %7855 = vmatprep.subr.bf16.mxu0 %v16558_v55  ;;  %v16603_v37 = vld [vmem:[#allocation9 + $0xa44] ss:$16 sps:$4 sm:$0xff]   ;;  %v16606_v55 = vld [vmem:[#allocation9 + $0x1ec] ss:$16 sps:$4 sm:$0xff]  }
 0x3d1   : > { %v18606_v21 = vpop.f32.mrf.mxu0  ;;  %7806 = vmatmul.mubr.bf16.vlgmr.msra.gmra.mxu0 %v18598_v8 }
 0x3d2   : > { %7677 = vmatpush2.bf16.msra.mxu1 %v16553_v24  ;;  %7856 = vmatpush1.bf16.msra.mxu0 %v16556_v62  ;;  %v16601_v24 = vld [vmem:[#allocation9 + $0xa40] ss:$16 sps:$4 sm:$0xff]   ;;  %v16604_v62 = vld [vmem:[#allocation9 + $0x1e8] ss:$16 sps:$4 sm:$0xff]  }
 0x3d3   : > { %7887 = vmatprep.mubr.bf16.mxu0 %v18437_v42  ;;  %v18611_v15 = vpop.f32.mrf.mxu0  ;;  %7678 = vmatprep.subr.bf16.mxu1 %v16561_v13  ;;  %v4434_v42 = vmax.f32 %v4417_v27, 0.0  ;;  %v16612_v13 = vld [vmem:[#allocation9 + $0x1cc] ss:$16 sps:$4 sm:$0xff]  }
 0x3d4   : > { %7857 = vmatprep.subr.bf16.mxu0 %v16564_v51  ;;  %v16610_v51 = vld [vmem:[#allocation9 + $0x1c8] ss:$16 sps:$4 sm:$0xff]   ;;  %v16624_v27 = vld [vmem:[#allocation9 + $0x18c] ss:$16 sps:$4 sm:$0xff]  }
 0x3d5   : > { %v7565_v31 = vpop.f32.mrf.mxu0  ;;  %v18616_v1 = vpack.c.bf16 %v4434_v42, %v4434_v42  ;;  %v16636_v42 = vld [vmem:[#allocation9 + $0x14c] ss:$16 sps:$4 sm:$0xff]  }
 0x3d6   : > { %7679 = vmatpush2.bf16.msra.mxu1 %v16559_v61  ;;  %7858 = vmatpush1.bf16.msra.mxu0 %v16562_v17  ;;  %v16615_v61 = vld [vmem:[#allocation9 + $0xa04] ss:$16 sps:$4 sm:$0xff]   ;;  %v16618_v17 = vld [vmem:[#allocation9 + $0x1ac] ss:$16 sps:$4 sm:$0xff]   ;;  %v16619_v31 = vld [vmem:[#allocation9 + $0xbe0] ss:$16 sps:$4 sm:$0xff]  }
 0x3d7   : > { %v7566_v4 = vpop.f32.mrf.mxu0  ;;  %7680 = vmatprep.subr.bf16.mxu1 %v16567_v16  ;;  %7859 = vmatprep.subr.bf16.mxu0 %v16570_v60  ;;  %v16616_v16 = vld [vmem:[#allocation9 + $0x1a8] ss:$16 sps:$4 sm:$0xff]   ;;  %v16621_v60 = vld [vmem:[#allocation9 + $0xbe4] ss:$16 sps:$4 sm:$0xff]  }
 0x3d8   : > { %v16625_v4 = vld [vmem:[#allocation9 + $0xbc0] ss:$16 sps:$4 sm:$0xff]  }
 0x3da   : > { %7681 = vmatpush2.bf16.msra.mxu1 %v16565_v3  ;;  %7860 = vmatpush1.bf16.msra.mxu0 %v16568_v46  ;;  %v16622_v3 = vld [vmem:[#allocation9 + $0x188] ss:$16 sps:$4 sm:$0xff]   ;;  %v16627_v46 = vld [vmem:[#allocation9 + $0xbc4] ss:$16 sps:$4 sm:$0xff]  }
 0x3db   : > { %7732 = vmatprep.subr.bf16.mxu1 %v16573_v47  ;;  %7861 = vmatprep.subr.bf16.mxu0 %v16576_v33  ;;  %v16628_v47 = vld [vmem:[#allocation9 + $0x168] ss:$16 sps:$4 sm:$0xff]   ;;  %v16633_v33 = vld [vmem:[#allocation9 + $0xba4] ss:$16 sps:$4 sm:$0xff]  }
 0x3dd   : > { %7683 = vmatmul.mubr.bf16.vlgmr.msra.gmra.mxu1 %v18614_v9 }
 0x3de   : > { %7733 = vmatpush1.bf16.msra.mxu1 %v16571_v50  ;;  %7764 = vmatprep.mubr.bf16.mxu1 %v18616_v1  ;;  %v16631_v50 = vld [vmem:[#allocation9 + $0xba0] ss:$16 sps:$4 sm:$0xff]  }
 0x3df   : > { %7862 = vmatpush1.bf16.msra.mxu0 %v16574_v34  ;;  %7734 = vmatprep.subr.bf16.mxu1 %v16579_v20  ;;  %v16634_v34 = vld [vmem:[#allocation9 + $0x148] ss:$16 sps:$4 sm:$0xff]   ;;  %v16639_v20 = vld [vmem:[#allocation9 + $0xb84] ss:$16 sps:$4 sm:$0xff]  }
 0x3e0   : > { %7863 = vmatprep.subr.bf16.mxu0 %v16582_v54  ;;  %v4156_v54 = vadd.f32 %v18509_v23, %v18492_v57  ;;  %v16651_v57 = vld [vmem:[#allocation9 + $0xb44] ss:$16 sps:$4 sm:$0xff]   ;;  %v16654_v23 = vld [vmem:[#allocation9 + $0x4ec] ss:$16 sps:$4 sm:$0xff]  }
 0x3e2   : > { %7735 = vmatpush1.bf16.msra.mxu1 %v16577_v19  ;;  %v16642_v19 = vld [vmem:[#allocation9 + $0x12c] ss:$16 sps:$4 sm:$0xff]  }
 0x3e3   : > { %7864 = vmatpush1.bf16.msra.mxu0 %v16580_v36  ;;  %7736 = vmatprep.subr.bf16.mxu1 %v16585_v11  ;;  %v16637_v36 = vld [vmem:[#allocation9 + $0xb80] ss:$16 sps:$4 sm:$0xff]   ;;  %v16640_v11 = vld [vmem:[#allocation9 + $0x128] ss:$16 sps:$4 sm:$0xff]  }
 0x3e4   : > { %7865 = vmatprep.subr.bf16.mxu0 %v16588_v39  ;;  %v16645_v39 = vld [vmem:[#allocation9 + $0xb64] ss:$16 sps:$4 sm:$0xff]  }
 0x3e6   : > { %7737 = vmatpush1.bf16.msra.mxu1 %v16583_v30  ;;  %v4209_v30 = vadd.f32 %v18513_v38, %v4156_v54  ;;  %v16688_v54 = vld [vmem:[#allocation9 + $0x428] ss:$16 sps:$4 sm:$0xff]  }
 0x3e7   : > { %7866 = vmatpush1.bf16.msra.mxu0 %v16586_v0  ;;  %7738 = vmatprep.subr.bf16.mxu1 %v16591_v22  ;;  %v16648_v0 = vld [vmem:[#allocation9 + $0x10c] ss:$16 sps:$4 sm:$0xff]  }
 0x3e8   : > { %7867 = vmatprep.subr.bf16.mxu0 %v16594_v53  ;;  %v4262_v22 = vadd.f32 %v18561_v40, %v4209_v30  ;;  %v16643_v53 = vld [vmem:[#allocation9 + $0xb60] ss:$16 sps:$4 sm:$0xff]   ;;  %v16660_v40 = vld [vmem:[#allocation9 + $0x4cc] ss:$16 sps:$4 sm:$0xff]   ;;  %v16694_v30 = vld [vmem:[#allocation9 + $0x408] ss:$16 sps:$4 sm:$0xff]  }
 0x3ea   : > { %7739 = vmatpush1.bf16.msra.mxu1 %v16589_v18  ;;  %v16646_v18 = vld [vmem:[#allocation9 + $0x108] ss:$16 sps:$4 sm:$0xff]  }
 0x3eb   : > { %7868 = vmatpush1.bf16.msra.mxu0 %v16592_v49  ;;  %7740 = vmatprep.subr.bf16.mxu1 %v16597_v59  ;;  %v4315_v49 = vadd.f32 %v18567_v6, %v4262_v22  ;;  %v16649_v59 = vld [vmem:[#allocation9 + $0xb40] ss:$16 sps:$4 sm:$0xff]   ;;  %v16702_v22 = vld [vmem:[#allocation9 + $0x5ec] ss:$16 sps:$4 sm:$0xff]  }
 0x3ec   : > { %7869 = vmatprep.subr.bf16.mxu0 %v16600_v43  ;;  %v16652_v43 = vld [vmem:[#allocation9 + $0x4e8] ss:$16 sps:$4 sm:$0xff]  }
 0x3ed   : > { %v4368_v38 = vadd.f32 %v18602_v45, %v4315_v49  ;;  %v16666_v45 = vld [vmem:[#allocation9 + $0x4ac] ss:$16 sps:$4 sm:$0xff]  }
 0x3ee   : > { %7741 = vmatpush1.bf16.msra.mxu1 %v16595_v5  ;;  %v16657_v5 = vld [vmem:[#allocation9 + $0xb24] ss:$16 sps:$4 sm:$0xff]   ;;  %v16708_v49 = vld [vmem:[#allocation9 + $0x5cc] ss:$16 sps:$4 sm:$0xff]  }
 0x3ef   : > { %7870 = vmatpush1.bf16.msra.mxu0 %v16598_v44  ;;  %7742 = vmatprep.subr.bf16.mxu1 %v16603_v37  ;;  %v16655_v37 = vld [vmem:[#allocation9 + $0xb20] ss:$16 sps:$4 sm:$0xff]  }
 0x3f0   : > { %7871 = vmatprep.subr.bf16.mxu0 %v16606_v55  ;;  %v4420_v55 = vpop.f32.mrf.mxu1 }
 0x3f2   : > { %7743 = vmatpush1.bf16.msra.mxu1 %v16601_v24  ;;  %v16658_v24 = vld [vmem:[#allocation9 + $0x4c8] ss:$16 sps:$4 sm:$0xff]  }
 0x3f3   : > { %7872 = vmatpush2.bf16.msra.mxu0 %v16604_v62  ;;  %7744 = vmatprep.subr.bf16.mxu1 %v16609_v56  ;;  %v16663_v62 = vld [vmem:[#allocation9 + $0xb04] ss:$16 sps:$4 sm:$0xff]   ;;  %v4421_v56 = vadd.f32 %v4420_v55, %v4368_v38 }
 0x3f4   : > { %7873 = vmatprep.subr.bf16.mxu0 %v16612_v13  ;;  %v16711_v38 = vld [vmem:[#allocation9 + $0xe04] ss:$16 sps:$4 sm:$0xff]  }
 0x3f5   : > { %v16717_v55 = vld [vmem:[#allocation9 + $0xfe4] ss:$16 sps:$4 sm:$0xff]  }
 0x3f6   : > { %7745 = vmatpush1.bf16.msra.mxu1 %v16607_v48  ;;  %v16661_v48 = vld [vmem:[#allocation9 + $0xb00] ss:$16 sps:$4 sm:$0xff]  }
 0x3f7   : > { %7874 = vmatpush2.bf16.msra.mxu0 %v16610_v51  ;;  %7746 = vmatprep.subr.bf16.mxu1 %v16615_v61  ;;  %v4433_v51 = vmax.f32 %v18585_v12, 0.0  ;;  %v16664_v61 = vld [vmem:[#allocation9 + $0x4a8] ss:$16 sps:$4 sm:$0xff]   ;;  %v16678_v12 = vld [vmem:[#allocation9 + $0x46c] ss:$16 sps:$4 sm:$0xff]  }
 0x3f8   : > { %7875 = vmatprep.subr.bf16.mxu0 %v16618_v17  ;;  %v16669_v17 = vld [vmem:[#allocation9 + $0xee4] ss:$16 sps:$4 sm:$0xff]  }
 0x3fa   : > { %7747 = vmatpush1.bf16.msra.mxu1 %v16613_v14  ;;  %v4438_v14 = vmax.f32 %v4421_v56, 0.0  ;;  %v16718_v56 = vld [vmem:[#allocation9 + $0x588] ss:$16 sps:$4 sm:$0xff]  }
 0x3fb   : > { %7876 = vmatpush2.bf16.msra.mxu0 %v16616_v16  ;;  %7748 = vmatprep.subr.bf16.mxu1 %v16621_v60  ;;  %v16667_v16 = vld [vmem:[#allocation9 + $0xee0] ss:$16 sps:$4 sm:$0xff]   ;;  %v18633_v60 = vpack.c.bf16 %v4433_v51, %v4433_v51  ;;  %v16724_v51 = vld [vmem:[#allocation9 + $0x568] ss:$16 sps:$4 sm:$0xff]  }
 0x3fc   : > { %7877 = vmatprep.subr.bf16.mxu0 %v16624_v27  ;;  %v16670_v27 = vld [vmem:[#allocation9 + $0x488] ss:$16 sps:$4 sm:$0xff]  }
 0x3fe   : > { %7749 = vmatpush2.bf16.msra.mxu1 %v16619_v31  ;;  %v16675_v31 = vld [vmem:[#allocation9 + $0xec4] ss:$16 sps:$4 sm:$0xff]  }
 0x3ff   : > { %7878 = vmatpush2.bf16.msra.mxu0 %v16622_v3  ;;  %7750 = vmatprep.subr.bf16.mxu1 %v16627_v46  ;;  %v18635_v3 = vpack.c.bf16 %v4438_v14, %v4438_v14  ;;  %v16673_v46 = vld [vmem:[#allocation9 + $0xec0] ss:$16 sps:$4 sm:$0xff]   ;;  %v16730_v14 = vld [vmem:[#allocation9 + $0x548] ss:$16 sps:$4 sm:$0xff]  }
 0x400   : > { %7879 = vmatprep.subr.bf16.mxu0 %v16630_v32  ;;  %v16676_v32 = vld [vmem:[#allocation9 + $0x468] ss:$16 sps:$4 sm:$0xff]  }
 0x402   : > { %7751 = vmatpush2.bf16.msra.mxu1 %v16625_v4  ;;  %v16681_v4 = vld [vmem:[#allocation9 + $0xea4] ss:$16 sps:$4 sm:$0xff]  }
 0x403   : > { %7880 = vmatpush2.bf16.msra.mxu0 %v16628_v47  ;;  %7752 = vmatprep.subr.bf16.mxu1 %v16633_v33  ;;  %v16684_v47 = vld [vmem:[#allocation9 + $0x44c] ss:$16 sps:$4 sm:$0xff]   ;;  %v16679_v33 = vld [vmem:[#allocation9 + $0xea0] ss:$16 sps:$4 sm:$0xff]  }
 0x404   : > { %7881 = vmatprep.subr.bf16.mxu0 %v16636_v42  ;;  %v16682_v42 = vld [vmem:[#allocation9 + $0x448] ss:$16 sps:$4 sm:$0xff]  }
 0x406   : > { %7753 = vmatpush2.bf16.msra.mxu1 %v16631_v50  ;;  %v16687_v50 = vld [vmem:[#allocation9 + $0xe84] ss:$16 sps:$4 sm:$0xff]  }
 0x407   : > { %7882 = vmatpush2.bf16.msra.mxu0 %v16634_v34  ;;  %7754 = vmatprep.subr.bf16.mxu1 %v16639_v20  ;;  %v16690_v34 = vld [vmem:[#allocation9 + $0x42c] ss:$16 sps:$4 sm:$0xff]   ;;  %v16685_v20 = vld [vmem:[#allocation9 + $0xe80] ss:$16 sps:$4 sm:$0xff]  }
 0x408   : > { %7883 = vmatprep.subr.bf16.mxu0 %v16642_v19  ;;  %v16693_v19 = vld [vmem:[#allocation9 + $0xe64] ss:$16 sps:$4 sm:$0xff]  }
 0x40a   : > { %7755 = vmatpush2.bf16.msra.mxu1 %v16637_v36  ;;  %v16696_v36 = vld [vmem:[#allocation9 + $0x40c] ss:$16 sps:$4 sm:$0xff]  }
 0x40b   : > { %7884 = vmatpush2.bf16.msra.mxu0 %v16640_v11  ;;  %7756 = vmatprep.subr.bf16.mxu1 %v16645_v39  ;;  %v16691_v11 = vld [vmem:[#allocation9 + $0xe60] ss:$16 sps:$4 sm:$0xff]   ;;  %v8186_v39 = vld [vmem:[%s21135_s5 + $0x10] sm:$0xff] }
 0x40c   : > { %7885 = vmatprep.subr.bf16.mxu0 %v16648_v0  ;;  %v16699_v0 = vld [vmem:[#allocation9 + $0xe44] ss:$16 sps:$4 sm:$0xff]   ;;  %8188 = vrot.lane.b32.xlu0 %v8186_v39, %s17803_s2 }
 0x40d   : > { %v16759_v39 = vld [vmem:[#allocation9 + $0xf04] ss:$16 sps:$4 sm:$0xff]  }
 0x40e   : > { %7757 = vmatpush2.bf16.msra.mxu1 %v16643_v53  ;;  %v16697_v53 = vld [vmem:[#allocation9 + $0xe40] ss:$16 sps:$4 sm:$0xff]  }
 0x40f   : > { %7886 = vmatpush2.bf16.msra.mxu0 %v16646_v18  ;;  %7758 = vmatprep.subr.bf16.mxu1 %v16651_v57  ;;  %v8194_v18 = vld [vmem:[%s21135_s5 + $0x20] sm:$0xff] }
 0x410   : > { %7937 = vmatprep.subr.bf16.mxu0 %v16654_v23  ;;  %v16700_v57 = vld [vmem:[#allocation9 + $0x5e8] ss:$16 sps:$4 sm:$0xff]   ;;  %v16705_v23 = vld [vmem:[#allocation9 + $0xe24] ss:$16 sps:$4 sm:$0xff]   ;;  %8196 = vrot.lane.b32.xlu0 %v8194_v18, %s17803_s2 }
 0x411   : > { %v18626_v44 = vpop.f32.mrf.mxu0 }
 0x412   : > { %7759 = vmatpush2.bf16.msra.mxu1 %v16649_v59  ;;  %7888 = vmatmul.mubr.bf16.vlgmr.msra.gmra.mxu0 %v18461_v2  ;;  %v16703_v59 = vld [vmem:[#allocation9 + $0xe20] ss:$16 sps:$4 sm:$0xff]  }
 0x413   : > { %7938 = vmatpush1.bf16.msra.mxu0 %v16652_v43  ;;  %7969 = vmatprep.mubr.bf16.mxu0 %v18465_v26  ;;  %v18630_v6 = vpop.f32.mrf.mxu0  ;;  %v16672_v26 = vld [vmem:[#allocation9 + $0x48c] ss:$16 sps:$4 sm:$0xff]   ;;  %v16706_v43 = vld [vmem:[#allocation9 + $0x5c8] ss:$16 sps:$4 sm:$0xff]  }
 0x414   : > { %7760 = vmatprep.subr.bf16.mxu1 %v16657_v5  ;;  %7939 = vmatprep.subr.bf16.mxu0 %v16660_v40  ;;  %v16714_v5 = vld [vmem:[#allocation9 + $0x5ac] ss:$16 sps:$4 sm:$0xff]   ;;  %v16709_v40 = vld [vmem:[#allocation9 + $0xe00] ss:$16 sps:$4 sm:$0xff]  }
 0x415   : > { %v7647_v13 = vpop.f32.mrf.mxu0 }
 0x416   : > { %7761 = vmatpush2.bf16.msra.mxu1 %v16655_v37  ;;  %v16712_v37 = vld [vmem:[#allocation9 + $0x5a8] ss:$16 sps:$4 sm:$0xff]   ;;  %v16726_v13 = vld [vmem:[#allocation9 + $0x56c] ss:$16 sps:$4 sm:$0xff]  }
 0x417   : > { %7940 = vmatpush1.bf16.msra.mxu0 %v16658_v24  ;;  %v7648_v2 = vpop.f32.mrf.mxu0  ;;  %7762 = vmatprep.subr.bf16.mxu1 %v16663_v62  ;;  %v16720_v24 = vld [vmem:[#allocation9 + $0x58c] ss:$16 sps:$4 sm:$0xff]   ;;  %v16715_v62 = vld [vmem:[#allocation9 + $0xfe0] ss:$16 sps:$4 sm:$0xff]  }
 0x418   : > { %7941 = vmatprep.subr.bf16.mxu0 %v16666_v45  ;;  %v16723_v45 = vld [vmem:[#allocation9 + $0xfc4] ss:$16 sps:$4 sm:$0xff]  }
 0x419   : > { %v16729_v2 = vld [vmem:[#allocation9 + $0xfa4] ss:$16 sps:$4 sm:$0xff]  }
 0x41a   : > { %7763 = vmatpush2.bf16.msra.mxu1 %v16661_v48  ;;  %v16721_v48 = vld [vmem:[#allocation9 + $0xfc0] ss:$16 sps:$4 sm:$0xff]  }
 0x41b   : > { %7942 = vmatpush1.bf16.msra.mxu0 %v16664_v61  ;;  %7814 = vmatprep.subr.bf16.mxu1 %v16669_v17  ;;  %v16732_v61 = vld [vmem:[#allocation9 + $0x54c] ss:$16 sps:$4 sm:$0xff]   ;;  %v16727_v17 = vld [vmem:[#allocation9 + $0xfa0] ss:$16 sps:$4 sm:$0xff]  }
 0x41c   : > { %7943 = vmatprep.subr.bf16.mxu0 %v16672_v26  ;;  %v16735_v26 = vld [vmem:[#allocation9 + $0xf84] ss:$16 sps:$4 sm:$0xff]  }
 0x41d   : > { %7765 = vmatmul.mubr.bf16.vlgmr.msra.gmra.mxu1 %v18633_v60 }
 0x41e   : > { %7815 = vmatpush1.bf16.msra.mxu1 %v16667_v16  ;;  %7846 = vmatprep.mubr.bf16.mxu1 %v18635_v3  ;;  %v16738_v16 = vld [vmem:[#allocation9 + $0x52c] ss:$16 sps:$4 sm:$0xff]  }
 0x41f   : > { %7944 = vmatpush1.bf16.msra.mxu0 %v16670_v27  ;;  %7816 = vmatprep.subr.bf16.mxu1 %v16675_v31  ;;  %v16733_v27 = vld [vmem:[#allocation9 + $0xf80] ss:$16 sps:$4 sm:$0xff]   ;;  %v16736_v31 = vld [vmem:[#allocation9 + $0x528] ss:$16 sps:$4 sm:$0xff]  }
 0x420   : > { %7945 = vmatprep.subr.bf16.mxu0 %v16678_v12  ;;  %v16741_v12 = vld [vmem:[#allocation9 + $0xf64] ss:$16 sps:$4 sm:$0xff]  }
 0x422   : > { %7817 = vmatpush1.bf16.msra.mxu1 %v16673_v46  ;;  %v16744_v46 = vld [vmem:[#allocation9 + $0x50c] ss:$16 sps:$4 sm:$0xff]  }
 0x423   : > { %7946 = vmatpush1.bf16.msra.mxu0 %v16676_v32  ;;  %7818 = vmatprep.subr.bf16.mxu1 %v16681_v4  ;;  %v16739_v32 = vld [vmem:[#allocation9 + $0xf60] ss:$16 sps:$4 sm:$0xff]   ;;  %v16742_v4 = vld [vmem:[#allocation9 + $0x508] ss:$16 sps:$4 sm:$0xff]  }
 0x424   : > { %7947 = vmatprep.subr.bf16.mxu0 %v16684_v47  ;;  %v16747_v47 = vld [vmem:[#allocation9 + $0xf44] ss:$16 sps:$4 sm:$0xff]  }
 0x426   : > { %7819 = vmatpush1.bf16.msra.mxu1 %v16679_v33  ;;  %v16750_v33 = vld [vmem:[#allocation9 + $0x8ec] ss:$16 sps:$4 sm:$0xff]  }
 0x427   : > { %7948 = vmatpush1.bf16.msra.mxu0 %v16682_v42  ;;  %7820 = vmatprep.subr.bf16.mxu1 %v16687_v50  ;;  %v16745_v42 = vld [vmem:[#allocation9 + $0xf40] ss:$16 sps:$4 sm:$0xff]   ;;  %v16748_v50 = vld [vmem:[#allocation9 + $0x8e8] ss:$16 sps:$4 sm:$0xff]  }
 0x428   : > { %7949 = vmatprep.subr.bf16.mxu0 %v16690_v34  ;;  %v16753_v34 = vld [vmem:[#allocation9 + $0xf24] ss:$16 sps:$4 sm:$0xff]  }
 0x42a   : > { %7821 = vmatpush1.bf16.msra.mxu1 %v16685_v20  ;;  %v16756_v20 = vld [vmem:[#allocation9 + $0x8cc] ss:$16 sps:$4 sm:$0xff]  }
 0x42b   : > { %7950 = vmatpush1.bf16.msra.mxu0 %v16688_v54  ;;  %7822 = vmatprep.subr.bf16.mxu1 %v16693_v19  ;;  %v16751_v19 = vld [vmem:[#allocation9 + $0xf20] ss:$16 sps:$4 sm:$0xff]  }
 0x42c   : > { %7951 = vmatprep.subr.bf16.mxu0 %v16696_v36 }
 0x42e   : > { %7823 = vmatpush1.bf16.msra.mxu1 %v16691_v11  ;;  %v16754_v11 = vld [vmem:[#allocation9 + $0x8c8] ss:$16 sps:$4 sm:$0xff]  }
 0x42f   : > { %7952 = vmatpush1.bf16.msra.mxu0 %v16694_v30  ;;  %7824 = vmatprep.subr.bf16.mxu1 %v16699_v0  ;;  %v16762_v30 = vld [vmem:[#allocation9 + $0x8ac] ss:$16 sps:$4 sm:$0xff]  }
 0x430   : > { %7953 = vmatprep.subr.bf16.mxu0 %v16702_v22  ;;  %v16757_v22 = vld [vmem:[#allocation9 + $0xf00] ss:$16 sps:$4 sm:$0xff]  }
 0x432   : > { %7825 = vmatpush1.bf16.msra.mxu1 %v16697_v53  ;;  %v4437_v53 = vmax.f32 %v18594_v41, 0.0 }
 0x433   : > { %7954 = vmatpush2.bf16.msra.mxu0 %v16700_v57  ;;  %7826 = vmatprep.subr.bf16.mxu1 %v16705_v23  ;;  %v16765_v57 = vld [vmem:[#allocation9 + $0x2ec] ss:$16 sps:$4 sm:$0xff]  }
 0x434   : > { %7955 = vmatprep.subr.bf16.mxu0 %v16708_v49  ;;  %v16768_v23 = vld [vmem:[#allocation9 + $0x88c] ss:$16 sps:$4 sm:$0xff]   ;;  %v18654_v49 = vpack.c.bf16 %v4437_v53, %v4437_v53  ;;  %v16820_v53 = vld [vmem:[#allocation9 + $0x968] ss:$16 sps:$4 sm:$0xff]  }
 0x436   : > { %7827 = vmatpush1.bf16.msra.mxu1 %v16703_v59  ;;  %v16766_v59 = vld [vmem:[#allocation9 + $0x888] ss:$16 sps:$4 sm:$0xff]  }
 0x437   : > { %7956 = vmatpush2.bf16.msra.mxu0 %v16706_v43  ;;  %7828 = vmatprep.subr.bf16.mxu1 %v16711_v38  ;;  %v16771_v43 = vld [vmem:[#allocation9 + $0x2cc] ss:$16 sps:$4 sm:$0xff]  }
 0x438   : > { %7957 = vmatprep.subr.bf16.mxu0 %v16714_v5  ;;  %v16774_v38 = vld [vmem:[#allocation9 + $0x86c] ss:$16 sps:$4 sm:$0xff]   ;;  %v16769_v5 = vld [vmem:[#allocation9 + $0x2c8] ss:$16 sps:$4 sm:$0xff]  }
 0x43a   : > { %7829 = vmatpush1.bf16.msra.mxu1 %v16709_v40 }
 0x43b   : > { %7958 = vmatpush2.bf16.msra.mxu0 %v16712_v37  ;;  %7830 = vmatprep.subr.bf16.mxu1 %v16717_v55  ;;  %v16772_v37 = vld [vmem:[#allocation9 + $0x868] ss:$16 sps:$4 sm:$0xff]   ;;  %v16777_v55 = vld [vmem:[#allocation9 + $0x2ac] ss:$16 sps:$4 sm:$0xff]  }
 0x43c   : > { %7959 = vmatprep.subr.bf16.mxu0 %v16720_v24  ;;  %v16780_v24 = vld [vmem:[#allocation9 + $0x84c] ss:$16 sps:$4 sm:$0xff]  }
 0x43e   : > { %7831 = vmatpush2.bf16.msra.mxu1 %v16715_v62 }
 0x43f   : > { %7960 = vmatpush2.bf16.msra.mxu0 %v16718_v56  ;;  %7832 = vmatprep.subr.bf16.mxu1 %v16723_v45  ;;  %v16775_v56 = vld [vmem:[#allocation9 + $0x2a8] ss:$16 sps:$4 sm:$0xff]  }
 0x440   : > { %7961 = vmatprep.subr.bf16.mxu0 %v16726_v13  ;;  %v16778_v13 = vld [vmem:[#allocation9 + $0x848] ss:$16 sps:$4 sm:$0xff]  }
 0x442   : > { %7833 = vmatpush2.bf16.msra.mxu1 %v16721_v48  ;;  %v16783_v48 = vld [vmem:[#allocation9 + $0x28c] ss:$16 sps:$4 sm:$0xff]  }
 0x443   : > { %7962 = vmatpush2.bf16.msra.mxu0 %v16724_v51  ;;  %7834 = vmatprep.subr.bf16.mxu1 %v16729_v2  ;;  %v16786_v51 = vld [vmem:[#allocation9 + $0x82c] ss:$16 sps:$4 sm:$0xff]   ;;  %v16784_v2 = vld [vmem:[#allocation9 + $0x828] ss:$16 sps:$4 sm:$0xff]  }
 0x444   : > { %7963 = vmatprep.subr.bf16.mxu0 %v16732_v61  ;;  %v16789_v61 = vld [vmem:[#allocation9 + $0x26c] ss:$16 sps:$4 sm:$0xff]  }
 0x446   : > { %7835 = vmatpush2.bf16.msra.mxu1 %v16727_v17  ;;  %v16792_v17 = vld [vmem:[#allocation9 + $0x80c] ss:$16 sps:$4 sm:$0xff]  }
 0x447   : > { %7964 = vmatpush2.bf16.msra.mxu0 %v16730_v14  ;;  %7836 = vmatprep.subr.bf16.mxu1 %v16735_v26  ;;  %v16787_v14 = vld [vmem:[#allocation9 + $0x268] ss:$16 sps:$4 sm:$0xff]  }
 0x448   : > { %7965 = vmatprep.subr.bf16.mxu0 %v16738_v16  ;;  %v16790_v26 = vld [vmem:[#allocation9 + $0x808] ss:$16 sps:$4 sm:$0xff]   ;;  %v16795_v16 = vld [vmem:[#allocation9 + $0x24c] ss:$16 sps:$4 sm:$0xff]  }
 0x44a   : > { %7837 = vmatpush2.bf16.msra.mxu1 %v16733_v27  ;;  %v16798_v27 = vld [vmem:[#allocation9 + $0x9ec] ss:$16 sps:$4 sm:$0xff]  }
 0x44b   : > { %7966 = vmatpush2.bf16.msra.mxu0 %v16736_v31  ;;  %7838 = vmatprep.subr.bf16.mxu1 %v16741_v12  ;;  %v16793_v31 = vld [vmem:[#allocation9 + $0x248] ss:$16 sps:$4 sm:$0xff]  }
 0x44c   : > { %7967 = vmatprep.subr.bf16.mxu0 %v16744_v46  ;;  %v16796_v12 = vld [vmem:[#allocation9 + $0x9e8] ss:$16 sps:$4 sm:$0xff]   ;;  %v16801_v46 = vld [vmem:[#allocation9 + $0x22c] ss:$16 sps:$4 sm:$0xff]  }
 0x44e   : > { %7839 = vmatpush2.bf16.msra.mxu1 %v16739_v32  ;;  %v16804_v32 = vld [vmem:[#allocation9 + $0x9cc] ss:$16 sps:$4 sm:$0xff]  }
 0x44f   : > { %7968 = vmatpush2.bf16.msra.mxu0 %v16742_v4  ;;  %7840 = vmatprep.subr.bf16.mxu1 %v16747_v47  ;;  %v16799_v4 = vld [vmem:[#allocation9 + $0x228] ss:$16 sps:$4 sm:$0xff]  }
 0x450   : > { %8019 = vmatprep.subr.bf16.mxu0 %v16750_v33  ;;  %v16802_v47 = vld [vmem:[#allocation9 + $0x9c8] ss:$16 sps:$4 sm:$0xff]   ;;  %v16807_v33 = vld [vmem:[#allocation9 + $0x20c] ss:$16 sps:$4 sm:$0xff]  }
 0x451   : > { %v18647_v54 = vpop.f32.mrf.mxu0 }
 0x452   : > { %7841 = vmatpush2.bf16.msra.mxu1 %v16745_v42  ;;  %7970 = vmatmul.mubr.bf16.vlgmr.msra.gmra.mxu0 %v18507_v29  ;;  %v16760_v29 = vld [vmem:[#allocation9 + $0x8a8] ss:$16 sps:$4 sm:$0xff]   ;;  %v16810_v42 = vld [vmem:[#allocation9 + $0x9ac] ss:$16 sps:$4 sm:$0xff]  }
 0x453   : > { %8020 = vmatpush1.bf16.msra.mxu0 %v16748_v50  ;;  %8051 = vmatprep.mubr.bf16.mxu0 %v18511_v58  ;;  %v18651_v36 = vpop.f32.mrf.mxu0  ;;  %v16763_v58 = vld [vmem:[#allocation9 + $0x2e8] ss:$16 sps:$4 sm:$0xff]  }
 0x454   : > { %7842 = vmatprep.subr.bf16.mxu1 %v16753_v34  ;;  %8021 = vmatprep.subr.bf16.mxu0 %v16756_v20  ;;  %v16805_v50 = vld [vmem:[#allocation9 + $0x208] ss:$16 sps:$4 sm:$0xff]   ;;  %v16813_v20 = vld [vmem:[#allocation9 + $0x3ec] ss:$16 sps:$4 sm:$0xff]  }
 0x455   : > { %v7729_v0 = vpop.f32.mrf.mxu0  ;;  %v16808_v34 = vld [vmem:[#allocation9 + $0x9a8] ss:$16 sps:$4 sm:$0xff]  }
 0x456   : > { %7843 = vmatpush2.bf16.msra.mxu1 %v16751_v19  ;;  %v16816_v19 = vld [vmem:[#allocation9 + $0x98c] ss:$16 sps:$4 sm:$0xff]  }
 0x457   : > { %8022 = vmatpush1.bf16.msra.mxu0 %v16754_v11  ;;  %v7730_v18 = vpop.f32.mrf.mxu0  ;;  %7844 = vmatprep.subr.bf16.mxu1 %v16759_v39  ;;  %v16811_v11 = vld [vmem:[#allocation9 + $0x3e8] ss:$16 sps:$4 sm:$0xff]   ;;  %v16822_v0 = vld [vmem:[#allocation9 + $0x96c] ss:$16 sps:$4 sm:$0xff]  }
 0x458   : > { %8023 = vmatprep.subr.bf16.mxu0 %v16762_v30  ;;  %v16814_v39 = vld [vmem:[#allocation9 + $0x988] ss:$16 sps:$4 sm:$0xff]   ;;  %v16819_v30 = vld [vmem:[#allocation9 + $0x3cc] ss:$16 sps:$4 sm:$0xff]  }
 0x459   : > { %v16825_v18 = vld [vmem:[#allocation9 + $0x3ac] ss:$16 sps:$4 sm:$0xff]  }
 0x45a   : > { %7845 = vmatpush2.bf16.msra.mxu1 %v16757_v22  ;;  %v16817_v22 = vld [vmem:[#allocation9 + $0x3c8] ss:$16 sps:$4 sm:$0xff]  }
 0x45b   : > { %8024 = vmatpush1.bf16.msra.mxu0 %v16760_v29  ;;  %7896 = vmatprep.subr.bf16.mxu1 %v16765_v57  ;;  %v16828_v29 = vld [vmem:[#allocation9 + $0x94c] ss:$16 sps:$4 sm:$0xff]   ;;  %v16823_v57 = vld [vmem:[#allocation9 + $0x3a8] ss:$16 sps:$4 sm:$0xff]  }
 0x45c   : > { %8025 = vmatprep.subr.bf16.mxu0 %v16768_v23  ;;  %v16826_v23 = vld [vmem:[#allocation9 + $0x948] ss:$16 sps:$4 sm:$0xff]  }
 0x45d   : > { %7847 = vmatmul.mubr.bf16.vlgmr.msra.gmra.mxu1 %v18654_v49  ;;  %v18657_v41 = vpop.f32.mrf.mxu1 }
 0x45e   : > { %7897 = vmatpush1.bf16.msra.mxu1 %v16763_v58  ;;  %7928 = vmatprep.mubr.bf16.mxu1 %v18578_v25  ;;  %v16781_v25 = vld [vmem:[#allocation9 + $0x288] ss:$16 sps:$4 sm:$0xff]   ;;  %v16831_v58 = vld [vmem:[#allocation9 + $0x38c] ss:$16 sps:$4 sm:$0xff]  }
 0x45f   : > { %8026 = vmatpush1.bf16.msra.mxu0 %v16766_v59  ;;  %v18660_v40 = vpop.f32.mrf.mxu1  ;;  %7898 = vmatprep.subr.bf16.mxu1 %v16771_v43  ;;  %v16834_v59 = vld [vmem:[#allocation9 + $0x92c] ss:$16 sps:$4 sm:$0xff]   ;;  %v16829_v43 = vld [vmem:[#allocation9 + $0x388] ss:$16 sps:$4 sm:$0xff]  }
 0x460   : > { %8027 = vmatprep.subr.bf16.mxu0 %v16774_v38  ;;  %v16832_v38 = vld [vmem:[#allocation9 + $0x928] ss:$16 sps:$4 sm:$0xff]  }
 0x461   : > { %v7606_v62 = vpop.f32.mrf.mxu1 }
 0x462   : > { %7899 = vmatpush1.bf16.msra.mxu1 %v16769_v5  ;;  %v16837_v5 = vld [vmem:[#allocation9 + $0x36c] ss:$16 sps:$4 sm:$0xff]  }
 0x463   : > { %8028 = vmatpush1.bf16.msra.mxu0 %v16772_v37  ;;  %v7607_v45 = vpop.f32.mrf.mxu1  ;;  %7900 = vmatprep.subr.bf16.mxu1 %v16777_v55  ;;  %v16840_v37 = vld [vmem:[#allocation9 + $0x90c] ss:$16 sps:$4 sm:$0xff]   ;;  %v16835_v55 = vld [vmem:[#allocation9 + $0x368] ss:$16 sps:$4 sm:$0xff]  }
 0x464   : > { %8029 = vmatprep.subr.bf16.mxu0 %v16780_v24  ;;  %v16838_v24 = vld [vmem:[#allocation9 + $0x908] ss:$16 sps:$4 sm:$0xff]   ;;  %v16843_v62 = vld [vmem:[#allocation9 + $0x34c] ss:$16 sps:$4 sm:$0xff]  }
 0x465   : > { %v16841_v45 = vld [vmem:[#allocation9 + $0x348] ss:$16 sps:$4 sm:$0xff]  }
 0x466   : > { %7901 = vmatpush1.bf16.msra.mxu1 %v16775_v56  ;;  %v16846_v56 = vld [vmem:[#allocation9 + $0xcec] ss:$16 sps:$4 sm:$0xff]  }
 0x467   : > { %8030 = vmatpush1.bf16.msra.mxu0 %v16778_v13  ;;  %7902 = vmatprep.subr.bf16.mxu1 %v16783_v48  ;;  %v16844_v13 = vld [vmem:[#allocation9 + $0xce8] ss:$16 sps:$4 sm:$0xff]   ;;  %v16849_v48 = vld [vmem:[#allocation9 + $0x32c] ss:$16 sps:$4 sm:$0xff]  }
 0x468   : > { %8031 = vmatprep.subr.bf16.mxu0 %v16786_v51  ;;  %v16852_v51 = vld [vmem:[#allocation9 + $0xccc] ss:$16 sps:$4 sm:$0xff]  }
 0x46a   : > { %7903 = vmatpush1.bf16.msra.mxu1 %v16781_v25 }
 0x46b   : > { %8032 = vmatpush1.bf16.msra.mxu0 %v16784_v2  ;;  %7904 = vmatprep.subr.bf16.mxu1 %v16789_v61  ;;  %v16847_v2 = vld [vmem:[#allocation9 + $0x328] ss:$16 sps:$4 sm:$0xff]  }
 0x46c   : > { %8033 = vmatprep.subr.bf16.mxu0 %v16792_v17  ;;  %v16850_v17 = vld [vmem:[#allocation9 + $0xcc8] ss:$16 sps:$4 sm:$0xff]  }
 0x46e   : > { %7905 = vmatpush1.bf16.msra.mxu1 %v16787_v14  ;;  %v16855_v14 = vld [vmem:[#allocation9 + $0x30c] ss:$16 sps:$4 sm:$0xff]  }
 0x46f   : > { %8034 = vmatpush1.bf16.msra.mxu0 %v16790_v26  ;;  %7906 = vmatprep.subr.bf16.mxu1 %v16795_v16  ;;  %v16858_v26 = vld [vmem:[#allocation9 + $0xcac] ss:$16 sps:$4 sm:$0xff]  }
 0x470   : > { %8035 = vmatprep.subr.bf16.mxu0 %v16798_v27  ;;  %v16853_v27 = vld [vmem:[#allocation9 + $0x308] ss:$16 sps:$4 sm:$0xff]  }
 0x472   : > { %7907 = vmatpush1.bf16.msra.mxu1 %v16793_v31 }
 0x473   : > { %8036 = vmatpush2.bf16.msra.mxu0 %v16796_v12  ;;  %7908 = vmatprep.subr.bf16.mxu1 %v16801_v46  ;;  %v16856_v12 = vld [vmem:[#allocation9 + $0xca8] ss:$16 sps:$4 sm:$0xff]   ;;  %v16861_v46 = vld [vmem:[#allocation9 + $0x6ec] ss:$16 sps:$4 sm:$0xff]  }
 0x474   : > { %8037 = vmatprep.subr.bf16.mxu0 %v16804_v32  ;;  %v7605_v32 = vadd.f32 %v18660_v40, %v18611_v15  ;;  %v16865_v40 = vld [vmem:[#allocation9 + $0x6c8] ss:$16 sps:$4 sm:$0xff]  }
 0x476   : > { %7909 = vmatpush1.bf16.msra.mxu1 %v16799_v4  ;;  %v16859_v4 = vld [vmem:[#allocation9 + $0x6e8] ss:$16 sps:$4 sm:$0xff]  }
 0x477   : > { %8038 = vmatpush2.bf16.msra.mxu0 %v16802_v47  ;;  %7910 = vmatprep.subr.bf16.mxu1 %v16807_v33  ;;  %v8202_v47 = vld [vmem:[%s21135_s5 + $0x30] sm:$0xff] }
 0x478   : > { %8039 = vmatprep.subr.bf16.mxu0 %v16810_v42  ;;  %v16862_v33 = vld [vmem:[#allocation9 + $0xc88] ss:$16 sps:$4 sm:$0xff]   ;;  %v16867_v42 = vld [vmem:[#allocation9 + $0x6cc] ss:$16 sps:$4 sm:$0xff]   ;;  %8204 = vrot.lane.b32.xlu1 %v8202_v47, %s17803_s2 }
 0x479   : > { %v16930_v47 = vld [vmem:[#allocation9 + $0xd2c] ss:$16 sps:$4 sm:$0xff]  }
 0x47a   : > { %7911 = vmatpush1.bf16.msra.mxu1 %v16805_v50 }
 0x47b   : > { %8040 = vmatpush2.bf16.msra.mxu0 %v16808_v34  ;;  %7912 = vmatprep.subr.bf16.mxu1 %v16813_v20  ;;  %v16870_v34 = vld [vmem:[#allocation9 + $0xc6c] ss:$16 sps:$4 sm:$0xff]  }
 0x47c   : > { %8041 = vmatprep.subr.bf16.mxu0 %v16816_v19  ;;  %v16868_v19 = vld [vmem:[#allocation9 + $0xc68] ss:$16 sps:$4 sm:$0xff]  }
 0x47e   : > { %7913 = vmatpush2.bf16.msra.mxu1 %v16811_v11 }
 0x47f   : > { %8042 = vmatpush2.bf16.msra.mxu0 %v16814_v39  ;;  %7914 = vmatprep.subr.bf16.mxu1 %v16819_v30  ;;  %v16876_v39 = vld [vmem:[#allocation9 + $0xc4c] ss:$16 sps:$4 sm:$0xff]  }
 0x480   : > { %8043 = vmatprep.subr.bf16.mxu0 %v16822_v0  ;;  %v8210_v0 = vld [vmem:[%s21135_s5 + $0x40] sm:$0xff] }
 0x481   : > { %8212 = vrot.lane.b32.xlu1 %v8210_v0, %s17803_s2 }
 0x482   : > { %7915 = vmatpush2.bf16.msra.mxu1 %v16817_v22  ;;  %v16879_v22 = vld [vmem:[#allocation9 + $0x68c] ss:$16 sps:$4 sm:$0xff]  }
 0x483   : > { %8044 = vmatpush2.bf16.msra.mxu0 %v16820_v53  ;;  %7916 = vmatprep.subr.bf16.mxu1 %v16825_v18  ;;  %v16882_v53 = vld [vmem:[#allocation9 + $0xc2c] ss:$16 sps:$4 sm:$0xff]   ;;  %v16877_v18 = vld [vmem:[#allocation9 + $0x688] ss:$16 sps:$4 sm:$0xff]  }
 0x484   : > { %8045 = vmatprep.subr.bf16.mxu0 %v16828_v29  ;;  %v16880_v29 = vld [vmem:[#allocation9 + $0xc28] ss:$16 sps:$4 sm:$0xff]  }
 0x486   : > { %7917 = vmatpush2.bf16.msra.mxu1 %v16823_v57  ;;  %v16885_v57 = vld [vmem:[#allocation9 + $0x66c] ss:$16 sps:$4 sm:$0xff]  }
 0x487   : > { %8046 = vmatpush2.bf16.msra.mxu0 %v16826_v23  ;;  %7918 = vmatprep.subr.bf16.mxu1 %v16831_v58  ;;  %v16888_v23 = vld [vmem:[#allocation9 + $0xc0c] ss:$16 sps:$4 sm:$0xff]   ;;  %v16883_v58 = vld [vmem:[#allocation9 + $0x668] ss:$16 sps:$4 sm:$0xff]  }
 0x488   : > { %8047 = vmatprep.subr.bf16.mxu0 %v16834_v59  ;;  %v16886_v59 = vld [vmem:[#allocation9 + $0xc08] ss:$16 sps:$4 sm:$0xff]  }
 0x48a   : > { %7919 = vmatpush2.bf16.msra.mxu1 %v16829_v43  ;;  %v16891_v43 = vld [vmem:[#allocation9 + $0x64c] ss:$16 sps:$4 sm:$0xff]  }
 0x48b   : > { %8048 = vmatpush2.bf16.msra.mxu0 %v16832_v38  ;;  %7920 = vmatprep.subr.bf16.mxu1 %v16837_v5  ;;  %v16894_v38 = vld [vmem:[#allocation9 + $0xdec] ss:$16 sps:$4 sm:$0xff]   ;;  %v16889_v5 = vld [vmem:[#allocation9 + $0x648] ss:$16 sps:$4 sm:$0xff]  }
 0x48c   : > { %8049 = vmatprep.subr.bf16.mxu0 %v16840_v37  ;;  %v16892_v37 = vld [vmem:[#allocation9 + $0xde8] ss:$16 sps:$4 sm:$0xff]  }
 0x48e   : > { %7921 = vmatpush2.bf16.msra.mxu1 %v16835_v55  ;;  %v16897_v55 = vld [vmem:[#allocation9 + $0x62c] ss:$16 sps:$4 sm:$0xff]  }
 0x48f   : > { %8050 = vmatpush2.bf16.msra.mxu0 %v16838_v24  ;;  %7922 = vmatprep.subr.bf16.mxu1 %v16843_v62  ;;  %v16900_v24 = vld [vmem:[#allocation9 + $0xdcc] ss:$16 sps:$4 sm:$0xff]   ;;  %v16895_v62 = vld [vmem:[#allocation9 + $0x628] ss:$16 sps:$4 sm:$0xff]  }
 0x490   : > { %8101 = vmatprep.subr.bf16.mxu0 %v16846_v56  ;;  %v16898_v56 = vld [vmem:[#allocation9 + $0xdc8] ss:$16 sps:$4 sm:$0xff]  }
 0x491   : > { %v18662_v25 = vpop.f32.mrf.mxu0 }
 0x492   : > { %7923 = vmatpush2.bf16.msra.mxu1 %v16841_v45  ;;  %8052 = vmatmul.mubr.bf16.vlgmr.msra.gmra.mxu0 %v18559_v63  ;;  %v7603_v63 = vadd.f32 %v18657_v41, %v18606_v21  ;;  %v7646_v41 = vadd.f32 %v18630_v6, %v7605_v32  ;;  %v16874_v6 = vld [vmem:[#allocation9 + $0xc48] ss:$16 sps:$4 sm:$0xff]   ;;  %v16903_v45 = vld [vmem:[#allocation9 + $0x60c] ss:$16 sps:$4 sm:$0xff]  }
 0x493   : > { %8102 = vmatpush1.bf16.msra.mxu0 %v16844_v13  ;;  %8133 = vmatprep.mubr.bf16.mxu0 %v18563_v28  ;;  %v18666_v61 = vpop.f32.mrf.mxu0  ;;  %v16864_v28 = vld [vmem:[#allocation9 + $0xc8c] ss:$16 sps:$4 sm:$0xff]   ;;  %v16922_v32 = vld [vmem:[#allocation9 + $0xd48] ss:$16 sps:$4 sm:$0xff]  }
 0x494   : > { %7924 = vmatprep.subr.bf16.mxu1 %v16849_v48  ;;  %8103 = vmatprep.subr.bf16.mxu0 %v16852_v51  ;;  %v7644_v50 = vadd.f32 %v18626_v44, %v7603_v63  ;;  %v16873_v44 = vld [vmem:[#allocation9 + $0x6ac] ss:$16 sps:$4 sm:$0xff]   ;;  %v16901_v48 = vld [vmem:[#allocation9 + $0x608] ss:$16 sps:$4 sm:$0xff]  }
 0x495   : > { %v7811_v16 = vpop.f32.mrf.mxu0  ;;  %v16906_v13 = vld [vmem:[#allocation9 + $0xdac] ss:$16 sps:$4 sm:$0xff]   ;;  %v16904_v51 = vld [vmem:[#allocation9 + $0xda8] ss:$16 sps:$4 sm:$0xff]  }
 0x496   : > { %7925 = vmatpush2.bf16.msra.mxu1 %v16847_v2  ;;  %v16909_v2 = vld [vmem:[#allocation9 + $0x7ec] ss:$16 sps:$4 sm:$0xff]  }
 0x497   : > { %8104 = vmatpush1.bf16.msra.mxu0 %v16850_v17  ;;  %v7812_v31 = vpop.f32.mrf.mxu0  ;;  %7926 = vmatprep.subr.bf16.mxu1 %v16855_v14  ;;  %v16912_v17 = vld [vmem:[#allocation9 + $0xd8c] ss:$16 sps:$4 sm:$0xff]   ;;  %v16907_v14 = vld [vmem:[#allocation9 + $0x7e8] ss:$16 sps:$4 sm:$0xff]  }
 0x498   : > { %8105 = vmatprep.subr.bf16.mxu0 %v16858_v26  ;;  %v16910_v26 = vld [vmem:[#allocation9 + $0xd88] ss:$16 sps:$4 sm:$0xff]   ;;  %v16915_v16 = vld [vmem:[#allocation9 + $0x7cc] ss:$16 sps:$4 sm:$0xff]  }
 0x499   : > { %v16913_v31 = vld [vmem:[#allocation9 + $0x7c8] ss:$16 sps:$4 sm:$0xff]   ;;  %v16924_v63 = vld [vmem:[#allocation9 + $0xd4c] ss:$16 sps:$4 sm:$0xff]  }
 0x49a   : > { %7927 = vmatpush2.bf16.msra.mxu1 %v16853_v27  ;;  %v16918_v27 = vld [vmem:[#allocation9 + $0xd6c] ss:$16 sps:$4 sm:$0xff]  }
 0x49b   : > { %8106 = vmatpush1.bf16.msra.mxu0 %v16856_v12  ;;  %7978 = vmatprep.subr.bf16.mxu1 %v16861_v46  ;;  %v16916_v12 = vld [vmem:[#allocation9 + $0xd68] ss:$16 sps:$4 sm:$0xff]   ;;  %v16921_v46 = vld [vmem:[#allocation9 + $0x7ac] ss:$16 sps:$4 sm:$0xff]  }
 0x49c   : > { %8107 = vmatprep.subr.bf16.mxu0 %v16864_v28  ;;  %v16919_v28 = vld [vmem:[#allocation9 + $0x7a8] ss:$16 sps:$4 sm:$0xff]  }
 0x49d   : > { %v7684_v21 = vpop.f32.mrf.mxu1  ;;  %7929 = vmatmul.mubr.bf16.vlgmr.msra.gmra.mxu1 %v18581_v35  ;;  %v16871_v35 = vld [vmem:[#allocation9 + $0x6a8] ss:$16 sps:$4 sm:$0xff]  }
 0x49e   : > { %v18678_v15 = vadd.f32 %v7684_v21, %v7644_v50  ;;  %7979 = vmatpush1.bf16.msra.mxu1 %v16859_v4  ;;  %8010 = vmatprep.mubr.bf16.mxu1 %v18591_v52  ;;  %v16927_v4 = vld [vmem:[#allocation9 + $0x78c] ss:$16 sps:$4 sm:$0xff]   ;;  %v16931_v21 = vld [vmem:[#allocation9 + $0x768] ss:$16 sps:$4 sm:$0xff]  }
 0x49f   : > { %v7686_v20 = vpop.f32.mrf.mxu1  ;;  %8108 = vmatpush1.bf16.msra.mxu0 %v16862_v33  ;;  %7980 = vmatprep.subr.bf16.mxu1 %v16867_v42  ;;  %v16925_v33 = vld [vmem:[#allocation9 + $0x788] ss:$16 sps:$4 sm:$0xff]   ;;  %v16933_v50 = vld [vmem:[#allocation9 + $0x76c] ss:$16 sps:$4 sm:$0xff]  }
 0x4a0   : > { %v18682_v11 = vadd.f32 %v7686_v20, %v7646_v41  ;;  %8109 = vmatprep.subr.bf16.mxu0 %v16870_v34  ;;  %v16928_v42 = vld [vmem:[#allocation9 + $0xd28] ss:$16 sps:$4 sm:$0xff]   ;;  %v16936_v34 = vld [vmem:[#allocation9 + $0xd0c] ss:$16 sps:$4 sm:$0xff]  }
 0x4a1   : > { %v7688_v30 = vpop.f32.mrf.mxu1  ;;  %v16934_v41 = vld [vmem:[#allocation9 + $0xd08] ss:$16 sps:$4 sm:$0xff]  }
 0x4a2   : > { %7981 = vmatpush1.bf16.msra.mxu1 %v16865_v40  ;;  %v16939_v40 = vld [vmem:[#allocation9 + $0x74c] ss:$16 sps:$4 sm:$0xff]   ;;  %v16937_v20 = vld [vmem:[#allocation9 + $0x748] ss:$16 sps:$4 sm:$0xff]  }
 0x4a3   : > { %v7689_v52 = vpop.f32.mrf.mxu1  ;;  %8110 = vmatpush1.bf16.msra.mxu0 %v16868_v19  ;;  %7982 = vmatprep.subr.bf16.mxu1 %v16873_v44  ;;  %v16942_v19 = vld [vmem:[#allocation9 + $0x72c] ss:$16 sps:$4 sm:$0xff]  }
 0x4a4   : > { %8111 = vmatprep.subr.bf16.mxu0 %v16876_v39  ;;  %v16940_v39 = vld [vmem:[#allocation9 + $0x728] ss:$16 sps:$4 sm:$0xff]   ;;  %v16945_v30 = vld [vmem:[#allocation9 + $0x70c] ss:$16 sps:$4 sm:$0xff]  }
 0x4a5   : > { %v16943_v52 = vld [vmem:[#allocation9 + $0x708] ss:$16 sps:$4 sm:$0xff]  }
 0x4a6   : > { %7983 = vmatpush1.bf16.msra.mxu1 %v16871_v35 }
 0x4a7   : > { %8112 = vmatpush1.bf16.msra.mxu0 %v16874_v6  ;;  %7984 = vmatprep.subr.bf16.mxu1 %v16879_v22  ;;  %v16948_v6 = vld [vmem:[#allocation9 + $0xaec] ss:$16 sps:$4 sm:$0xff]  }
 0x4a8   : > { %8113 = vmatprep.subr.bf16.mxu0 %v16882_v53  ;;  %v16946_v53 = vld [vmem:[#allocation9 + $0xae8] ss:$16 sps:$4 sm:$0xff]  }
 0x4aa   : > { %7985 = vmatpush1.bf16.msra.mxu1 %v16877_v18  ;;  %v16951_v18 = vld [vmem:[#allocation9 + $0xacc] ss:$16 sps:$4 sm:$0xff]  }
 0x4ab   : > { %8114 = vmatpush1.bf16.msra.mxu0 %v16880_v29  ;;  %7986 = vmatprep.subr.bf16.mxu1 %v16885_v57 }
 0x4ac   : > { %8115 = vmatprep.subr.bf16.mxu0 %v16888_v23  ;;  %v16954_v23 = vld [vmem:[#allocation9 + $0xaac] ss:$16 sps:$4 sm:$0xff]  }
 0x4ae   : > { %7987 = vmatpush1.bf16.msra.mxu1 %v16883_v58 }
 0x4af   : > { %8116 = vmatpush1.bf16.msra.mxu0 %v16886_v59  ;;  %7988 = vmatprep.subr.bf16.mxu1 %v16891_v43  ;;  %v16952_v59 = vld [vmem:[#allocation9 + $0xaa8] ss:$16 sps:$4 sm:$0xff]  }
 0x4b0   : > { %8117 = vmatprep.subr.bf16.mxu0 %v16894_v38  ;;  %v16957_v38 = vld [vmem:[#allocation9 + $0xa8c] ss:$16 sps:$4 sm:$0xff]  }
 0x4b2   : > { %7989 = vmatpush1.bf16.msra.mxu1 %v16889_v5  ;;  %v16955_v5 = vld [vmem:[#allocation9 + $0xa88] ss:$16 sps:$4 sm:$0xff]  }
 0x4b3   : > { %8118 = vmatpush2.bf16.msra.mxu0 %v16892_v37  ;;  %7990 = vmatprep.subr.bf16.mxu1 %v16897_v55  ;;  %v16960_v37 = vld [vmem:[#allocation9 + $0xa6c] ss:$16 sps:$4 sm:$0xff]  }
 0x4b4   : > { %8119 = vmatprep.subr.bf16.mxu0 %v16900_v24  ;;  %v16963_v55 = vld [vmem:[#allocation9 + $0xa4c] ss:$16 sps:$4 sm:$0xff]  }
 0x4b5   : > { %v16966_v24 = vld [vmem:[#allocation9 + $0xa2c] ss:$16 sps:$4 sm:$0xff]  }
 0x4b6   : > { %7991 = vmatpush1.bf16.msra.mxu1 %v16895_v62  ;;  %v16964_v62 = vld [vmem:[#allocation9 + $0xa28] ss:$16 sps:$4 sm:$0xff]  }
 0x4b7   : > { %8120 = vmatpush2.bf16.msra.mxu0 %v16898_v56  ;;  %7992 = vmatprep.subr.bf16.mxu1 %v16903_v45  ;;  %v16969_v56 = vld [vmem:[#allocation9 + $0xa0c] ss:$16 sps:$4 sm:$0xff]   ;;  %v16967_v45 = vld [vmem:[#allocation9 + $0xa08] ss:$16 sps:$4 sm:$0xff]  }
 0x4b8   : > { %8121 = vmatprep.subr.bf16.mxu0 %v16906_v13  ;;  %v16972_v13 = vld [vmem:[#allocation9 + $0xbec] ss:$16 sps:$4 sm:$0xff]  }
 0x4ba   : > { %7993 = vmatpush1.bf16.msra.mxu1 %v16901_v48  ;;  %v16970_v48 = vld [vmem:[#allocation9 + $0xbe8] ss:$16 sps:$4 sm:$0xff]  }
 0x4bb   : > { %8122 = vmatpush2.bf16.msra.mxu0 %v16904_v51  ;;  %7994 = vmatprep.subr.bf16.mxu1 %v16909_v2  ;;  %v16975_v51 = vld [vmem:[#allocation9 + $0xbcc] ss:$16 sps:$4 sm:$0xff]   ;;  %v16973_v2 = vld [vmem:[#allocation9 + $0xbc8] ss:$16 sps:$4 sm:$0xff]  }
 0x4bc   : > { %8123 = vmatprep.subr.bf16.mxu0 %v16912_v17  ;;  %v16978_v17 = vld [vmem:[#allocation9 + $0xbac] ss:$16 sps:$4 sm:$0xff]  }
 0x4be   : > { %7995 = vmatpush2.bf16.msra.mxu1 %v16907_v14  ;;  %v16976_v14 = vld [vmem:[#allocation9 + $0xba8] ss:$16 sps:$4 sm:$0xff]  }
 0x4bf   : > { %8124 = vmatpush2.bf16.msra.mxu0 %v16910_v26  ;;  %7996 = vmatprep.subr.bf16.mxu1 %v16915_v16  ;;  %v16981_v26 = vld [vmem:[#allocation9 + $0xb8c] ss:$16 sps:$4 sm:$0xff]   ;;  %v16979_v16 = vld [vmem:[#allocation9 + $0xb88] ss:$16 sps:$4 sm:$0xff]  }
 0x4c0   : > { %8125 = vmatprep.subr.bf16.mxu0 %v16918_v27  ;;  %v16984_v27 = vld [vmem:[#allocation9 + $0xb6c] ss:$16 sps:$4 sm:$0xff]  }
 0x4c2   : > { %7997 = vmatpush2.bf16.msra.mxu1 %v16913_v31  ;;  %v16982_v31 = vld [vmem:[#allocation9 + $0xb68] ss:$16 sps:$4 sm:$0xff]  }
 0x4c3   : > { %8126 = vmatpush2.bf16.msra.mxu0 %v16916_v12  ;;  %7998 = vmatprep.subr.bf16.mxu1 %v16921_v46  ;;  %v16987_v12 = vld [vmem:[#allocation9 + $0xb4c] ss:$16 sps:$4 sm:$0xff]   ;;  %v16985_v46 = vld [vmem:[#allocation9 + $0xb48] ss:$16 sps:$4 sm:$0xff]  }
 0x4c4   : > { %8127 = vmatprep.subr.bf16.mxu0 %v16924_v63  ;;  %v16990_v63 = vld [vmem:[#allocation9 + $0xb2c] ss:$16 sps:$4 sm:$0xff]  }
 0x4c6   : > { %7999 = vmatpush2.bf16.msra.mxu1 %v16919_v28 }
 0x4c7   : > { %8128 = vmatpush2.bf16.msra.mxu0 %v16922_v32  ;;  %8000 = vmatprep.subr.bf16.mxu1 %v16927_v4  ;;  %v16988_v32 = vld [vmem:[#allocation9 + $0xb28] ss:$16 sps:$4 sm:$0xff]   ;;  %v16993_v4 = vld [vmem:[#allocation9 + $0xb0c] ss:$16 sps:$4 sm:$0xff]  }
 0x4c8   : > { %8129 = vmatprep.subr.bf16.mxu0 %v16930_v47 }
 0x4ca   : > { %8001 = vmatpush2.bf16.msra.mxu1 %v16925_v33  ;;  %v7726_v33 = vadd.f32 %v18647_v54, %v18678_v15 }
 0x4cb   : > { %8130 = vmatpush2.bf16.msra.mxu0 %v16928_v42  ;;  %8002 = vmatprep.subr.bf16.mxu1 %v16933_v50  ;;  %v16991_v50 = vld [vmem:[#allocation9 + $0xb08] ss:$16 sps:$4 sm:$0xff]  }
 0x4cc   : > { %8131 = vmatprep.subr.bf16.mxu0 %v16936_v34  ;;  %v16996_v34 = vld [vmem:[#allocation9 + $0xeec] ss:$16 sps:$4 sm:$0xff]  }
 0x4ce   : > { %8003 = vmatpush2.bf16.msra.mxu1 %v16931_v21 }
 0x4cf   : > { %8132 = vmatpush2.bf16.msra.mxu0 %v16934_v41  ;;  %8004 = vmatprep.subr.bf16.mxu1 %v16939_v40  ;;  %v7728_v41 = vadd.f32 %v18651_v36, %v18682_v11  ;;  %v16997_v11 = vld [vmem:[#allocation9 + $0xec8] ss:$16 sps:$4 sm:$0xff]  }
 0x4d2   : > { %v18688_v44 = vpop.f32.mrf.mxu0  ;;  %8005 = vmatpush2.bf16.msra.mxu1 %v16937_v20  ;;  %8134 = vmatmul.mubr.bf16.vlgmr.msra.gmra.mxu0 %v18598_v8  ;;  %v16949_v8 = vld [vmem:[#allocation9 + $0xac8] ss:$16 sps:$4 sm:$0xff]   ;;  %v8189_v20 = vpop.permute.xlu0 %8188 }
 0x4d3   : > { %8006 = vmatprep.subr.bf16.mxu1 %v16942_v19 }
 0x4d4   : > { %v18691_v35 = vpop.f32.mrf.mxu0 }
 0x4d6   : > { %v7893_v0 = vpop.f32.mrf.mxu0  ;;  %8007 = vmatpush2.bf16.msra.mxu1 %v16940_v39  ;;  %v16994_v39 = vld [vmem:[#allocation9 + $0xee8] ss:$16 sps:$4 sm:$0xff]  }
 0x4d7   : > { %8008 = vmatprep.subr.bf16.mxu1 %v16945_v30  ;;  %v16999_v30 = vld [vmem:[#allocation9 + $0xecc] ss:$16 sps:$4 sm:$0xff]  }
 0x4d8   : > { %v7894_v22 = vpop.f32.mrf.mxu0 }
 0x4d9   : > { %v17002_v22 = vld [vmem:[#allocation9 + $0xeac] ss:$16 sps:$4 sm:$0xff]  }
 0x4da   : > { %8009 = vmatpush2.bf16.msra.mxu1 %v16943_v52 }
 0x4db   : > { %8060 = vmatprep.subr.bf16.mxu1 %v16948_v6  ;;  %v8197_v6 = vpop.permute.xlu0 %8196 }
 0x4dd   : > { %v18693_v29 = vpop.f32.mrf.mxu1  ;;  %8011 = vmatmul.mubr.bf16.vlgmr.msra.gmra.mxu1 %v18614_v9  ;;  %v16958_v9 = vld [vmem:[#allocation9 + $0xa68] ss:$16 sps:$4 sm:$0xff]  }
 0x4de   : > { %8061 = vmatpush1.bf16.msra.mxu1 %v16946_v53  ;;  %8092 = vmatprep.mubr.bf16.mxu1 %v18616_v1  ;;  %v16961_v1 = vld [vmem:[#allocation9 + $0xa48] ss:$16 sps:$4 sm:$0xff]   ;;  %v7767_v21 = vadd.f32 %v18693_v29, %v7726_v33 }
 0x4df   : > { %v18697_v57 = vpop.f32.mrf.mxu1  ;;  %8062 = vmatprep.subr.bf16.mxu1 %v16951_v18 }
 0x4e0   : > { %v7769_v19 = vadd.f32 %v18697_v57, %v7728_v41  ;;  %v7808_v54 = vadd.f32 %v18662_v25, %v7767_v21  ;;  %v17008_v57 = vld [vmem:[#allocation9 + $0xe6c] ss:$16 sps:$4 sm:$0xff]  }
 0x4e1   : > { %v7770_v58 = vpop.f32.mrf.mxu1 }
 0x4e2   : > { %8063 = vmatpush1.bf16.msra.mxu1 %v16949_v8  ;;  %v7810_v36 = vadd.f32 %v18666_v61, %v7769_v19  ;;  %v17003_v61 = vld [vmem:[#allocation9 + $0xe88] ss:$16 sps:$4 sm:$0xff]   ;;  %v17011_v58 = vld [vmem:[#allocation9 + $0xe4c] ss:$16 sps:$4 sm:$0xff]  }
 0x4e3   : > { %v7771_v43 = vpop.f32.mrf.mxu1  ;;  %8064 = vmatprep.subr.bf16.mxu1 %v16954_v23  ;;  %v17006_v23 = vld [vmem:[#allocation9 + $0xe68] ss:$16 sps:$4 sm:$0xff]  }
 0x4e4   : > { %v17014_v43 = vld [vmem:[#allocation9 + $0xe2c] ss:$16 sps:$4 sm:$0xff]  }
 0x4e6   : > { %8065 = vmatpush1.bf16.msra.mxu1 %v16952_v59  ;;  %v17009_v59 = vld [vmem:[#allocation9 + $0xe48] ss:$16 sps:$4 sm:$0xff]  }
 0x4e7   : > { %8066 = vmatprep.subr.bf16.mxu1 %v16957_v38  ;;  %v17012_v38 = vld [vmem:[#allocation9 + $0xe28] ss:$16 sps:$4 sm:$0xff]  }
 0x4ea   : > { %8067 = vmatpush1.bf16.msra.mxu1 %v16955_v5  ;;  %v17017_v5 = vld [vmem:[#allocation9 + $0xe0c] ss:$16 sps:$4 sm:$0xff]  }
 0x4eb   : > { %8068 = vmatprep.subr.bf16.mxu1 %v16960_v37  ;;  %v17015_v37 = vld [vmem:[#allocation9 + $0xe08] ss:$16 sps:$4 sm:$0xff]  }
 0x4ee   : > { %8069 = vmatpush1.bf16.msra.mxu1 %v16958_v9  ;;  %v17020_v9 = vld [vmem:[#allocation9 + $0xfec] ss:$16 sps:$4 sm:$0xff]  }
 0x4ef   : > { %8070 = vmatprep.subr.bf16.mxu1 %v16963_v55  ;;  %v17018_v55 = vld [vmem:[#allocation9 + $0xfe8] ss:$16 sps:$4 sm:$0xff]  }
 0x4f2   : > { %8071 = vmatpush1.bf16.msra.mxu1 %v16961_v1  ;;  %v17023_v1 = vld [vmem:[#allocation9 + $0xfcc] ss:$16 sps:$4 sm:$0xff]  }
 0x4f3   : > { %8072 = vmatprep.subr.bf16.mxu1 %v16966_v24  ;;  %v17021_v24 = vld [vmem:[#allocation9 + $0xfc8] ss:$16 sps:$4 sm:$0xff]  }
 0x4f6   : > { %8073 = vmatpush1.bf16.msra.mxu1 %v16964_v62  ;;  %v17026_v62 = vld [vmem:[#allocation9 + $0xfac] ss:$16 sps:$4 sm:$0xff]  }
 0x4f7   : > { %8074 = vmatprep.subr.bf16.mxu1 %v16969_v56  ;;  %v17024_v56 = vld [vmem:[#allocation9 + $0xfa8] ss:$16 sps:$4 sm:$0xff]  }
 0x4fa   : > { %8075 = vmatpush1.bf16.msra.mxu1 %v16967_v45  ;;  %v17029_v45 = vld [vmem:[#allocation9 + $0xf8c] ss:$16 sps:$4 sm:$0xff]  }
 0x4fb   : > { %8076 = vmatprep.subr.bf16.mxu1 %v16972_v13  ;;  %v17027_v13 = vld [vmem:[#allocation9 + $0xf88] ss:$16 sps:$4 sm:$0xff]  }
 0x4fe   : > { %8077 = vmatpush2.bf16.msra.mxu1 %v16970_v48  ;;  %v17032_v48 = vld [vmem:[#allocation9 + $0xf6c] ss:$16 sps:$4 sm:$0xff]  }
 0x4ff   : > { %8078 = vmatprep.subr.bf16.mxu1 %v16975_v51  ;;  %v17030_v51 = vld [vmem:[#allocation9 + $0xf68] ss:$16 sps:$4 sm:$0xff]  }
 0x502   : > { %8079 = vmatpush2.bf16.msra.mxu1 %v16973_v2  ;;  %v17035_v2 = vld [vmem:[#allocation9 + $0xf4c] ss:$16 sps:$4 sm:$0xff]  }
 0x503   : > { %8080 = vmatprep.subr.bf16.mxu1 %v16978_v17  ;;  %v17033_v17 = vld [vmem:[#allocation9 + $0xf48] ss:$16 sps:$4 sm:$0xff]  }
 0x506   : > { %8081 = vmatpush2.bf16.msra.mxu1 %v16976_v14  ;;  %v17038_v14 = vld [vmem:[#allocation9 + $0xf2c] ss:$16 sps:$4 sm:$0xff]  }
 0x507   : > { %8082 = vmatprep.subr.bf16.mxu1 %v16981_v26 }
 0x50a   : > { %8083 = vmatpush2.bf16.msra.mxu1 %v16979_v16  ;;  %v17036_v16 = vld [vmem:[#allocation9 + $0xf28] ss:$16 sps:$4 sm:$0xff]  }
 0x50b   : > { %8084 = vmatprep.subr.bf16.mxu1 %v16984_v27  ;;  %v17041_v27 = vld [vmem:[#allocation9 + $0xf0c] ss:$16 sps:$4 sm:$0xff]  }
 0x50e   : > { %8085 = vmatpush2.bf16.msra.mxu1 %v16982_v31 }
 0x50f   : > { %8086 = vmatprep.subr.bf16.mxu1 %v16987_v12 }
 0x512   : > { %v18699_v28 = vpop.f32.mrf.mxu0  ;;  %8087 = vmatpush2.bf16.msra.mxu1 %v16985_v46  ;;  %v17039_v46 = vld [vmem:[#allocation9 + $0xf08] ss:$16 sps:$4 sm:$0xff]  }
 0x513   : > { %8088 = vmatprep.subr.bf16.mxu1 %v16990_v63 }
 0x514   : > { %v18701_v47 = vpop.f32.mrf.mxu0 }
 0x516   : > { %v7975_v42 = vpop.f32.mrf.mxu0  ;;  %8089 = vmatpush2.bf16.msra.mxu1 %v16988_v32  ;;  %v21151_v32 = vmov 0.0  }
 0x517   : > { %8090 = vmatprep.subr.bf16.mxu1 %v16993_v4 }
 0x518   : > { %v7976_v40 = vpop.f32.mrf.mxu0 }
 0x51a   : > { %8091 = vmatpush2.bf16.msra.mxu1 %v16991_v50 }
 0x51b   : > { %8142 = vmatprep.subr.bf16.mxu1 %v16996_v34 }
 0x51d   : > { %v7848_v15 = vpop.f32.mrf.mxu1  ;;  %8093 = vmatmul.mubr.bf16.vlgmr.msra.gmra.mxu1 %v18633_v60  ;;  %v17000_v60 = vld [vmem:[#allocation9 + $0xea8] ss:$16 sps:$4 sm:$0xff]  }
 0x51e   : > { %v18711_v0 = vadd.f32 %v7848_v15, %v7808_v54  ;;  %8143 = vmatpush1.bf16.msra.mxu1 %v16994_v39  ;;  %8174 = vmatprep.mubr.bf16.mxu1 %v18635_v3  ;;  %v17005_v3 = vld [vmem:[#allocation9 + $0xe8c] ss:$16 sps:$4 sm:$0xff]  }
 0x51f   : > { %v7850_v52 = vpop.f32.mrf.mxu1  ;;  %8144 = vmatprep.subr.bf16.mxu1 %v16999_v30 }
 0x520   : > { %v8191_v53 = vadd.f32 %v8189_v20, %v18711_v0  ;;  %v18716_v18 = vadd.f32 %v7850_v52, %v7810_v36 }
 0x521   : > { %v7852_v25 = vpop.f32.mrf.mxu1 }
 0x522   : > { %v8199_v29 = vadd.f32 %v8197_v6, %v18716_v18  ;;  %8145 = vmatpush1.bf16.msra.mxu1 %v16997_v11  ;;  %8217 = vrot.lane.b32.xlu0 %v8191_v53, %s17803_s2 }
 0x523   : > { %v7853_v8 = vpop.f32.mrf.mxu1  ;;  %8146 = vmatprep.subr.bf16.mxu1 %v17002_v22 }
 0x524   : > { %8221 = vrot.lane.b32.xlu1 %v8199_v29, %s17803_s2 }
 0x526   : > { %8147 = vmatpush1.bf16.msra.mxu1 %v17000_v60 }
 0x527   : > { %8148 = vmatprep.subr.bf16.mxu1 %v17005_v3  ;;  %v8205_v3 = vpop.permute.xlu1 %8204 }
 0x52a   : > { %8149 = vmatpush1.bf16.msra.mxu1 %v17003_v61 }
 0x52b   : > { %8150 = vmatprep.subr.bf16.mxu1 %v17008_v57 }
 0x52e   : > { %8151 = vmatpush1.bf16.msra.mxu1 %v17006_v23 }
 0x52f   : > { %8152 = vmatprep.subr.bf16.mxu1 %v17011_v58 }
 0x532   : > { %8153 = vmatpush1.bf16.msra.mxu1 %v17009_v59  ;;  %v8213_v59 = vpop.permute.xlu1 %8212 }
 0x533   : > { %8154 = vmatprep.subr.bf16.mxu1 %v17014_v43 }
 0x536   : > { %8155 = vmatpush1.bf16.msra.mxu1 %v17012_v38 }
 0x537   : > { %8156 = vmatprep.subr.bf16.mxu1 %v17017_v5 }
 0x53a   : > { %8157 = vmatpush1.bf16.msra.mxu1 %v17015_v37  ;;  %v8183_v37 = vld [vmem:[%s21135_s5] sm:$0xff] }
 0x53b   : > { %8158 = vmatprep.subr.bf16.mxu1 %v17020_v9  ;;  %v8248_v9 = vsel %vm8247_vm10, %v8183_v37, 0.0 }
 0x53e   : > { %8159 = vmatpush2.bf16.msra.mxu1 %v17018_v55  ;;  %v8184_v55 = vld [vmem:[%s21135_s5 + $0x8] sm:$0xff] }
 0x53f   : > { %8160 = vmatprep.subr.bf16.mxu1 %v17023_v1  ;;  %v8192_v1 = vld [vmem:[%s21135_s5 + $0x18] sm:$0xff] }
 0x542   : > { %8161 = vmatpush2.bf16.msra.mxu1 %v17021_v24 }
 0x543   : > { %8162 = vmatprep.subr.bf16.mxu1 %v17026_v62  ;;  %v18742_v62 = vadd.f32 %v8184_v55, %v18711_v0  ;;  %v17053_v55 = vld [vmem:[#allocation11 + $0x4] ss:$16 sps:$4 sm:$0xff]  }
 0x545   : > { %21209 = vst [vmem:[#allocation26_spill] sm:$0xff] %v18742_v62 }
 0x546   : > { %8163 = vmatpush2.bf16.msra.mxu1 %v17024_v56  ;;  %v18745_v56 = vadd.f32 %v8192_v1, %v18716_v18  ;;  %v8208_v18 = vld [vmem:[%s21135_s5 + $0x38] sm:$0xff] }
 0x547   : > { %8164 = vmatprep.subr.bf16.mxu1 %v17029_v45  ;;  %v17051_v1 = vld [vmem:[#allocation11] ss:$16 sps:$4 sm:$0xff]  }
 0x548   : > { %21210 = vst [vmem:[#allocation27_spill] sm:$0xff] %v18745_v56  ;;  %v8257_v0 = vsel %vm8247_vm10, %v18745_v56, 0.0 }
 0x54a   : > { %8165 = vmatpush2.bf16.msra.mxu1 %v17027_v13  ;;  %v8200_v13 = vld [vmem:[%s21135_s5 + $0x28] sm:$0xff] }
 0x54b   : > { %8166 = vmatprep.subr.bf16.mxu1 %v17032_v48  ;;  %v8251_v48 = vsel %vm8247_vm10, %v18742_v62, 0.0 }
 0x54e   : > { %8167 = vmatpush2.bf16.msra.mxu1 %v17030_v51 }
 0x54f   : > { %8168 = vmatprep.subr.bf16.mxu1 %v17035_v2 }
 0x552   : > { %v8053_v26 = vpop.f32.mrf.mxu0  ;;  %8169 = vmatpush2.bf16.msra.mxu1 %v17033_v17 }
 0x553   : > { %8170 = vmatprep.subr.bf16.mxu1 %v17038_v14 }
 0x554   : > { %v8055_v31 = vpop.f32.mrf.mxu0 }
 0x556   : > { %v8057_v12 = vpop.f32.mrf.mxu0  ;;  %8171 = vmatpush2.bf16.msra.mxu1 %v17036_v16 }
 0x557   : > { %8172 = vmatprep.subr.bf16.mxu1 %v17041_v27 }
 0x558   : > { %v8058_v63 = vpop.f32.mrf.mxu0 }
 0x55a   : > { %8173 = vmatpush2.bf16.msra.mxu1 %v17039_v46 }
 0x55b   : > { %14750 = vmatprep.subr.bf16.mxu1 %v21151_v32 }
 0x55d   : > { %v7930_v4 = vpop.f32.mrf.mxu1  ;;  %8175 = vmatmul.mubr.bf16.vlgmr.msra.gmra.mxu1 %v18654_v49 }
 0x55e   : > { %v7931_v40 = vadd.f32 %v7930_v4, %v18688_v44  ;;  %14752 = vmatprep.mubr.msk.bf16.mxu1 %vm17809_vm11, %v21151_v32 }
 0x55f   : > { %v7932_v33 = vpop.f32.mrf.mxu1 }
 0x560   : > { %v7933_v19 = vadd.f32 %v7932_v33, %v18691_v35  ;;  %v7972_v39 = vadd.f32 %v18699_v28, %v7931_v40 }
 0x561   : > { %v7934_v42 = vpop.f32.mrf.mxu1 }
 0x562   : > { %v7974_v15 = vadd.f32 %v18701_v47, %v7933_v19 }
 0x563   : > { %v7935_v50 = vpop.f32.mrf.mxu1 }
 0x592   : > { %v8135_v34 = vpop.f32.mrf.mxu0 }
 0x594   : > { %v8137_v21 = vpop.f32.mrf.mxu0  ;;  %v18739_v24 = vpop.permute.xlu0 %8217 }
 0x595   : > { %21208 = vst [vmem:[#allocation25_spill] sm:$0xff] %v18739_v24  ;;  %v8254_v45 = vsel %vm8247_vm10, %v18739_v24, 0.0 }
 0x596   : > { %v8139_v41 = vpop.f32.mrf.mxu0  ;;  %v18754_v51 = vpop.permute.xlu1 %8221 }
 0x597   : > { %21211 = vst [vmem:[#allocation28_spill] sm:$0xff] %v18754_v51  ;;  %v8260_v17 = vsel %vm8247_vm10, %v18754_v51, 0.0 }
 0x598   : > { %v8140_v20 = vpop.f32.mrf.mxu0 }
 0x59d   : > { %v8012_v30 = vpop.f32.mrf.mxu1 }
 0x59e   : > { %v8013_v54 = vadd.f32 %v8012_v30, %v7972_v39 }
 0x59f   : > { %v8014_v36 = vpop.f32.mrf.mxu1 }
 0x5a0   : > { %v8015_v11 = vadd.f32 %v8014_v36, %v7974_v15  ;;  %v8054_v29 = vadd.f32 %v8053_v26, %v8013_v54 }
 0x5a1   : > { %v8016_v49 = vpop.f32.mrf.mxu1 }
 0x5a2   : > { %v8056_v44 = vadd.f32 %v8055_v31, %v8015_v11 }
 0x5a3   : > { %v8017_v52 = vpop.f32.mrf.mxu1 }
 0x5dd   : > { %v8094_v6 = vpop.f32.mrf.mxu1 }
 0x5de   : > { %v8095_v60 = vadd.f32 %v8094_v6, %v8054_v29 }
 0x5df   : > { %v8096_v22 = vpop.f32.mrf.mxu1 }
 0x5e0   : > { %v8097_v8 = vadd.f32 %v8096_v22, %v8056_v44  ;;  %v8136_v35 = vadd.f32 %v8135_v34, %v8095_v60 }
 0x5e1   : > { %v8098_v53 = vpop.f32.mrf.mxu1 }
 0x5e2   : > { %v8138_v57 = vadd.f32 %v8137_v21, %v8097_v8 }
 0x5e3   : > { %v8099_v25 = vpop.f32.mrf.mxu1 }
 0x61d   : > { %v8176_v61 = vpop.f32.mrf.mxu1 }
 0x61e   : > { %v8177_v28 = vadd.f32 %v8176_v61, %v8136_v35 }
 0x61f   : > { %v8178_v23 = vpop.f32.mrf.mxu1 }
 0x620   : > { %v8207_v58 = vadd.f32 %v8205_v3, %v8177_v28  ;;  %v8179_v47 = vadd.f32 %v8178_v23, %v8138_v57  ;;  %v18756_v2 = vadd.f32 %v8200_v13, %v8177_v28 }
 0x621   : > { %v8180_v43 = vpop.f32.mrf.mxu1 }
 0x622   : > { %v8215_v38 = vadd.f32 %v8213_v59, %v8179_v47  ;;  %8225 = vrot.lane.b32.xlu0 %v8207_v58, %s17803_s2  ;;  %21212 = vst [vmem:[#allocation29_spill] sm:$0xff] %v18756_v2  ;;  %v18765_v14 = vadd.f32 %v8208_v18, %v8179_v47  ;;  %v8263_v26 = vsel %vm8247_vm10, %v18756_v2, 0.0  ;;  %v17042_v59 = vld [vmem:[#allocation11 + $0x60] ss:$16 sps:$4 sm:$0xff]   ;;  %v17044_v43 = vld [vmem:[#allocation11 + $0x64] ss:$16 sps:$4 sm:$0xff]  }
 0x623   : > { %v8181_v5 = vpop.f32.mrf.mxu1  ;;  %8471 = vmatprep.subr.bf16.mxu0 %v17044_v43 }
 0x624   : > { %8229 = vrot.lane.b32.xlu1 %v8215_v38, %s17803_s2  ;;  %21213 = vst [vmem:[#allocation30_spill] sm:$0xff] %v18765_v14  ;;  %v8269_v16 = vsel %vm8247_vm10, %v18765_v14, 0.0  ;;  %8472 = vmatpush1.bf16.msra.mxu0 %v17042_v59  ;;  %v17047_v38 = vld [vmem:[#allocation11 + $0x44] ss:$16 sps:$4 sm:$0xff]   ;;  %v17045_v5 = vld [vmem:[#allocation11 + $0x40] ss:$16 sps:$4 sm:$0xff]  }
 0x625   : > { %8473 = vmatprep.subr.bf16.mxu0 %v17047_v38 }
 0x628   : > { %8474 = vmatpush1.bf16.msra.mxu0 %v17045_v5 }
 0x641   : > { %8249 = vadd.xlane.f32.xlu0 %v8248_v9  ;;  %v17048_v9 = vld [vmem:[#allocation11 + $0x20] ss:$16 sps:$4 sm:$0xff]  }
 0x645   : > { %8255 = vadd.xlane.f32.xlu0 %v8254_v45  ;;  %v21149_v45 = vmov 0  }
 0x646   : > { %8495 = vmatprep.mubr.bf16.mxu0 %v21149_v45 }
 0x648   : > { %8252 = vadd.xlane.f32.xlu1 %v8251_v48 }
 0x649   : > { %8258 = vadd.xlane.f32.xlu0 %v8257_v0 }
 0x64c   : > { %8261 = vadd.xlane.f32.xlu1 %v8260_v17 }
 0x64d   : > { %8264 = vadd.xlane.f32.xlu0 %v8263_v26 }
 0x651   : > { %8270 = vadd.xlane.f32.xlu0 %v8269_v16 }
 0x694   : > { %v18771_v27 = vpop.permute.xlu0 %8225 }
 0x695   : > { %21214 = vst [vmem:[#allocation31_spill] sm:$0xff] %v18771_v27  ;;  %v8266_v31 = vsel %vm8247_vm10, %v18771_v27, 0.0 }
 0x696   : > { %v18775_v12 = vpop.permute.xlu1 %8229  ;;  %8267 = vadd.xlane.f32.xlu1 %v8266_v31 }
 0x697   : > { %21215 = vst [vmem:[#allocation32_spill] sm:$0xff] %v18775_v12  ;;  %v8272_v46 = vsel %vm8247_vm10, %v18775_v12, 0.0 }
 0x69a   : > { %8273 = vadd.xlane.f32.xlu1 %v8272_v46 }
 0x6ca   : > { %v8250_v63 = vpop.xlane.xlu0 %8249 }
 0x6cb   : > { %v8276_v4 = vmul.f32 0.015625, %v8250_v63 }
 0x6cd   : > { %v18779_v33 = vsub.f32 %v8183_v37, %v8276_v4  ;;  %v17050_v37 = vld [vmem:[#allocation11 + $0x24] ss:$16 sps:$4 sm:$0xff]  }
 0x6ce   : > { %v8256_v42 = vpop.xlane.xlu0 %8255  ;;  %8475 = vmatprep.subr.bf16.mxu0 %v17050_v37 }
 0x6cf   : > { %v8278_v50 = vmul.f32 0.015625, %v8256_v42  ;;  %v8294_v34 = vmul.f32 %v18779_v33, %v18779_v33  ;;  %8476 = vmatpush1.bf16.msra.mxu0 %v17048_v9 }
 0x6d0   : > { %8477 = vmatprep.subr.bf16.mxu0 %v17053_v55 }
 0x6d1   : > { %v18784_v21 = vsub.f32 %v18739_v24, %v8278_v50  ;;  %v8253_v41 = vpop.xlane.xlu1 %8252  ;;  %v8303_v40 = vsel %vm8247_vm10, %v8294_v34, 0.0 }
 0x6d2   : > { %v8277_v20 = vmul.f32 0.015625, %v8253_v41  ;;  %8304 = vadd.xlane.f32.xlu0 %v8303_v40  ;;  %v8259_v19 = vpop.xlane.xlu0 %8258 }
 0x6d3   : > { %v8279_v39 = vmul.f32 0.015625, %v8259_v19  ;;  %v8296_v30 = vmul.f32 %v18784_v21, %v18784_v21  ;;  %8478 = vmatpush1.bf16.msra.mxu0 %v17051_v1 }
 0x6d4   : > { %v18790_v54 = vsub.f32 %v18742_v62, %v8277_v20  ;;  %14802 = vmatprep.subr.bf16.mxu0 %v21151_v32 }
 0x6d5   : > { %v18793_v15 = vsub.f32 %v18745_v56, %v8279_v39  ;;  %v8262_v36 = vpop.xlane.xlu1 %8261  ;;  %v8309_v11 = vsel %vm8247_vm10, %v8296_v30, 0.0 }
 0x6d6   : > { %v8280_v49 = vmul.f32 0.015625, %v8262_v36  ;;  %8310 = vadd.xlane.f32.xlu0 %v8309_v11  ;;  %v8265_v52 = vpop.xlane.xlu0 %8264  ;;  %v8295_v6 = vmul.f32 %v18790_v54, %v18790_v54 }
 0x6d7   : > { %v8281_v22 = vmul.f32 0.015625, %v8265_v52  ;;  %v8297_v29 = vmul.f32 %v18793_v15, %v18793_v15 }
 0x6d8   : > { %v18799_v53 = vsub.f32 %v18754_v51, %v8280_v49  ;;  %v8306_v25 = vsel %vm8247_vm10, %v8295_v6, 0.0 }
 0x6d9   : > { %v18805_v60 = vsub.f32 %v18756_v2, %v8281_v22  ;;  %8307 = vadd.xlane.f32.xlu1 %v8306_v25  ;;  %v8312_v35 = vsel %vm8247_vm10, %v8297_v29, 0.0 }
 0x6da   : > { %v8271_v44 = vpop.xlane.xlu0 %8270  ;;  %v8298_v8 = vmul.f32 %v18799_v53, %v18799_v53 }
 0x6db   : > { %v8283_v3 = vmul.f32 0.015625, %v8271_v44  ;;  %v8299_v28 = vmul.f32 %v18805_v60, %v18805_v60 }
 0x6dc   : > { %v8315_v61 = vsel %vm8247_vm10, %v8298_v8, 0.0 }
 0x6dd   : > { %v18814_v57 = vsub.f32 %v18765_v14, %v8283_v3  ;;  %8313 = vadd.xlane.f32.xlu1 %v8312_v35  ;;  %8316 = vadd.xlane.f32.xlu0 %v8315_v61  ;;  %v8318_v23 = vsel %vm8247_vm10, %v8299_v28, 0.0  ;;  %v8238_v3 = vld [vmem:[#allocation12] ss:$0 sm:$0xff] }
 0x6df   : > { %v8301_v58 = vmul.f32 %v18814_v57, %v18814_v57 }
 0x6e1   : > { %8319 = vadd.xlane.f32.xlu1 %v8318_v23  ;;  %v8324_v47 = vsel %vm8247_vm10, %v8301_v58, 0.0  ;;  %v8239_v58 = vld [vmem:[#allocation12 + $0x1] ss:$0 sm:$0xff] }
 0x6e5   : > { %8325 = vadd.xlane.f32.xlu1 %v8324_v47 }
 0x71f   : > { %v8268_v13 = vpop.xlane.xlu1 %8267 }
 0x720   : > { %v8282_v48 = vmul.f32 0.015625, %v8268_v13 }
 0x722   : > { %v18823_v0 = vsub.f32 %v18771_v27, %v8282_v48 }
 0x723   : > { %v8274_v18 = vpop.xlane.xlu1 %8273 }
 0x724   : > { %v8284_v17 = vmul.f32 0.015625, %v8274_v18  ;;  %v8300_v26 = vmul.f32 %v18823_v0, %v18823_v0 }
 0x726   : > { %v18828_v16 = vsub.f32 %v18775_v12, %v8284_v17  ;;  %v8321_v31 = vsel %vm8247_vm10, %v8300_v26, 0.0 }
 0x727   : > { %8322 = vadd.xlane.f32.xlu0 %v8321_v31 }
 0x728   : > { %v8302_v46 = vmul.f32 %v18828_v16, %v18828_v16 }
 0x72a   : > { %v8327_v63 = vsel %vm8247_vm10, %v8302_v46, 0.0 }
 0x72b   : > { %8328 = vadd.xlane.f32.xlu0 %v8327_v63 }
 0x75b   : > { %v8305_v4 = vpop.xlane.xlu0 %8304 }
 0x75c   : > { %v8330_v42 = vmul.f32 0.015625, %v8305_v4 }
 0x75e   : > { %v8339_v50 = vadd.f32 1e-05, %v8330_v42 }
 0x75f   : > { %v8311_v34 = vpop.xlane.xlu0 %8310 }
 0x760   : > { %17102 = vrsqrt.f32 %v8339_v50  ;;  %v8332_v41 = vmul.f32 0.015625, %v8311_v34 }
 0x762   : > { %v8308_v40 = vpop.xlane.xlu1 %8307  ;;  %v8341_v19 = vadd.f32 1e-05, %v8332_v41 }
 0x763   : > { %v8331_v20 = vmul.f32 0.015625, %v8308_v40 }
 0x765   : > { %v8340_v39 = vadd.f32 1e-05, %v8331_v20 }
 0x766   : > { %v8317_v30 = vpop.xlane.xlu0 %8316  ;;  %v8314_v36 = vpop.xlane.xlu1 %8313 }
 0x767   : > { %17104 = vrsqrt.f32 %v8340_v39  ;;  %v8333_v11 = vmul.f32 0.015625, %v8314_v36  ;;  %v8334_v49 = vmul.f32 0.015625, %v8317_v30 }
 0x768   : > { %17106 = vrsqrt.f32 %v8341_v19 }
 0x769   : > { %v8342_v52 = vadd.f32 1e-05, %v8333_v11  ;;  %v8343_v25 = vadd.f32 1e-05, %v8334_v49 }
 0x76a   : > { %v8320_v6 = vpop.xlane.xlu1 %8319 }
 0x76b   : > { %v8335_v22 = vmul.f32 0.015625, %v8320_v6  ;;  %17108 = vrsqrt.f32 %v8342_v52 }
 0x76d   : > { %v8344_v29 = vadd.f32 1e-05, %v8335_v22  ;;  %v17103_v44 = vpop.eup %17102 }
 0x76e   : > { %v8357_v8 = vmul.f32 %v17103_v44, %v18779_v33  ;;  %v8326_v4 = vpop.xlane.xlu1 %8325 }
 0x76f   : > { %17110 = vrsqrt.f32 %v8344_v29  ;;  %v8337_v42 = vmul.f32 0.015625, %v8326_v4 }
 0x770   : > { %17112 = vrsqrt.f32 %v8343_v25  ;;  %v8366_v28 = vmul.f32 %v8357_v8, %v8238_v3 }
 0x772   : > { %v8375_v43 = vadd.f32 %v8366_v28, %v8239_v58 }
 0x774   : > { %v17105_v35 = vpop.eup %17104 }
 0x775   : > { %v8358_v61 = vmul.f32 %v17105_v35, %v18790_v54  ;;  %v17107_v23 = vpop.eup %17106 }
 0x776   : > { %v8359_v5 = vmul.f32 %v17107_v23, %v18784_v21 }
 0x777   : > { %v8367_v47 = vmul.f32 %v8358_v61, %v8238_v3 }
 0x778   : > { %v17109_v59 = vpop.eup %17108  ;;  %v8368_v33 = vmul.f32 %v8359_v5, %v8238_v3 }
 0x779   : > { %v8376_v38 = vadd.f32 %v8367_v47, %v8239_v58  ;;  %v8360_v37 = vmul.f32 %v17109_v59, %v18793_v15 }
 0x77a   : > { %v8377_v18 = vadd.f32 %v8368_v33, %v8239_v58 }
 0x77b   : > { %v8384_v9 = vpack.c.bf16 %v8376_v38, %v8375_v43  ;;  %v8369_v1 = vmul.f32 %v8360_v37, %v8238_v3 }
 0x77c   : > { %v17111_v55 = vpop.eup %17110 }
 0x77d   : > { %14362 = vmatmul.mubr.msk.bf16.vlgmr.msra.gmra.mxu0 %vm8247_vm10, %v8384_v9  ;;  %v17113_v13 = vpop.eup %17112  ;;  %v8378_v54 = vadd.f32 %v8369_v1, %v8239_v58  ;;  %v8362_v48 = vmul.f32 %v17111_v55, %v18805_v60  ;;  %v8346_v60 = vadd.f32 1e-05, %v8337_v42 }
 0x77e   : > { %8505 = vmatprep.mubr.bf16.mxu0 %v21149_v45  ;;  %v8361_v17 = vmul.f32 %v17113_v13, %v18799_v53 }
 0x77f   : > { %v8385_v26 = vpack.c.bf16 %v8378_v54, %v8377_v18  ;;  %v8371_v31 = vmul.f32 %v8362_v48, %v8238_v3  ;;  %17114 = vrsqrt.f32 %v8346_v60 }
 0x780   : > { %v8370_v21 = vmul.f32 %v8361_v17, %v8238_v3 }
 0x781   : > { %v8380_v15 = vadd.f32 %v8371_v31, %v8239_v58 }
 0x782   : > { %v8379_v46 = vadd.f32 %v8370_v21, %v8239_v58 }
 0x784   : > { %v8386_v63 = vpack.c.bf16 %v8380_v15, %v8379_v46 }
 0x785   : > { %14363 = vmatmul.mubr.msk.bf16.gmra.mxu0 %vm8247_vm10, %v8385_v26 }
 0x786   : > { %8515 = vmatprep.mubr.bf16.mxu0 %v21149_v45 }
 0x78c   : > { %v17115_v19 = vpop.eup %17114 }
 0x78d   : > { %14364 = vmatmul.mubr.msk.bf16.gmra.mxu0 %vm8247_vm10, %v8386_v63  ;;  %v8364_v39 = vmul.f32 %v17115_v19, %v18814_v57  ;;  %v18852_v57 = vld [vmem:[#allocation12 + $0x2] ss:$8 sm:$0x3] }
 0x78e   : > { %8525 = vmatprep.mubr.bf16.mxu0 %v21149_v45 }
 0x78f   : > { %v8373_v11 = vmul.f32 %v8364_v39, %v8238_v3 }
 0x791   : > { %v8382_v22 = vadd.f32 %v8373_v11, %v8239_v58 }
 0x7b0   : > { %v8323_v50 = vpop.xlane.xlu0 %8322 }
 0x7b1   : > { %v8336_v53 = vmul.f32 0.015625, %v8323_v50 }
 0x7b3   : > { %v8345_v34 = vadd.f32 1e-05, %v8336_v53 }
 0x7b4   : > { %v8329_v41 = vpop.xlane.xlu0 %8328 }
 0x7b5   : > { %17116 = vrsqrt.f32 %v8345_v34  ;;  %v8338_v40 = vmul.f32 0.015625, %v8329_v41 }
 0x7b7   : > { %v8347_v20 = vadd.f32 1e-05, %v8338_v40 }
 0x7b9   : > { %17118 = vrsqrt.f32 %v8347_v20 }
 0x7c2   : > { %v17117_v30 = vpop.eup %17116 }
 0x7c3   : > { %v8363_v36 = vmul.f32 %v17117_v30, %v18823_v0  ;;  %v8401_v0 = vrot.slane %v18852_v57, %v18052_v7 }
 0x7c5   : > { %v8372_v49 = vmul.f32 %v8363_v36, %v8238_v3  ;;  %v8405_v36 = vrot.slane %v18852_v57, %v18056_v10 }
 0x7c6   : > { %v17119_v52 = vpop.eup %17118 }
 0x7c7   : > { %v8381_v6 = vadd.f32 %v8372_v49, %v8239_v58  ;;  %v8365_v25 = vmul.f32 %v17119_v52, %v18828_v16 }
 0x7c9   : > { %v8387_v29 = vpack.c.bf16 %v8382_v22, %v8381_v6  ;;  %v8374_v44 = vmul.f32 %v8365_v25, %v8238_v3 }
 0x7cb   : > { %14365 = vmatmul.mubr.msk.bf16.gmra.mxu0 %vm8247_vm10, %v8387_v29  ;;  %v8383_v8 = vadd.f32 %v8374_v44, %v8239_v58 }
 0x7cc   : > { %8535 = vmatprep.mubr.bf16.mxu0 %v21149_v45 }
 0x7cd   : > { %v8388_v35 = vpack.c.bf16 %v8383_v8, %v8383_v8 }
 0x7d3   : > { %14366 = vmatmul.mubr.msk.bf16.gmra.mxu0 %vm8247_vm10, %v8388_v35 }
 0x7d4   : > { %14804 = vmatprep.mubr.msk.bf16.mxu0 %vm17809_vm11, %v21151_v32 }
 0x83d   : > { %v8497_v61 = vpop.f32.mrf.mxu0 }
 0x83e   : > { %v8498_v28 = vadd.f32 %v8497_v61, %v8401_v0 }
 0x83f   : > { %v18856_v23 = vpop.f32.mrf.mxu0 }
 0x840   : > { %8553 = vrot.lane.b32.xlu1 %v8498_v28, %s17803_s2  ;;  %v8500_v44 = vadd.f32 %v18856_v23, %v8405_v36 }
 0x841   : > { %v8501_v16 = vpop.f32.mrf.mxu0 }
 0x842   : > { %v8502_v3 = vadd.f32 %v8501_v16, %v8401_v0 }
 0x843   : > { %v18859_v47 = vpop.f32.mrf.mxu0 }
 0x844   : > { %v18861_v59 = vpack.c.bf16 %v8502_v3, %v8498_v28  ;;  %8555 = vrot.lane.b32.xlu0 %v8502_v3, %s17803_s2  ;;  %v8504_v25 = vadd.f32 %v18859_v47, %v8405_v36 }
 0x845   : > { %v8507_v58 = vpop.f32.mrf.mxu0 }
 0x846   : > { %v8508_v43 = vadd.f32 %v8507_v58, %v8401_v0  ;;  %v18929_v8 = vpack.c.bf16 %v8504_v25, %v8500_v44 }
 0x847   : > { %v18864_v38 = vpop.f32.mrf.mxu0 }
 0x848   : > { %8557 = vrot.lane.b32.xlu1 %v8508_v43, %s17803_s2  ;;  %v8510_v3 = vadd.f32 %v18864_v38, %v8405_v36 }
 0x849   : > { %v8511_v5 = vpop.f32.mrf.mxu0 }
 0x84a   : > { %v8512_v37 = vadd.f32 %v8511_v5, %v8401_v0 }
 0x84b   : > { %v18867_v9 = vpop.f32.mrf.mxu0 }
 0x84c   : > { %v18869_v55 = vpack.c.bf16 %v8512_v37, %v8508_v43  ;;  %8559 = vrot.lane.b32.xlu1 %v8512_v37, %s17803_s2  ;;  %v8514_v23 = vadd.f32 %v18867_v9, %v8405_v36 }
 0x84d   : > { %v8517_v1 = vpop.f32.mrf.mxu0 }
 0x84e   : > { %v8518_v33 = vadd.f32 %v8517_v1, %v8401_v0  ;;  %v18949_v47 = vpack.c.bf16 %v8514_v23, %v8510_v3 }
 0x84f   : > { %v8519_v13 = vpop.f32.mrf.mxu0 }
 0x850   : > { %8561 = vrot.lane.b32.xlu0 %v8518_v33, %s17803_s2  ;;  %v8520_v22 = vadd.f32 %v8519_v13, %v8405_v36 }
 0x851   : > { %v8521_v54 = vpop.f32.mrf.mxu0 }
 0x852   : > { %v8522_v48 = vadd.f32 %v8521_v54, %v8401_v0 }
 0x853   : > { %v8523_v17 = vpop.f32.mrf.mxu0 }
 0x854   : > { %v18873_v18 = vpack.c.bf16 %v8522_v48, %v8518_v33  ;;  %8563 = vrot.lane.b32.xlu1 %v8522_v48, %s17803_s2  ;;  %v8524_v52 = vadd.f32 %v8523_v17, %v8405_v36 }
 0x856   : > { %v18924_v29 = vpack.c.bf16 %v8524_v52, %v8520_v22 }
 0x88b   : > { %v8527_v26 = vpop.f32.mrf.mxu0 }
 0x88c   : > { %v8528_v31 = vadd.f32 %v8527_v26, %v8401_v0 }
 0x88d   : > { %v18876_v21 = vpop.f32.mrf.mxu0 }
 0x88e   : > { %8565 = vrot.lane.b32.xlu0 %v8528_v31, %s17803_s2  ;;  %v8530_v28 = vadd.f32 %v18876_v21, %v8405_v36 }
 0x88f   : > { %v8531_v15 = vpop.f32.mrf.mxu0 }
 0x890   : > { %v8532_v46 = vadd.f32 %v8531_v15, %v8401_v0 }
 0x891   : > { %v18879_v63 = vpop.f32.mrf.mxu0 }
 0x892   : > { %8567 = vrot.lane.b32.xlu1 %v8532_v46, %s17803_s2  ;;  %v18889_v34 = vpack.c.bf16 %v8532_v46, %v8528_v31  ;;  %v8534_v61 = vadd.f32 %v18879_v63, %v8405_v36 }
 0x893   : > { %v8537_v4 = vpop.f32.mrf.mxu0 }
 0x894   : > { %v8538_v42 = vadd.f32 %v8537_v4, %v8401_v0  ;;  %v18944_v16 = vpack.c.bf16 %v8534_v61, %v8530_v28 }
 0x895   : > { %v8539_v60 = vpop.f32.mrf.mxu0 }
 0x896   : > { %8569 = vrot.lane.b32.xlu0 %v8538_v42, %s17803_s2  ;;  %v18893_v41 = vpack.c.bf16 %v8538_v42, %v8538_v42  ;;  %v8540_v49 = vadd.f32 %v8539_v60, %v8405_v36 }
 0x897   : > { %v8541_v50 = vpop.f32.mrf.mxu0 }
 0x898   : > { %v18919_v6 = vpack.c.bf16 %v8540_v49, %v8540_v49 }
 0x899   : > { %v8542_v53 = vpop.f32.mrf.mxu0 }
 0x89a   : > { %8932 = vrot.lane.b32.xlu0 %v18861_v59, %s17806_s19  ;;  %v8853_v37 = vsel %vm1363_vm9, %v18919_v6, 0 }
 0x89e   : > { %8934 = vrot.lane.b32.xlu0 %v18869_v55, %s17806_s19 }
 0x8a2   : > { %8936 = vrot.lane.b32.xlu0 %v18873_v18, %s17806_s19 }
 0x8a6   : > { %8938 = vrot.lane.b32.xlu0 %v18889_v34, %s17806_s19 }
 0x8aa   : > { %8940 = vrot.lane.b32.xlu0 %v18893_v41, %s17806_s19 }
 0x8ae   : > { %9260 = vrot.lane.b32.xlu0 %v18861_v59, %s17807_s16 }
 0x8b2   : > { %9262 = vrot.lane.b32.xlu0 %v18869_v55, %s17807_s16  ;;  %v8554_v40 = vpop.permute.xlu1 %8553 }
 0x8b6   : > { %9264 = vrot.lane.b32.xlu0 %v18873_v18, %s17807_s16  ;;  %v8556_v20 = vpop.permute.xlu0 %8555 }
 0x8ba   : > { %9266 = vrot.lane.b32.xlu0 %v18889_v34, %s17807_s16  ;;  %v8558_v19 = vpop.permute.xlu1 %8557 }
 0x8bb   : > { %8580 = vxpose.xlu1.b32.start [1/9] (short) (narrow) %v8554_v40, 64  ;;  %v21216_v40 = vlaneseq }
 0x8be   : > { %9268 = vrot.lane.b32.xlu0 %v18893_v41, %s17807_s16  ;;  %v8560_v39 = vpop.permute.xlu1 %8559 }
 0x8bf   : > { %8581 = vxpose.xlu1.b32.cont [2/9] (short) (narrow) %v8556_v20, 64  ;;  %v8233_v20 = vand.u32 127, %v21216_v40 }
 0x8c1   : > { %vm8234_vm13 = vcmp.ge.s32.totalorder %v8233_v20, 1  ;;  %vm8235_vm14 = vcmp.lt.s32.totalorder %v8233_v20, 8 }
 0x8c2   : > { %9583 = vrot.lane.b32.xlu0 %v18861_v59, %s17808_s15  ;;  %v8562_v30 = vpop.permute.xlu0 %8561  ;;  %vm8236_vm15 = vmand %vm8234_vm13, %vm8235_vm14 }
 0x8c3   : > { %8582 = vxpose.xlu1.b32.cont [3/9] (short) (narrow) %v8558_v19, 64  ;;  %v19039_v19 = vsel %vm8236_vm15, -1e+30, %v21151_v32 }
 0x8c4   : > { %21217 = vst [vmem:[#allocation33_spill] sm:$0xff] %v19039_v19 }
 0x8c6   : > { %9585 = vrot.lane.b32.xlu0 %v18869_v55, %s17808_s15  ;;  %v8564_v11 = vpop.permute.xlu1 %8563 }
 0x8c7   : > { %8583 = vxpose.xlu1.b32.cont [4/9] (short) (narrow) %v8560_v39, 64 }
 0x8ca   : > { %9587 = vrot.lane.b32.xlu0 %v18873_v18, %s17808_s15 }
 0x8cb   : > { %8584 = vxpose.xlu1.b32.cont [5/9] (short) (narrow) %v8562_v30, 64 }
 0x8ce   : > { %9589 = vrot.lane.b32.xlu0 %v18889_v34, %s17808_s15 }
 0x8cf   : > { %8585 = vxpose.xlu1.b32.cont [6/9] (short) (narrow) %v8564_v11, 64 }
 0x8d2   : > { %9591 = vrot.lane.b32.xlu0 %v18893_v41, %s17808_s15 }
 0x8d6   : > { %9164 = vrot.lane.b32.xlu0 %v18919_v6, %s17806_s19 }
 0x8da   : > { %9160 = vrot.lane.b32.xlu0 %v18924_v29, %s17806_s19 }
 0x8de   : > { %9156 = vrot.lane.b32.xlu0 %v18929_v8, %s17806_s19 }
 0x8e2   : > { %9487 = vrot.lane.b32.xlu0 %v18919_v6, %s17807_s16 }
 0x8e6   : > { %9483 = vrot.lane.b32.xlu0 %v18924_v29, %s17807_s16 }
 0x900   : > { %v8566_v35 = vpop.permute.xlu0 %8565 }
 0x901   : > { %8586 = vxpose.xlu1.b32.cont [7/9] (short) (narrow) %v8566_v35, 64 }
 0x904   : > { %v8568_v57 = vpop.permute.xlu1 %8567 }
 0x905   : > { %8587 = vxpose.xlu1.b32.cont [8/9] (short) (narrow) %v8568_v57, 64 }
 0x908   : > { %v8570_v0 = vpop.permute.xlu0 %8569 }
 0x909   : > { %8588 = vxpose.xlu1.b32.end [9/9] (short) (narrow) %v8570_v0, 64 }
 0x927   : > { %9162 = vrot.lane.b32.xlu1 %v18944_v16, %s17806_s19 }
 0x92b   : > { %9158 = vrot.lane.b32.xlu1 %v18949_v47, %s17806_s19 }
 0x92f   : > { %9485 = vrot.lane.b32.xlu1 %v18944_v16, %s17807_s16 }
 0x933   : > { %9481 = vrot.lane.b32.xlu1 %v18949_v47, %s17807_s16 }
 0x965   : > { %v8596_v58 = vpop.trf.xlu1 }
 0x969   : > { %v8597_v43 = vpop.trf.xlu1 }
 0x96a   : > { %v8612_v5 = vpack.c.bf16 %v8597_v43, %v8596_v58 }
 0x96c   : > { %14751 = vmatpush3.bf16.msra.mxu1 %v8612_v5 }
 0x96d   : > { %v8598_v38 = vpop.trf.xlu1  ;;  %14772 = vmatprep.subr.bf16.mxu1 %v21151_v32 }
 0x96f   : > { %14753 = vmatmul.mubr.msk.bf16.vlgmr.msra.gmra.mxu1 %vm8626_vm12, %v18861_v59  ;;  %v8933_v59 = vpop.permute.xlu0 %8932 }
 0x970   : > { %14773 = vmatpush3.bf16.msra.mxu1 %v8853_v37  ;;  %14756 = vmatprep.mubr.msk.bf16.mxu1 %vm17809_vm11, %v21151_v32 }
 0x971   : > { %v8599_v9 = vpop.trf.xlu1  ;;  %14774 = vmatprep.subr.bf16.mxu1 %v21151_v32 }
 0x972   : > { %v8613_v1 = vpack.c.bf16 %v8599_v9, %v8598_v38 }
 0x974   : > { %14775 = vmatpush3.bf16.msra.mxu1 %v18944_v16  ;;  %14803 = vmatpush3.bf16.msra.mxu0 %v8613_v1 }
 0x975   : > { %14776 = vmatprep.subr.bf16.mxu1 %v21151_v32  ;;  %v8600_v33 = vpop.trf.xlu1  ;;  %14854 = vmatprep.subr.bf16.mxu0 %v21151_v32 }
 0x977   : > { %14757 = vmatmul.mubr.msk.bf16.gmra.mxu1 %vm8626_vm12, %v18869_v55  ;;  %14805 = vmatmul.mubr.msk.bf16.vlgmr.msra.gmra.mxu0 %vm8626_vm12, %v8933_v59  ;;  %v8935_v55 = vpop.permute.xlu0 %8934 }
 0x978   : > { %14777 = vmatpush3.bf16.msra.mxu1 %v18924_v29  ;;  %14760 = vmatprep.mubr.msk.bf16.mxu1 %vm17809_vm11, %v21151_v32 }
 0x979   : > { %14778 = vmatprep.subr.bf16.mxu1 %v21151_v32  ;;  %14808 = vmatprep.mubr.msk.bf16.mxu0 %vm17809_vm11, %v21151_v32  ;;  %v8601_v13 = vpop.trf.xlu1 }
 0x97a   : > { %v8614_v54 = vpack.c.bf16 %v8601_v13, %v8600_v33 }
 0x97b   : > { %v8937_v48 = vpop.permute.xlu0 %8936 }
 0x97c   : > { %14779 = vmatpush3.bf16.msra.mxu1 %v18949_v47  ;;  %14855 = vmatpush3.bf16.msra.mxu0 %v8614_v54 }
 0x97d   : > { %14780 = vmatprep.subr.bf16.mxu1 %v21151_v32  ;;  %14906 = vmatprep.subr.bf16.mxu0 %v21151_v32  ;;  %v8602_v17 = vpop.trf.xlu1 }
 0x97f   : > { %14761 = vmatmul.mubr.msk.bf16.gmra.mxu1 %vm8626_vm12, %v18873_v18  ;;  %14809 = vmatmul.mubr.msk.bf16.gmra.mxu0 %vm8626_vm12, %v8935_v55  ;;  %v8939_v18 = vpop.permute.xlu0 %8938 }
 0x980   : > { %14781 = vmatpush3.bf16.msra.mxu1 %v18929_v8  ;;  %14764 = vmatprep.mubr.msk.bf16.mxu1 %vm17809_vm11, %v21151_v32 }
 0x981   : > { %14812 = vmatprep.mubr.msk.bf16.mxu0 %vm17809_vm11, %v21151_v32  ;;  %14824 = vmatprep.subr.bf16.mxu1 %v21151_v32  ;;  %v8603_v31 = vpop.trf.xlu1 }
 0x982   : > { %v8615_v21 = vpack.c.bf16 %v8603_v31, %v8602_v17 }
 0x983   : > { %v8941_v26 = vpop.permute.xlu0 %8940 }
 0x987   : > { %14765 = vmatmul.mubr.msk.bf16.gmra.mxu1 %vm8626_vm12, %v18889_v34  ;;  %14813 = vmatmul.mubr.msk.bf16.gmra.mxu0 %vm8626_vm12, %v8937_v48  ;;  %v9261_v15 = vpop.permute.xlu0 %9260 }
 0x988   : > { %14768 = vmatprep.mubr.msk.bf16.mxu1 %vm17809_vm11, %v21151_v32  ;;  %14816 = vmatprep.mubr.msk.bf16.mxu0 %vm17809_vm11, %v21151_v32 }
 0x98b   : > { %v9263_v46 = vpop.permute.xlu0 %9262 }
 0x98f   : > { %14769 = vmatmul.mubr.msk.bf16.gmra.mxu1 %vm8626_vm12, %v18893_v41  ;;  %14817 = vmatmul.mubr.msk.bf16.gmra.mxu0 %vm8626_vm12, %v8939_v18  ;;  %v9265_v63 = vpop.permute.xlu0 %9264 }
 0x990   : > { %14820 = vmatprep.mubr.msk.bf16.mxu0 %vm17809_vm11, %v21151_v32  ;;  %14782 = vmatprep.mubr.msk.bf16.mxu1 %vm17809_vm11, %v21151_v32 }
 0x993   : > { %v9267_v4 = vpop.permute.xlu0 %9266 }
 0x997   : > { %14821 = vmatmul.mubr.msk.bf16.gmra.mxu0 %vm8626_vm12, %v8941_v26  ;;  %v9269_v42 = vpop.permute.xlu0 %9268 }
 0x998   : > { %14856 = vmatprep.mubr.msk.bf16.mxu0 %vm17809_vm11, %v21151_v32 }
 0x99b   : > { %v9584_v60 = vpop.permute.xlu0 %9583 }
 0x99f   : > { %14857 = vmatmul.mubr.msk.bf16.vlgmr.msra.gmra.mxu0 %vm8626_vm12, %v9261_v15  ;;  %v9586_v50 = vpop.permute.xlu0 %9585 }
 0x9a0   : > { %14860 = vmatprep.mubr.msk.bf16.mxu0 %vm17809_vm11, %v21151_v32  ;;  %14907 = vmatpush3.bf16.msra.mxu0 %v8615_v21 }
 0x9a1   : > { %14958 = vmatprep.subr.bf16.mxu0 %v21151_v32 }
 0x9a3   : > { %v9588_v53 = vpop.permute.xlu0 %9587 }
 0x9a7   : > { %14861 = vmatmul.mubr.msk.bf16.gmra.mxu0 %vm8626_vm12, %v9263_v46  ;;  %v9590_v34 = vpop.permute.xlu0 %9589 }
 0x9a8   : > { %14864 = vmatprep.mubr.msk.bf16.mxu0 %vm17809_vm11, %v21151_v32 }
 0x9ab   : > { %v9592_v41 = vpop.permute.xlu0 %9591 }
 0x9af   : > { %14865 = vmatmul.mubr.msk.bf16.gmra.mxu0 %vm8626_vm12, %v9265_v63 }
 0x9b0   : > { %14868 = vmatprep.mubr.msk.bf16.mxu0 %vm17809_vm11, %v21151_v32 }
 0x9b7   : > { %14869 = vmatmul.mubr.msk.bf16.gmra.mxu0 %vm8626_vm12, %v9267_v4 }
 0x9b8   : > { %14872 = vmatprep.mubr.msk.bf16.mxu0 %vm17809_vm11, %v21151_v32 }
 0x9bf   : > { %14873 = vmatmul.mubr.msk.bf16.gmra.mxu0 %vm8626_vm12, %v9269_v42 }
 0x9c0   : > { %14908 = vmatprep.mubr.msk.bf16.mxu0 %vm17809_vm11, %v21151_v32 }
 0x9c7   : > { %14909 = vmatmul.mubr.msk.bf16.vlgmr.msra.gmra.mxu0 %vm8626_vm12, %v9584_v60 }
 0x9c8   : > { %14912 = vmatprep.mubr.msk.bf16.mxu0 %vm17809_vm11, %v21151_v32 }
 0x9cf   : > { %14913 = vmatmul.mubr.msk.bf16.gmra.mxu0 %vm8626_vm12, %v9586_v50 }
 0x9d0   : > { %14916 = vmatprep.mubr.msk.bf16.mxu0 %vm17809_vm11, %v21151_v32 }
 0x9d7   : > { %14917 = vmatmul.mubr.msk.bf16.gmra.mxu0 %vm8626_vm12, %v9588_v53 }
 0x9d8   : > { %14920 = vmatprep.mubr.msk.bf16.mxu0 %vm17809_vm11, %v21151_v32 }
 0x9df   : > { %14921 = vmatmul.mubr.msk.bf16.gmra.mxu0 %vm8626_vm12, %v9590_v34 }
 0x9e0   : > { %14924 = vmatprep.mubr.msk.bf16.mxu0 %vm17809_vm11, %v21151_v32 }
 0x9e7   : > { %14925 = vmatmul.mubr.msk.bf16.gmra.mxu0 %vm8626_vm12, %v9592_v41 }
 0x9e8   : > { %14966 = vmatprep.mubr.msk.bf16.mxu0 %vm17809_vm11, %v21151_v32 }
 0xa2f   : > { %v8676_v39 = vpop.f32.mrf.mxu1 }
 0xa30   : > { %v8714_v30 = vmul.f32 0.25, %v8676_v39 }
 0xa31   : > { %v14754_v36 = vpop.f32.mrf.mxu1 }
 0xa32   : > { %v19042_v11 = vadd.f32 %v8714_v30, %v19039_v19 }
 0xa33   : > { %v8679_v49 = vpop.f32.mrf.mxu1 }
 0xa34   : > { %v8715_v52 = vmul.f32 0.25, %v8679_v49  ;;  %v8733_v22 = vsel %vm8732_vm0, %v19042_v11, -inf }
 0xa35   : > { %8734 = vmax.xlane.f32.xlu0 %v8733_v22  ;;  %v14755_v25 = vpop.f32.mrf.mxu1 }
 0xa36   : > { %v19047_v44 = vadd.f32 %v8715_v52, %v19039_v19 }
 0xa37   : > { %v8684_v35 = vpop.f32.mrf.mxu1  ;;  %v8991_v57 = vpop.f32.mrf.mxu0 }
 0xa38   : > { %v8716_v0 = vmul.f32 0.25, %v8684_v35  ;;  %v9029_v61 = vmul.f32 0.25, %v8991_v57  ;;  %v8736_v28 = vsel %vm8732_vm0, %v19047_v44, -inf }
 0xa39   : > { %8737 = vmax.xlane.f32.xlu1 %v8736_v28  ;;  %v14758_v23 = vpop.f32.mrf.mxu1  ;;  %v14806_v3 = vpop.f32.mrf.mxu0 }
 0xa3a   : > { %v19052_v58 = vadd.f32 %v8716_v0, %v19039_v19  ;;  %v19055_v43 = vadd.f32 %v9029_v61, %v19039_v19 }
 0xa3b   : > { %v8687_v5 = vpop.f32.mrf.mxu1  ;;  %v8994_v38 = vpop.f32.mrf.mxu0 }
 0xa3c   : > { %v8717_v37 = vmul.f32 0.25, %v8687_v5  ;;  %v9030_v9 = vmul.f32 0.25, %v8994_v38  ;;  %v8739_v1 = vsel %vm8732_vm0, %v19052_v58, -inf  ;;  %v9047_v33 = vsel %vm8732_vm0, %v19055_v43, -inf }
 0xa3d   : > { %8740 = vmax.xlane.f32.xlu0 %v8739_v1  ;;  %v14759_v59 = vpop.f32.mrf.mxu1  ;;  %9048 = vmax.xlane.f32.xlu1 %v9047_v33  ;;  %v14807_v13 = vpop.f32.mrf.mxu0 }
 0xa3e   : > { %v19062_v54 = vadd.f32 %v8717_v37, %v19039_v19  ;;  %v19067_v31 = vadd.f32 %v9030_v9, %v19039_v19 }
 0xa3f   : > { %v8692_v55 = vpop.f32.mrf.mxu1  ;;  %v8999_v48 = vpop.f32.mrf.mxu0 }
 0xa40   : > { %v8718_v18 = vmul.f32 0.25, %v8692_v55  ;;  %v9031_v17 = vmul.f32 0.25, %v8999_v48  ;;  %v8742_v26 = vsel %vm8732_vm0, %v19062_v54, -inf  ;;  %v9050_v60 = vsel %vm8732_vm0, %v19067_v31, -inf }
 0xa41   : > { %8743 = vmax.xlane.f32.xlu0 %v8742_v26  ;;  %v14762_v21 = vpop.f32.mrf.mxu1  ;;  %v14810_v15 = vpop.f32.mrf.mxu0 }
 0xa42   : > { %v19070_v46 = vadd.f32 %v9031_v17, %v19039_v19  ;;  %v19077_v53 = vadd.f32 %v8718_v18, %v19039_v19 }
 0xa43   : > { %v8695_v63 = vpop.f32.mrf.mxu1  ;;  %v9002_v4 = vpop.f32.mrf.mxu0 }
 0xa44   : > { %v8719_v42 = vmul.f32 0.25, %v8695_v63  ;;  %v9053_v50 = vsel %vm8732_vm0, %v19070_v46, -inf  ;;  %v9032_v40 = vmul.f32 0.25, %v9002_v4  ;;  %v8745_v36 = vsel %vm8732_vm0, %v19077_v53, -inf }
 0xa45   : > { %v14763_v34 = vpop.f32.mrf.mxu1  ;;  %9051 = vmax.xlane.f32.xlu0 %v9050_v60  ;;  %9054 = vmax.xlane.f32.xlu1 %v9053_v50  ;;  %v14811_v41 = vpop.f32.mrf.mxu0 }
 0xa46   : > { %v19082_v49 = vadd.f32 %v8719_v42, %v19039_v19  ;;  %v19088_v0 = vadd.f32 %v9032_v40, %v19039_v19 }
 0xa47   : > { %v8700_v20 = vpop.f32.mrf.mxu1  ;;  %v9007_v39 = vpop.f32.mrf.mxu0 }
 0xa48   : > { %v9033_v30 = vmul.f32 0.25, %v9007_v39  ;;  %v8720_v61 = vmul.f32 0.25, %v8700_v20  ;;  %v8748_v23 = vsel %vm8732_vm0, %v19082_v49, -inf  ;;  %v9056_v59 = vsel %vm8732_vm0, %v19088_v0, -inf }
 0xa49   : > { %v14766_v52 = vpop.f32.mrf.mxu1  ;;  %8746 = vmax.xlane.f32.xlu0 %v8745_v36  ;;  %v14814_v22 = vpop.f32.mrf.mxu0 }
 0xa4a   : > { %v19085_v25 = vadd.f32 %v9033_v30, %v19039_v19  ;;  %v19102_v55 = vadd.f32 %v8720_v61, %v19039_v19 }
 0xa4b   : > { %v8703_v35 = vpop.f32.mrf.mxu1  ;;  %v9010_v57 = vpop.f32.mrf.mxu0 }
 0xa4c   : > { %v8721_v28 = vmul.f32 0.25, %v8703_v35  ;;  %v9059_v3 = vsel %vm8732_vm0, %v19085_v25, -inf  ;;  %v9034_v33 = vmul.f32 0.25, %v9010_v57  ;;  %v8751_v15 = vsel %vm8732_vm0, %v19102_v55, -inf }
 0xa4d   : > { %v14767_v5 = vpop.f32.mrf.mxu1  ;;  %8749 = vmax.xlane.f32.xlu0 %v8748_v23  ;;  %9060 = vmax.xlane.f32.xlu1 %v9059_v3  ;;  %v14815_v38 = vpop.f32.mrf.mxu0 }
 0xa4e   : > { %v19095_v37 = vadd.f32 %v8721_v28, %v19039_v19  ;;  %v19107_v63 = vadd.f32 %v9034_v33, %v19039_v19 }
 0xa4f   : > { %v8708_v9 = vpop.f32.mrf.mxu1  ;;  %v9015_v1 = vpop.f32.mrf.mxu0 }
 0xa50   : > { %v8754_v13 = vsel %vm8732_vm0, %v19095_v37, -inf  ;;  %v8722_v21 = vmul.f32 0.25, %v8708_v9  ;;  %v9062_v50 = vsel %vm8732_vm0, %v19107_v63, -inf }
 0xa51   : > { %v14770_v48 = vpop.f32.mrf.mxu1  ;;  %9057 = vmax.xlane.f32.xlu0 %v9056_v59  ;;  %8755 = vmax.xlane.f32.xlu1 %v8754_v13  ;;  %v14818_v18 = vpop.f32.mrf.mxu0  ;;  %v9035_v13 = vmul.f32 0.25, %v9015_v1 }
 0xa52   : > { %v19112_v34 = vadd.f32 %v8722_v21, %v19039_v19 }
 0xa53   : > { %v8711_v17 = vpop.f32.mrf.mxu1  ;;  %v9018_v26 = vpop.f32.mrf.mxu0  ;;  %v19121_v21 = vadd.f32 %v9035_v13, %v19039_v19 }
 0xa54   : > { %v8757_v20 = vsel %vm8732_vm0, %v19112_v34, -inf }
 0xa55   : > { %v14771_v4 = vpop.f32.mrf.mxu1  ;;  %8752 = vmax.xlane.f32.xlu0 %v8751_v15  ;;  %v14819_v42 = vpop.f32.mrf.mxu0 }
 0xa57   : > { %v9023_v60 = vpop.f32.mrf.mxu0 }
 0xa59   : > { %9063 = vmax.xlane.f32.xlu0 %v9062_v50  ;;  %v14822_v41 = vpop.f32.mrf.mxu0  ;;  %v9065_v50 = vsel %vm8732_vm0, %v19121_v21, -inf }
 0xa5b   : > { %v9026_v40 = vpop.f32.mrf.mxu0 }
 0xa5d   : > { %8758 = vmax.xlane.f32.xlu0 %v8757_v20  ;;  %v14823_v39 = vpop.f32.mrf.mxu0  ;;  %v9036_v20 = vmul.f32 0.25, %v9018_v26 }
 0xa5f   : > { %v9319_v30 = vpop.f32.mrf.mxu0 }
 0xa61   : > { %v14858_v36 = vpop.f32.mrf.mxu0 }
 0xa62   : > { %9810 = vrot.lane.b32.xlu1 %v18919_v6, %s17808_s15  ;;  %v9037_v6 = vmul.f32 0.25, %v9023_v60 }
 0xa63   : > { %v9322_v52 = vpop.f32.mrf.mxu0 }
 0xa64   : > { %v9358_v4 = vmul.f32 0.25, %v9322_v52  ;;  %v19126_v41 = vadd.f32 %v9037_v6, %v19039_v19 }
 0xa65   : > { %v14859_v22 = vpop.f32.mrf.mxu0 }
 0xa66   : > { %v9071_v60 = vsel %vm8732_vm0, %v19126_v41, -inf  ;;  %v19131_v36 = vadd.f32 %v9358_v4, %v19039_v19  ;;  %v9357_v22 = vmul.f32 0.25, %v9319_v30 }
 0xa67   : > { %v9327_v35 = vpop.f32.mrf.mxu0 }
 0xa68   : > { %v9359_v13 = vmul.f32 0.25, %v9327_v35 }
 0xa69   : > { %v14862_v57 = vpop.f32.mrf.mxu0 }
 0xa6a   : > { %v19134_v57 = vadd.f32 %v9036_v20, %v19039_v19  ;;  %v19152_v4 = vadd.f32 %v9359_v13, %v19039_v19 }
 0xa6b   : > { %v9330_v61 = vpop.f32.mrf.mxu0 }
 0xa6c   : > { %v9360_v1 = vmul.f32 0.25, %v9330_v61  ;;  %v9068_v30 = vsel %vm8732_vm0, %v19134_v57, -inf }
 0xa6d   : > { %v14863_v28 = vpop.f32.mrf.mxu0 }
 0xa6e   : > { %v19139_v26 = vadd.f32 %v9360_v1, %v19039_v19 }
 0xa6f   : > { %v9335_v23 = vpop.f32.mrf.mxu0 }
 0xa71   : > { %v14866_v3 = vpop.f32.mrf.mxu0 }
 0xa73   : > { %9479 = vrot.lane.b32.xlu0 %v18929_v8, %s17807_s16  ;;  %v9338_v5 = vpop.f32.mrf.mxu0 }
 0xa74   : > { %v9362_v28 = vmul.f32 0.25, %v9338_v5  ;;  %v9384_v5 = vsel %vm8732_vm0, %v19139_v26, -inf }
 0xa75   : > { %v14867_v38 = vpop.f32.mrf.mxu0 }
 0xa76   : > { %v9378_v38 = vsel %vm8732_vm0, %v19131_v36, -inf }
 0xa77   : > { %v9343_v9 = vpop.f32.mrf.mxu0 }
 0xa79   : > { %v14870_v33 = vpop.f32.mrf.mxu0 }
 0xa7a   : > { %v19142_v33 = vadd.f32 %v9357_v22, %v19039_v19  ;;  %v9381_v22 = vsel %vm8732_vm0, %v19152_v4, -inf }
 0xa7b   : > { %v9346_v59 = vpop.f32.mrf.mxu0 }
 0xa7c   : > { %v9375_v35 = vsel %vm8732_vm0, %v19142_v33, -inf }
 0xa7d   : > { %v14871_v48 = vpop.f32.mrf.mxu0 }
 0xa7e   : > { %v9364_v48 = vmul.f32 0.25, %v9346_v59  ;;  %v9361_v59 = vmul.f32 0.25, %v9335_v23 }
 0xa7f   : > { %v9351_v18 = vpop.f32.mrf.mxu0 }
 0xa80   : > { %v19159_v1 = vadd.f32 %v9364_v48, %v19039_v19 }
 0xa81   : > { %v14874_v17 = vpop.f32.mrf.mxu0 }
 0xa82   : > { %v19149_v17 = vadd.f32 %v9362_v28, %v19039_v19  ;;  %v19164_v28 = vadd.f32 %v9361_v59, %v19039_v19 }
 0xa83   : > { %v9354_v15 = vpop.f32.mrf.mxu0 }
 0xa84   : > { %v9390_v20 = vsel %vm8732_vm0, %v19149_v17, -inf }
 0xa85   : > { %v14875_v42 = vpop.f32.mrf.mxu0 }
 0xa86   : > { %9066 = vmax.xlane.f32.xlu1 %v9065_v50 }
 0xa87   : > { %v9642_v40 = vpop.f32.mrf.mxu0 }
 0xa88   : > { %v9680_v42 = vmul.f32 0.25, %v9642_v40  ;;  %v9396_v40 = vsel %vm8732_vm0, %v19159_v1, -inf }
 0xa89   : > { %v14910_v39 = vpop.f32.mrf.mxu0 }
 0xa8a   : > { %9072 = vmax.xlane.f32.xlu1 %v9071_v60  ;;  %v9363_v60 = vmul.f32 0.25, %v9343_v9  ;;  %v9365_v9 = vmul.f32 0.25, %v9351_v18 }
 0xa8b   : > { %v9645_v52 = vpop.f32.mrf.mxu0 }
 0xa8c   : > { %v19172_v48 = vadd.f32 %v9363_v60, %v19039_v19 }
 0xa8d   : > { %v14911_v3 = vpop.f32.mrf.mxu0 }
 0xa8e   : > { %9379 = vmax.xlane.f32.xlu1 %v9378_v38  ;;  %v19169_v38 = vadd.f32 %v9680_v42, %v19039_v19  ;;  %v19182_v42 = vadd.f32 %v9365_v9, %v19039_v19  ;;  %v9393_v18 = vsel %vm8732_vm0, %v19172_v48, -inf }
 0xa8f   : > { %v9650_v61 = vpop.f32.mrf.mxu0 }
 0xa91   : > { %v14914_v6 = vpop.f32.mrf.mxu0 }
 0xa92   : > { %9069 = vmax.xlane.f32.xlu0 %v9068_v30  ;;  %9385 = vmax.xlane.f32.xlu1 %v9384_v5  ;;  %v9387_v5 = vsel %vm8732_vm0, %v19164_v28, -inf }
 0xa93   : > { %v9653_v15 = vpop.f32.mrf.mxu0 }
 0xa94   : > { %v9683_v3 = vmul.f32 0.25, %v9653_v15  ;;  %v9698_v15 = vsel %vm8732_vm0, %v19169_v38, -inf }
 0xa95   : > { %v14915_v50 = vpop.f32.mrf.mxu0 }
 0xa96   : > { %9376 = vmax.xlane.f32.xlu0 %v9375_v35  ;;  %9391 = vmax.xlane.f32.xlu1 %v9390_v20  ;;  %v19179_v35 = vadd.f32 %v9683_v3, %v19039_v19  ;;  %v9681_v50 = vmul.f32 0.25, %v9645_v52  ;;  %v19191_v3 = vpop.permute.xlu0 %9164  ;;  %v9682_v52 = vmul.f32 0.25, %v9650_v61 }
 0xa97   : > { %v9658_v39 = vpop.f32.mrf.mxu0 }
 0xa98   : > { %v19196_v9 = vadd.f32 %v9681_v50, %v19039_v19 }
 0xa99   : > { %v14918_v23 = vpop.f32.mrf.mxu0 }
 0xa9a   : > { %9382 = vmax.xlane.f32.xlu0 %v9381_v22  ;;  %9397 = vmax.xlane.f32.xlu1 %v9396_v40  ;;  %v9707_v22 = vsel %vm8732_vm0, %v19179_v35, -inf  ;;  %v9701_v61 = vsel %vm8732_vm0, %v19196_v9, -inf }
 0xa9b   : > { %v9661_v13 = vpop.f32.mrf.mxu0 }
 0xa9c   : > { %v9685_v6 = vmul.f32 0.25, %v9661_v13  ;;  %v9399_v13 = vsel %vm8732_vm0, %v19182_v42, -inf }
 0xa9d   : > { %v14919_v30 = vpop.f32.mrf.mxu0 }
 0xa9e   : > { %9388 = vmax.xlane.f32.xlu0 %v9387_v5  ;;  %9699 = vmax.xlane.f32.xlu1 %v9698_v15  ;;  %v19189_v23 = vadd.f32 %v9685_v6, %v19039_v19 }
 0xa9f   : > { %v9666_v59 = vpop.f32.mrf.mxu0 }
 0xaa0   : > { %v9686_v20 = vmul.f32 0.25, %v9666_v59  ;;  %v9713_v5 = vsel %vm8732_vm0, %v19189_v23, -inf  ;;  %v19203_v59 = vpop.permute.xlu0 %9160 }
 0xaa1   : > { %v14922_v60 = vpop.f32.mrf.mxu0 }
 0xaa2   : > { %9394 = vmax.xlane.f32.xlu0 %v9393_v18  ;;  %9708 = vmax.xlane.f32.xlu1 %v9707_v22  ;;  %v19201_v15 = vadd.f32 %v9686_v20, %v19039_v19  ;;  %v19206_v60 = vadd.f32 %v9682_v52, %v19039_v19  ;;  %v9684_v22 = vmul.f32 0.25, %v9658_v39 }
 0xaa3   : > { %v9669_v40 = vpop.f32.mrf.mxu0 }
 0xaa4   : > { %v19220_v39 = vadd.f32 %v9684_v22, %v19039_v19  ;;  %v9704_v45 = vsel %vm8732_vm0, %v19206_v60, -inf  ;;  %v19224_v32 = vpop.permute.xlu0 %9156 }
 0xaa5   : > { %v14923_v30 = vpop.f32.mrf.mxu0 }
 0xaa6   : > { %9400 = vmax.xlane.f32.xlu0 %v9399_v13  ;;  %9714 = vmax.xlane.f32.xlu1 %v9713_v5  ;;  %v9716_v30 = vsel %vm8732_vm0, %v19201_v15, -inf  ;;  %v19215_v5 = vpop.permute.xlu1 %9162 }
 0xaa7   : > { %v9674_v6 = vpop.f32.mrf.mxu0 }
 0xaa8   : > { %v9688_v18 = vmul.f32 0.25, %v9674_v6  ;;  %v9687_v6 = vmul.f32 0.25, %v9669_v40  ;;  %v19233_v22 = vpop.permute.xlu0 %9487 }
 0xaa9   : > { %v14926_v50 = vpop.f32.mrf.mxu0 }
 0xaaa   : > { %9702 = vmax.xlane.f32.xlu0 %v9701_v61  ;;  %9717 = vmax.xlane.f32.xlu1 %v9716_v30  ;;  %v19213_v20 = vadd.f32 %v9688_v18, %v19039_v19  ;;  %v19227_v18 = vadd.f32 %v9687_v6, %v19039_v19  ;;  %v9710_v61 = vsel %vm8732_vm0, %v19220_v39, -inf  ;;  %v19231_v30 = vpop.permute.xlu1 %9158 }
 0xaab   : > { %v9677_v13 = vpop.f32.mrf.mxu0 }
 0xaac   : > { %v9722_v52 = vsel %vm8732_vm0, %v19213_v20, -inf  ;;  %v9719_v40 = vsel %vm8732_vm0, %v19227_v18, -inf }
 0xaad   : > { %v14927_v50 = vpop.f32.mrf.mxu0 }
 0xaae   : > { %9705 = vmax.xlane.f32.xlu0 %v9704_v45  ;;  %9723 = vmax.xlane.f32.xlu1 %v9722_v52  ;;  %v19237_v13 = vpop.permute.xlu1 %9485  ;;  %v19239_v50 = vpop.permute.xlu0 %9483 }
 0xab2   : > { %9711 = vmax.xlane.f32.xlu0 %v9710_v61  ;;  %v19241_v45 = vpop.permute.xlu1 %9481 }
 0xab3   : > { %21218 = vst [vmem:[#allocation34_spill] sm:$0xff] %v19241_v45 }
 0xab6   : > { %9720 = vmax.xlane.f32.xlu0 %v9719_v40 }
 0xabe   : > { %v8735_v52 = vpop.xlane.xlu0 %8734 }
 0xabf   : > { %v8760_v6 = vsub.f32 %v19042_v11, %v8735_v52 }
 0xac1   : > { %v8769_v19 = vmul.f32 1.442695, %v8760_v6 }
 0xac2   : > { %v8738_v10 = vpop.xlane.xlu1 %8737 }
 0xac3   : > { %17120 = vpow2.f32 %v8769_v19  ;;  %v8761_v61 = vsub.f32 %v19047_v44, %v8738_v10 }
 0xac5   : > { %v8771_v7 = vmul.f32 1.442695, %v8761_v61 }
 0xac6   : > { %v8741_v12 = vpop.xlane.xlu0 %8740  ;;  %v9049_v14 = vpop.xlane.xlu1 %9048 }
 0xac7   : > { %17122 = vpow2.f32 %v8771_v7  ;;  %v8762_v40 = vsub.f32 %v19052_v58, %v8741_v12  ;;  %v9074_v27 = vsub.f32 %v19055_v43, %v9049_v14 }
 0xac9   : > { %v8773_v2 = vmul.f32 1.442695, %v8762_v40  ;;  %v9083_v51 = vmul.f32 1.442695, %v9074_v27 }
 0xaca   : > { %v8744_v56 = vpop.xlane.xlu0 %8743 }
 0xacb   : > { %17124 = vpow2.f32 %v8773_v2  ;;  %v8763_v24 = vsub.f32 %v19062_v54, %v8744_v56 }
 0xacc   : > { %17126 = vpow2.f32 %v9083_v51 }
 0xacd   : > { %v8775_v11 = vmul.f32 1.442695, %v8763_v24 }
 0xace   : > { %v9052_v52 = vpop.xlane.xlu0 %9051  ;;  %v9055_v19 = vpop.xlane.xlu1 %9054 }
 0xacf   : > { %17128 = vpow2.f32 %v8775_v11  ;;  %v9075_v10 = vsub.f32 %v19067_v31, %v9052_v52  ;;  %v9076_v12 = vsub.f32 %v19070_v46, %v9055_v19 }
 0xad0   : > { %v19249_v44 = vpop.eup %17120 }
 0xad1   : > { %v9085_v7 = vmul.f32 1.442695, %v9075_v10  ;;  %v8787_v14 = vsel %vm8732_vm0, %v19249_v44, 0.0  ;;  %v9087_v24 = vmul.f32 1.442695, %v9076_v12 }
 0xad2   : > { %v8747_v27 = vpop.xlane.xlu0 %8746  ;;  %8788 = vadd.xlane.f32.xlu0 %v8787_v14 }
 0xad3   : > { %17130 = vpow2.f32 %v9085_v7  ;;  %v8764_v56 = vsub.f32 %v19077_v53, %v8747_v27 }
 0xad4   : > { %v19255_v51 = vpop.eup %17122 }
 0xad5   : > { %v8777_v2 = vmul.f32 1.442695, %v8764_v56  ;;  %v8790_v58 = vsel %vm8732_vm0, %v19255_v51, 0.0 }
 0xad6   : > { %v8750_v43 = vpop.xlane.xlu0 %8749  ;;  %8791 = vadd.xlane.f32.xlu1 %v8790_v58  ;;  %v9061_v54 = vpop.xlane.xlu1 %9060 }
 0xad7   : > { %17132 = vpow2.f32 %v8777_v2  ;;  %v8765_v31 = vsub.f32 %v19082_v49, %v8750_v43  ;;  %v9078_v46 = vsub.f32 %v19085_v25, %v9061_v54 }
 0xad8   : > { %v19261_v6 = vpop.eup %17124  ;;  %17134 = vpow2.f32 %v9087_v24 }
 0xad9   : > { %v19263_v61 = vpop.eup %17126  ;;  %v8779_v53 = vmul.f32 1.442695, %v8765_v31  ;;  %v9091_v40 = vmul.f32 1.442695, %v9078_v46  ;;  %v8793_v11 = vsel %vm8732_vm0, %v19261_v6, 0.0 }
 0xada   : > { %v9058_v52 = vpop.xlane.xlu0 %9057  ;;  %8794 = vadd.xlane.f32.xlu0 %v8793_v11  ;;  %v8756_v19 = vpop.xlane.xlu1 %8755  ;;  %v9101_v25 = vsel %vm8732_vm0, %v19263_v61, 0.0 }
 0xadb   : > { %17136 = vpow2.f32 %v8779_v53  ;;  %v9077_v10 = vsub.f32 %v19088_v0, %v9058_v52  ;;  %v8767_v49 = vsub.f32 %v19095_v37, %v8756_v19 }
 0xadc   : > { %v19269_v7 = vpop.eup %17128  ;;  %17138 = vpow2.f32 %v9091_v40 }
 0xadd   : > { %v9089_v12 = vmul.f32 1.442695, %v9077_v10  ;;  %v8783_v14 = vmul.f32 1.442695, %v8767_v49  ;;  %v8796_v27 = vsel %vm8732_vm0, %v19269_v7, 0.0 }
 0xade   : > { %v8753_v56 = vpop.xlane.xlu0 %8752  ;;  %8797 = vadd.xlane.f32.xlu1 %v8796_v27  ;;  %9102 = vadd.xlane.f32.xlu0 %v9101_v25 }
 0xadf   : > { %17140 = vpow2.f32 %v9089_v12  ;;  %v8766_v24 = vsub.f32 %v19102_v55, %v8753_v56 }
 0xae0   : > { %v19276_v0 = vpop.eup %17130  ;;  %17142 = vpow2.f32 %v8783_v14 }
 0xae1   : > { %v8781_v37 = vmul.f32 1.442695, %v8766_v24  ;;  %v9104_v2 = vsel %vm8732_vm0, %v19276_v0, 0.0 }
 0xae2   : > { %v9064_v58 = vpop.xlane.xlu0 %9063  ;;  %9105 = vadd.xlane.f32.xlu1 %v9104_v2 }
 0xae3   : > { %17144 = vpow2.f32 %v8781_v37  ;;  %v9079_v43 = vsub.f32 %v19107_v63, %v9064_v58 }
 0xae4   : > { %v19281_v54 = vpop.eup %17132 }
 0xae5   : > { %v9093_v31 = vmul.f32 1.442695, %v9079_v43  ;;  %v8799_v46 = vsel %vm8732_vm0, %v19281_v54, 0.0  ;;  %v19285_v53 = vpop.eup %17134  ;;  %v19318_v43 = vpop.permute.xlu1 %9810 }
 0xae6   : > { %v8759_v55 = vpop.xlane.xlu0 %8758  ;;  %8800 = vadd.xlane.f32.xlu0 %v8799_v46  ;;  %v9107_v63 = vsel %vm8732_vm0, %v19285_v53, 0.0  ;;  %21221 = vst [vmem:[#allocation37_spill] sm:$0xff] %v19318_v43 }
 0xae7   : > { %17146 = vpow2.f32 %v9093_v31  ;;  %v8768_v40 = vsub.f32 %v19112_v34, %v8759_v55 }
 0xae8   : > { %v19288_v11 = vpop.eup %17136 }
 0xae9   : > { %v8785_v52 = vmul.f32 1.442695, %v8768_v40  ;;  %v8802_v19 = vsel %vm8732_vm0, %v19288_v11, 0.0  ;;  %v19294_v10 = vpop.eup %17138 }
 0xaea   : > { %21219 = vst [vmem:[#allocation35_spill] sm:$0xff] %v19294_v10  ;;  %8803 = vadd.xlane.f32.xlu1 %v8802_v19  ;;  %9108 = vadd.xlane.f32.xlu0 %v9107_v63  ;;  %v9113_v34 = vsel %vm8732_vm0, %v19294_v10, 0.0  ;;  %v19321_v40 = vpop.permute.xlu0 %9479 }
 0xaeb   : > { %17148 = vpow2.f32 %v8785_v52  ;;  %21222 = vst [vmem:[#allocation38_spill] sm:$0xff] %v19321_v40 }
 0xaec   : > { %v19296_v49 = vpop.eup %17140 }
 0xaed   : > { %v9110_v25 = vsel %vm8732_vm0, %v19296_v49, 0.0  ;;  %v19302_v12 = vpop.eup %17142 }
 0xaee   : > { %9111 = vadd.xlane.f32.xlu1 %v9110_v25  ;;  %9114 = vadd.xlane.f32.xlu0 %v9113_v34  ;;  %v8808_v56 = vsel %vm8732_vm0, %v19302_v12, 0.0 }
 0xaf0   : > { %v19304_v14 = vpop.eup %17144 }
 0xaf1   : > { %v8805_v27 = vsel %vm8732_vm0, %v19304_v14, 0.0 }
 0xaf2   : > { %8806 = vadd.xlane.f32.xlu1 %v8805_v27  ;;  %8809 = vadd.xlane.f32.xlu0 %v8808_v56 }
 0xaf4   : > { %v19310_v24 = vpop.eup %17146 }
 0xaf5   : > { %21220 = vst [vmem:[#allocation36_spill] sm:$0xff] %v19310_v24  ;;  %v9116_v37 = vsel %vm8732_vm0, %v19310_v24, 0.0 }
 0xaf6   : > { %9117 = vadd.xlane.f32.xlu1 %v9116_v37 }
 0xaf8   : > { %v19314_v2 = vpop.eup %17148 }
 0xaf9   : > { %v8811_v58 = vsel %vm8732_vm0, %v19314_v2, 0.0 }
 0xafa   : > { %8812 = vadd.xlane.f32.xlu1 %v8811_v58 }
 0xb0f   : > { %v9067_v31 = vpop.xlane.xlu1 %9066 }
 0xb10   : > { %v9080_v46 = vsub.f32 %v19121_v21, %v9067_v31 }
 0xb12   : > { %v9095_v55 = vmul.f32 1.442695, %v9080_v46 }
 0xb13   : > { %v9073_v27 = vpop.xlane.xlu1 %9072 }
 0xb14   : > { %17150 = vpow2.f32 %v9095_v55 }
 0xb17   : > { %v9380_v37 = vpop.xlane.xlu1 %9379 }
 0xb1b   : > { %v9070_v52 = vpop.xlane.xlu0 %9069  ;;  %v9386_v46 = vpop.xlane.xlu1 %9385 }
 0xb1c   : > { %v9081_v19 = vsub.f32 %v19134_v57, %v9070_v52 }
 0xb1e   : > { %v9097_v63 = vmul.f32 1.442695, %v9081_v19 }
 0xb1f   : > { %v9377_v56 = vpop.xlane.xlu0 %9376  ;;  %v9392_v55 = vpop.xlane.xlu1 %9391 }
 0xb20   : > { %17152 = vpow2.f32 %v9097_v63  ;;  %v9082_v63 = vsub.f32 %v19126_v41, %v9073_v27  ;;  %v9402_v43 = vsub.f32 %v19142_v33, %v9377_v56  ;;  %v9405_v33 = vsub.f32 %v19139_v26, %v9386_v46 }
 0xb21   : > { %v19324_v25 = vpop.eup %17150 }
 0xb22   : > { %21223 = vst [vmem:[#allocation39_spill] sm:$0xff] %v19324_v25  ;;  %v9119_v34 = vsel %vm8732_vm0, %v19324_v25, 0.0  ;;  %v9099_v62 = vmul.f32 1.442695, %v9082_v63 }
 0xb23   : > { %9120 = vadd.xlane.f32.xlu1 %v9119_v34  ;;  %v9383_v21 = vpop.xlane.xlu0 %9382  ;;  %v9398_v19 = vpop.xlane.xlu1 %9397 }
 0xb24   : > { %17154 = vpow2.f32 %v9099_v62  ;;  %v9409_v26 = vsub.f32 %v19159_v1, %v9398_v19 }
 0xb27   : > { %v9389_v57 = vpop.xlane.xlu0 %9388  ;;  %v9700_v25 = vpop.xlane.xlu1 %9699 }
 0xb28   : > { %v9406_v41 = vsub.f32 %v19164_v28, %v9389_v57 }
 0xb2a   : > { %v9419_v63 = vmul.f32 1.442695, %v9406_v41 }
 0xb2b   : > { %v9395_v52 = vpop.xlane.xlu0 %9394  ;;  %v19339_v45 = vpop.xlane.xlu1 %9708 }
 0xb2d   : > { %v19328_v58 = vpop.eup %17152 }
 0xb2e   : > { %21224 = vst [vmem:[#allocation40_spill] sm:$0xff] %v19328_v58  ;;  %v9122_v31 = vsel %vm8732_vm0, %v19328_v58, 0.0  ;;  %v9411_v58 = vmul.f32 1.442695, %v9402_v43  ;;  %v9407_v43 = vsub.f32 %v19149_v17, %v9392_v55 }
 0xb2f   : > { %9123 = vadd.xlane.f32.xlu0 %v9122_v31  ;;  %v9401_v34 = vpop.xlane.xlu0 %9400  ;;  %v9403_v31 = vsub.f32 %v19131_v36, %v9380_v37  ;;  %v9715_v62 = vpop.xlane.xlu1 %9714  ;;  %v9417_v36 = vmul.f32 1.442695, %v9405_v33 }
 0xb30   : > { %17156 = vpow2.f32 %v9411_v58  ;;  %v9410_v1 = vsub.f32 %v19182_v42, %v9401_v34 }
 0xb31   : > { %v9413_v10 = vmul.f32 1.442695, %v9403_v31  ;;  %v19349_v28 = vpop.eup %17154 }
 0xb32   : > { %v9125_v17 = vsel %vm8732_vm0, %v19349_v28, 0.0  ;;  %v9427_v41 = vmul.f32 1.442695, %v9410_v1 }
 0xb33   : > { %v9703_v40 = vpop.xlane.xlu0 %9702  ;;  %17158 = vpow2.f32 %v9413_v10  ;;  %v19352_v58 = vpop.xlane.xlu1 %9717  ;;  %v9421_v10 = vmul.f32 1.442695, %v9407_v43  ;;  %v9728_v43 = vsub.f32 %v19179_v35, %v19339_v45 }
 0xb34   : > { %9806 = vrot.lane.b32.xlu1 %v18924_v29, %s17808_s15  ;;  %v9404_v29 = vsub.f32 %v19152_v4, %v9383_v21  ;;  %v9725_v4 = vsub.f32 %v19169_v38, %v9700_v25  ;;  %v9730_v21 = vsub.f32 %v19189_v23, %v9715_v62  ;;  %v9425_v38 = vmul.f32 1.442695, %v9409_v26 }
 0xb35   : > { %v9726_v31 = vsub.f32 %v19196_v9, %v9703_v40 }
 0xb36   : > { %v9415_v56 = vmul.f32 1.442695, %v9404_v29  ;;  %v9744_v25 = vmul.f32 1.442695, %v9730_v21  ;;  %v9740_v21 = vmul.f32 1.442695, %v9728_v43 }
 0xb37   : > { %v9706_v27 = vpop.xlane.xlu0 %9705  ;;  %v19362_v55 = vpop.xlane.xlu1 %9723  ;;  %v21225_v43 = vmov 0.0  }
 0xb38   : > { %17160 = vpow2.f32 %v9415_v56  ;;  %v9736_v56 = vmul.f32 1.442695, %v9726_v31 }
 0xb39   : > { %17162 = vpow2.f32 %v9419_v63 }
 0xb3a   : > { %17164 = vpow2.f32 %v9417_v36 }
 0xb3b   : > { %v19345_v24 = vpop.xlane.xlu0 %9711 }
 0xb3c   : > { %v9729_v35 = vsub.f32 %v19220_v39, %v19345_v24  ;;  %v9731_v24 = vsub.f32 %v19201_v15, %v19352_v58 }
 0xb3d   : > { %v19359_v57 = vpop.eup %17156 }
 0xb3e   : > { %v9429_v23 = vsel %vm8732_vm0, %v19359_v57, 0.0 }
 0xb3f   : > { %v19355_v46 = vpop.xlane.xlu0 %9720 }
 0xb40   : > { %v19366_v19 = vpop.eup %17158 }
 0xb41   : > { %v9432_v42 = vsel %vm8732_vm0, %v19366_v19, 0.0 }
 0xb45   : > { %9808 = vrot.lane.b32.xlu0 %v18944_v16, %s17808_s15  ;;  %v9408_v16 = vsub.f32 %v19172_v48, %v9395_v52  ;;  %v9734_v48 = vmul.f32 1.442695, %v9725_v4  ;;  %v19369_v29 = vpop.eup %17160 }
 0xb46   : > { %v19373_v34 = vpop.eup %17162  ;;  %v9435_v40 = vsel %vm8732_vm0, %v19369_v29, 0.0 }
 0xb47   : > { %v9423_v37 = vmul.f32 1.442695, %v9408_v16  ;;  %v19375_v63 = vpop.eup %17164  ;;  %v9727_v16 = vsub.f32 %v19206_v60, %v9706_v27  ;;  %v9441_v9 = vsel %vm8732_vm0, %v19373_v34, 0.0 }
 0xb48   : > { %v9438_v26 = vsel %vm8732_vm0, %v19375_v63, 0.0 }
 0xb49   : > { %17166 = vpow2.f32 %v9423_v37  ;;  %v9738_v37 = vmul.f32 1.442695, %v9727_v16 }
 0xb4a   : > { %17168 = vpow2.f32 %v9421_v10 }
 0xb4b   : > { %17170 = vpow2.f32 %v9734_v48 }
 0xb4c   : > { %17172 = vpow2.f32 %v9425_v38 }
 0xb56   : > { %v19382_v62 = vpop.eup %17166 }
 0xb57   : > { %v19386_v4 = vpop.eup %17168  ;;  %v9447_v27 = vsel %vm8732_vm0, %v19382_v62, 0.0 }
 0xb58   : > { %9126 = vadd.xlane.f32.xlu1 %v9125_v17  ;;  %v19392_v10 = vpop.eup %17170  ;;  %v9444_v38 = vsel %vm8732_vm0, %v19386_v4, 0.0 }
 0xb59   : > { %v19394_v48 = vpop.eup %17172  ;;  %v9752_v1 = vsel %vm8732_vm0, %v19392_v10, 0.0 }
 0xb5b   : > { %v8789_v52 = vpop.xlane.xlu0 %8788 }
 0xb5c   : > { %9430 = vadd.xlane.f32.xlu1 %v9429_v23  ;;  %17174 = vrcp.f32 %v8789_v52  ;;  %v9742_v23 = vmul.f32 1.442695, %v9729_v35 }
 0xb5d   : > { %17176 = vpow2.f32 %v9744_v25 }
 0xb5f   : > { %v8792_v33 = vpop.xlane.xlu1 %8791 }
 0xb60   : > { %17178 = vrcp.f32 %v8792_v33  ;;  %9433 = vadd.xlane.f32.xlu1 %v9432_v42  ;;  %v9450_v42 = vsel %vm8732_vm0, %v19394_v48, 0.0 }
 0xb61   : > { %17180 = vpow2.f32 %v9427_v41 }
 0xb62   : > { %17182 = vpow2.f32 %v9736_v56 }
 0xb63   : > { %v8795_v36 = vpop.xlane.xlu0 %8794 }
 0xb64   : > { %9442 = vadd.xlane.f32.xlu0 %v9441_v9  ;;  %9436 = vadd.xlane.f32.xlu1 %v9435_v40  ;;  %17184 = vrcp.f32 %v8795_v36 }
 0xb67   : > { %v8798_v60 = vpop.xlane.xlu1 %8797  ;;  %v19398_v17 = vpop.xlane.xlu0 %9102 }
 0xb68   : > { %9448 = vadd.xlane.f32.xlu0 %v9447_v27  ;;  %9439 = vadd.xlane.f32.xlu1 %v9438_v26  ;;  %17186 = vrcp.f32 %v8798_v60 }
 0xb69   : > { %v17175_v45 = vpop.eup %17174  ;;  %17188 = vpow2.f32 %v9738_v37 }
 0xb6a   : > { %v19404_v25 = vpop.eup %17176  ;;  %v8823_v31 = vmul.f32 %v17175_v45, %v19249_v44  ;;  %17190 = vpow2.f32 %v9740_v21  ;;  %v9186_v44 = vsel %vm1363_vm9, %v19191_v3, 0 }
 0xb6b   : > { %v19410_v41 = vpop.xlane.xlu1 %9105  ;;  %v9767_v56 = vsel %vm8732_vm0, %v19404_v25, 0.0  ;;  %17192 = vpow2.f32 %v9742_v23 }
 0xb6c   : > { %9445 = vadd.xlane.f32.xlu1 %v9444_v38  ;;  %9753 = vadd.xlane.f32.xlu0 %v9752_v1 }
 0xb6d   : > { %v17179_v52 = vpop.eup %17178 }
 0xb6e   : > { %v8824_v39 = vmul.f32 %v17179_v52, %v19255_v51  ;;  %v19416_v16 = vpop.eup %17180  ;;  %v9746_v51 = vmul.f32 1.442695, %v9731_v24 }
 0xb6f   : > { %v8801_v33 = vpop.xlane.xlu0 %8800  ;;  %v19421_v15 = vpop.eup %17182  ;;  %v9453_v36 = vsel %vm8732_vm0, %v19416_v16, 0.0 }
 0xb70   : > { %v8832_v9 = vpack.c.bf16 %v8824_v39, %v8823_v31  ;;  %9451 = vadd.xlane.f32.xlu1 %v9450_v42  ;;  %9768 = vadd.xlane.f32.xlu0 %v9767_v56  ;;  %17194 = vrcp.f32 %v8801_v33  ;;  %v9755_v26 = vsel %vm8732_vm0, %v19421_v15, 0.0 }
 0xb71   : > { %v17185_v37 = vpop.eup %17184 }
 0xb72   : > { %14783 = vmatmul.mubr.msk.bf16.vlgmr.msra.gmra.mxu1 %vm8732_vm0, %v8832_v9  ;;  %v8825_v35 = vmul.f32 %v17185_v37, %v19261_v6 }
 0xb73   : > { %14825 = vmatpush3.bf16.msra.mxu1 %v9186_v44  ;;  %v19423_v58 = vpop.xlane.xlu0 %9108  ;;  %v8804_v40 = vpop.xlane.xlu1 %8803  ;;  %14786 = vmatprep.mubr.msk.bf16.mxu1 %vm17809_vm11, %v21225_v43 }
 0xb74   : > { %9454 = vadd.xlane.f32.xlu1 %v9453_v36  ;;  %14826 = vmatprep.subr.bf16.mxu1 %v21225_v43  ;;  %17196 = vrcp.f32 %v8804_v40  ;;  %v9733_v36 = vsub.f32 %v19213_v20, %v19362_v55 }
 0xb75   : > { %v17187_v3 = vpop.eup %17186  ;;  %17198 = vpow2.f32 %v9746_v51 }
 0xb76   : > { %v8826_v45 = vmul.f32 %v17187_v3, %v19269_v7  ;;  %v19437_v21 = vpop.eup %17188  ;;  %v9509_v3 = vsel %vm1363_vm9, %v19233_v22, 0 }
 0xb77   : > { %14827 = vmatpush3.bf16.msra.mxu1 %v19215_v5  ;;  %v19431_v60 = vpop.xlane.xlu0 %9114  ;;  %v9112_v27 = vpop.xlane.xlu1 %9111  ;;  %v9758_v52 = vsel %vm8732_vm0, %v19437_v21, 0.0 }
 0xb78   : > { %9756 = vadd.xlane.f32.xlu1 %v9755_v26  ;;  %14828 = vmatprep.subr.bf16.mxu1 %v21225_v43  ;;  %v8833_v38 = vpack.c.bf16 %v8826_v45, %v8825_v35  ;;  %v19443_v23 = vpop.eup %17190 }
 0xb79   : > { %v19449_v6 = vpop.eup %17192  ;;  %v9761_v31 = vsel %vm8732_vm0, %v19443_v23, 0.0 }
 0xb7a   : > { %14787 = vmatmul.mubr.msk.bf16.gmra.mxu1 %vm8732_vm0, %v8833_v38  ;;  %v9764_v33 = vsel %vm8732_vm0, %v19449_v6, 0.0  ;;  %v21227_v38 = vld [vmem:[#allocation35_spill] sm:$0xff] }
 0xb7b   : > { %v8810_v1 = vpop.xlane.xlu0 %8809  ;;  %v8807_v5 = vpop.xlane.xlu1 %8806  ;;  %14829 = vmatpush3.bf16.msra.mxu1 %v19203_v59  ;;  %14790 = vmatprep.mubr.msk.bf16.mxu1 %vm17809_vm11, %v21225_v43 }
 0xb7c   : > { %17200 = vrcp.f32 %v8810_v1  ;;  %9759 = vadd.xlane.f32.xlu1 %v9758_v52  ;;  %14830 = vmatprep.subr.bf16.mxu1 %v21225_v43 }
 0xb7d   : > { %17202 = vrcp.f32 %v8807_v5  ;;  %v17195_v39 = vpop.eup %17194  ;;  %v21228_v5 = vld [vmem:[#allocation34_spill] sm:$0xff] }
 0xb7e   : > { %v8827_v42 = vmul.f32 %v17195_v39, %v19281_v54 }
 0xb7f   : > { %v9118_v7 = vpop.xlane.xlu1 %9117  ;;  %14831 = vmatpush3.bf16.msra.mxu1 %v19231_v30 }
 0xb80   : > { %9762 = vadd.xlane.f32.xlu1 %v9761_v31  ;;  %14832 = vmatprep.subr.bf16.mxu1 %v21225_v43 }
 0xb81   : > { %v17197_v59 = vpop.eup %17196 }
 0xb82   : > { %v8828_v56 = vmul.f32 %v17197_v59, %v19288_v11  ;;  %v19459_v9 = vpop.eup %17198 }
 0xb83   : > { %v8813_v24 = vpop.xlane.xlu1 %8812  ;;  %14833 = vmatpush3.bf16.msra.mxu1 %v19224_v32  ;;  %v9770_v30 = vsel %vm8732_vm0, %v19459_v9, 0.0 }
 0xb84   : > { %17204 = vrcp.f32 %v8813_v24  ;;  %9765 = vadd.xlane.f32.xlu1 %v9764_v33  ;;  %v8834_v44 = vpack.c.bf16 %v8828_v56, %v8827_v42  ;;  %14876 = vmatprep.subr.bf16.mxu1 %v21225_v43  ;;  %v21230_v24 = vld [vmem:[#allocation39_spill] sm:$0xff]  ;;  %v21231_v42 = vld [vmem:[#allocation40_spill] sm:$0xff] }
 0xb85   : > { %17206 = vrcp.f32 %v19410_v41 }
 0xb86   : > { %9804 = vrot.lane.b32.xlu0 %v18949_v47, %s17808_s15  ;;  %14791 = vmatmul.mubr.msk.bf16.gmra.mxu1 %vm8732_vm0, %v8834_v44  ;;  %17208 = vrcp.f32 %v19398_v17  ;;  %v9732_v47 = vsub.f32 %v19227_v18, %v19355_v46 }
 0xb87   : > { %14794 = vmatprep.mubr.msk.bf16.mxu1 %vm17809_vm11, %v21225_v43  ;;  %17210 = vrcp.f32 %v9112_v27 }
 0xb88   : > { %9771 = vadd.xlane.f32.xlu1 %v9770_v30  ;;  %v9748_v37 = vmul.f32 1.442695, %v9732_v47  ;;  %17212 = vrcp.f32 %v19423_v58 }
 0xb89   : > { %v17201_v54 = vpop.eup %17200 }
 0xb8a   : > { %v17203_v32 = vpop.eup %17202  ;;  %v8830_v11 = vmul.f32 %v17201_v54, %v19302_v12  ;;  %17214 = vpow2.f32 %v9748_v37 }
 0xb8b   : > { %v8829_v51 = vmul.f32 %v17203_v32, %v19304_v14  ;;  %v9750_v14 = vmul.f32 1.442695, %v9733_v36 }
 0xb8d   : > { %v8835_v40 = vpack.c.bf16 %v8830_v11, %v8829_v51  ;;  %17216 = vpow2.f32 %v9750_v14 }
 0xb8e   : > { %17218 = vrcp.f32 %v9118_v7 }
 0xb8f   : > { %14795 = vmatmul.mubr.msk.bf16.gmra.mxu1 %vm8732_vm0, %v8835_v40  ;;  %17220 = vrcp.f32 %v19431_v60 }
 0xb90   : > { %14798 = vmatprep.mubr.msk.bf16.mxu1 %vm17809_vm11, %v21225_v43 }
 0xb91   : > { %v17205_v41 = vpop.eup %17204 }
 0xb92   : > { %v8831_v12 = vmul.f32 %v17205_v41, %v19314_v2  ;;  %v17207_v18 = vpop.eup %17206 }
 0xb93   : > { %v17209_v46 = vpop.eup %17208  ;;  %v9138_v20 = vmul.f32 %v17207_v18, %v19276_v0 }
 0xb94   : > { %v8836_v17 = vpack.c.bf16 %v8831_v12, %v8831_v12  ;;  %v9137_v2 = vmul.f32 %v17209_v46, %v19263_v61  ;;  %v17211_v58 = vpop.eup %17210 }
 0xb95   : > { %v17213_v27 = vpop.eup %17212 }
 0xb96   : > { %v9146_v55 = vpack.c.bf16 %v9138_v20, %v9137_v2  ;;  %v9139_v61 = vmul.f32 %v17213_v27, %v19285_v53 }
 0xb97   : > { %14799 = vmatmul.mubr.msk.bf16.gmra.mxu1 %vm8732_vm0, %v8836_v17  ;;  %v19496_v0 = vpop.eup %17214 }
 0xb98   : > { %14834 = vmatprep.mubr.msk.bf16.mxu1 %vm17809_vm11, %v21225_v43  ;;  %v9773_v22 = vsel %vm8732_vm0, %v19496_v0, 0.0 }
 0xb99   : > { %9802 = vrot.lane.b32.xlu1 %v18929_v8, %s17808_s15  ;;  %v9140_v8 = vmul.f32 %v17211_v58, %v19296_v49  ;;  %v21232_v58 = vld [vmem:[#allocation37_spill] sm:$0xff] }
 0xb9a   : > { %v19504_v60 = vpop.eup %17216 }
 0xb9b   : > { %v9147_v26 = vpack.c.bf16 %v9140_v8, %v9139_v61  ;;  %v17219_v35 = vpop.eup %17218  ;;  %v9776_v53 = vsel %vm8732_vm0, %v19504_v60, 0.0 }
 0xb9c   : > { %v17221_v45 = vpop.eup %17220 }
 0xb9d   : > { %v9141_v1 = vmul.f32 %v17221_v45, %v21227_v38 }
 0xb9f   : > { %14835 = vmatmul.mubr.msk.bf16.vlgmr.msra.gmra.mxu1 %vm8732_vm0, %v9146_v55 }
 0xba0   : > { %14877 = vmatpush3.bf16.msra.mxu1 %v9509_v3  ;;  %14838 = vmatprep.mubr.msk.bf16.mxu1 %vm17809_vm11, %v21225_v43  ;;  %v9832_v3 = vsel %vm1363_vm9, %v21232_v58, 0 }
 0xba1   : > { %14878 = vmatprep.subr.bf16.mxu1 %v21225_v43 }
 0xba4   : > { %14879 = vmatpush3.bf16.msra.mxu1 %v19237_v13  ;;  %v21226_v13 = vld [vmem:[#allocation36_spill] sm:$0xff] }
 0xba5   : > { %9774 = vadd.xlane.f32.xlu0 %v9773_v22  ;;  %14880 = vmatprep.subr.bf16.mxu1 %v21225_v43  ;;  %v9142_v49 = vmul.f32 %v17219_v35, %v21226_v13 }
 0xba7   : > { %14839 = vmatmul.mubr.msk.bf16.gmra.mxu1 %vm8732_vm0, %v9147_v26  ;;  %v9148_v52 = vpack.c.bf16 %v9142_v49, %v9141_v1 }
 0xba8   : > { %14881 = vmatpush3.bf16.msra.mxu1 %v19239_v50  ;;  %14842 = vmatprep.mubr.msk.bf16.mxu1 %vm17809_vm11, %v21225_v43  ;;  %v21229_v50 = vld [vmem:[#allocation38_spill] sm:$0xff] }
 0xba9   : > { %9777 = vadd.xlane.f32.xlu0 %v9776_v53  ;;  %14882 = vmatprep.subr.bf16.mxu1 %v21225_v43 }
 0xbac   : > { %14883 = vmatpush3.bf16.msra.mxu1 %v21228_v5  ;;  %v9121_v7 = vpop.xlane.xlu1 %9120 }
 0xbad   : > { %14884 = vmatprep.subr.bf16.mxu1 %v21225_v43  ;;  %17222 = vrcp.f32 %v9121_v7 }
 0xbaf   : > { %14843 = vmatmul.mubr.msk.bf16.gmra.mxu1 %vm8732_vm0, %v9148_v52 }
 0xbb0   : > { %14885 = vmatpush3.bf16.msra.mxu1 %v21229_v50  ;;  %14846 = vmatprep.mubr.msk.bf16.mxu1 %vm17809_vm11, %v21225_v43  ;;  %v9807_v30 = vpop.permute.xlu1 %9806 }
 0xbb1   : > { %14928 = vmatprep.subr.bf16.mxu1 %v21225_v43 }
 0xbb8   : > { %v9124_v31 = vpop.xlane.xlu0 %9123 }
 0xbb9   : > { %17224 = vrcp.f32 %v9124_v31 }
 0xbba   : > { %v17223_v39 = vpop.eup %17222 }
 0xbbb   : > { %v9143_v33 = vmul.f32 %v17223_v39, %v21230_v24 }
 0xbbc   : > { %v9809_v51 = vpop.permute.xlu0 %9808 }
 0xbc6   : > { %v17225_v59 = vpop.eup %17224 }
 0xbc7   : > { %v9144_v56 = vmul.f32 %v17225_v59, %v21231_v42 }
 0xbc9   : > { %v9149_v44 = vpack.c.bf16 %v9144_v56, %v9143_v33 }
 0xbcb   : > { %14847 = vmatmul.mubr.msk.bf16.gmra.mxu1 %vm8732_vm0, %v9149_v44 }
 0xbcc   : > { %14850 = vmatprep.mubr.msk.bf16.mxu1 %vm17809_vm11, %v21225_v43 }
 0xbe1   : > { %v9127_v54 = vpop.xlane.xlu1 %9126 }
 0xbe2   : > { %17226 = vrcp.f32 %v9127_v54 }
 0xbe5   : > { %v9431_v32 = vpop.xlane.xlu1 %9430 }
 0xbe6   : > { %17228 = vrcp.f32 %v9431_v32 }
 0xbe9   : > { %v9434_v11 = vpop.xlane.xlu1 %9433 }
 0xbea   : > { %17230 = vrcp.f32 %v9434_v11 }
 0xbed   : > { %v9437_v47 = vpop.xlane.xlu1 %9436  ;;  %v9443_v37 = vpop.xlane.xlu0 %9442 }
 0xbee   : > { %17232 = vrcp.f32 %v9437_v47 }
 0xbef   : > { %v17227_v40 = vpop.eup %17226 }
 0xbf0   : > { %v9145_v36 = vmul.f32 %v17227_v40, %v19349_v28 }
 0xbf1   : > { %v9440_v41 = vpop.xlane.xlu1 %9439  ;;  %v9449_v46 = vpop.xlane.xlu0 %9448 }
 0xbf2   : > { %v9150_v12 = vpack.c.bf16 %v9145_v36, %v9145_v36  ;;  %17234 = vrcp.f32 %v9440_v41 }
 0xbf3   : > { %v17229_v14 = vpop.eup %17228 }
 0xbf4   : > { %14851 = vmatmul.mubr.msk.bf16.gmra.mxu1 %vm8732_vm0, %v9150_v12  ;;  %v9465_v20 = vmul.f32 %v17229_v14, %v19359_v57 }
 0xbf5   : > { %v9446_v17 = vpop.xlane.xlu1 %9445  ;;  %14886 = vmatprep.mubr.msk.bf16.mxu1 %vm17809_vm11, %v21225_v43  ;;  %v9754_v27 = vpop.xlane.xlu0 %9753 }
 0xbf6   : > { %17236 = vrcp.f32 %v9446_v17 }
 0xbf7   : > { %v17231_v18 = vpop.eup %17230  ;;  %17238 = vrcp.f32 %v9443_v37 }
 0xbf8   : > { %v9466_v2 = vmul.f32 %v17231_v18, %v19366_v19 }
 0xbf9   : > { %v9452_v28 = vpop.xlane.xlu1 %9451  ;;  %v9769_v35 = vpop.xlane.xlu0 %9768 }
 0xbfa   : > { %v9474_v55 = vpack.c.bf16 %v9466_v2, %v9465_v20  ;;  %17240 = vrcp.f32 %v9452_v28 }
 0xbfb   : > { %v17233_v61 = vpop.eup %17232  ;;  %17242 = vrcp.f32 %v9449_v46 }
 0xbfc   : > { %14887 = vmatmul.mubr.msk.bf16.vlgmr.msra.gmra.mxu1 %vm8732_vm0, %v9474_v55  ;;  %v9467_v22 = vmul.f32 %v17233_v61, %v19369_v29 }
 0xbfd   : > { %14929 = vmatpush3.bf16.msra.mxu1 %v9832_v3  ;;  %v9455_v8 = vpop.xlane.xlu1 %9454  ;;  %14890 = vmatprep.mubr.msk.bf16.mxu1 %vm17809_vm11, %v21225_v43  ;;  %v9805_v38 = vpop.permute.xlu0 %9804 }
 0xbfe   : > { %14930 = vmatprep.subr.bf16.mxu1 %v21225_v43  ;;  %17244 = vrcp.f32 %v9455_v8 }
 0xbff   : > { %v17235_v57 = vpop.eup %17234 }
 0xc00   : > { %v9468_v26 = vmul.f32 %v17235_v57, %v19375_v63 }
 0xc01   : > { %14931 = vmatpush3.bf16.msra.mxu1 %v9809_v51  ;;  %v9757_v19 = vpop.xlane.xlu1 %9756 }
 0xc02   : > { %14932 = vmatprep.subr.bf16.mxu1 %v21225_v43  ;;  %v9475_v45 = vpack.c.bf16 %v9468_v26, %v9467_v22  ;;  %17246 = vrcp.f32 %v9757_v19 }
 0xc03   : > { %v17237_v53 = vpop.eup %17236  ;;  %17248 = vrcp.f32 %v9754_v27 }
 0xc04   : > { %14891 = vmatmul.mubr.msk.bf16.gmra.mxu1 %vm8732_vm0, %v9475_v45  ;;  %v17239_v49 = vpop.eup %17238  ;;  %v9470_v29 = vmul.f32 %v17237_v53, %v19386_v4 }
 0xc05   : > { %v9760_v13 = vpop.xlane.xlu1 %9759  ;;  %14933 = vmatpush3.bf16.msra.mxu1 %v9807_v30  ;;  %14894 = vmatprep.mubr.msk.bf16.mxu1 %vm17809_vm11, %v21225_v43  ;;  %v9469_v1 = vmul.f32 %v17239_v49, %v19373_v34 }
 0xc06   : > { %14934 = vmatprep.subr.bf16.mxu1 %v21225_v43 }
 0xc07   : > { %v9476_v5 = vpack.c.bf16 %v9470_v29, %v9469_v1  ;;  %v17241_v52 = vpop.eup %17240 }
 0xc08   : > { %v17243_v7 = vpop.eup %17242  ;;  %v9472_v31 = vmul.f32 %v17241_v52, %v19394_v48 }
 0xc09   : > { %v9763_v63 = vpop.xlane.xlu1 %9762  ;;  %14935 = vmatpush3.bf16.msra.mxu1 %v9805_v38  ;;  %v9471_v39 = vmul.f32 %v17243_v7, %v19382_v62 }
 0xc0a   : > { %14936 = vmatprep.subr.bf16.mxu1 %v21225_v43  ;;  %17250 = vrcp.f32 %v9763_v63 }
 0xc0b   : > { %v9477_v34 = vpack.c.bf16 %v9472_v31, %v9471_v39  ;;  %v17245_v59 = vpop.eup %17244  ;;  %17252 = vrcp.f32 %v9760_v13 }
 0xc0c   : > { %14895 = vmatmul.mubr.msk.bf16.gmra.mxu1 %vm8732_vm0, %v9476_v5  ;;  %v9473_v33 = vmul.f32 %v17245_v59, %v19416_v16 }
 0xc0d   : > { %v9766_v50 = vpop.xlane.xlu1 %9765  ;;  %14898 = vmatprep.mubr.msk.bf16.mxu1 %vm17809_vm11, %v21225_v43 }
 0xc0e   : > { %v9478_v48 = vpack.c.bf16 %v9473_v33, %v9473_v33  ;;  %17254 = vrcp.f32 %v9766_v50 }
 0xc0f   : > { %v17247_v42 = vpop.eup %17246  ;;  %17256 = vrcp.f32 %v9769_v35 }
 0xc10   : > { %v17249_v62 = vpop.eup %17248  ;;  %v9789_v56 = vmul.f32 %v17247_v42, %v19421_v15 }
 0xc11   : > { %v9772_v4 = vpop.xlane.xlu1 %9771  ;;  %v9788_v44 = vmul.f32 %v17249_v62, %v19392_v10 }
 0xc12   : > { %17258 = vrcp.f32 %v9772_v4 }
 0xc13   : > { %v9797_v30 = vpack.c.bf16 %v9789_v56, %v9788_v44 }
 0xc14   : > { %14899 = vmatmul.mubr.msk.bf16.gmra.mxu1 %vm8732_vm0, %v9477_v34 }
 0xc15   : > { %v9803_v24 = vpop.permute.xlu1 %9802  ;;  %14902 = vmatprep.mubr.msk.bf16.mxu1 %vm17809_vm11, %v21225_v43 }
 0xc16   : > { %14937 = vmatpush3.bf16.msra.mxu1 %v9803_v24 }
 0xc17   : > { %14986 = vmatprep.subr.bf16.mxu1 %v21225_v43  ;;  %v17251_v54 = vpop.eup %17250 }
 0xc18   : > { %v17253_v16 = vpop.eup %17252  ;;  %v9791_v32 = vmul.f32 %v17251_v54, %v19443_v23  ;;  %v17054_v54 = vld [vmem:[#allocation11 + $0x68] ss:$16 sps:$4 sm:$0xff]  }
 0xc19   : > { %v9790_v11 = vmul.f32 %v17253_v16, %v19437_v21  ;;  %14959 = vmatpush3.bf16.msra.mxu0 %v17054_v54 }
 0xc1a   : > { %14960 = vmatprep.subr.bf16.mxu0 %v21225_v43 }
 0xc1b   : > { %v9798_v51 = vpack.c.bf16 %v9791_v32, %v9790_v11  ;;  %v17255_v47 = vpop.eup %17254  ;;  %v17055_v32 = vld [vmem:[#allocation11 + $0x48] ss:$16 sps:$4 sm:$0xff]  }
 0xc1c   : > { %14903 = vmatmul.mubr.msk.bf16.gmra.mxu1 %vm8732_vm0, %v9478_v48  ;;  %v17257_v15 = vpop.eup %17256  ;;  %v9792_v40 = vmul.f32 %v17255_v47, %v19449_v6  ;;  %v17056_v47 = vld [vmem:[#allocation11 + $0x28] ss:$16 sps:$4 sm:$0xff]  }
 0xc1d   : > { %14938 = vmatprep.mubr.msk.bf16.mxu1 %vm17809_vm11, %v21225_v43  ;;  %v9793_v36 = vmul.f32 %v17257_v15, %v19404_v25  ;;  %14961 = vmatpush3.bf16.msra.mxu0 %v17055_v32 }
 0xc1e   : > { %14962 = vmatprep.subr.bf16.mxu0 %v21225_v43 }
 0xc1f   : > { %v9799_v21 = vpack.c.bf16 %v9793_v36, %v9792_v40  ;;  %v17259_v17 = vpop.eup %17258 }
 0xc20   : > { %v9794_v25 = vmul.f32 %v17259_v17, %v19459_v9 }
 0xc21   : > { %14963 = vmatpush3.bf16.msra.mxu0 %v17056_v47 }
 0xc22   : > { %14964 = vmatprep.subr.bf16.mxu0 %v21225_v43 }
 0xc24   : > { %14939 = vmatmul.mubr.msk.bf16.vlgmr.msra.gmra.mxu1 %vm8732_vm0, %v9797_v30 }
 0xc25   : > { %14942 = vmatprep.mubr.msk.bf16.mxu1 %vm17809_vm11, %v21225_v43 }
 0xc2c   : > { %14943 = vmatmul.mubr.msk.bf16.gmra.mxu1 %vm8732_vm0, %v9798_v51 }
 0xc2d   : > { %14946 = vmatprep.mubr.msk.bf16.mxu1 %vm17809_vm11, %v21225_v43 }
 0xc2e   : > { %v9775_v10 = vpop.xlane.xlu0 %9774 }
 0xc2f   : > { %17260 = vrcp.f32 %v9775_v10 }
 0xc32   : > { %v9778_v37 = vpop.xlane.xlu0 %9777  ;;  %v19575_v41 = vpop.f32.mrf.mxu1 }
 0xc33   : > { %17262 = vrcp.f32 %v9778_v37 }
 0xc34   : > { %v14784_v23 = vpop.f32.mrf.mxu1  ;;  %14947 = vmatmul.mubr.msk.bf16.gmra.mxu1 %vm8732_vm0, %v9799_v21 }
 0xc35   : > { %14950 = vmatprep.mubr.msk.bf16.mxu1 %vm17809_vm11, %v21225_v43 }
 0xc36   : > { %v19578_v12 = vpop.f32.mrf.mxu1 }
 0xc38   : > { %v14785_v14 = vpop.f32.mrf.mxu1 }
 0xc3a   : > { %v19582_v18 = vpop.f32.mrf.mxu1 }
 0xc3c   : > { %v17261_v6 = vpop.eup %17260  ;;  %v14788_v46 = vpop.f32.mrf.mxu1 }
 0xc3d   : > { %v9795_v20 = vmul.f32 %v17261_v6, %v19496_v0 }
 0xc3e   : > { %v19586_v2 = vpop.f32.mrf.mxu1 }
 0xc3f   : > { %v9800_v28 = vpack.c.bf16 %v9795_v20, %v9794_v25 }
 0xc40   : > { %v17263_v55 = vpop.eup %17262  ;;  %v14789_v58 = vpop.f32.mrf.mxu1 }
 0xc41   : > { %14951 = vmatmul.mubr.msk.bf16.gmra.mxu1 %vm8732_vm0, %v9800_v28  ;;  %v9796_v3 = vmul.f32 %v17263_v55, %v19504_v60 }
 0xc42   : > { %14954 = vmatprep.mubr.msk.bf16.mxu1 %vm17809_vm11, %v21225_v43 }
 0xc43   : > { %v9801_v8 = vpack.c.bf16 %v9796_v3, %v9796_v3 }
 0xc46   : > { %v19592_v27 = vpop.f32.mrf.mxu1 }
 0xc48   : > { %v14792_v61 = vpop.f32.mrf.mxu1 }
 0xc49   : > { %14955 = vmatmul.mubr.msk.bf16.gmra.mxu1 %vm8732_vm0, %v9801_v8  ;;  %v17057_v61 = vld [vmem:[#allocation11 + $0x8] ss:$16 sps:$4 sm:$0xff]  }
 0xc4a   : > { %14994 = vmatprep.mubr.msk.bf16.mxu1 %vm17809_vm11, %v21225_v43  ;;  %v19597_v9 = vpop.f32.mrf.mxu1  ;;  %14965 = vmatpush3.bf16.msra.mxu0 %v17057_v61 }
 0xc4b   : > { %15014 = vmatprep.subr.bf16.mxu0 %v21225_v43 }
 0xc4c   : > { %v14793_v0 = vpop.f32.mrf.mxu1 }
 0xc4f   : > { %v19599_v57 = vpop.f32.mrf.mxu1 }
 0xc51   : > { %v14796_v19 = vpop.f32.mrf.mxu1 }
 0xc53   : > { %v19601_v22 = vpop.f32.mrf.mxu1 }
 0xc55   : > { %v14797_v26 = vpop.f32.mrf.mxu1 }
 0xc57   : > { %v19603_v35 = vpop.f32.mrf.mxu1 }
 0xc59   : > { %v14800_v60 = vpop.f32.mrf.mxu1 }
 0xc5b   : > { %v8924_v45 = vpop.f32.mrf.mxu1 }
 0xc5d   : > { %v14801_v53 = vpop.f32.mrf.mxu1 }
 0xc5f   : > { %v9222_v13 = vpop.f32.mrf.mxu1 }
 0xc61   : > { %v14836_v49 = vpop.f32.mrf.mxu1 }
 0xc63   : > { %v9225_v29 = vpop.f32.mrf.mxu1 }
 0xc64   : > { %v15484_v38 = vpack.i.bf16 %v9225_v29, %v9222_v13 }
 0xc65   : > { %v14837_v63 = vpop.f32.mrf.mxu1 }
 0xc66   : > { %15485 = vrot.lane.b32.xlu1 %v15484_v38, %s17810_s26 }
 0xc67   : > { %v9230_v1 = vpop.f32.mrf.mxu1 }
 0xc69   : > { %v14840_v5 = vpop.f32.mrf.mxu1 }
 0xc6b   : > { %v9233_v52 = vpop.f32.mrf.mxu1 }
 0xc6c   : > { %v15494_v50 = vpack.i.bf16 %v9233_v52, %v9230_v1 }
 0xc6d   : > { %v14841_v7 = vpop.f32.mrf.mxu1 }
 0xc6e   : > { %15495 = vrot.lane.b32.xlu1 %v15494_v50, %s17810_s26 }
 0xc6f   : > { %v19607_v31 = vpop.f32.mrf.mxu1 }
 0xc71   : > { %v14844_v4 = vpop.f32.mrf.mxu1 }
 0xc73   : > { %v19609_v39 = vpop.f32.mrf.mxu1 }
 0xc74   : > { %v15514_v34 = vpack.i.bf16 %v19609_v39, %v19607_v31 }
 0xc75   : > { %v14845_v59 = vpop.f32.mrf.mxu1 }
 0xc8b   : > { %v19613_v24 = vpop.f32.mrf.mxu1 }
 0xc8d   : > { %v14848_v33 = vpop.f32.mrf.mxu1 }
 0xc8f   : > { %v19615_v48 = vpop.f32.mrf.mxu1 }
 0xc90   : > { %v15529_v42 = vpack.i.bf16 %v19615_v48, %v19613_v24 }
 0xc91   : > { %v14849_v62 = vpop.f32.mrf.mxu1 }
 0xcb4   : > { %v19619_v56 = vpop.f32.mrf.mxu1 }
 0xcb6   : > { %v14852_v44 = vpop.f32.mrf.mxu1 }
 0xcb8   : > { %v9257_v30 = vpop.f32.mrf.mxu1 }
 0xcba   : > { %v14853_v16 = vpop.f32.mrf.mxu1 }
 0xcbc   : > { %v9545_v11 = vpop.f32.mrf.mxu1 }
 0xcbe   : > { %v14888_v51 = vpop.f32.mrf.mxu1 }
 0xcc0   : > { %v9548_v15 = vpop.f32.mrf.mxu1 }
 0xcc1   : > { %v15489_v10 = vpack.i.bf16 %v9548_v15, %v9545_v11 }
 0xcc2   : > { %v14889_v40 = vpop.f32.mrf.mxu1 }
 0xcc3   : > { %15490 = vrot.lane.b32.xlu0 %v15489_v10, %s17811_s29 }
 0xcc4   : > { %v9553_v36 = vpop.f32.mrf.mxu1 }
 0xcc6   : > { %v14892_v37 = vpop.f32.mrf.mxu1 }
 0xcc8   : > { %v9556_v21 = vpop.f32.mrf.mxu1 }
 0xcc9   : > { %v15504_v49 = vpack.i.bf16 %v9556_v21, %v9553_v36 }
 0xcca   : > { %v14893_v23 = vpop.f32.mrf.mxu1 }
 0xccc   : > { %v9561_v14 = vpop.f32.mrf.mxu1 }
 0xcce   : > { %v14896_v17 = vpop.f32.mrf.mxu1 }
 0xcd0   : > { %v9564_v6 = vpop.f32.mrf.mxu1 }
 0xcd1   : > { %v15519_v7 = vpack.i.bf16 %v9564_v6, %v9561_v14 }
 0xcd2   : > { %v14897_v46 = vpop.f32.mrf.mxu1 }
 0xcd4   : > { %v9569_v25 = vpop.f32.mrf.mxu1 }
 0xcd6   : > { %v14900_v20 = vpop.f32.mrf.mxu1 }
 0xcd8   : > { %v9572_v28 = vpop.f32.mrf.mxu1 }
 0xcd9   : > { %v15534_v39 = vpack.i.bf16 %v9572_v28, %v9569_v25 }
 0xcda   : > { %v14901_v55 = vpop.f32.mrf.mxu1 }
 0xcdc   : > { %v9577_v58 = vpop.f32.mrf.mxu1 }
 0xcde   : > { %v14904_v3 = vpop.f32.mrf.mxu1 }
 0xce0   : > { %v9580_v8 = vpop.f32.mrf.mxu1 }
 0xce2   : > { %v14905_v0 = vpop.f32.mrf.mxu1 }
 0xce4   : > { %v9868_v19 = vpop.f32.mrf.mxu1 }
 0xce6   : > { %v14940_v26 = vpop.f32.mrf.mxu1 }
 0xce8   : > { %v9871_v60 = vpop.f32.mrf.mxu1 }
 0xce9   : > { %v15499_v45 = vpack.i.bf16 %v9871_v60, %v9868_v19 }
 0xcea   : > { %v14941_v53 = vpop.f32.mrf.mxu1 }
 0xceb   : > { %15500 = vrot.lane.b32.xlu1 %v15499_v45, %s17812_s13 }
 0xcec   : > { %v9876_v13 = vpop.f32.mrf.mxu1 }
 0xcee   : > { %v14944_v29 = vpop.f32.mrf.mxu1 }
 0xcef   : > { %15505 = vrot.lane.b32.xlu1 %v15504_v49, %s17811_s29 }
 0xcf0   : > { %v9879_v38 = vpop.f32.mrf.mxu1 }
 0xcf1   : > { %v15509_v63 = vpack.i.bf16 %v9879_v38, %v9876_v13 }
 0xcf2   : > { %v14945_v1 = vpop.f32.mrf.mxu1 }
 0xcf3   : > { %15510 = vrot.lane.b32.xlu1 %v15509_v63, %s17812_s13 }
 0xcf4   : > { %v9884_v5 = vpop.f32.mrf.mxu1 }
 0xcf6   : > { %v14948_v52 = vpop.f32.mrf.mxu1 }
 0xcf7   : > { %15515 = vrot.lane.b32.xlu1 %v15514_v34, %s17810_s26 }
 0xcf8   : > { %v9887_v50 = vpop.f32.mrf.mxu1 }
 0xcf9   : > { %v15524_v31 = vpack.i.bf16 %v9887_v50, %v9884_v5 }
 0xcfa   : > { %v14949_v4 = vpop.f32.mrf.mxu1 }
 0xcfb   : > { %15520 = vrot.lane.b32.xlu1 %v15519_v7, %s17811_s29  ;;  %15525 = vrot.lane.b32.xlu0 %v15524_v31, %s17812_s13 }
 0xcff   : > { %15530 = vrot.lane.b32.xlu1 %v15529_v42, %s17810_s26  ;;  %15535 = vrot.lane.b32.xlu0 %v15534_v39, %s17811_s29  ;;  %v15486_v42 = vpop.permute.xlu1 %15485 }
 0xd00   : > { %v15488_v11 = vunpack.i.h.bf16 %v15486_v42  ;;  %v15487_v51 = vunpack.i.l.bf16 %v15486_v42 }
 0xd01   : > { %v9892_v59 = vpop.f32.mrf.mxu1 }
 0xd02   : > { %v10015_v10 = vsel %vm8626_vm12, %v19578_v12, %v15488_v11  ;;  %v10014_v40 = vsel %vm8626_vm12, %v19575_v41, %v15487_v51 }
 0xd03   : > { %v14952_v33 = vpop.f32.mrf.mxu1  ;;  %9931 = vrot.lane.b32.xlu0 %v19619_v56, %s17810_s26  ;;  %v15496_v32 = vpop.permute.xlu1 %15495 }
 0xd04   : > { %v15498_v25 = vunpack.i.h.bf16 %v15496_v32  ;;  %v15497_v20 = vunpack.i.l.bf16 %v15496_v32 }
 0xd05   : > { %v9895_v34 = vpop.f32.mrf.mxu1 }
 0xd06   : > { %v15539_v62 = vpack.i.bf16 %v9895_v34, %v9892_v59  ;;  %v10017_v12 = vsel %vm8626_vm12, %v19586_v2, %v15498_v25  ;;  %v21233_v25 = vld [vmem:[#allocation26_spill] sm:$0xff] }
 0xd07   : > { %v14953_v44 = vpop.f32.mrf.mxu1 }
 0xd08   : > { %15540 = vrot.lane.b32.xlu1 %v15539_v62, %s17812_s13 }
 0xd09   : > { %v9900_v30 = vpop.f32.mrf.mxu1 }
 0xd0a   : > { %10003 = vrot.lane.b32.xlu0 %v9900_v30, %s17812_s13 }
 0xd0b   : > { %v14956_v54 = vpop.f32.mrf.mxu1 }
 0xd0c   : > { %9967 = vrot.lane.b32.xlu1 %v9577_v58, %s17811_s29  ;;  %v10016_v58 = vsel %vm8626_vm12, %v19582_v18, %v15497_v20 }
 0xd0d   : > { %v9903_v24 = vpop.f32.mrf.mxu1 }
 0xd0f   : > { %v14957_v48 = vpop.f32.mrf.mxu1 }
 0xd35   : > { %v15491_v16 = vpop.permute.xlu0 %15490 }
 0xd36   : > { %v15493_v47 = vunpack.i.h.bf16 %v15491_v16  ;;  %v15492_v56 = vunpack.i.l.bf16 %v15491_v16 }
 0xd38   : > { %v10024_v21 = vsel %vm10023_vm1, %v10014_v40, %v15492_v56  ;;  %v10025_v23 = vsel %vm10023_vm1, %v10015_v10, %v15493_v47  ;;  %v8242_v40 = vld [vmem:[#allocation12 + $0x3] ss:$0 sm:$0xff] }
 0xd5d   : > { %v15501_v15 = vpop.permute.xlu1 %15500 }
 0xd5e   : > { %v15503_v36 = vunpack.i.h.bf16 %v15501_v15  ;;  %v15502_v37 = vunpack.i.l.bf16 %v15501_v15 }
 0xd60   : > { %v10034_v14 = vsel %vm10033_vm2, %v10024_v21, %v15502_v37  ;;  %v10035_v17 = vsel %vm10033_vm2, %v10025_v23, %v15503_v36  ;;  %v17501_v21 = vld [vmem:[%s21135_s5] sm:$0xff] }
 0xd61   : > { %v10043_v6 = vpack.c.bf16 %v10035_v17, %v10034_v14  ;;  %v15506_v46 = vpop.permute.xlu1 %15505 }
 0xd62   : > { %v15508_v28 = vunpack.i.h.bf16 %v15506_v46  ;;  %v15507_v55 = vunpack.i.l.bf16 %v15506_v46 }
 0xd63   : > { %14967 = vmatmul.mubr.msk.bf16.vlgmr.msra.gmra.mxu0 %vm8247_vm10, %v10043_v6 }
 0xd64   : > { %14970 = vmatprep.mubr.msk.bf16.mxu0 %vm17809_vm11, %v21225_v43  ;;  %v10026_v61 = vsel %vm10023_vm1, %v10016_v58, %v15507_v55  ;;  %v10027_v0 = vsel %vm10023_vm1, %v10017_v12, %v15508_v28  ;;  %v21234_v58 = vld [vmem:[#allocation25_spill] sm:$0xff] }
 0xd65   : > { %v15511_v41 = vpop.permute.xlu1 %15510 }
 0xd66   : > { %v15513_v3 = vunpack.i.h.bf16 %v15511_v41  ;;  %v15512_v8 = vunpack.i.l.bf16 %v15511_v41 }
 0xd68   : > { %v10036_v19 = vsel %vm10033_vm2, %v10026_v61, %v15512_v8  ;;  %v10037_v26 = vsel %vm10033_vm2, %v10027_v0, %v15513_v3 }
 0xd69   : > { %v10044_v60 = vpack.c.bf16 %v10037_v26, %v10036_v19  ;;  %v15516_v45 = vpop.permute.xlu1 %15515  ;;  %v21235_v26 = vld [vmem:[#allocation27_spill] sm:$0xff] }
 0xd6a   : > { %v15518_v53 = vunpack.i.h.bf16 %v15516_v45  ;;  %v15517_v13 = vunpack.i.l.bf16 %v15516_v45 }
 0xd6b   : > { %14971 = vmatmul.mubr.msk.bf16.gmra.mxu0 %vm8247_vm10, %v10044_v60 }
 0xd6c   : > { %14974 = vmatprep.mubr.msk.bf16.mxu0 %vm17809_vm11, %v21225_v43  ;;  %v10019_v1 = vsel %vm8626_vm12, %v19597_v9, %v15518_v53  ;;  %v10018_v5 = vsel %vm8626_vm12, %v19592_v27, %v15517_v13 }
 0xd6d   : > { %v15526_v18 = vpop.permute.xlu0 %15525  ;;  %v15521_v2 = vpop.permute.xlu1 %15520 }
 0xd6e   : > { %v15528_v49 = vunpack.i.h.bf16 %v15526_v18  ;;  %v15527_v29 = vunpack.i.l.bf16 %v15526_v18  ;;  %v15523_v38 = vunpack.i.h.bf16 %v15521_v2  ;;  %v15522_v63 = vunpack.i.l.bf16 %v15521_v2  ;;  %v21236_v2 = vld [vmem:[#allocation28_spill] sm:$0xff] }
 0xd70   : > { %v10028_v52 = vsel %vm10023_vm1, %v10018_v5, %v15522_v63  ;;  %v10029_v50 = vsel %vm10023_vm1, %v10019_v1, %v15523_v38  ;;  %v21237_v5 = vld [vmem:[#allocation29_spill] sm:$0xff] }
 0xd71   : > { %v10038_v7 = vsel %vm10033_vm2, %v10028_v52, %v15527_v29  ;;  %v10039_v31 = vsel %vm10033_vm2, %v10029_v50, %v15528_v49  ;;  %v15531_v4 = vpop.permute.xlu1 %15530  ;;  %v15536_v59 = vpop.permute.xlu0 %15535 }
 0xd72   : > { %v10045_v39 = vpack.c.bf16 %v10039_v31, %v10038_v7  ;;  %v15533_v33 = vunpack.i.h.bf16 %v15531_v4  ;;  %v15532_v34 = vunpack.i.l.bf16 %v15531_v4  ;;  %v15538_v9 = vunpack.i.h.bf16 %v15536_v59 }
 0xd73   : > { %v15537_v27 = vunpack.i.l.bf16 %v15536_v59 }
 0xd74   : > { %14975 = vmatmul.mubr.msk.bf16.gmra.mxu0 %vm8247_vm10, %v10045_v39  ;;  %v10021_v62 = vsel %vm8626_vm12, %v19601_v22, %v15533_v33  ;;  %v10020_v44 = vsel %vm8626_vm12, %v19599_v57, %v15532_v34  ;;  %v21238_v39 = vld [vmem:[#allocation31_spill] sm:$0xff] }
 0xd75   : > { %14978 = vmatprep.mubr.msk.bf16.mxu0 %vm17809_vm11, %v21225_v43  ;;  %v9932_v48 = vpop.permute.xlu0 %9931  ;;  %v10030_v42 = vsel %vm10023_vm1, %v10020_v44, %v15537_v27  ;;  %v10031_v16 = vsel %vm10023_vm1, %v10021_v62, %v15538_v9  ;;  %v21239_v62 = vld [vmem:[#allocation30_spill] sm:$0xff] }
 0xd76   : > { %v10022_v22 = vsel %vm8626_vm12, %v19603_v35, %v9932_v48 }
 0xd7a   : > { %v15541_v30 = vpop.permute.xlu1 %15540 }
 0xd7b   : > { %v15543_v54 = vunpack.i.h.bf16 %v15541_v30  ;;  %v15542_v24 = vunpack.i.l.bf16 %v15541_v30 }
 0xd7c   : > { %v10004_v57 = vpop.permute.xlu0 %10003 }
 0xd7d   : > { %v10040_v32 = vsel %vm10033_vm2, %v10030_v42, %v15542_v24  ;;  %v10041_v11 = vsel %vm10033_vm2, %v10031_v16, %v15543_v54  ;;  %v21240_v42 = vld [vmem:[#allocation32_spill] sm:$0xff] }
 0xd7e   : > { %v10046_v51 = vpack.c.bf16 %v10041_v11, %v10040_v32  ;;  %v9968_v47 = vpop.permute.xlu1 %9967 }
 0xd7f   : > { %v10032_v56 = vsel %vm10023_vm1, %v10022_v22, %v9968_v47 }
 0xd80   : > { %14979 = vmatmul.mubr.msk.bf16.gmra.mxu0 %vm8247_vm10, %v10046_v51  ;;  %v10042_v15 = vsel %vm10033_vm2, %v10032_v56, %v10004_v57 }
 0xd81   : > { %14982 = vmatprep.mubr.msk.bf16.mxu0 %vm17809_vm11, %v21225_v43  ;;  %v10047_v10 = vpack.c.bf16 %v10042_v15, %v10042_v15 }
 0xd88   : > { %14983 = vmatmul.mubr.msk.bf16.gmra.mxu0 %vm8247_vm10, %v10047_v10 }
 0xd89   : > { %15030 = vmatprep.mubr.msk.bf16.mxu0 %vm17809_vm11, %v21225_v43 }
 0xe23   : > { %v10129_v36 = vpop.f32.mrf.mxu0 }
 0xe24   : > { %v10130_v37 = vadd.f32 %v10129_v36, %v8242_v40 }
 0xe25   : > { %v14968_v35 = vpop.f32.mrf.mxu0 }
 0xe26   : > { %v19696_v23 = vadd.f32 %v17501_v21, %v10130_v37 }
 0xe27   : > { %v10132_v14 = vpop.f32.mrf.mxu0 }
 0xe28   : > { %v10133_v17 = vadd.f32 %v10132_v14, %v8242_v40  ;;  %v10176_v6 = vsel %vm8247_vm10, %v19696_v23, 0.0 }
 0xe29   : > { %10177 = vadd.xlane.f32.xlu1 %v10176_v6  ;;  %v14969_v46 = vpop.f32.mrf.mxu0 }
 0xe2a   : > { %v19701_v20 = vadd.f32 %v10133_v17, %v21233_v25 }
 0xe2b   : > { %v10137_v28 = vpop.f32.mrf.mxu0 }
 0xe2c   : > { %v10138_v55 = vadd.f32 %v10137_v28, %v8242_v40  ;;  %v10179_v41 = vsel %vm8247_vm10, %v19701_v20, 0.0 }
 0xe2d   : > { %10180 = vadd.xlane.f32.xlu0 %v10179_v41  ;;  %v14972_v12 = vpop.f32.mrf.mxu0 }
 0xe2e   : > { %v19706_v3 = vadd.f32 %v10138_v55, %v21234_v58 }
 0xe2f   : > { %v10140_v8 = vpop.f32.mrf.mxu0 }
 0xe30   : > { %v10141_v61 = vadd.f32 %v10140_v8, %v8242_v40  ;;  %v10182_v0 = vsel %vm8247_vm10, %v19706_v3, 0.0 }
 0xe31   : > { %10183 = vadd.xlane.f32.xlu0 %v10182_v0  ;;  %v14973_v19 = vpop.f32.mrf.mxu0 }
 0xe32   : > { %v19711_v60 = vadd.f32 %v10141_v61, %v21235_v26 }
 0xe34   : > { %v10145_v45 = vpop.f32.mrf.mxu0  ;;  %v10185_v53 = vsel %vm8247_vm10, %v19711_v60, 0.0 }
 0xe35   : > { %v10146_v13 = vadd.f32 %v10145_v45, %v8242_v40  ;;  %10186 = vadd.xlane.f32.xlu0 %v10185_v53 }
 0xe36   : > { %v14976_v18 = vpop.f32.mrf.mxu0 }
 0xe37   : > { %v19716_v49 = vadd.f32 %v10146_v13, %v21236_v2 }
 0xe38   : > { %v10148_v29 = vpop.f32.mrf.mxu0 }
 0xe39   : > { %v10149_v38 = vadd.f32 %v10148_v29, %v8242_v40  ;;  %v10188_v63 = vsel %vm8247_vm10, %v19716_v49, 0.0 }
 0xe3a   : > { %10189 = vadd.xlane.f32.xlu1 %v10188_v63  ;;  %v14977_v1 = vpop.f32.mrf.mxu0 }
 0xe3b   : > { %v19721_v52 = vadd.f32 %v10149_v38, %v21237_v5 }
 0xe3d   : > { %v10191_v50 = vsel %vm8247_vm10, %v19721_v52, 0.0 }
 0xe3e   : > { %10192 = vadd.xlane.f32.xlu0 %v10191_v50 }
 0xe40   : > { %v10153_v7 = vpop.f32.mrf.mxu0 }
 0xe41   : > { %v10154_v31 = vadd.f32 %v10153_v7, %v8242_v40 }
 0xe42   : > { %v14980_v4 = vpop.f32.mrf.mxu0 }
 0xe43   : > { %v19726_v59 = vadd.f32 %v10154_v31, %v21238_v39 }
 0xe44   : > { %v10156_v33 = vpop.f32.mrf.mxu0 }
 0xe45   : > { %v10157_v34 = vadd.f32 %v10156_v33, %v8242_v40  ;;  %v10194_v9 = vsel %vm8247_vm10, %v19726_v59, 0.0 }
 0xe46   : > { %10195 = vadd.xlane.f32.xlu1 %v10194_v9  ;;  %v14981_v27 = vpop.f32.mrf.mxu0 }
 0xe47   : > { %v19731_v44 = vadd.f32 %v10157_v34, %v21239_v62  ;;  %v17058_v62 = vld [vmem:[#allocation11 + $0x6c] ss:$16 sps:$4 sm:$0xff]  }
 0xe48   : > { %v10161_v30 = vpop.f32.mrf.mxu0  ;;  %14987 = vmatpush3.bf16.msra.mxu1 %v17058_v62 }
 0xe49   : > { %v10162_v54 = vadd.f32 %v10161_v30, %v8242_v40  ;;  %v10197_v24 = vsel %vm8247_vm10, %v19731_v44, 0.0  ;;  %14988 = vmatprep.subr.bf16.mxu1 %v21225_v43  ;;  %v17059_v30 = vld [vmem:[#allocation11 + $0x4c] ss:$16 sps:$4 sm:$0xff]  }
 0xe4a   : > { %10198 = vadd.xlane.f32.xlu0 %v10197_v24  ;;  %v14984_v48 = vpop.f32.mrf.mxu0  ;;  %v17061_v24 = vld [vmem:[#allocation11 + $0xc] ss:$16 sps:$4 sm:$0xff]  }
 0xe4b   : > { %v19736_v16 = vadd.f32 %v10162_v54, %v21240_v42  ;;  %v17060_v54 = vld [vmem:[#allocation11 + $0x2c] ss:$16 sps:$4 sm:$0xff]  }
 0xe4c   : > { %v10164_v32 = vpop.f32.mrf.mxu0  ;;  %14989 = vmatpush3.bf16.msra.mxu1 %v17059_v30 }
 0xe4d   : > { %v10200_v11 = vsel %vm8247_vm10, %v19736_v16, 0.0  ;;  %14990 = vmatprep.subr.bf16.mxu1 %v21225_v43 }
 0xe4e   : > { %10201 = vadd.xlane.f32.xlu1 %v10200_v11  ;;  %v14985_v51 = vpop.f32.mrf.mxu0 }
 0xe50   : > { %14991 = vmatpush3.bf16.msra.mxu1 %v17060_v54 }
 0xe51   : > { %14992 = vmatprep.subr.bf16.mxu1 %v21225_v43 }
 0xe54   : > { %14993 = vmatpush3.bf16.msra.mxu1 %v17061_v24 }
 0xeb2   : > { %v10178_v47 = vpop.xlane.xlu1 %10177 }
 0xeb3   : > { %v10203_v22 = vmul.f32 0.015625, %v10178_v47 }
 0xeb5   : > { %v19741_v56 = vsub.f32 %v19696_v23, %v10203_v22 }
 0xeb6   : > { %v10181_v57 = vpop.xlane.xlu0 %10180 }
 0xeb7   : > { %v10204_v15 = vmul.f32 0.015625, %v10181_v57  ;;  %v10221_v10 = vmul.f32 %v19741_v56, %v19741_v56 }
 0xeb9   : > { %v19746_v40 = vsub.f32 %v19701_v20, %v10204_v15  ;;  %v10230_v36 = vsel %vm8247_vm10, %v10221_v10, 0.0 }
 0xeba   : > { %v10184_v37 = vpop.xlane.xlu0 %10183  ;;  %10231 = vadd.xlane.f32.xlu0 %v10230_v36 }
 0xebb   : > { %v10205_v35 = vmul.f32 0.015625, %v10184_v37  ;;  %v10222_v21 = vmul.f32 %v19746_v40, %v19746_v40 }
 0xebd   : > { %v19752_v14 = vsub.f32 %v19706_v3, %v10205_v35  ;;  %v10233_v17 = vsel %vm8247_vm10, %v10222_v21, 0.0 }
 0xebe   : > { %v10187_v6 = vpop.xlane.xlu0 %10186  ;;  %10234 = vadd.xlane.f32.xlu1 %v10233_v17 }
 0xebf   : > { %v10206_v46 = vmul.f32 0.015625, %v10187_v6  ;;  %v10223_v25 = vmul.f32 %v19752_v14, %v19752_v14 }
 0xec1   : > { %v19758_v28 = vsub.f32 %v19711_v60, %v10206_v46  ;;  %v10236_v55 = vsel %vm8247_vm10, %v10223_v25, 0.0  ;;  %v8243_v46 = vld [vmem:[#allocation12 + $0x4] ss:$0 sm:$0xff] }
 0xec2   : > { %10237 = vadd.xlane.f32.xlu0 %v10236_v55 }
 0xec3   : > { %v10190_v41 = vpop.xlane.xlu1 %10189  ;;  %v10224_v12 = vmul.f32 %v19758_v28, %v19758_v28 }
 0xec4   : > { %v10207_v58 = vmul.f32 0.015625, %v10190_v41 }
 0xec5   : > { %v10239_v8 = vsel %vm8247_vm10, %v10224_v12, 0.0 }
 0xec6   : > { %v19765_v61 = vsub.f32 %v19716_v49, %v10207_v58  ;;  %10240 = vadd.xlane.f32.xlu1 %v10239_v8 }
 0xec7   : > { %v10193_v0 = vpop.xlane.xlu0 %10192 }
 0xec8   : > { %v10208_v19 = vmul.f32 0.015625, %v10193_v0  ;;  %v10225_v26 = vmul.f32 %v19765_v61, %v19765_v61  ;;  %v8244_v0 = vld [vmem:[#allocation12 + $0x5] ss:$0 sm:$0xff] }
 0xeca   : > { %v19770_v45 = vsub.f32 %v19721_v52, %v10208_v19  ;;  %v10242_v53 = vsel %vm8247_vm10, %v10225_v26, 0.0 }
 0xecb   : > { %10243 = vadd.xlane.f32.xlu0 %v10242_v53 }
 0xecc   : > { %v10226_v13 = vmul.f32 %v19770_v45, %v19770_v45 }
 0xece   : > { %v10245_v2 = vsel %vm8247_vm10, %v10226_v13, 0.0 }
 0xecf   : > { %v10196_v18 = vpop.xlane.xlu1 %10195  ;;  %10246 = vadd.xlane.f32.xlu1 %v10245_v2 }
 0xed0   : > { %v10209_v29 = vmul.f32 0.015625, %v10196_v18 }
 0xed2   : > { %v19777_v38 = vsub.f32 %v19726_v59, %v10209_v29 }
 0xed3   : > { %v10199_v63 = vpop.xlane.xlu0 %10198 }
 0xed4   : > { %v10210_v1 = vmul.f32 0.015625, %v10199_v63  ;;  %v10227_v5 = vmul.f32 %v19777_v38, %v19777_v38 }
 0xed6   : > { %v19782_v50 = vsub.f32 %v19731_v44, %v10210_v1  ;;  %v10248_v7 = vsel %vm8247_vm10, %v10227_v5, 0.0 }
 0xed7   : > { %10249 = vadd.xlane.f32.xlu0 %v10248_v7  ;;  %v10202_v31 = vpop.xlane.xlu1 %10201 }
 0xed8   : > { %v10211_v4 = vmul.f32 0.015625, %v10202_v31  ;;  %v10228_v39 = vmul.f32 %v19782_v50, %v19782_v50 }
 0xeda   : > { %v19788_v33 = vsub.f32 %v19736_v16, %v10211_v4  ;;  %v10251_v34 = vsel %vm8247_vm10, %v10228_v39, 0.0 }
 0xedb   : > { %10252 = vadd.xlane.f32.xlu1 %v10251_v34 }
 0xedc   : > { %v10229_v9 = vmul.f32 %v19788_v33, %v19788_v33 }
 0xede   : > { %v10254_v27 = vsel %vm8247_vm10, %v10229_v9, 0.0 }
 0xedf   : > { %10255 = vadd.xlane.f32.xlu0 %v10254_v27 }
 0xf43   : > { %v10232_v48 = vpop.xlane.xlu0 %10231 }
 0xf44   : > { %v10257_v42 = vmul.f32 0.015625, %v10232_v48 }
 0xf46   : > { %v10266_v32 = vadd.f32 1e-05, %v10257_v42 }
 0xf47   : > { %v10235_v11 = vpop.xlane.xlu1 %10234 }
 0xf48   : > { %17264 = vrsqrt.f32 %v10266_v32  ;;  %v10258_v51 = vmul.f32 0.015625, %v10235_v11 }
 0xf4a   : > { %v10267_v47 = vadd.f32 1e-05, %v10258_v51 }
 0xf4b   : > { %v10238_v22 = vpop.xlane.xlu0 %10237 }
 0xf4c   : > { %17266 = vrsqrt.f32 %v10267_v47  ;;  %v10259_v57 = vmul.f32 0.015625, %v10238_v22 }
 0xf4e   : > { %v10268_v15 = vadd.f32 1e-05, %v10259_v57 }
 0xf4f   : > { %v10241_v10 = vpop.xlane.xlu1 %10240 }
 0xf50   : > { %17268 = vrsqrt.f32 %v10268_v15  ;;  %v10260_v36 = vmul.f32 0.015625, %v10241_v10 }
 0xf52   : > { %v10269_v37 = vadd.f32 1e-05, %v10260_v36 }
 0xf54   : > { %17270 = vrsqrt.f32 %v10269_v37  ;;  %v10244_v35 = vpop.xlane.xlu0 %10243 }
 0xf55   : > { %v17265_v21 = vpop.eup %17264  ;;  %v10261_v17 = vmul.f32 0.015625, %v10244_v35 }
 0xf56   : > { %v10284_v6 = vmul.f32 %v17265_v21, %v19741_v56 }
 0xf57   : > { %v10270_v25 = vadd.f32 1e-05, %v10261_v17 }
 0xf58   : > { %v10247_v55 = vpop.xlane.xlu1 %10246  ;;  %v10293_v58 = vmul.f32 %v10284_v6, %v8243_v46 }
 0xf59   : > { %v17267_v41 = vpop.eup %17266  ;;  %17272 = vrsqrt.f32 %v10270_v25  ;;  %v10262_v12 = vmul.f32 0.015625, %v10247_v55 }
 0xf5a   : > { %v10285_v8 = vmul.f32 %v17267_v41, %v19746_v40  ;;  %v10302_v13 = vadd.f32 %v10293_v58, %v8244_v0  ;;  %v21241_v41 = vmov 0   ;;  %v17066_v58 = vld [vmem:[%s21137_s7 + $0x18] sm:$0xff]  }
 0xf5b   : > { %v10271_v19 = vadd.f32 1e-05, %v10262_v12  ;;  %v17065_v12 = vld [vmem:[%s21137_s7 + $0x20] sm:$0xff]  }
 0xf5c   : > { %v10294_v26 = vmul.f32 %v10285_v8, %v8243_v46  ;;  %v17067_v8 = vld [vmem:[%s21137_s7 + $0x10] sm:$0xff]  }
 0xf5d   : > { %v17269_v53 = vpop.eup %17268  ;;  %17274 = vrsqrt.f32 %v10271_v19  ;;  %v17069_v19 = vld [vmem:[%s21137_s7] sm:$0xff]  }
 0xf5e   : > { %v10303_v18 = vadd.f32 %v10294_v26, %v8244_v0  ;;  %v10286_v2 = vmul.f32 %v17269_v53, %v19752_v14  ;;  %v19852_v26 = vld [vmem:[#allocation12 + $0x6] ss:$0 sm:$0xff] }
 0xf60   : > { %v10250_v29 = vpop.xlane.xlu0 %10249  ;;  %v10311_v56 = vpack.c.bf16 %v10303_v18, %v10302_v13  ;;  %v10295_v31 = vmul.f32 %v10286_v2, %v8243_v46 }
 0xf61   : > { %v10263_v63 = vmul.f32 0.015625, %v10250_v29  ;;  %v17271_v1 = vpop.eup %17270 }
 0xf62   : > { %v10287_v5 = vmul.f32 %v17271_v1, %v19758_v28  ;;  %14995 = vmatmul.mubr.msk.bf16.vlgmr.msra.gmra.mxu1 %vm8247_vm10, %v10311_v56  ;;  %v10304_v14 = vadd.f32 %v10295_v31, %v8244_v0 }
 0xf63   : > { %v10272_v7 = vadd.f32 1e-05, %v10263_v63  ;;  %14998 = vmatprep.mubr.msk.bf16.mxu1 %vm17809_vm11, %v21225_v43 }
 0xf64   : > { %v10253_v40 = vpop.xlane.xlu1 %10252  ;;  %v10296_v39 = vmul.f32 %v10287_v5, %v8243_v46 }
 0xf65   : > { %17276 = vrsqrt.f32 %v10272_v7  ;;  %v10264_v4 = vmul.f32 0.015625, %v10253_v40 }
 0xf66   : > { %v17273_v34 = vpop.eup %17272  ;;  %v10305_v27 = vadd.f32 %v10296_v39, %v8244_v0 }
 0xf67   : > { %v10273_v9 = vadd.f32 1e-05, %v10264_v4  ;;  %v10288_v62 = vmul.f32 %v17273_v34, %v19765_v61 }
 0xf68   : > { %v10256_v30 = vpop.xlane.xlu0 %10255  ;;  %v10312_v54 = vpack.c.bf16 %v10305_v27, %v10304_v14 }
 0xf69   : > { %17278 = vrsqrt.f32 %v10273_v9  ;;  %v10265_v28 = vmul.f32 0.015625, %v10256_v30  ;;  %v10297_v32 = vmul.f32 %v10288_v62, %v8243_v46 }
 0xf6a   : > { %v17275_v24 = vpop.eup %17274  ;;  %14999 = vmatmul.mubr.msk.bf16.gmra.mxu1 %vm8247_vm10, %v10312_v54 }
 0xf6b   : > { %v10274_v48 = vadd.f32 1e-05, %v10265_v28  ;;  %v10289_v42 = vmul.f32 %v17275_v24, %v19770_v45  ;;  %15002 = vmatprep.mubr.msk.bf16.mxu1 %vm17809_vm11, %v21225_v43  ;;  %v10306_v51 = vadd.f32 %v10297_v32, %v8244_v0 }
 0xf6d   : > { %17280 = vrsqrt.f32 %v10274_v48  ;;  %v10298_v11 = vmul.f32 %v10289_v42, %v8243_v46 }
 0xf6f   : > { %v10307_v47 = vadd.f32 %v10298_v11, %v8244_v0 }
 0xf71   : > { %v10313_v61 = vpack.c.bf16 %v10307_v47, %v10306_v51 }
 0xf72   : > { %v17277_v22 = vpop.eup %17276 }
 0xf73   : > { %v10290_v57 = vmul.f32 %v17277_v22, %v19777_v38  ;;  %15003 = vmatmul.mubr.msk.bf16.gmra.mxu1 %vm8247_vm10, %v10313_v61 }
 0xf74   : > { %15006 = vmatprep.mubr.msk.bf16.mxu1 %vm17809_vm11, %v21225_v43 }
 0xf75   : > { %v10299_v10 = vmul.f32 %v10290_v57, %v8243_v46 }
 0xf76   : > { %v17279_v15 = vpop.eup %17278 }
 0xf77   : > { %v10291_v45 = vmul.f32 %v17279_v15, %v19782_v50  ;;  %v10308_v35 = vadd.f32 %v10299_v10, %v8244_v0  ;;  %v17062_v50 = vld [vmem:[%s21137_s7 + $0x38] sm:$0xff]  }
 0xf78   : > { %15015 = vmatpush3.bf16.msra.mxu0 %v17062_v50 }
 0xf79   : > { %v10300_v36 = vmul.f32 %v10291_v45, %v8243_v46  ;;  %15016 = vmatprep.subr.bf16.mxu0 %v21225_v43 }
 0xf7a   : > { %v17281_v37 = vpop.eup %17280 }
 0xf7b   : > { %v10309_v21 = vadd.f32 %v10300_v36, %v8244_v0  ;;  %v10292_v17 = vmul.f32 %v17281_v37, %v19788_v33  ;;  %v17063_v33 = vld [vmem:[%s21137_s7 + $0x30] sm:$0xff]  }
 0xf7c   : > { %15017 = vmatpush3.bf16.msra.mxu0 %v17063_v33 }
 0xf7d   : > { %v10314_v6 = vpack.c.bf16 %v10309_v21, %v10308_v35  ;;  %v10301_v25 = vmul.f32 %v10292_v17, %v8243_v46  ;;  %15018 = vmatprep.subr.bf16.mxu0 %v21225_v43  ;;  %v17064_v46 = vld [vmem:[%s21137_s7 + $0x28] sm:$0xff]  }
 0xf7f   : > { %15007 = vmatmul.mubr.msk.bf16.gmra.mxu1 %vm8247_vm10, %v10314_v6  ;;  %v10310_v38 = vadd.f32 %v10301_v25, %v8244_v0  ;;  %v17068_v0 = vld [vmem:[%s21137_s7 + $0x8] sm:$0xff]  }
 0xf80   : > { %15010 = vmatprep.mubr.msk.bf16.mxu1 %vm17809_vm11, %v21225_v43  ;;  %15019 = vmatpush3.bf16.msra.mxu0 %v17064_v46 }
 0xf81   : > { %v10315_v55 = vpack.c.bf16 %v10310_v38, %v10310_v38  ;;  %15020 = vmatprep.subr.bf16.mxu0 %v21225_v43 }
 0xf84   : > { %15021 = vmatpush3.bf16.msra.mxu0 %v17065_v12 }
 0xf85   : > { %15022 = vmatprep.subr.bf16.mxu0 %v21225_v43 }
 0xf87   : > { %15011 = vmatmul.mubr.msk.bf16.gmra.mxu1 %vm8247_vm10, %v10315_v55 }
 0xf88   : > { %10923 = vmatprep.mubr.bf16.mxu1 %v21241_v41  ;;  %15023 = vmatpush3.bf16.msra.mxu0 %v17066_v58 }
 0xf89   : > { %15024 = vmatprep.subr.bf16.mxu0 %v21225_v43 }
 0xf8c   : > { %15025 = vmatpush3.bf16.msra.mxu0 %v17067_v8 }
 0xf8d   : > { %15026 = vmatprep.subr.bf16.mxu0 %v21225_v43 }
 0xf90   : > { %15027 = vmatpush3.bf16.msra.mxu0 %v17068_v0 }
 0xf91   : > { %15028 = vmatprep.subr.bf16.mxu0 %v21225_v43 }
 0xf94   : > { %15029 = vmatpush3.bf16.msra.mxu0 %v17069_v19 }
 0xf95   : > { %15050 = vmatprep.subr.bf16.mxu0 %v21225_v43 }
0x1022   : > { %v10397_v53 = vpop.f32.mrf.mxu1 }
0x1023   : > { %v19855_v13 = vadd.f32 %v10397_v53, %v19852_v26 }
0x1024   : > { %v14996_v18 = vpop.f32.mrf.mxu1 }
0x1025   : > { %v10435_v2 = vmul.f32 %v19855_v13, %v19855_v13 }
0x1026   : > { %v10400_v29 = vpop.f32.mrf.mxu1 }
0x1027   : > { %v10444_v56 = vmul.f32 %v10435_v2, %v19855_v13  ;;  %v19861_v63 = vadd.f32 %v10400_v29, %v19852_v26 }
0x1028   : > { %v14997_v1 = vpop.f32.mrf.mxu1 }
0x1029   : > { %v10453_v5 = vmul.f32 0.044715, %v10444_v56  ;;  %v10436_v7 = vmul.f32 %v19861_v63, %v19861_v63 }
0x102a   : > { %v10405_v31 = vpop.f32.mrf.mxu1 }
0x102b   : > { %v10462_v40 = vadd.f32 %v10453_v5, %v19855_v13  ;;  %v10445_v4 = vmul.f32 %v10436_v7, %v19861_v63  ;;  %v19868_v39 = vadd.f32 %v10405_v31, %v19852_v26 }
0x102c   : > { %v15000_v34 = vpop.f32.mrf.mxu1 }
0x102d   : > { %v10471_v9 = vmul.f32 0.7978846, %v10462_v40  ;;  %v10454_v14 = vmul.f32 0.044715, %v10445_v4  ;;  %v10437_v27 = vmul.f32 %v19868_v39, %v19868_v39 }
0x102e   : > { %v10408_v62 = vpop.f32.mrf.mxu1 }
0x102f   : > { %17282 = vtanh.f32 %v10471_v9  ;;  %v10463_v30 = vadd.f32 %v10454_v14, %v19861_v63  ;;  %v10446_v28 = vmul.f32 %v10437_v27, %v19868_v39  ;;  %v19875_v54 = vadd.f32 %v10408_v62, %v19852_v26 }
0x1030   : > { %v15001_v24 = vpop.f32.mrf.mxu1 }
0x1031   : > { %v10472_v48 = vmul.f32 0.7978846, %v10463_v30  ;;  %v10455_v42 = vmul.f32 0.044715, %v10446_v28  ;;  %v10438_v32 = vmul.f32 %v19875_v54, %v19875_v54 }
0x1033   : > { %17284 = vtanh.f32 %v10472_v48  ;;  %v10464_v11 = vadd.f32 %v10455_v42, %v19868_v39  ;;  %v10447_v51 = vmul.f32 %v10438_v32, %v19875_v54  ;;  %v10413_v47 = vpop.f32.mrf.mxu1 }
0x1034   : > { %v19882_v22 = vadd.f32 %v10413_v47, %v19852_v26 }
0x1035   : > { %v10473_v61 = vmul.f32 0.7978846, %v10464_v11  ;;  %v10456_v57 = vmul.f32 0.044715, %v10447_v51  ;;  %v15004_v15 = vpop.f32.mrf.mxu1 }
0x1036   : > { %v10439_v45 = vmul.f32 %v19882_v22, %v19882_v22 }
0x1037   : > { %17286 = vtanh.f32 %v10473_v61  ;;  %v10465_v10 = vadd.f32 %v10456_v57, %v19875_v54  ;;  %v10416_v36 = vpop.f32.mrf.mxu1 }
0x1038   : > { %v10448_v37 = vmul.f32 %v10439_v45, %v19882_v22  ;;  %v19889_v35 = vadd.f32 %v10416_v36, %v19852_v26 }
0x1039   : > { %v10474_v21 = vmul.f32 0.7978846, %v10465_v10  ;;  %v15005_v17 = vpop.f32.mrf.mxu1 }
0x103a   : > { %v10457_v6 = vmul.f32 0.044715, %v10448_v37  ;;  %v10440_v25 = vmul.f32 %v19889_v35, %v19889_v35 }
0x103b   : > { %17288 = vtanh.f32 %v10474_v21 }
0x103c   : > { %v17283_v38 = vpop.eup %17282  ;;  %v10466_v55 = vadd.f32 %v10457_v6, %v19882_v22  ;;  %v10449_v50 = vmul.f32 %v10440_v25, %v19889_v35 }
0x103d   : > { %v10489_v33 = vadd.f32 1.0, %v17283_v38 }
0x103e   : > { %v10475_v46 = vmul.f32 0.7978846, %v10466_v55  ;;  %v10458_v12 = vmul.f32 0.044715, %v10449_v50 }
0x103f   : > { %v10421_v58 = vpop.f32.mrf.mxu1  ;;  %v10498_v19 = vmul.f32 0.5, %v10489_v33 }
0x1040   : > { %v19896_v8 = vadd.f32 %v10421_v58, %v19852_v26  ;;  %v17285_v0 = vpop.eup %17284  ;;  %17290 = vtanh.f32 %v10475_v46  ;;  %v10467_v53 = vadd.f32 %v10458_v12, %v19889_v35 }
0x1041   : > { %v15008_v18 = vpop.f32.mrf.mxu1  ;;  %v10490_v2 = vadd.f32 1.0, %v17285_v0  ;;  %v10507_v4 = vmul.f32 %v10498_v19, %v19855_v13 }
0x1042   : > { %v10441_v29 = vmul.f32 %v19896_v8, %v19896_v8  ;;  %v10476_v56 = vmul.f32 0.7978846, %v10467_v53 }
0x1043   : > { %v10424_v1 = vpop.f32.mrf.mxu1  ;;  %v10499_v5 = vmul.f32 0.5, %v10490_v2 }
0x1044   : > { %v10450_v7 = vmul.f32 %v10441_v29, %v19896_v8  ;;  %v10425_v31 = vadd.f32 %v10424_v1, %v19852_v26  ;;  %v17287_v40 = vpop.eup %17286  ;;  %17292 = vtanh.f32 %v10476_v56 }
0x1045   : > { %v15009_v34 = vpop.f32.mrf.mxu1  ;;  %v10508_v9 = vmul.f32 %v10499_v5, %v19861_v63  ;;  %v10491_v14 = vadd.f32 1.0, %v17287_v40 }
0x1046   : > { %v10459_v27 = vmul.f32 0.044715, %v10450_v7  ;;  %v10442_v62 = vmul.f32 %v10425_v31, %v10425_v31 }
0x1047   : > { %v10429_v30 = vpop.f32.mrf.mxu1  ;;  %v10516_v28 = vpack.c.bf16 %v10508_v9, %v10507_v4  ;;  %v10500_v51 = vmul.f32 0.5, %v10491_v14  ;;  %v8246_v9 = vld [vmem:[#allocation12 + $0x7] ss:$0 sm:$0xff] }
0x1048   : > { %v10468_v24 = vadd.f32 %v10459_v27, %v19896_v8  ;;  %v10451_v48 = vmul.f32 %v10442_v62, %v10425_v31  ;;  %v17289_v42 = vpop.eup %17288  ;;  %v10430_v32 = vadd.f32 %v10429_v30, %v19852_v26 }
0x1049   : > { %v15012_v11 = vpop.f32.mrf.mxu1  ;;  %v10492_v47 = vadd.f32 1.0, %v17289_v42  ;;  %15031 = vmatmul.mubr.bf16.vlgmr.msra.gmra.mxu0 %v10516_v28  ;;  %v10509_v21 = vmul.f32 %v10500_v51, %v19868_v39 }
0x104a   : > { %v10477_v61 = vmul.f32 0.7978846, %v10468_v24  ;;  %v10460_v13 = vmul.f32 0.044715, %v10451_v48  ;;  %v10443_v57 = vmul.f32 %v10430_v32, %v10430_v32  ;;  %15034 = vmatprep.mubr.msk.bf16.mxu0 %vm17809_vm11, %v21225_v43 }
0x104b   : > { %v10432_v15 = vpop.f32.mrf.mxu1  ;;  %v10501_v63 = vmul.f32 0.5, %v10492_v47 }
0x104c   : > { %17294 = vtanh.f32 %v10477_v61  ;;  %v10469_v45 = vadd.f32 %v10460_v13, %v10425_v31  ;;  %v10452_v10 = vmul.f32 %v10443_v57, %v10430_v32 }
0x104d   : > { %v15013_v36 = vpop.f32.mrf.mxu1  ;;  %v17291_v37 = vpop.eup %17290  ;;  %v10510_v26 = vmul.f32 %v10501_v63, %v19875_v54 }
0x104e   : > { %v10478_v17 = vmul.f32 0.7978846, %v10469_v45  ;;  %v10493_v6 = vadd.f32 1.0, %v17291_v37  ;;  %v10461_v25 = vmul.f32 0.044715, %v10452_v10 }
0x104f   : > { %v10517_v38 = vpack.c.bf16 %v10510_v26, %v10509_v21 }
0x1050   : > { %17296 = vtanh.f32 %v10478_v17  ;;  %v10470_v55 = vadd.f32 %v10461_v25, %v10430_v32  ;;  %v10502_v33 = vmul.f32 0.5, %v10493_v6 }
0x1051   : > { %v17293_v50 = vpop.eup %17292  ;;  %15035 = vmatmul.mubr.bf16.gmra.mxu0 %v10517_v38 }
0x1052   : > { %v10494_v46 = vadd.f32 1.0, %v17293_v50  ;;  %v10479_v12 = vmul.f32 0.7978846, %v10470_v55  ;;  %15038 = vmatprep.mubr.msk.bf16.mxu0 %vm17809_vm11, %v21225_v43  ;;  %v10511_v39 = vmul.f32 %v10502_v33, %v19882_v22 }
0x1054   : > { %v10503_v58 = vmul.f32 0.5, %v10494_v46  ;;  %17298 = vtanh.f32 %v10479_v12 }
0x1056   : > { %v10512_v54 = vmul.f32 %v10503_v58, %v19889_v35 }
0x1058   : > { %v10518_v19 = vpack.c.bf16 %v10512_v54, %v10511_v39 }
0x1059   : > { %v17295_v0 = vpop.eup %17294 }
0x105a   : > { %v10495_v53 = vadd.f32 1.0, %v17295_v0  ;;  %15039 = vmatmul.mubr.bf16.gmra.mxu0 %v10518_v19 }
0x105b   : > { %15042 = vmatprep.mubr.msk.bf16.mxu0 %vm17809_vm11, %v21225_v43 }
0x105c   : > { %v10504_v2 = vmul.f32 0.5, %v10495_v53 }
0x105d   : > { %v17297_v18 = vpop.eup %17296 }
0x105e   : > { %v10496_v29 = vadd.f32 1.0, %v17297_v18  ;;  %v10513_v5 = vmul.f32 %v10504_v2, %v19896_v8 }
0x1060   : > { %v10505_v56 = vmul.f32 0.5, %v10496_v29 }
0x1061   : > { %v17299_v1 = vpop.eup %17298 }
0x1062   : > { %v10514_v7 = vmul.f32 %v10505_v56, %v10425_v31  ;;  %v10497_v40 = vadd.f32 1.0, %v17299_v1 }
0x1064   : > { %v10519_v4 = vpack.c.bf16 %v10514_v7, %v10513_v5  ;;  %v10506_v22 = vmul.f32 0.5, %v10497_v40 }
0x1066   : > { %15043 = vmatmul.mubr.bf16.gmra.mxu0 %v10519_v4  ;;  %v10515_v35 = vmul.f32 %v10506_v22, %v10430_v32 }
0x1067   : > { %15046 = vmatprep.mubr.msk.bf16.mxu0 %vm17809_vm11, %v21225_v43 }
0x1068   : > { %v10520_v34 = vpack.c.bf16 %v10515_v35, %v10515_v35 }
0x106e   : > { %15047 = vmatmul.mubr.bf16.gmra.mxu0 %v10520_v34 }
0x106f   : > { %15052 = vmatprep.mubr.msk.bf16.mxu0 %vm17809_vm11, %v21225_v43 }
0x1109   : > { %v10619_v14 = vpop.f32.mrf.mxu0 }
0x110a   : > { %v10620_v27 = vadd.f32 %v10619_v14, %v8246_v9 }
0x110b   : > { %v15032_v62 = vpop.f32.mrf.mxu0 }
0x110c   : > { %v19923_v8 = vadd.f32 %v10620_v27, %v19696_v23 }
0x110d   : > { %v10622_v31 = vpop.f32.mrf.mxu0 }
0x110e   : > { %v10623_v30 = vadd.f32 %v10622_v31, %v8246_v9  ;;  %v10676_v28 = vsel %vm8247_vm10, %v19923_v8, 0.0 }
0x110f   : > { %10677 = vadd.xlane.f32.xlu1 %v10676_v28  ;;  %v15033_v24 = vpop.f32.mrf.mxu0 }
0x1110   : > { %v19928_v48 = vadd.f32 %v10623_v30, %v19701_v20 }
0x1111   : > { %v10627_v42 = vpop.f32.mrf.mxu0 }
0x1112   : > { %v10628_v32 = vadd.f32 %v10627_v42, %v8246_v9  ;;  %v10679_v11 = vsel %vm8247_vm10, %v19928_v48, 0.0 }
0x1113   : > { %10680 = vadd.xlane.f32.xlu0 %v10679_v11  ;;  %v15036_v51 = vpop.f32.mrf.mxu0 }
0x1114   : > { %v19933_v23 = vadd.f32 %v10628_v32, %v19706_v3 }
0x1115   : > { %v10630_v47 = vpop.f32.mrf.mxu0 }
0x1116   : > { %21242 = vst [vmem:[#allocation36_spill] sm:$0xff] %v19933_v23  ;;  %v10631_v61 = vadd.f32 %v10630_v47, %v8246_v9  ;;  %v10682_v13 = vsel %vm8247_vm10, %v19933_v23, 0.0 }
0x1117   : > { %10683 = vadd.xlane.f32.xlu1 %v10682_v13  ;;  %v15037_v57 = vpop.f32.mrf.mxu0 }
0x1118   : > { %v19938_v20 = vadd.f32 %v10631_v61, %v19711_v60 }
0x111a   : > { %21243 = vst [vmem:[#allocation35_spill] sm:$0xff] %v19938_v20  ;;  %v10635_v15 = vpop.f32.mrf.mxu0  ;;  %v10685_v63 = vsel %vm8247_vm10, %v19938_v20, 0.0 }
0x111b   : > { %v10636_v45 = vadd.f32 %v10635_v15, %v8246_v9  ;;  %10686 = vadd.xlane.f32.xlu0 %v10685_v63 }
0x111c   : > { %v15040_v10 = vpop.f32.mrf.mxu0 }
0x111d   : > { %v19943_v3 = vadd.f32 %v10636_v45, %v19716_v49 }
0x111e   : > { %v10638_v36 = vpop.f32.mrf.mxu0 }
0x111f   : > { %21244 = vst [vmem:[#allocation34_spill] sm:$0xff] %v19943_v3  ;;  %v10639_v37 = vadd.f32 %v10638_v36, %v8246_v9  ;;  %v10688_v21 = vsel %vm8247_vm10, %v19943_v3, 0.0 }
0x1120   : > { %10689 = vadd.xlane.f32.xlu1 %v10688_v21  ;;  %v15041_v26 = vpop.f32.mrf.mxu0 }
0x1121   : > { %v19948_v60 = vadd.f32 %v10639_v37, %v19721_v52 }
0x1123   : > { %21245 = vst [vmem:[#allocation38_spill] sm:$0xff] %v19948_v60  ;;  %v10691_v17 = vsel %vm8247_vm10, %v19948_v60, 0.0 }
0x1124   : > { %10692 = vadd.xlane.f32.xlu0 %v10691_v17 }
0x1126   : > { %v10643_v6 = vpop.f32.mrf.mxu0 }
0x1127   : > { %v10644_v25 = vadd.f32 %v10643_v6, %v8246_v9 }
0x1128   : > { %v15044_v38 = vpop.f32.mrf.mxu0 }
0x1129   : > { %v19953_v49 = vadd.f32 %v10644_v25, %v19726_v59 }
0x112a   : > { %v10646_v55 = vpop.f32.mrf.mxu0 }
0x112b   : > { %21246 = vst [vmem:[#allocation39_spill] sm:$0xff] %v19953_v49  ;;  %v10647_v50 = vadd.f32 %v10646_v55, %v8246_v9  ;;  %v10694_v33 = vsel %vm8247_vm10, %v19953_v49, 0.0 }
0x112c   : > { %10695 = vadd.xlane.f32.xlu1 %v10694_v33  ;;  %v15045_v46 = vpop.f32.mrf.mxu0  ;;  %v17072_v33 = vld [vmem:[#allocation11 + $0xe4] ss:$16 sps:$4 sm:$0xff]  }
0x112d   : > { %v19958_v52 = vadd.f32 %v10647_v50, %v19731_v44  ;;  %10899 = vmatprep.subr.bf16.mxu1 %v17072_v33 }
0x112e   : > { %v10651_v12 = vpop.f32.mrf.mxu0 }
0x112f   : > { %21247 = vst [vmem:[#allocation40_spill] sm:$0xff] %v19958_v52  ;;  %v10652_v58 = vadd.f32 %v10651_v12, %v8246_v9  ;;  %v10697_v39 = vsel %vm8247_vm10, %v19958_v52, 0.0  ;;  %v17070_v12 = vld [vmem:[#allocation11 + $0xe0] ss:$16 sps:$4 sm:$0xff]  }
0x1130   : > { %10698 = vadd.xlane.f32.xlu0 %v10697_v39  ;;  %v15048_v54 = vpop.f32.mrf.mxu0  ;;  %10900 = vmatpush1.bf16.msra.mxu1 %v17070_v12  ;;  %v17073_v39 = vld [vmem:[#allocation11 + $0xc0] ss:$16 sps:$4 sm:$0xff]  }
0x1131   : > { %v19963_v59 = vadd.f32 %v10652_v58, %v19736_v16  ;;  %v17075_v58 = vld [vmem:[#allocation11 + $0xc4] ss:$16 sps:$4 sm:$0xff]  }
0x1132   : > { %v10654_v0 = vpop.f32.mrf.mxu0  ;;  %10901 = vmatprep.subr.bf16.mxu1 %v17075_v58  ;;  %v17078_v54 = vld [vmem:[#allocation11 + $0xa4] ss:$16 sps:$4 sm:$0xff]  }
0x1133   : > { %21248 = vst [vmem:[#allocation37_spill] sm:$0xff] %v19963_v59  ;;  %v10700_v19 = vsel %vm8247_vm10, %v19963_v59, 0.0  ;;  %v17076_v0 = vld [vmem:[#allocation11 + $0xa0] ss:$16 sps:$4 sm:$0xff]  }
0x1134   : > { %10701 = vadd.xlane.f32.xlu1 %v10700_v19  ;;  %v15049_v53 = vpop.f32.mrf.mxu0  ;;  %10902 = vmatpush1.bf16.msra.mxu1 %v17073_v39  ;;  %v17081_v19 = vld [vmem:[#allocation11 + $0x84] ss:$16 sps:$4 sm:$0xff]  }
0x1135   : > { %10903 = vmatprep.subr.bf16.mxu1 %v17078_v54  ;;  %v17079_v53 = vld [vmem:[#allocation11 + $0x80] ss:$16 sps:$4 sm:$0xff]  }
0x1138   : > { %10904 = vmatpush1.bf16.msra.mxu1 %v17076_v0 }
0x1139   : > { %10905 = vmatprep.subr.bf16.mxu1 %v17081_v19 }
0x113c   : > { %10906 = vmatpush1.bf16.msra.mxu1 %v17079_v53 }
0x113d   : > { %15072 = vmatprep.subr.bf16.mxu1 %v21225_v43 }
0x1198   : > { %v10678_v18 = vpop.xlane.xlu1 %10677 }
0x1199   : > { %v10703_v2 = vmul.f32 0.015625, %v10678_v18 }
0x119b   : > { %v19968_v44 = vsub.f32 %v19923_v8, %v10703_v2 }
0x119c   : > { %v10681_v29 = vpop.xlane.xlu0 %10680 }
0x119d   : > { %v10704_v56 = vmul.f32 0.015625, %v10681_v29  ;;  %v10721_v1 = vmul.f32 %v19968_v44, %v19968_v44 }
0x119f   : > { %v19973_v5 = vsub.f32 %v19928_v48, %v10704_v56  ;;  %v10730_v16 = vsel %vm8247_vm10, %v10721_v1, 0.0 }
0x11a0   : > { %v10684_v7 = vpop.xlane.xlu1 %10683  ;;  %10731 = vadd.xlane.f32.xlu0 %v10730_v16 }
0x11a1   : > { %v10705_v40 = vmul.f32 0.015625, %v10684_v7  ;;  %v10722_v4 = vmul.f32 %v19973_v5, %v19973_v5 }
0x11a3   : > { %v19979_v22 = vsub.f32 %v19933_v23, %v10705_v40  ;;  %v10733_v35 = vsel %vm8247_vm10, %v10722_v4, 0.0 }
0x11a4   : > { %v10687_v34 = vpop.xlane.xlu0 %10686  ;;  %10734 = vadd.xlane.f32.xlu1 %v10733_v35 }
0x11a5   : > { %v10706_v9 = vmul.f32 0.015625, %v10687_v34  ;;  %v10723_v14 = vmul.f32 %v19979_v22, %v19979_v22 }
0x11a7   : > { %v19985_v27 = vsub.f32 %v19938_v20, %v10706_v9  ;;  %v10736_v62 = vsel %vm8247_vm10, %v10723_v14, 0.0 }
0x11a8   : > { %10737 = vadd.xlane.f32.xlu0 %v10736_v62 }
0x11a9   : > { %v10690_v31 = vpop.xlane.xlu1 %10689  ;;  %v10724_v30 = vmul.f32 %v19985_v27, %v19985_v27 }
0x11aa   : > { %v10707_v28 = vmul.f32 0.015625, %v10690_v31 }
0x11ab   : > { %v10739_v24 = vsel %vm8247_vm10, %v10724_v30, 0.0 }
0x11ac   : > { %v19992_v42 = vsub.f32 %v19943_v3, %v10707_v28  ;;  %10740 = vadd.xlane.f32.xlu1 %v10739_v24  ;;  %v10667_v28 = vld [vmem:[#allocation12 + $0x10] ss:$0 sm:$0xff] }
0x11ad   : > { %v10693_v32 = vpop.xlane.xlu0 %10692 }
0x11ae   : > { %v10708_v11 = vmul.f32 0.015625, %v10693_v32  ;;  %v10725_v51 = vmul.f32 %v19992_v42, %v19992_v42 }
0x11b0   : > { %v19997_v47 = vsub.f32 %v19948_v60, %v10708_v11  ;;  %v10742_v61 = vsel %vm8247_vm10, %v10725_v51, 0.0 }
0x11b1   : > { %10743 = vadd.xlane.f32.xlu0 %v10742_v61 }
0x11b2   : > { %v10726_v13 = vmul.f32 %v19997_v47, %v19997_v47 }
0x11b4   : > { %v10745_v15 = vsel %vm8247_vm10, %v10726_v13, 0.0 }
0x11b5   : > { %v10696_v57 = vpop.xlane.xlu1 %10695  ;;  %10746 = vadd.xlane.f32.xlu1 %v10745_v15 }
0x11b6   : > { %v10709_v63 = vmul.f32 0.015625, %v10696_v57  ;;  %v10668_v57 = vld [vmem:[#allocation12 + $0x11] ss:$0 sm:$0xff] }
0x11b8   : > { %v20004_v45 = vsub.f32 %v19953_v49, %v10709_v63 }
0x11b9   : > { %v10699_v10 = vpop.xlane.xlu0 %10698 }
0x11ba   : > { %v10710_v36 = vmul.f32 0.015625, %v10699_v10  ;;  %v10727_v37 = vmul.f32 %v20004_v45, %v20004_v45 }
0x11bc   : > { %v20009_v21 = vsub.f32 %v19958_v52, %v10710_v36  ;;  %v10748_v26 = vsel %vm8247_vm10, %v10727_v37, 0.0 }
0x11bd   : > { %10749 = vadd.xlane.f32.xlu0 %v10748_v26  ;;  %v10702_v17 = vpop.xlane.xlu1 %10701 }
0x11be   : > { %v10711_v6 = vmul.f32 0.015625, %v10702_v17  ;;  %v10728_v25 = vmul.f32 %v20009_v21, %v20009_v21 }
0x11c0   : > { %v20015_v38 = vsub.f32 %v19963_v59, %v10711_v6  ;;  %v10751_v55 = vsel %vm8247_vm10, %v10728_v25, 0.0 }
0x11c1   : > { %10752 = vadd.xlane.f32.xlu1 %v10751_v55 }
0x11c2   : > { %v10729_v50 = vmul.f32 %v20015_v38, %v20015_v38 }
0x11c4   : > { %v10754_v46 = vsel %vm8247_vm10, %v10729_v50, 0.0 }
0x11c5   : > { %10755 = vadd.xlane.f32.xlu0 %v10754_v46 }
0x1229   : > { %v10732_v18 = vpop.xlane.xlu0 %10731 }
0x122a   : > { %v10757_v2 = vmul.f32 0.015625, %v10732_v18 }
0x122c   : > { %v10766_v29 = vadd.f32 1e-05, %v10757_v2 }
0x122d   : > { %v10735_v56 = vpop.xlane.xlu1 %10734 }
0x122e   : > { %17300 = vrsqrt.f32 %v10766_v29  ;;  %v10758_v1 = vmul.f32 0.015625, %v10735_v56 }
0x1230   : > { %v10767_v16 = vadd.f32 1e-05, %v10758_v1 }
0x1231   : > { %v10738_v7 = vpop.xlane.xlu0 %10737 }
0x1232   : > { %17302 = vrsqrt.f32 %v10767_v16  ;;  %v10759_v40 = vmul.f32 0.015625, %v10738_v7 }
0x1234   : > { %v10768_v4 = vadd.f32 1e-05, %v10759_v40 }
0x1235   : > { %v10741_v35 = vpop.xlane.xlu1 %10740 }
0x1236   : > { %17304 = vrsqrt.f32 %v10768_v4  ;;  %v10760_v34 = vmul.f32 0.015625, %v10741_v35 }
0x1238   : > { %v10769_v9 = vadd.f32 1e-05, %v10760_v34 }
0x123a   : > { %17306 = vrsqrt.f32 %v10769_v9  ;;  %v10744_v14 = vpop.xlane.xlu0 %10743 }
0x123b   : > { %v17301_v62 = vpop.eup %17300  ;;  %v10761_v31 = vmul.f32 0.015625, %v10744_v14 }
0x123c   : > { %v10784_v30 = vmul.f32 %v17301_v62, %v19968_v44 }
0x123d   : > { %v10770_v24 = vadd.f32 1e-05, %v10761_v31 }
0x123e   : > { %v10747_v32 = vpop.xlane.xlu1 %10746  ;;  %v10793_v61 = vmul.f32 %v10784_v30, %v10667_v28 }
0x123f   : > { %v17303_v11 = vpop.eup %17302  ;;  %17308 = vrsqrt.f32 %v10770_v24  ;;  %v10762_v51 = vmul.f32 0.015625, %v10747_v32 }
0x1240   : > { %v10785_v13 = vmul.f32 %v17303_v11, %v19973_v5  ;;  %v10802_v36 = vadd.f32 %v10793_v61, %v10668_v57 }
0x1241   : > { %v10771_v15 = vadd.f32 1e-05, %v10762_v51  ;;  %v21249_v51 = vld [vmem:[#allocation23_spill] sm:$0xff] }
0x1242   : > { %v10794_v63 = vmul.f32 %v10785_v13, %v10667_v28 }
0x1243   : > { %v17305_v10 = vpop.eup %17304  ;;  %17310 = vrsqrt.f32 %v10771_v15 }
0x1244   : > { %v10803_v37 = vadd.f32 %v10794_v63, %v10668_v57  ;;  %v10786_v26 = vmul.f32 %v17305_v10, %v19979_v22 }
0x1246   : > { %v10750_v17 = vpop.xlane.xlu0 %10749  ;;  %v10811_v44 = vpack.c.bf16 %v10803_v37, %v10802_v36  ;;  %v10795_v33 = vmul.f32 %v10786_v26, %v10667_v28 }
0x1247   : > { %v10763_v6 = vmul.f32 0.015625, %v10750_v17  ;;  %v17307_v25 = vpop.eup %17306 }
0x1248   : > { %v10787_v55 = vmul.f32 %v17307_v25, %v19985_v27  ;;  %14441 = vmatmul.mubr.msk.bf16.vlgmr.msra.gmra.mxu1 %vm8247_vm10, %v10811_v44  ;;  %v10804_v54 = vadd.f32 %v10795_v33, %v10668_v57 }
0x1249   : > { %v10772_v50 = vadd.f32 1e-05, %v10763_v6  ;;  %10933 = vmatprep.mubr.bf16.mxu1 %v21241_v41 }
0x124a   : > { %v10753_v5 = vpop.xlane.xlu1 %10752  ;;  %v10796_v12 = vmul.f32 %v10787_v55, %v10667_v28 }
0x124b   : > { %17312 = vrsqrt.f32 %v10772_v50  ;;  %v10764_v46 = vmul.f32 0.015625, %v10753_v5 }
0x124c   : > { %v17309_v58 = vpop.eup %17308  ;;  %v10805_v22 = vadd.f32 %v10796_v12, %v10668_v57 }
0x124d   : > { %v10773_v39 = vadd.f32 1e-05, %v10764_v46  ;;  %v10788_v0 = vmul.f32 %v17309_v58, %v19992_v42 }
0x124e   : > { %v10756_v19 = vpop.xlane.xlu0 %10755  ;;  %v10812_v27 = vpack.c.bf16 %v10805_v22, %v10804_v54 }
0x124f   : > { %17314 = vrsqrt.f32 %v10773_v39  ;;  %v10765_v53 = vmul.f32 0.015625, %v10756_v19  ;;  %v10797_v56 = vmul.f32 %v10788_v0, %v10667_v28  ;;  %v21250_v0 = vld [vmem:[#allocation24_spill] sm:$0xff] }
0x1250   : > { %v17311_v18 = vpop.eup %17310  ;;  %14442 = vmatmul.mubr.msk.bf16.gmra.mxu1 %vm8247_vm10, %v10812_v27 }
0x1251   : > { %v10774_v2 = vadd.f32 1e-05, %v10765_v53  ;;  %v10789_v29 = vmul.f32 %v17311_v18, %v19997_v47  ;;  %10943 = vmatprep.mubr.bf16.mxu1 %v21241_v41  ;;  %v10806_v16 = vadd.f32 %v10797_v56, %v10668_v57 }
0x1253   : > { %17316 = vrsqrt.f32 %v10774_v2  ;;  %v10798_v1 = vmul.f32 %v10789_v29, %v10667_v28 }
0x1255   : > { %v10807_v7 = vadd.f32 %v10798_v1, %v10668_v57 }
0x1257   : > { %v10813_v4 = vpack.c.bf16 %v10807_v7, %v10806_v16 }
0x1258   : > { %v17313_v40 = vpop.eup %17312 }
0x1259   : > { %v10790_v42 = vmul.f32 %v17313_v40, %v20004_v45  ;;  %14443 = vmatmul.mubr.msk.bf16.gmra.mxu1 %vm8247_vm10, %v10813_v4 }
0x125a   : > { %10953 = vmatprep.mubr.bf16.mxu1 %v21241_v41 }
0x125b   : > { %v10799_v9 = vmul.f32 %v10790_v42, %v10667_v28 }
0x125c   : > { %v17315_v35 = vpop.eup %17314 }
0x125d   : > { %v10791_v34 = vmul.f32 %v17315_v35, %v20009_v21  ;;  %v10808_v62 = vadd.f32 %v10799_v9, %v10668_v57  ;;  %v10670_v21 = vld [vmem:[#allocation12 + $0x12] ss:$8 sm:$0x3] }
0x125e   : > { %v10829_v61 = vrot.slane %v10670_v21, %v21249_v51  ;;  %v10833_v19 = vrot.slane %v10670_v21, %v21250_v0 }
0x125f   : > { %v10800_v47 = vmul.f32 %v10791_v34, %v10667_v28 }
0x1260   : > { %v17317_v14 = vpop.eup %17316 }
0x1261   : > { %v10809_v31 = vadd.f32 %v10800_v47, %v10668_v57  ;;  %v10792_v30 = vmul.f32 %v17317_v14, %v20015_v38 }
0x1263   : > { %v10814_v24 = vpack.c.bf16 %v10809_v31, %v10808_v62  ;;  %v10801_v32 = vmul.f32 %v10792_v30, %v10667_v28 }
0x1265   : > { %14444 = vmatmul.mubr.msk.bf16.gmra.mxu1 %vm8247_vm10, %v10814_v24  ;;  %v10810_v45 = vadd.f32 %v10801_v32, %v10668_v57 }
0x1266   : > { %10963 = vmatprep.mubr.bf16.mxu1 %v21241_v41 }
0x1267   : > { %v10815_v11 = vpack.c.bf16 %v10810_v45, %v10810_v45 }
0x126d   : > { %14445 = vmatmul.mubr.msk.bf16.gmra.mxu1 %vm8247_vm10, %v10815_v11 }
0x126e   : > { %15082 = vmatprep.mubr.msk.bf16.mxu1 %vm17809_vm11, %v21225_v43 }
0x1308   : > { %v10925_v13 = vpop.f32.mrf.mxu1 }
0x1309   : > { %v10926_v15 = vadd.f32 %v10925_v13, %v10829_v61 }
0x130a   : > { %v20043_v63 = vpop.f32.mrf.mxu1 }
0x130b   : > { %10981 = vrot.lane.b32.xlu1 %v10926_v15, %s17803_s2  ;;  %v10928_v32 = vadd.f32 %v20043_v63, %v10833_v19 }
0x130c   : > { %v10929_v38 = vpop.f32.mrf.mxu1 }
0x130d   : > { %v10930_v28 = vadd.f32 %v10929_v38, %v10829_v61 }
0x130e   : > { %v10931_v10 = vpop.f32.mrf.mxu1 }
0x130f   : > { %10983 = vrot.lane.b32.xlu0 %v10930_v28, %s17803_s2  ;;  %v20055_v29 = vpack.c.bf16 %v10930_v28, %v10926_v15  ;;  %v10932_v30 = vadd.f32 %v10931_v10, %v10833_v19 }
0x1310   : > { %v10935_v41 = vpop.f32.mrf.mxu1 }
0x1311   : > { %v10936_v57 = vadd.f32 %v10935_v41, %v10829_v61  ;;  %v20091_v11 = vpack.c.bf16 %v10932_v30, %v10928_v32 }
0x1312   : > { %v10937_v36 = vpop.f32.mrf.mxu1 }
0x1313   : > { %10985 = vrot.lane.b32.xlu1 %v10936_v57, %s17803_s2  ;;  %v10938_v62 = vadd.f32 %v10937_v36, %v10833_v19 }
0x1314   : > { %v10939_v37 = vpop.f32.mrf.mxu1 }
0x1315   : > { %v10940_v26 = vadd.f32 %v10939_v37, %v10829_v61 }
0x1316   : > { %v10941_v17 = vpop.f32.mrf.mxu1 }
0x1317   : > { %10987 = vrot.lane.b32.xlu1 %v10940_v26, %s17803_s2  ;;  %v20063_v4 = vpack.c.bf16 %v10940_v26, %v10936_v57  ;;  %v10942_v47 = vadd.f32 %v10941_v17, %v10833_v19 }
0x1319   : > { %v10945_v44 = vpop.f32.mrf.mxu1  ;;  %v20082_v24 = vpack.c.bf16 %v10942_v47, %v10938_v62 }
0x131a   : > { %v10946_v6 = vadd.f32 %v10945_v44, %v10829_v61 }
0x131b   : > { %v10947_v25 = vpop.f32.mrf.mxu1 }
0x131c   : > { %10989 = vrot.lane.b32.xlu1 %v10946_v6, %s17803_s2  ;;  %v10948_v34 = vadd.f32 %v10947_v25, %v10833_v19 }
0x131d   : > { %v10949_v55 = vpop.f32.mrf.mxu1 }
0x131e   : > { %v10950_v50 = vadd.f32 %v10949_v55, %v10829_v61 }
0x131f   : > { %v10951_v33 = vpop.f32.mrf.mxu1 }
0x1320   : > { %10991 = vrot.lane.b32.xlu0 %v10950_v50, %s17803_s2  ;;  %v10952_v42 = vadd.f32 %v10951_v33, %v10833_v19  ;;  %v20071_v9 = vpack.c.bf16 %v10950_v50, %v10946_v6 }
0x1322   : > { %v20074_v14 = vpack.c.bf16 %v10952_v42, %v10948_v34 }
0x1325   : > { %v10955_v5 = vpop.f32.mrf.mxu1 }
0x1326   : > { %v10956_v46 = vadd.f32 %v10955_v5, %v10829_v61 }
0x1327   : > { %v10957_v12 = vpop.f32.mrf.mxu1 }
0x1328   : > { %10993 = vrot.lane.b32.xlu1 %v10956_v46, %s17803_s2  ;;  %v10958_v40 = vadd.f32 %v10957_v12, %v10833_v19 }
0x1329   : > { %v10959_v58 = vpop.f32.mrf.mxu1 }
0x132a   : > { %v10960_v39 = vadd.f32 %v10959_v58, %v10829_v61 }
0x132b   : > { %v10961_v54 = vpop.f32.mrf.mxu1 }
0x132c   : > { %10995 = vrot.lane.b32.xlu0 %v10960_v39, %s17803_s2  ;;  %v10962_v1 = vadd.f32 %v10961_v54, %v10833_v19  ;;  %v20079_v31 = vpack.c.bf16 %v10960_v39, %v10956_v46 }
0x132d   : > { %v10965_v22 = vpop.f32.mrf.mxu1 }
0x132e   : > { %v10966_v53 = vadd.f32 %v10965_v22, %v10829_v61  ;;  %v20066_v35 = vpack.c.bf16 %v10962_v1, %v10958_v40  ;;  %v21251_v1 = vld [vmem:[#allocation33_spill] sm:$0xff] }
0x132f   : > { %v10967_v27 = vpop.f32.mrf.mxu1 }
0x1330   : > { %v10968_v18 = vadd.f32 %v10967_v27, %v10833_v19  ;;  %10997 = vrot.lane.b32.xlu1 %v10966_v53, %s17803_s2  ;;  %v20088_v45 = vpack.c.bf16 %v10966_v53, %v10966_v53 }
0x1331   : > { %v10969_v2 = vpop.f32.mrf.mxu1 }
0x1332   : > { %v20057_v56 = vpack.c.bf16 %v10968_v18, %v10968_v18 }
0x1333   : > { %v10970_v16 = vpop.f32.mrf.mxu1 }
0x1334   : > { %11358 = vrot.lane.b32.xlu1 %v20055_v29, %s17806_s19  ;;  %v11279_v7 = vsel %vm1363_vm9, %v20057_v56, 0 }
0x1335   : > { %15073 = vmatpush3.bf16.msra.mxu1 %v11279_v7 }
0x1336   : > { %15074 = vmatprep.subr.bf16.mxu1 %v21225_v43 }
0x1338   : > { %11360 = vrot.lane.b32.xlu1 %v20063_v4, %s17806_s19 }
0x1339   : > { %15075 = vmatpush3.bf16.msra.mxu1 %v20066_v35 }
0x133a   : > { %15076 = vmatprep.subr.bf16.mxu1 %v21225_v43 }
0x133c   : > { %11362 = vrot.lane.b32.xlu1 %v20071_v9, %s17806_s19 }
0x133d   : > { %15077 = vmatpush3.bf16.msra.mxu1 %v20074_v14 }
0x133e   : > { %15078 = vmatprep.subr.bf16.mxu1 %v21225_v43 }
0x1340   : > { %11364 = vrot.lane.b32.xlu1 %v20079_v31, %s17806_s19 }
0x1341   : > { %15079 = vmatpush3.bf16.msra.mxu1 %v20082_v24 }
0x1342   : > { %15080 = vmatprep.subr.bf16.mxu1 %v21225_v43 }
0x1344   : > { %11366 = vrot.lane.b32.xlu1 %v20088_v45, %s17806_s19 }
0x1345   : > { %15081 = vmatpush3.bf16.msra.mxu1 %v20091_v11 }
0x1346   : > { %15124 = vmatprep.subr.bf16.mxu1 %v21225_v43 }
0x1348   : > { %11686 = vrot.lane.b32.xlu1 %v20055_v29, %s17807_s16 }
0x134c   : > { %11688 = vrot.lane.b32.xlu1 %v20063_v4, %s17807_s16 }
0x1350   : > { %11690 = vrot.lane.b32.xlu1 %v20071_v9, %s17807_s16 }
0x1354   : > { %11692 = vrot.lane.b32.xlu1 %v20079_v31, %s17807_s16 }
0x1358   : > { %11694 = vrot.lane.b32.xlu1 %v20088_v45, %s17807_s16 }
0x135c   : > { %12009 = vrot.lane.b32.xlu1 %v20055_v29, %s17808_s15 }
0x1360   : > { %11588 = vrot.lane.b32.xlu1 %v20066_v35, %s17806_s19 }
0x1364   : > { %11584 = vrot.lane.b32.xlu1 %v20082_v24, %s17806_s19 }
0x1368   : > { %11913 = vrot.lane.b32.xlu1 %v20057_v56, %s17807_s16 }
0x136c   : > { %11907 = vrot.lane.b32.xlu1 %v20082_v24, %s17807_s16 }
0x137d   : > { %v10982_v21 = vpop.permute.xlu1 %10981 }
0x137e   : > { %11008 = vxpose.xlu0.b32.start [1/9] (short) (narrow) %v10982_v21, 64 }
0x1381   : > { %v10984_v51 = vpop.permute.xlu0 %10983 }
0x1382   : > { %11009 = vxpose.xlu0.b32.cont [2/9] (short) (narrow) %v10984_v51, 64 }
0x1385   : > { %v10986_v61 = vpop.permute.xlu1 %10985 }
0x1386   : > { %11010 = vxpose.xlu0.b32.cont [3/9] (short) (narrow) %v10986_v61, 64 }
0x1389   : > { %v10988_v13 = vpop.permute.xlu1 %10987 }
0x138a   : > { %11011 = vxpose.xlu0.b32.cont [4/9] (short) (narrow) %v10988_v13, 64 }
0x138e   : > { %v10990_v15 = vpop.permute.xlu1 %10989 }
0x138f   : > { %11012 = vxpose.xlu0.b32.cont [5/9] (short) (narrow) %v10990_v15, 64 }
0x1392   : > { %v10992_v63 = vpop.permute.xlu0 %10991 }
0x1393   : > { %11013 = vxpose.xlu0.b32.cont [6/9] (short) (narrow) %v10992_v63, 64 }
0x139a   : > { %v10994_v38 = vpop.permute.xlu1 %10993 }
0x139b   : > { %11014 = vxpose.xlu0.b32.cont [7/9] (short) (narrow) %v10994_v38, 64 }
0x139e   : > { %v10996_v28 = vpop.permute.xlu0 %10995 }
0x139f   : > { %11015 = vxpose.xlu0.b32.cont [8/9] (short) (narrow) %v10996_v28, 64 }
0x13a2   : > { %v10998_v10 = vpop.permute.xlu1 %10997 }
0x13a3   : > { %11016 = vxpose.xlu0.b32.end [9/9] (short) (narrow) %v10998_v10, 64 }
0x13a6   : > { %v11359_v55 = vpop.permute.xlu1 %11358 }
0x13aa   : > { %v11361_v50 = vpop.permute.xlu1 %11360 }
0x13ae   : > { %v11363_v33 = vpop.permute.xlu1 %11362 }
0x13b2   : > { %v11365_v5 = vpop.permute.xlu1 %11364 }
0x13b6   : > { %v11367_v12 = vpop.permute.xlu1 %11366 }
0x13ba   : > { %v11687_v54 = vpop.permute.xlu1 %11686 }
0x13be   : > { %v11689_v22 = vpop.permute.xlu1 %11688 }
0x13c2   : > { %v11691_v0 = vpop.permute.xlu1 %11690 }
0x13c6   : > { %v11693_v19 = vpop.permute.xlu1 %11692 }
0x13ca   : > { %v11695_v53 = vpop.permute.xlu1 %11694 }
0x13cc   : > { %11590 = vrot.lane.b32.xlu0 %v20057_v56, %s17806_s19 }
0x13ce   : > { %v12010_v27 = vpop.permute.xlu1 %12009 }
0x13d0   : > { %11586 = vrot.lane.b32.xlu0 %v20074_v14, %s17806_s19 }
0x13d4   : > { %11582 = vrot.lane.b32.xlu0 %v20091_v11, %s17806_s19 }
0x13d8   : > { %11911 = vrot.lane.b32.xlu0 %v20066_v35, %s17807_s16 }
0x13dc   : > { %11909 = vrot.lane.b32.xlu0 %v20074_v14, %s17807_s16 }
0x13e0   : > { %11905 = vrot.lane.b32.xlu0 %v20091_v11, %s17807_s16  ;;  %s21089_s16 = scalar_lea.hbm %s21141_s11, %s14533_s25 }
0x13ff   : > { %v11024_v41 = vpop.trf.xlu0 }
0x1403   : > { %v11025_v57 = vpop.trf.xlu0 }
0x1404   : > { %v11040_v36 = vpack.c.bf16 %v11025_v57, %v11024_v41 }
0x1406   : > { %15051 = vmatpush3.bf16.msra.mxu0 %v11040_v36 }
0x1407   : > { %v11026_v37 = vpop.trf.xlu0  ;;  %15102 = vmatprep.subr.bf16.mxu0 %v21225_v43 }
0x1409   : > { %15053 = vmatmul.mubr.msk.bf16.vlgmr.msra.gmra.mxu0 %vm8626_vm12, %v20055_v29 }
0x140a   : > { %15056 = vmatprep.mubr.msk.bf16.mxu0 %vm17809_vm11, %v21225_v43 }
0x140b   : > { %v11027_v26 = vpop.trf.xlu0 }
0x140c   : > { %v11041_v17 = vpack.c.bf16 %v11027_v26, %v11026_v37 }
0x140e   : > { %15103 = vmatpush3.bf16.msra.mxu0 %v11041_v17 }
0x140f   : > { %15154 = vmatprep.subr.bf16.mxu0 %v21225_v43  ;;  %v11028_v44 = vpop.trf.xlu0 }
0x1411   : > { %15057 = vmatmul.mubr.msk.bf16.gmra.mxu0 %vm8626_vm12, %v20063_v4 }
0x1412   : > { %15060 = vmatprep.mubr.msk.bf16.mxu0 %vm17809_vm11, %v21225_v43 }
0x1413   : > { %v11029_v6 = vpop.trf.xlu0 }
0x1414   : > { %v11042_v25 = vpack.c.bf16 %v11029_v6, %v11028_v44 }
0x1417   : > { %v11030_v46 = vpop.trf.xlu0 }
0x1419   : > { %15061 = vmatmul.mubr.msk.bf16.gmra.mxu0 %vm8626_vm12, %v20071_v9 }
0x141a   : > { %15064 = vmatprep.mubr.msk.bf16.mxu0 %vm17809_vm11, %v21225_v43 }
0x141b   : > { %v11031_v58 = vpop.trf.xlu0 }
0x141c   : > { %v11043_v39 = vpack.c.bf16 %v11031_v58, %v11030_v46 }
0x1421   : > { %15065 = vmatmul.mubr.msk.bf16.gmra.mxu0 %vm8626_vm12, %v20079_v31 }
0x1422   : > { %15068 = vmatprep.mubr.msk.bf16.mxu0 %vm17809_vm11, %v21225_v43 }
0x1429   : > { %15069 = vmatmul.mubr.msk.bf16.gmra.mxu0 %vm8626_vm12, %v20088_v45 }
0x142a   : > { %15104 = vmatprep.mubr.msk.bf16.mxu0 %vm17809_vm11, %v21225_v43 }
0x1431   : > { %15105 = vmatmul.mubr.msk.bf16.vlgmr.msra.gmra.mxu0 %vm8626_vm12, %v11359_v55 }
0x1432   : > { %15108 = vmatprep.mubr.msk.bf16.mxu0 %vm17809_vm11, %v21225_v43  ;;  %15155 = vmatpush3.bf16.msra.mxu0 %v11042_v25 }
0x1433   : > { %15206 = vmatprep.subr.bf16.mxu0 %v21225_v43 }
0x1439   : > { %15109 = vmatmul.mubr.msk.bf16.gmra.mxu0 %vm8626_vm12, %v11361_v50 }
0x143a   : > { %15112 = vmatprep.mubr.msk.bf16.mxu0 %vm17809_vm11, %v21225_v43 }
0x1441   : > { %15113 = vmatmul.mubr.msk.bf16.gmra.mxu0 %vm8626_vm12, %v11363_v33 }
0x1442   : > { %15116 = vmatprep.mubr.msk.bf16.mxu0 %vm17809_vm11, %v21225_v43 }
0x1449   : > { %15117 = vmatmul.mubr.msk.bf16.gmra.mxu0 %vm8626_vm12, %v11365_v5 }
0x144a   : > { %15120 = vmatprep.mubr.msk.bf16.mxu0 %vm17809_vm11, %v21225_v43 }
0x1451   : > { %15121 = vmatmul.mubr.msk.bf16.gmra.mxu0 %vm8626_vm12, %v11367_v12 }
0x1452   : > { %15156 = vmatprep.mubr.msk.bf16.mxu0 %vm17809_vm11, %v21225_v43 }
0x1459   : > { %15157 = vmatmul.mubr.msk.bf16.vlgmr.msra.gmra.mxu0 %vm8626_vm12, %v11687_v54 }
0x145a   : > { %15160 = vmatprep.mubr.msk.bf16.mxu0 %vm17809_vm11, %v21225_v43  ;;  %15207 = vmatpush3.bf16.msra.mxu0 %v11043_v39 }
0x145b   : > { %15258 = vmatprep.subr.bf16.mxu0 %v21225_v43 }
0x1461   : > { %15161 = vmatmul.mubr.msk.bf16.gmra.mxu0 %vm8626_vm12, %v11689_v22 }
0x1462   : > { %15164 = vmatprep.mubr.msk.bf16.mxu0 %vm17809_vm11, %v21225_v43 }
0x1469   : > { %15165 = vmatmul.mubr.msk.bf16.gmra.mxu0 %vm8626_vm12, %v11691_v0 }
0x146a   : > { %15168 = vmatprep.mubr.msk.bf16.mxu0 %vm17809_vm11, %v21225_v43 }
0x1471   : > { %15169 = vmatmul.mubr.msk.bf16.gmra.mxu0 %vm8626_vm12, %v11693_v19 }
0x1472   : > { %15172 = vmatprep.mubr.msk.bf16.mxu0 %vm17809_vm11, %v21225_v43 }
0x1479   : > { %15173 = vmatmul.mubr.msk.bf16.gmra.mxu0 %vm8626_vm12, %v11695_v53 }
0x147a   : > { %15208 = vmatprep.mubr.msk.bf16.mxu0 %vm17809_vm11, %v21225_v43 }
0x1481   : > { %15209 = vmatmul.mubr.msk.bf16.vlgmr.msra.gmra.mxu0 %vm8626_vm12, %v12010_v27 }
0x1482   : > { %15212 = vmatprep.mubr.msk.bf16.mxu0 %vm17809_vm11, %v21225_v43 }
0x14c9   : > { %v11103_v18 = vpop.f32.mrf.mxu0 }
0x14ca   : > { %v11141_v2 = vmul.f32 0.25, %v11103_v18 }
0x14cb   : > { %v15054_v29 = vpop.f32.mrf.mxu0 }
0x14cc   : > { %v20187_v16 = vadd.f32 %v11141_v2, %v21251_v1 }
0x14cd   : > { %v11106_v7 = vpop.f32.mrf.mxu0 }
0x14ce   : > { %v11142_v40 = vmul.f32 0.25, %v11106_v7  ;;  %v11159_v42 = vsel %vm8732_vm0, %v20187_v16, -inf }
0x14cf   : > { %11160 = vmax.xlane.f32.xlu1 %v11159_v42  ;;  %v15055_v34 = vpop.f32.mrf.mxu0 }
0x14d0   : > { %v20192_v47 = vadd.f32 %v11142_v40, %v21251_v1 }
0x14d1   : > { %v11111_v62 = vpop.f32.mrf.mxu0 }
0x14d2   : > { %v11143_v30 = vmul.f32 0.25, %v11111_v62  ;;  %v11162_v32 = vsel %vm8732_vm0, %v20192_v47, -inf }
0x14d3   : > { %11163 = vmax.xlane.f32.xlu0 %v11162_v32  ;;  %v15058_v21 = vpop.f32.mrf.mxu0 }
0x14d4   : > { %v20197_v51 = vadd.f32 %v11143_v30, %v21251_v1 }
0x14d5   : > { %v11114_v61 = vpop.f32.mrf.mxu0 }
0x14d6   : > { %v11144_v13 = vmul.f32 0.25, %v11114_v61  ;;  %v11165_v15 = vsel %vm8732_vm0, %v20197_v51, -inf }
0x14d7   : > { %11166 = vmax.xlane.f32.xlu1 %v11165_v15  ;;  %v15059_v63 = vpop.f32.mrf.mxu0 }
0x14d8   : > { %v20202_v38 = vadd.f32 %v11144_v13, %v21251_v1 }
0x14d9   : > { %v11119_v28 = vpop.f32.mrf.mxu0 }
0x14da   : > { %v11145_v10 = vmul.f32 0.25, %v11119_v28  ;;  %v11168_v41 = vsel %vm8732_vm0, %v20202_v38, -inf }
0x14db   : > { %11169 = vmax.xlane.f32.xlu1 %v11168_v41  ;;  %v15062_v57 = vpop.f32.mrf.mxu0 }
0x14dc   : > { %v20207_v36 = vadd.f32 %v11145_v10, %v21251_v1 }
0x14dd   : > { %v11122_v37 = vpop.f32.mrf.mxu0 }
0x14de   : > { %v11146_v26 = vmul.f32 0.25, %v11122_v37  ;;  %v11171_v17 = vsel %vm8732_vm0, %v20207_v36, -inf }
0x14df   : > { %11172 = vmax.xlane.f32.xlu1 %v11171_v17  ;;  %v15063_v44 = vpop.f32.mrf.mxu0 }
0x14e0   : > { %v20212_v6 = vadd.f32 %v11146_v26, %v21251_v1 }
0x14e1   : > { %v11127_v25 = vpop.f32.mrf.mxu0 }
0x14e2   : > { %v11147_v55 = vmul.f32 0.25, %v11127_v25  ;;  %v11174_v50 = vsel %vm8732_vm0, %v20212_v6, -inf }
0x14e3   : > { %11175 = vmax.xlane.f32.xlu1 %v11174_v50  ;;  %v15066_v33 = vpop.f32.mrf.mxu0 }
0x14e4   : > { %v20217_v5 = vadd.f32 %v11147_v55, %v21251_v1 }
0x14e5   : > { %v11130_v46 = vpop.f32.mrf.mxu0 }
0x14e6   : > { %v11148_v12 = vmul.f32 0.25, %v11130_v46  ;;  %v11177_v58 = vsel %vm8732_vm0, %v20217_v5, -inf }
0x14e7   : > { %11178 = vmax.xlane.f32.xlu1 %v11177_v58  ;;  %v15067_v39 = vpop.f32.mrf.mxu0 }
0x14e8   : > { %v20222_v54 = vadd.f32 %v11148_v12, %v21251_v1 }
0x14e9   : > { %v11135_v22 = vpop.f32.mrf.mxu0 }
0x14ea   : > { %v11149_v0 = vmul.f32 0.25, %v11135_v22  ;;  %v11180_v19 = vsel %vm8732_vm0, %v20222_v54, -inf }
0x14eb   : > { %11181 = vmax.xlane.f32.xlu1 %v11180_v19  ;;  %v15070_v53 = vpop.f32.mrf.mxu0 }
0x14ec   : > { %v20227_v27 = vadd.f32 %v11149_v0, %v21251_v1 }
0x14ed   : > { %v11138_v18 = vpop.f32.mrf.mxu0 }
0x14ee   : > { %v11183_v2 = vsel %vm8732_vm0, %v20227_v27, -inf }
0x14ef   : > { %11184 = vmax.xlane.f32.xlu0 %v11183_v2  ;;  %v15071_v29 = vpop.f32.mrf.mxu0 }
0x14f1   : > { %v11417_v7 = vpop.f32.mrf.mxu0 }
0x14f2   : > { %v11455_v40 = vmul.f32 0.25, %v11417_v7 }
0x14f3   : > { %v15106_v42 = vpop.f32.mrf.mxu0 }
0x14f4   : > { %v20232_v34 = vadd.f32 %v11455_v40, %v21251_v1 }
0x14f5   : > { %v11420_v62 = vpop.f32.mrf.mxu0 }
0x14f6   : > { %v11473_v30 = vsel %vm8732_vm0, %v20232_v34, -inf  ;;  %v11456_v46 = vmul.f32 0.25, %v11420_v62 }
0x14f7   : > { %11474 = vmax.xlane.f32.xlu1 %v11473_v30  ;;  %v15107_v32 = vpop.f32.mrf.mxu0 }
0x14f8   : > { %v20241_v39 = vadd.f32 %v11456_v46, %v21251_v1 }
0x14f9   : > { %v11425_v21 = vpop.f32.mrf.mxu0 }
0x14fa   : > { %v11457_v19 = vmul.f32 0.25, %v11425_v21  ;;  %v11476_v2 = vsel %vm8732_vm0, %v20241_v39, -inf }
0x14fb   : > { %v15110_v61 = vpop.f32.mrf.mxu0 }
0x14fc   : > { %v20249_v40 = vadd.f32 %v11457_v19, %v21251_v1 }
0x14fd   : > { %v11428_v13 = vpop.f32.mrf.mxu0 }
0x14ff   : > { %v15111_v15 = vpop.f32.mrf.mxu0 }
0x1501   : > { %v11433_v63 = vpop.f32.mrf.mxu0 }
0x1502   : > { %v11459_v7 = vmul.f32 0.25, %v11433_v63 }
0x1503   : > { %v15114_v28 = vpop.f32.mrf.mxu0 }
0x1504   : > { %v20257_v61 = vadd.f32 %v11459_v7, %v21251_v1 }
0x1505   : > { %12013 = vrot.lane.b32.xlu0 %v20071_v9, %s17808_s15  ;;  %v11436_v10 = vpop.f32.mrf.mxu0  ;;  %v11458_v9 = vmul.f32 0.25, %v11428_v13 }
0x1506   : > { %v11460_v53 = vmul.f32 0.25, %v11436_v10  ;;  %v11479_v10 = vsel %vm8732_vm0, %v20249_v40, -inf }
0x1507   : > { %v15115_v41 = vpop.f32.mrf.mxu0 }
0x1508   : > { %12011 = vrot.lane.b32.xlu1 %v20063_v4, %s17808_s15  ;;  %v20244_v4 = vadd.f32 %v11458_v9, %v21251_v1  ;;  %v20252_v42 = vadd.f32 %v11460_v53, %v21251_v1 }
0x1509   : > { %v11441_v57 = vpop.f32.mrf.mxu0 }
0x150a   : > { %v11482_v32 = vsel %vm8732_vm0, %v20244_v4, -inf  ;;  %v11461_v13 = vmul.f32 0.25, %v11441_v57  ;;  %v11488_v41 = vsel %vm8732_vm0, %v20252_v42, -inf  ;;  %v11485_v57 = vsel %vm8732_vm0, %v20257_v61, -inf }
0x150b   : > { %v15118_v37 = vpop.f32.mrf.mxu0 }
0x150d   : > { %v11444_v26 = vpop.f32.mrf.mxu0 }
0x150e   : > { %v11462_v62 = vmul.f32 0.25, %v11444_v26  ;;  %v20267_v26 = vadd.f32 %v11461_v13, %v21251_v1 }
0x150f   : > { %v15119_v17 = vpop.f32.mrf.mxu0 }
0x1510   : > { %v20260_v15 = vadd.f32 %v11462_v62, %v21251_v1  ;;  %v11491_v9 = vsel %vm8732_vm0, %v20267_v26, -inf }
0x1511   : > { %v11449_v44 = vpop.f32.mrf.mxu0 }
0x1512   : > { %v11463_v17 = vmul.f32 0.25, %v11449_v44 }
0x1513   : > { %v15122_v25 = vpop.f32.mrf.mxu0 }
0x1515   : > { %v11452_v55 = vpop.f32.mrf.mxu0 }
0x1517   : > { %v15123_v50 = vpop.f32.mrf.mxu0 }
0x1519   : > { %v11745_v33 = vpop.f32.mrf.mxu0 }
0x151a   : > { %v11783_v63 = vmul.f32 0.25, %v11745_v33  ;;  %v11494_v33 = vsel %vm8732_vm0, %v20260_v15, -inf }
0x151b   : > { %v15158_v12 = vpop.f32.mrf.mxu0 }
0x151c   : > { %v20272_v25 = vadd.f32 %v11783_v63, %v21251_v1  ;;  %v20296_v63 = vpop.permute.xlu0 %11590 }
0x151d   : > { %v11748_v58 = vpop.f32.mrf.mxu0 }
0x151e   : > { %v11784_v12 = vmul.f32 0.25, %v11748_v58 }
0x151f   : > { %v15159_v22 = vpop.f32.mrf.mxu0 }
0x1520   : > { %v20279_v22 = vadd.f32 %v11463_v17, %v21251_v1 }
0x1521   : > { %v11753_v0 = vpop.f32.mrf.mxu0 }
0x1522   : > { %v11785_v55 = vmul.f32 0.25, %v11753_v0  ;;  %v11801_v0 = vsel %vm8732_vm0, %v20272_v25, -inf }
0x1523   : > { %v15162_v18 = vpop.f32.mrf.mxu0 }
0x1524   : > { %11477 = vmax.xlane.f32.xlu0 %v11476_v2  ;;  %v20282_v44 = vadd.f32 %v11785_v55, %v21251_v1  ;;  %v20287_v2 = vadd.f32 %v11784_v12, %v21251_v1 }
0x1525   : > { %v11756_v29 = vpop.f32.mrf.mxu0 }
0x1526   : > { %v11786_v58 = vmul.f32 0.25, %v11756_v29  ;;  %v11804_v29 = vsel %vm8732_vm0, %v20287_v2, -inf }
0x1527   : > { %v15163_v30 = vpop.f32.mrf.mxu0 }
0x1528   : > { %11483 = vmax.xlane.f32.xlu0 %v11482_v32  ;;  %v11497_v32 = vsel %vm8732_vm0, %v20279_v22, -inf }
0x1529   : > { %v11761_v21 = vpop.f32.mrf.mxu0 }
0x152a   : > { %v11787_v19 = vmul.f32 0.25, %v11761_v21  ;;  %v11807_v21 = vsel %vm8732_vm0, %v20282_v44, -inf }
0x152b   : > { %v15166_v28 = vpop.f32.mrf.mxu0 }
0x152c   : > { %11480 = vmax.xlane.f32.xlu1 %v11479_v10  ;;  %11489 = vmax.xlane.f32.xlu0 %v11488_v41  ;;  %v20290_v7 = vadd.f32 %v11787_v19, %v21251_v1  ;;  %v20299_v28 = vadd.f32 %v11786_v58, %v21251_v1  ;;  %v20320_v58 = vpop.permute.xlu1 %11588 }
0x152d   : > { %v11764_v37 = vpop.f32.mrf.mxu0 }
0x152e   : > { %v11788_v10 = vmul.f32 0.25, %v11764_v37  ;;  %v11813_v55 = vsel %vm8732_vm0, %v20290_v7, -inf }
0x152f   : > { %v15167_v50 = vpop.f32.mrf.mxu0 }
0x1530   : > { %11486 = vmax.xlane.f32.xlu1 %v11485_v57  ;;  %11495 = vmax.xlane.f32.xlu0 %v11494_v33  ;;  %v11810_v33 = vsel %vm8732_vm0, %v20299_v28, -inf }
0x1531   : > { %v11769_v46 = vpop.f32.mrf.mxu0 }
0x1532   : > { %v11789_v62 = vmul.f32 0.25, %v11769_v46  ;;  %v20311_v46 = vadd.f32 %v11788_v10, %v21251_v1 }
0x1533   : > { %v15170_v53 = vpop.f32.mrf.mxu0 }
0x1534   : > { %11492 = vmax.xlane.f32.xlu1 %v11491_v9  ;;  %11802 = vmax.xlane.f32.xlu0 %v11801_v0  ;;  %v20304_v41 = vadd.f32 %v11789_v62, %v21251_v1  ;;  %v20318_v53 = vpop.permute.xlu0 %11586 }
0x1535   : > { %v11772_v18 = vpop.f32.mrf.mxu0 }
0x1536   : > { %v11790_v12 = vmul.f32 0.25, %v11772_v18  ;;  %v11819_v19 = vsel %vm8732_vm0, %v20304_v41, -inf  ;;  %v11816_v18 = vsel %vm8732_vm0, %v20311_v46, -inf }
0x1537   : > { %v15171_v30 = vpop.f32.mrf.mxu0 }
0x1538   : > { %11498 = vmax.xlane.f32.xlu1 %v11497_v32  ;;  %11808 = vmax.xlane.f32.xlu0 %v11807_v21  ;;  %v20323_v62 = vadd.f32 %v11790_v12, %v21251_v1 }
0x1539   : > { %v11777_v13 = vpop.f32.mrf.mxu0 }
0x153a   : > { %v11791_v57 = vmul.f32 0.25, %v11777_v13 }
0x153b   : > { %v15174_v17 = vpop.f32.mrf.mxu0 }
0x153c   : > { %11805 = vmax.xlane.f32.xlu1 %v11804_v29  ;;  %11814 = vmax.xlane.f32.xlu0 %v11813_v55  ;;  %v20314_v37 = vadd.f32 %v11791_v57, %v21251_v1  ;;  %v20329_v29 = vpop.permute.xlu0 %11582  ;;  %v11822_v55 = vsel %vm8732_vm0, %v20323_v62, -inf }
0x153d   : > { %v11780_v50 = vpop.f32.mrf.mxu0 }
0x153e   : > { %v11825_v21 = vsel %vm8732_vm0, %v20314_v37, -inf  ;;  %v20336_v50 = vpop.permute.xlu1 %11584 }
0x153f   : > { %v15175_v9 = vpop.f32.mrf.mxu0 }
0x1540   : > { %11811 = vmax.xlane.f32.xlu1 %v11810_v33  ;;  %11820 = vmax.xlane.f32.xlu0 %v11819_v19  ;;  %v20345_v19 = vpop.permute.xlu0 %11911 }
0x1541   : > { %v12068_v0 = vpop.f32.mrf.mxu0 }
0x1542   : > { %v12106_v30 = vmul.f32 0.25, %v12068_v0  ;;  %v20347_v0 = vpop.permute.xlu1 %11913 }
0x1543   : > { %v15210_v32 = vpop.f32.mrf.mxu0 }
0x1544   : > { %11817 = vmax.xlane.f32.xlu1 %v11816_v18  ;;  %11826 = vmax.xlane.f32.xlu0 %v11825_v21  ;;  %v20332_v57 = vadd.f32 %v12106_v30, %v21251_v1  ;;  %v20349_v30 = vpop.permute.xlu0 %11909 }
0x1545   : > { %v12071_v13 = vpop.f32.mrf.mxu0 }
0x1546   : > { %v12107_v10 = vmul.f32 0.25, %v12071_v13  ;;  %v12124_v9 = vsel %vm8732_vm0, %v20332_v57, -inf  ;;  %v20351_v32 = vpop.permute.xlu1 %11907 }
0x1547   : > { %v15211_v17 = vpop.f32.mrf.mxu0 }
0x1548   : > { %v20339_v33 = vadd.f32 %v12107_v10, %v21251_v1  ;;  %11823 = vmax.xlane.f32.xlu1 %v11822_v55  ;;  %v20353_v18 = vpop.permute.xlu0 %11905 }
0x154a   : > { %v12127_v12 = vsel %vm8732_vm0, %v20339_v33, -inf }
0x154b   : > { %12128 = vmax.xlane.f32.xlu0 %v12127_v12 }
0x154c   : > { %12125 = vmax.xlane.f32.xlu1 %v12124_v9 }
0x1558   : > { %v11161_v21 = vpop.xlane.xlu1 %11160 }
0x1559   : > { %v11186_v13 = vsub.f32 %v20187_v16, %v11161_v21 }
0x155b   : > { %v11195_v10 = vmul.f32 1.442695, %v11186_v13 }
0x155c   : > { %v11164_v17 = vpop.xlane.xlu0 %11163 }
0x155d   : > { %17318 = vpow2.f32 %v11195_v10  ;;  %v11187_v55 = vsub.f32 %v20192_v47, %v11164_v17 }
0x155f   : > { %v11197_v12 = vmul.f32 1.442695, %v11187_v55 }
0x1560   : > { %v11167_v59 = vpop.xlane.xlu1 %11166 }
0x1561   : > { %17320 = vpow2.f32 %v11197_v12  ;;  %v11188_v9 = vsub.f32 %v20197_v51, %v11167_v59 }
0x1563   : > { %v11199_v52 = vmul.f32 1.442695, %v11188_v9 }
0x1564   : > { %v11170_v49 = vpop.xlane.xlu1 %11169 }
0x1565   : > { %17322 = vpow2.f32 %v11199_v52  ;;  %v11189_v60 = vsub.f32 %v20202_v38, %v11170_v49 }
0x1567   : > { %v11201_v3 = vmul.f32 1.442695, %v11189_v60 }
0x1568   : > { %v11173_v20 = vpop.xlane.xlu1 %11172 }
0x1569   : > { %17324 = vpow2.f32 %v11201_v3  ;;  %v11190_v16 = vsub.f32 %v20207_v36, %v11173_v20 }
0x156a   : > { %v20360_v21 = vpop.eup %17318 }
0x156b   : > { %v11203_v13 = vmul.f32 1.442695, %v11190_v16  ;;  %v11213_v47 = vsel %vm8732_vm0, %v20360_v21, 0.0 }
0x156c   : > { %v11176_v10 = vpop.xlane.xlu1 %11175  ;;  %11214 = vadd.xlane.f32.xlu0 %v11213_v47 }
0x156d   : > { %17326 = vpow2.f32 %v11203_v13  ;;  %v11191_v59 = vsub.f32 %v20212_v6, %v11176_v10 }
0x156e   : > { %v20365_v51 = vpop.eup %17320 }
0x156f   : > { %v11205_v52 = vmul.f32 1.442695, %v11191_v59  ;;  %v11216_v60 = vsel %vm8732_vm0, %v20365_v51, 0.0 }
0x1570   : > { %v11179_v3 = vpop.xlane.xlu1 %11178  ;;  %11217 = vadd.xlane.f32.xlu1 %v11216_v60 }
0x1571   : > { %17328 = vpow2.f32 %v11205_v52  ;;  %v11192_v20 = vsub.f32 %v20217_v5, %v11179_v3 }
0x1572   : > { %v20370_v49 = vpop.eup %17322 }
0x1573   : > { %v11207_v38 = vmul.f32 1.442695, %v11192_v20  ;;  %v11219_v36 = vsel %vm8732_vm0, %v20370_v49, 0.0 }
0x1574   : > { %v11182_v17 = vpop.xlane.xlu1 %11181  ;;  %11220 = vadd.xlane.f32.xlu0 %v11219_v36 }
0x1575   : > { %17330 = vpow2.f32 %v11207_v38  ;;  %v11193_v6 = vsub.f32 %v20222_v54, %v11182_v17 }
0x1576   : > { %v20375_v55 = vpop.eup %17324 }
0x1577   : > { %v11209_v12 = vmul.f32 1.442695, %v11193_v6  ;;  %v11222_v9 = vsel %vm8732_vm0, %v20375_v55, 0.0 }
0x1578   : > { %v11185_v16 = vpop.xlane.xlu0 %11184  ;;  %11223 = vadd.xlane.f32.xlu1 %v11222_v9 }
0x1579   : > { %17332 = vpow2.f32 %v11209_v12  ;;  %v11194_v5 = vsub.f32 %v20227_v27, %v11185_v16 }
0x157a   : > { %v20380_v13 = vpop.eup %17326 }
0x157b   : > { %v11211_v47 = vmul.f32 1.442695, %v11194_v5  ;;  %v11225_v10 = vsel %vm8732_vm0, %v20380_v13, 0.0 }
0x157c   : > { %11226 = vadd.xlane.f32.xlu0 %v11225_v10  ;;  %v12014_v12 = vpop.permute.xlu0 %12013 }
0x157d   : > { %17334 = vpow2.f32 %v11211_v47 }
0x157e   : > { %v20384_v54 = vpop.eup %17328 }
0x157f   : > { %v11228_v59 = vsel %vm8732_vm0, %v20384_v54, 0.0 }
0x1580   : > { %v11475_v52 = vpop.xlane.xlu1 %11474  ;;  %11229 = vadd.xlane.f32.xlu1 %v11228_v59 }
0x1581   : > { %v11500_v60 = vsub.f32 %v20232_v34, %v11475_v52 }
0x1582   : > { %v20389_v3 = vpop.eup %17330 }
0x1583   : > { %v11509_v27 = vmul.f32 1.442695, %v11500_v60  ;;  %v11231_v20 = vsel %vm8732_vm0, %v20389_v3, 0.0 }
0x1584   : > { %v12012_v38 = vpop.permute.xlu1 %12011  ;;  %11232 = vadd.xlane.f32.xlu1 %v11231_v20 }
0x1585   : > { %17336 = vpow2.f32 %v11509_v27  ;;  %15213 = vmatmul.mubr.msk.bf16.gmra.mxu0 %vm8626_vm12, %v12012_v38 }
0x1586   : > { %v20394_v36 = vpop.eup %17332  ;;  %15216 = vmatprep.mubr.msk.bf16.mxu0 %vm17809_vm11, %v21225_v43 }
0x1587   : > { %v11234_v17 = vsel %vm8732_vm0, %v20394_v36, 0.0 }
0x1588   : > { %11235 = vadd.xlane.f32.xlu0 %v11234_v17 }
0x158a   : > { %v20400_v34 = vpop.eup %17334 }
0x158b   : > { %v11237_v6 = vsel %vm8732_vm0, %v20400_v34, 0.0 }
0x158c   : > { %11238 = vadd.xlane.f32.xlu1 %v11237_v6 }
0x158d   : > { %15217 = vmatmul.mubr.msk.bf16.gmra.mxu0 %vm8626_vm12, %v12014_v12 }
0x158e   : > { %15220 = vmatprep.mubr.msk.bf16.mxu0 %vm17809_vm11, %v21225_v43 }
0x1592   : > { %v20407_v9 = vpop.eup %17336 }
0x1593   : > { %v11527_v16 = vsel %vm8732_vm0, %v20407_v9, 0.0 }
0x1594   : > { %11528 = vadd.xlane.f32.xlu0 %v11527_v16 }
0x15ad   : > { %v11478_v5 = vpop.xlane.xlu0 %11477 }
0x15ae   : > { %v11501_v47 = vsub.f32 %v20241_v39, %v11478_v5 }
0x15b0   : > { %v11511_v10 = vmul.f32 1.442695, %v11501_v47 }
0x15b1   : > { %v11484_v59 = vpop.xlane.xlu0 %11483 }
0x15b2   : > { %17338 = vpow2.f32 %v11511_v10  ;;  %v11503_v52 = vsub.f32 %v20244_v4, %v11484_v59 }
0x15b4   : > { %v11515_v60 = vmul.f32 1.442695, %v11503_v52 }
0x15b5   : > { %v11481_v27 = vpop.xlane.xlu1 %11480  ;;  %v11490_v20 = vpop.xlane.xlu0 %11489 }
0x15b6   : > { %17340 = vpow2.f32 %v11515_v60  ;;  %v11502_v38 = vsub.f32 %v20249_v40, %v11481_v27  ;;  %v11505_v17 = vsub.f32 %v20252_v42, %v11490_v20 }
0x15b8   : > { %v11513_v6 = vmul.f32 1.442695, %v11502_v38  ;;  %v11519_v12 = vmul.f32 1.442695, %v11505_v17 }
0x15b9   : > { %v11487_v23 = vpop.xlane.xlu1 %11486  ;;  %v11496_v16 = vpop.xlane.xlu0 %11495 }
0x15ba   : > { %17342 = vpow2.f32 %v11513_v6  ;;  %v11504_v39 = vsub.f32 %v20257_v61, %v11487_v23  ;;  %v11507_v5 = vsub.f32 %v20260_v15, %v11496_v16 }
0x15bb   : > { %17344 = vpow2.f32 %v11519_v12 }
0x15bc   : > { %v11517_v47 = vmul.f32 1.442695, %v11504_v39  ;;  %v11523_v4 = vmul.f32 1.442695, %v11507_v5 }
0x15bd   : > { %v11493_v10 = vpop.xlane.xlu1 %11492  ;;  %v11803_v59 = vpop.xlane.xlu0 %11802 }
0x15be   : > { %17346 = vpow2.f32 %v11517_v47  ;;  %v11506_v52 = vsub.f32 %v20267_v26, %v11493_v10  ;;  %v11828_v60 = vsub.f32 %v20272_v25, %v11803_v59 }
0x15bf   : > { %v20418_v40 = vpop.eup %17338  ;;  %17348 = vpow2.f32 %v11523_v4 }
0x15c0   : > { %v11521_v42 = vmul.f32 1.442695, %v11506_v52  ;;  %v11530_v27 = vsel %vm8732_vm0, %v20418_v40, 0.0  ;;  %v11837_v38 = vmul.f32 1.442695, %v11828_v60 }
0x15c1   : > { %v11499_v23 = vpop.xlane.xlu1 %11498  ;;  %v11809_v61 = vpop.xlane.xlu0 %11808  ;;  %11531 = vadd.xlane.f32.xlu1 %v11530_v27 }
0x15c2   : > { %17350 = vpow2.f32 %v11521_v42  ;;  %v11508_v15 = vsub.f32 %v20279_v22, %v11499_v23  ;;  %v11830_v5 = vsub.f32 %v20282_v44, %v11809_v61 }
0x15c3   : > { %v20424_v20 = vpop.eup %17340 }
0x15c4   : > { %v11525_v17 = vmul.f32 1.442695, %v11508_v15  ;;  %v11536_v26 = vsel %vm8732_vm0, %v20424_v20, 0.0  ;;  %v11841_v42 = vmul.f32 1.442695, %v11830_v5 }
0x15c5   : > { %v11806_v6 = vpop.xlane.xlu1 %11805  ;;  %v11815_v12 = vpop.xlane.xlu0 %11814  ;;  %11537 = vadd.xlane.f32.xlu1 %v11536_v26 }
0x15c6   : > { %17352 = vpow2.f32 %v11525_v17  ;;  %v11829_v25 = vsub.f32 %v20287_v2, %v11806_v6  ;;  %v11832_v16 = vsub.f32 %v20290_v7, %v11815_v12 }
0x15c7   : > { %v20430_v39 = vpop.eup %17342  ;;  %17354 = vpow2.f32 %v11837_v38 }
0x15c8   : > { %v11839_v22 = vmul.f32 1.442695, %v11829_v25  ;;  %v11845_v47 = vmul.f32 1.442695, %v11832_v16  ;;  %v11533_v4 = vsel %vm8732_vm0, %v20430_v39, 0.0  ;;  %v20435_v10 = vpop.eup %17344 }
0x15c9   : > { %v11812_v59 = vpop.xlane.xlu1 %11811  ;;  %11534 = vadd.xlane.f32.xlu0 %v11533_v4  ;;  %v11542_v7 = vsel %vm8732_vm0, %v20435_v10, 0.0 }
0x15ca   : > { %17356 = vpow2.f32 %v11845_v47  ;;  %v11831_v2 = vsub.f32 %v20299_v28, %v11812_v59 }
0x15cb   : > { %v20437_v52 = vpop.eup %17346  ;;  %17358 = vpow2.f32 %v11839_v22 }
0x15cc   : > { %v11539_v44 = vsel %vm8732_vm0, %v20437_v52, 0.0  ;;  %v20444_v60 = vpop.eup %17348  ;;  %17360 = vpow2.f32 %v11841_v42  ;;  %v11843_v61 = vmul.f32 1.442695, %v11831_v2 }
0x15cd   : > { %v11818_v27 = vpop.xlane.xlu1 %11817  ;;  %11540 = vadd.xlane.f32.xlu1 %v11539_v44  ;;  %11543 = vadd.xlane.f32.xlu0 %v11542_v7  ;;  %v11548_v38 = vsel %vm8732_vm0, %v20444_v60, 0.0  ;;  %v11821_v44 = vpop.xlane.xlu0 %11820 }
0x15ce   : > { %v11833_v15 = vsub.f32 %v20311_v46, %v11818_v27  ;;  %17362 = vpow2.f32 %v11843_v61 }
0x15cf   : > { %v20446_v23 = vpop.eup %17350 }
0x15d0   : > { %v11545_v28 = vsel %vm8732_vm0, %v20446_v23, 0.0  ;;  %v11847_v26 = vmul.f32 1.442695, %v11833_v15 }
0x15d1   : > { %11546 = vadd.xlane.f32.xlu1 %v11545_v28  ;;  %11549 = vadd.xlane.f32.xlu0 %v11548_v38  ;;  %v11827_v27 = vpop.xlane.xlu0 %11826  ;;  %v11824_v61 = vpop.xlane.xlu1 %11823 }
0x15d2   : > { %17364 = vpow2.f32 %v11847_v26  ;;  %v11834_v26 = vsub.f32 %v20304_v41, %v11821_v44  ;;  %v11836_v44 = vsub.f32 %v20314_v37, %v11827_v27 }
0x15d3   : > { %v20453_v17 = vpop.eup %17352 }
0x15d4   : > { %v11551_v6 = vsel %vm8732_vm0, %v20453_v17, 0.0  ;;  %v20457_v12 = vpop.eup %17354 }
0x15d5   : > { %11552 = vadd.xlane.f32.xlu1 %v11551_v6  ;;  %v11855_v46 = vsel %vm8732_vm0, %v20457_v12, 0.0  ;;  %v12129_v15 = vpop.xlane.xlu0 %12128  ;;  %v20485_v28 = vpop.xlane.xlu1 %12125 }
0x15d7   : > { %v20459_v25 = vpop.eup %17356 }
0x15d8   : > { %v20463_v16 = vpop.eup %17358  ;;  %v11867_v5 = vsel %vm8732_vm0, %v20459_v25, 0.0 }
0x15d9   : > { %11856 = vadd.xlane.f32.xlu1 %v11855_v46  ;;  %11868 = vadd.xlane.f32.xlu0 %v11867_v5  ;;  %v20467_v22 = vpop.eup %17360  ;;  %v11858_v47 = vsel %vm8732_vm0, %v20463_v16, 0.0  ;;  %v11849_v46 = vmul.f32 1.442695, %v11834_v26 }
0x15da   : > { %v11861_v4 = vsel %vm8732_vm0, %v20467_v22, 0.0 }
0x15db   : > { %v20473_v59 = vpop.eup %17362 }
0x15dc   : > { %v11864_v42 = vsel %vm8732_vm0, %v20473_v59, 0.0 }
0x15dd   : > { %11859 = vadd.xlane.f32.xlu1 %v11858_v47 }
0x15df   : > { %v20477_v2 = vpop.eup %17364 }
0x15e0   : > { %v11870_v7 = vsel %vm8732_vm0, %v20477_v2, 0.0 }
0x15e1   : > { %11862 = vadd.xlane.f32.xlu1 %v11861_v4 }
0x15e5   : > { %11865 = vadd.xlane.f32.xlu1 %v11864_v42 }
0x15e9   : > { %11871 = vadd.xlane.f32.xlu1 %v11870_v7 }
0x15ef   : > { %12015 = vrot.lane.b32.xlu0 %v20079_v31, %s17808_s15 }
0x15f3   : > { %12234 = vrot.lane.b32.xlu0 %v20066_v35, %s17808_s15  ;;  %v11835_v35 = vsub.f32 %v20323_v62, %v11824_v61  ;;  %v11853_v62 = vmul.f32 1.442695, %v11836_v44  ;;  %v12152_v61 = vsub.f32 %v20339_v33, %v12129_v15 }
0x15f5   : > { %v11215_v38 = vpop.xlane.xlu0 %11214 }
0x15f6   : > { %17366 = vrcp.f32 %v11215_v38  ;;  %v11851_v38 = vmul.f32 1.442695, %v11835_v35 }
0x15f9   : > { %v11218_v6 = vpop.xlane.xlu1 %11217 }
0x15fa   : > { %17368 = vrcp.f32 %v11218_v6  ;;  %12236 = vrot.lane.b32.xlu1 %v20057_v56, %s17808_s15  ;;  %v11612_v6 = vsel %vm1363_vm9, %v20296_v63, 0 }
0x15fd   : > { %v11221_v5 = vpop.xlane.xlu0 %11220 }
0x15fe   : > { %17370 = vrcp.f32 %v11221_v5  ;;  %v12162_v5 = vmul.f32 1.442695, %v12152_v61 }
0x15ff   : > { %17372 = vpow2.f32 %v11849_v46 }
0x1601   : > { %v11224_v31 = vpop.xlane.xlu1 %11223 }
0x1602   : > { %17374 = vrcp.f32 %v11224_v31 }
0x1603   : > { %v17367_v47 = vpop.eup %17366 }
0x1604   : > { %v11249_v7 = vmul.f32 %v17367_v47, %v20360_v21 }
0x1605   : > { %v11227_v4 = vpop.xlane.xlu0 %11226 }
0x1606   : > { %17376 = vrcp.f32 %v11227_v4 }
0x1607   : > { %v17369_v42 = vpop.eup %17368 }
0x1608   : > { %v11250_v41 = vmul.f32 %v17369_v42, %v20365_v51 }
0x1609   : > { %v11230_v56 = vpop.xlane.xlu1 %11229 }
0x160a   : > { %v11258_v26 = vpack.c.bf16 %v11250_v41, %v11249_v7  ;;  %17378 = vrcp.f32 %v11230_v56 }
0x160b   : > { %v17371_v46 = vpop.eup %17370  ;;  %17380 = vpow2.f32 %v11851_v38 }
0x160c   : > { %15083 = vmatmul.mubr.msk.bf16.vlgmr.msra.gmra.mxu1 %vm8732_vm0, %v11258_v26  ;;  %v20500_v37 = vpop.eup %17372  ;;  %v11251_v63 = vmul.f32 %v17371_v46, %v20370_v49 }
0x160d   : > { %15125 = vmatpush3.bf16.msra.mxu1 %v11612_v6  ;;  %v11233_v21 = vpop.xlane.xlu1 %11232  ;;  %15086 = vmatprep.mubr.msk.bf16.mxu1 %vm17809_vm11, %v21225_v43  ;;  %v11873_v15 = vsel %vm8732_vm0, %v20500_v37, 0.0  ;;  %v12151_v6 = vsub.f32 %v20332_v57, %v20485_v28 }
0x160e   : > { %15126 = vmatprep.subr.bf16.mxu1 %v21225_v43  ;;  %17382 = vrcp.f32 %v11233_v21 }
0x160f   : > { %v17375_v51 = vpop.eup %17374  ;;  %17384 = vpow2.f32 %v11853_v62  ;;  %v12160_v46 = vmul.f32 1.442695, %v12151_v6 }
0x1610   : > { %v11252_v27 = vmul.f32 %v17375_v51, %v20375_v55 }
0x1611   : > { %15127 = vmatpush3.bf16.msra.mxu1 %v20320_v58  ;;  %v11236_v33 = vpop.xlane.xlu0 %11235 }
0x1612   : > { %17386 = vrcp.f32 %v11236_v33  ;;  %15128 = vmatprep.subr.bf16.mxu1 %v21225_v43  ;;  %v11259_v31 = vpack.c.bf16 %v11252_v27, %v11251_v63  ;;  %11874 = vadd.xlane.f32.xlu0 %v11873_v15 }
0x1613   : > { %v17377_v47 = vpop.eup %17376  ;;  %17388 = vpow2.f32 %v12162_v5 }
0x1614   : > { %15087 = vmatmul.mubr.msk.bf16.gmra.mxu1 %vm8732_vm0, %v11259_v31  ;;  %v11253_v55 = vmul.f32 %v17377_v47, %v20380_v13 }
0x1615   : > { %15129 = vmatpush3.bf16.msra.mxu1 %v20318_v53  ;;  %v11239_v49 = vpop.xlane.xlu1 %11238  ;;  %15090 = vmatprep.mubr.msk.bf16.mxu1 %vm17809_vm11, %v21225_v43 }
0x1616   : > { %17390 = vrcp.f32 %v11239_v49  ;;  %15130 = vmatprep.subr.bf16.mxu1 %v21225_v43 }
0x1617   : > { %v17379_v58 = vpop.eup %17378  ;;  %17392 = vpow2.f32 %v12160_v46 }
0x1618   : > { %v11254_v35 = vmul.f32 %v17379_v58, %v20384_v54  ;;  %v20517_v4 = vpop.eup %17380 }
0x1619   : > { %15131 = vmatpush3.bf16.msra.mxu1 %v20336_v50  ;;  %v11876_v7 = vsel %vm8732_vm0, %v20517_v4, 0.0 }
0x161a   : > { %15132 = vmatprep.subr.bf16.mxu1 %v21225_v43  ;;  %v11260_v42 = vpack.c.bf16 %v11254_v35, %v11253_v55 }
0x161b   : > { %v17383_v53 = vpop.eup %17382 }
0x161c   : > { %15091 = vmatmul.mubr.msk.bf16.gmra.mxu1 %vm8732_vm0, %v11260_v42  ;;  %v20526_v13 = vpop.eup %17384  ;;  %v11255_v54 = vmul.f32 %v17383_v53, %v20389_v3 }
0x161d   : > { %15133 = vmatpush3.bf16.msra.mxu1 %v20329_v29  ;;  %15094 = vmatprep.mubr.msk.bf16.mxu1 %vm17809_vm11, %v21225_v43  ;;  %v11879_v44 = vsel %vm8732_vm0, %v20526_v13, 0.0  ;;  %v11529_v61 = vpop.xlane.xlu0 %11528 }
0x161e   : > { %11877 = vadd.xlane.f32.xlu1 %v11876_v7  ;;  %15176 = vmatprep.subr.bf16.mxu1 %v21225_v43  ;;  %17394 = vrcp.f32 %v11529_v61 }
0x161f   : > { %v17387_v50 = vpop.eup %17386 }
0x1620   : > { %v11256_v41 = vmul.f32 %v17387_v50, %v20394_v36  ;;  %v20533_v29 = vpop.eup %17388 }
0x1621   : > { %v12181_v26 = vsel %vm8732_vm0, %v20533_v29, 0.0 }
0x1622   : > { %11880 = vadd.xlane.f32.xlu1 %v11879_v44  ;;  %v11261_v38 = vpack.c.bf16 %v11256_v41, %v11255_v54  ;;  %v11935_v44 = vsel %vm1363_vm9, %v20347_v0, 0 }
0x1623   : > { %v17391_v56 = vpop.eup %17390 }
0x1624   : > { %15095 = vmatmul.mubr.msk.bf16.gmra.mxu1 %vm8732_vm0, %v11261_v38  ;;  %v11257_v3 = vmul.f32 %v17391_v56, %v20400_v34  ;;  %v20550_v62 = vpop.eup %17392 }
0x1625   : > { %15098 = vmatprep.mubr.msk.bf16.mxu1 %vm17809_vm11, %v21225_v43 }
0x1626   : > { %12182 = vadd.xlane.f32.xlu1 %v12181_v26  ;;  %v11262_v36 = vpack.c.bf16 %v11257_v3, %v11257_v3 }
0x1628   : > { %12232 = vrot.lane.b32.xlu0 %v20074_v14, %s17808_s15  ;;  %v12178_v14 = vsel %vm8732_vm0, %v20550_v62, 0.0 }
0x162b   : > { %v17395_v47 = vpop.eup %17394 }
0x162c   : > { %15099 = vmatmul.mubr.msk.bf16.gmra.mxu1 %vm8732_vm0, %v11262_v36  ;;  %v11563_v42 = vmul.f32 %v17395_v47, %v20407_v9 }
0x162d   : > { %15134 = vmatprep.mubr.msk.bf16.mxu1 %vm17809_vm11, %v21225_v43 }
0x1637   : > { %12228 = vrot.lane.b32.xlu1 %v20091_v11, %s17808_s15 }
0x1645   : > { %v12076_v34 = vpop.f32.mrf.mxu0 }
0x1646   : > { %v12108_v33 = vmul.f32 0.25, %v12076_v34 }
0x1647   : > { %v15214_v21 = vpop.f32.mrf.mxu0  ;;  %12179 = vadd.xlane.f32.xlu0 %v12178_v14 }
0x1648   : > { %v20561_v49 = vadd.f32 %v12108_v33, %v21251_v1 }
0x1649   : > { %v20554_v51 = vpop.f32.mrf.mxu0 }
0x164a   : > { %v11532_v63 = vpop.xlane.xlu1 %11531  ;;  %v12130_v50 = vsel %vm8732_vm0, %v20561_v49, -inf }
0x164b   : > { %17396 = vrcp.f32 %v11532_v63  ;;  %v15215_v57 = vpop.f32.mrf.mxu0  ;;  %v12109_v63 = vmul.f32 0.25, %v20554_v51 }
0x164d   : > { %v20556_v28 = vpop.f32.mrf.mxu0 }
0x164e   : > { %v11538_v27 = vpop.xlane.xlu1 %11537 }
0x164f   : > { %v15218_v5 = vpop.f32.mrf.mxu0  ;;  %17398 = vrcp.f32 %v11538_v27  ;;  %v12110_v27 = vmul.f32 0.25, %v20556_v28 }
0x1651   : > { %v20558_v11 = vpop.f32.mrf.mxu0 }
0x1652   : > { %v11535_v15 = vpop.xlane.xlu0 %11534  ;;  %v12111_v51 = vmul.f32 0.25, %v20558_v11 }
0x1653   : > { %17400 = vrcp.f32 %v11535_v15  ;;  %v15219_v31 = vpop.f32.mrf.mxu0 }
0x1656   : > { %v11541_v58 = vpop.xlane.xlu1 %11540  ;;  %v11544_v55 = vpop.xlane.xlu0 %11543 }
0x1657   : > { %17402 = vrcp.f32 %v11541_v58 }
0x1658   : > { %v17397_v35 = vpop.eup %17396  ;;  %17404 = vrcp.f32 %v11544_v55 }
0x1659   : > { %v11564_v53 = vmul.f32 %v17397_v35, %v20418_v40  ;;  %v20621_v35 = vadd.f32 %v12111_v51, %v21251_v1 }
0x165a   : > { %v11547_v7 = vpop.xlane.xlu1 %11546  ;;  %v11550_v41 = vpop.xlane.xlu0 %11549 }
0x165b   : > { %v11572_v54 = vpack.c.bf16 %v11564_v53, %v11563_v42  ;;  %12131 = vmax.xlane.f32.xlu1 %v12130_v50  ;;  %17406 = vrcp.f32 %v11547_v7  ;;  %v12139_v53 = vsel %vm8732_vm0, %v20621_v35, -inf }
0x165c   : > { %v17399_v38 = vpop.eup %17398  ;;  %17408 = vrcp.f32 %v11550_v41 }
0x165d   : > { %15135 = vmatmul.mubr.msk.bf16.vlgmr.msra.gmra.mxu1 %vm8732_vm0, %v11572_v54  ;;  %12230 = vrot.lane.b32.xlu0 %v20082_v24, %s17808_s15  ;;  %v11566_v0 = vmul.f32 %v17399_v38, %v20424_v20 }
0x165e   : > { %15177 = vmatpush3.bf16.msra.mxu1 %v11935_v44  ;;  %v11553_v9 = vpop.xlane.xlu1 %11552  ;;  %15138 = vmatprep.mubr.msk.bf16.mxu1 %vm17809_vm11, %v21225_v43 }
0x165f   : > { %15178 = vmatprep.subr.bf16.mxu1 %v21225_v43  ;;  %17410 = vrcp.f32 %v11553_v9 }
0x1660   : > { %v17401_v40 = vpop.eup %17400 }
0x1661   : > { %v11565_v56 = vmul.f32 %v17401_v40, %v20430_v39  ;;  %12017 = vrot.lane.b32.xlu0 %v20088_v45, %s17808_s15  ;;  %s13173_s15 = scalar_lea.sflag [#allocation5], %s478_s24 }
0x1662   : > { %15179 = vmatpush3.bf16.msra.mxu1 %v20345_v19  ;;  %v11857_v26 = vpop.xlane.xlu1 %11856  ;;  %v11869_v24 = vpop.xlane.xlu0 %11868 }
0x1663   : > { %15180 = vmatprep.subr.bf16.mxu1 %v21225_v43  ;;  %v11573_v3 = vpack.c.bf16 %v11566_v0, %v11565_v56 }
0x1664   : > { %v17403_v36 = vpop.eup %17402 }
0x1665   : > { %v17405_v6 = vpop.eup %17404  ;;  %15139 = vmatmul.mubr.msk.bf16.gmra.mxu1 %vm8732_vm0, %v11573_v3  ;;  %v11567_v45 = vmul.f32 %v17403_v36, %v20437_v52 }
0x1666   : > { %15181 = vmatpush3.bf16.msra.mxu1 %v20349_v30  ;;  %15142 = vmatprep.mubr.msk.bf16.mxu1 %vm17809_vm11, %v21225_v43  ;;  %v12016_v20 = vpop.permute.xlu0 %12015  ;;  %v11568_v19 = vmul.f32 %v17405_v6, %v20435_v10  ;;  %v11860_v39 = vpop.xlane.xlu1 %11859 }
0x1667   : > { %15182 = vmatprep.subr.bf16.mxu1 %v21225_v43  ;;  %15221 = vmatmul.mubr.msk.bf16.gmra.mxu0 %vm8626_vm12, %v12016_v20  ;;  %17412 = vrcp.f32 %v11860_v39 }
0x1668   : > { %15224 = vmatprep.mubr.msk.bf16.mxu0 %vm17809_vm11, %v21225_v43  ;;  %v17407_v30 = vpop.eup %17406  ;;  %v11574_v46 = vpack.c.bf16 %v11568_v19, %v11567_v45  ;;  %17414 = vrcp.f32 %v11857_v26 }
0x1669   : > { %v17409_v34 = vpop.eup %17408  ;;  %v11569_v10 = vmul.f32 %v17407_v30, %v20446_v23 }
0x166a   : > { %15183 = vmatpush3.bf16.msra.mxu1 %v20351_v32  ;;  %v11863_v61 = vpop.xlane.xlu1 %11862  ;;  %v11570_v52 = vmul.f32 %v17409_v34, %v20444_v60  ;;  %v20606_v60 = vadd.f32 %v12109_v63, %v21251_v1  ;;  %v12235_v7 = vpop.permute.xlu0 %12234 }
0x166b   : > { %15184 = vmatprep.subr.bf16.mxu1 %v21225_v43 }
0x166c   : > { %v11575_v32 = vpack.c.bf16 %v11570_v52, %v11569_v10  ;;  %v17411_v14 = vpop.eup %17410  ;;  %v12133_v31 = vsel %vm8732_vm0, %v20606_v60, -inf }
0x166d   : > { %15143 = vmatmul.mubr.msk.bf16.gmra.mxu1 %vm8732_vm0, %v11574_v46 }
0x166e   : > { %15185 = vmatpush3.bf16.msra.mxu1 %v20353_v18  ;;  %15146 = vmatprep.mubr.msk.bf16.mxu1 %vm17809_vm11, %v21225_v43  ;;  %v11866_v21 = vpop.xlane.xlu1 %11865  ;;  %v11571_v18 = vmul.f32 %v17411_v14, %v20453_v17  ;;  %v20614_v17 = vadd.f32 %v12110_v27, %v21251_v1 }
0x166f   : > { %15228 = vmatprep.subr.bf16.mxu1 %v21225_v43  ;;  %17416 = vrcp.f32 %v11866_v21 }
0x1670   : > { %17418 = vrcp.f32 %v11863_v61  ;;  %v11576_v23 = vpack.c.bf16 %v11571_v18, %v11571_v18 }
0x1672   : > { %v11872_v5 = vpop.xlane.xlu1 %11871 }
0x1673   : > { %17420 = vrcp.f32 %v11872_v5 }
0x1674   : > { %v17413_v57 = vpop.eup %17412  ;;  %17422 = vrcp.f32 %v11869_v24 }
0x1675   : > { %15147 = vmatmul.mubr.msk.bf16.gmra.mxu1 %vm8732_vm0, %v11575_v32  ;;  %v17415_v33 = vpop.eup %17414  ;;  %v11892_v15 = vmul.f32 %v17413_v57, %v20463_v16  ;;  %v12136_v16 = vsel %vm8732_vm0, %v20614_v17, -inf }
0x1676   : > { %15150 = vmatprep.mubr.msk.bf16.mxu1 %vm17809_vm11, %v21225_v43  ;;  %v11891_v28 = vmul.f32 %v17415_v33, %v20457_v12  ;;  %v12237_v47 = vpop.permute.xlu1 %12236 }
0x1677   : > { %v12258_v42 = vsel %vm1363_vm9, %v12237_v47, 0 }
0x1678   : > { %v11900_v58 = vpack.c.bf16 %v11892_v15, %v11891_v28 }
0x167c   : > { %v17417_v55 = vpop.eup %17416 }
0x167d   : > { %15151 = vmatmul.mubr.msk.bf16.gmra.mxu1 %vm8732_vm0, %v11576_v23  ;;  %v17419_v11 = vpop.eup %17418  ;;  %v11894_v12 = vmul.f32 %v17417_v55, %v20473_v59 }
0x167e   : > { %15186 = vmatprep.mubr.msk.bf16.mxu1 %vm17809_vm11, %v21225_v43  ;;  %v11893_v50 = vmul.f32 %v17419_v11, %v20467_v22 }
0x1680   : > { %12134 = vmax.xlane.f32.xlu0 %v12133_v31  ;;  %v11901_v54 = vpack.c.bf16 %v11894_v12, %v11893_v50  ;;  %v17421_v41 = vpop.eup %17420 }
0x1681   : > { %v17423_v44 = vpop.eup %17422  ;;  %v11896_v59 = vmul.f32 %v17421_v41, %v20477_v2 }
0x1682   : > { %v11895_v38 = vmul.f32 %v17423_v44, %v20459_v25 }
0x1684   : > { %12137 = vmax.xlane.f32.xlu0 %v12136_v16  ;;  %v11902_v9 = vpack.c.bf16 %v11896_v59, %v11895_v38 }
0x1685   : > { %15187 = vmatmul.mubr.msk.bf16.vlgmr.msra.gmra.mxu1 %vm8732_vm0, %v11900_v58 }
0x1686   : > { %15229 = vmatpush3.bf16.msra.mxu1 %v12258_v42  ;;  %15190 = vmatprep.mubr.msk.bf16.mxu1 %vm17809_vm11, %v21225_v43 }
0x1687   : > { %15230 = vmatprep.subr.bf16.mxu1 %v21225_v43 }
0x1688   : > { %12140 = vmax.xlane.f32.xlu0 %v12139_v53 }
0x168a   : > { %15231 = vmatpush3.bf16.msra.mxu1 %v12235_v7 }
0x168b   : > { %15232 = vmatprep.subr.bf16.mxu1 %v21225_v43 }
0x168d   : > { %15191 = vmatmul.mubr.msk.bf16.gmra.mxu1 %vm8732_vm0, %v11901_v54 }
0x168e   : > { %15194 = vmatprep.mubr.msk.bf16.mxu1 %vm17809_vm11, %v21225_v43 }
0x1695   : > { %15195 = vmatmul.mubr.msk.bf16.gmra.mxu1 %vm8732_vm0, %v11902_v9 }
0x1696   : > { %15198 = vmatprep.mubr.msk.bf16.mxu1 %vm17809_vm11, %v21225_v43 }
0x169b   : > { %v11875_v22 = vpop.xlane.xlu0 %11874 }
0x169c   : > { %17424 = vrcp.f32 %v11875_v22 }
0x169f   : > { %v12233_v40 = vpop.permute.xlu0 %12232 }
0x16a0   : > { %15233 = vmatpush3.bf16.msra.mxu1 %v12233_v40 }
0x16a1   : > { %15234 = vmatprep.subr.bf16.mxu1 %v21225_v43 }
0x16a7   : > { %v11878_v56 = vpop.xlane.xlu1 %11877 }
0x16a8   : > { %17426 = vrcp.f32 %v11878_v56 }
0x16a9   : > { %v17425_v26 = vpop.eup %17424 }
0x16aa   : > { %v11897_v25 = vmul.f32 %v17425_v26, %v20500_v37 }
0x16ab   : > { %v11881_v0 = vpop.xlane.xlu1 %11880 }
0x16ac   : > { %17428 = vrcp.f32 %v11881_v0 }
0x16af   : > { %v12183_v37 = vpop.xlane.xlu1 %12182 }
0x16b0   : > { %17430 = vrcp.f32 %v12183_v37 }
0x16b3   : > { %v12229_v10 = vpop.permute.xlu1 %12228 }
0x16b5   : > { %v17427_v2 = vpop.eup %17426 }
0x16b6   : > { %v11898_v24 = vmul.f32 %v17427_v2, %v20517_v4 }
0x16b8   : > { %v11903_v3 = vpack.c.bf16 %v11898_v24, %v11897_v25 }
0x16b9   : > { %v17429_v36 = vpop.eup %17428 }
0x16ba   : > { %15199 = vmatmul.mubr.msk.bf16.gmra.mxu1 %vm8732_vm0, %v11903_v3  ;;  %v11899_v6 = vmul.f32 %v17429_v36, %v20526_v13 }
0x16bb   : > { %15202 = vmatprep.mubr.msk.bf16.mxu1 %vm17809_vm11, %v21225_v43 }
0x16bc   : > { %v11904_v20 = vpack.c.bf16 %v11899_v6, %v11899_v6 }
0x16bd   : > { %v17431_v21 = vpop.eup %17430 }
0x16be   : > { %v12215_v23 = vmul.f32 %v17431_v21, %v20533_v29 }
0x16c2   : > { %15203 = vmatmul.mubr.msk.bf16.gmra.mxu1 %vm8732_vm0, %v11904_v20 }
0x16c3   : > { %15238 = vmatprep.mubr.msk.bf16.mxu1 %vm17809_vm11, %v21225_v43 }
0x16cc   : > { %v20653_v45 = vpop.f32.mrf.mxu1 }
0x16ce   : > { %v15084_v19 = vpop.f32.mrf.mxu1 }
0x16d0   : > { %v20655_v4 = vpop.f32.mrf.mxu1  ;;  %v12180_v39 = vpop.xlane.xlu0 %12179 }
0x16d1   : > { %17432 = vrcp.f32 %v12180_v39 }
0x16d2   : > { %v15085_v30 = vpop.f32.mrf.mxu1 }
0x16d4   : > { %v20657_v46 = vpop.f32.mrf.mxu1  ;;  %v12231_v34 = vpop.permute.xlu0 %12230 }
0x16d5   : > { %15235 = vmatpush3.bf16.msra.mxu1 %v12231_v34 }
0x16d6   : > { %v15088_v13 = vpop.f32.mrf.mxu1  ;;  %15236 = vmatprep.subr.bf16.mxu1 %v21225_v43 }
0x16d8   : > { %v20660_v61 = vpop.f32.mrf.mxu1  ;;  %v12018_v52 = vpop.permute.xlu0 %12017 }
0x16d9   : > { %15225 = vmatmul.mubr.msk.bf16.gmra.mxu0 %vm8626_vm12, %v12018_v52  ;;  %15237 = vmatpush3.bf16.msra.mxu1 %v12229_v10 }
0x16da   : > { %v15089_v32 = vpop.f32.mrf.mxu1  ;;  %15266 = vmatprep.mubr.msk.bf16.mxu0 %vm17809_vm11, %v21225_v43  ;;  %15286 = vmatprep.subr.bf16.mxu1 %v21225_v43 }
0x16dc   : > { %v20666_v14 = vpop.f32.mrf.mxu1 }
0x16de   : > { %v15092_v18 = vpop.f32.mrf.mxu1  ;;  %v17433_v63 = vpop.eup %17432 }
0x16df   : > { %v12214_v57 = vmul.f32 %v17433_v63, %v20550_v62 }
0x16e0   : > { %v20670_v27 = vpop.f32.mrf.mxu1 }
0x16e1   : > { %v12223_v5 = vpack.c.bf16 %v12215_v23, %v12214_v57 }
0x16e2   : > { %v15093_v33 = vpop.f32.mrf.mxu1 }
0x16e3   : > { %15239 = vmatmul.mubr.msk.bf16.vlgmr.msra.gmra.mxu1 %vm8732_vm0, %v12223_v5 }
0x16e4   : > { %v20673_v15 = vpop.f32.mrf.mxu1  ;;  %15242 = vmatprep.mubr.msk.bf16.mxu1 %vm17809_vm11, %v21225_v43  ;;  %v12132_v33 = vpop.xlane.xlu1 %12131 }
0x16e6   : > { %v15096_v51 = vpop.f32.mrf.mxu1 }
0x16e8   : > { %v20677_v31 = vpop.f32.mrf.mxu1 }
0x16ea   : > { %v15097_v28 = vpop.f32.mrf.mxu1 }
0x16ec   : > { %v20679_v47 = vpop.f32.mrf.mxu1 }
0x16ee   : > { %v15100_v29 = vpop.f32.mrf.mxu1 }
0x16f0   : > { %v11350_v58 = vpop.f32.mrf.mxu1 }
0x16f1   : > { %v12153_v58 = vsub.f32 %v20561_v49, %v12132_v33 }
0x16f2   : > { %v15101_v62 = vpop.f32.mrf.mxu1 }
0x1709   : > { %v12135_v23 = vpop.xlane.xlu0 %12134 }
0x170d   : > { %v20715_v28 = vpop.xlane.xlu0 %12137 }
0x171d   : > { %v11648_v55 = vpop.f32.mrf.mxu1 }
0x171f   : > { %v15136_v16 = vpop.f32.mrf.mxu1 }
0x1721   : > { %v11651_v42 = vpop.f32.mrf.mxu1 }
0x1722   : > { %v15544_v30 = vpack.i.bf16 %v11651_v42, %v11648_v55  ;;  %v12164_v42 = vmul.f32 1.442695, %v12153_v58 }
0x1723   : > { %v15137_v11 = vpop.f32.mrf.mxu1 }
0x1724   : > { %v12154_v11 = vsub.f32 %v20606_v60, %v12135_v23  ;;  %17434 = vpow2.f32 %v12164_v42  ;;  %v17084_v23 = vld [vmem:[#allocation11 + $0xa8] ss:$16 sps:$4 sm:$0xff]  }
0x1725   : > { %v20681_v12 = vpop.f32.mrf.mxu1 }
0x1727   : > { %v15140_v53 = vpop.f32.mrf.mxu1  ;;  %v12092_v7 = vpop.f32.mrf.mxu0 }
0x1728   : > { %v12112_v50 = vmul.f32 0.25, %v12092_v7  ;;  %v12141_v53 = vpop.xlane.xlu0 %12140 }
0x1729   : > { %v20683_v54 = vpop.f32.mrf.mxu1  ;;  %v15222_v44 = vpop.f32.mrf.mxu0 }
0x172a   : > { %v15559_v41 = vpack.i.bf16 %v20683_v54, %v20681_v12  ;;  %v20688_v59 = vadd.f32 %v12112_v50, %v21251_v1  ;;  %v12166_v44 = vmul.f32 1.442695, %v12154_v11 }
0x172b   : > { %v15141_v38 = vpop.f32.mrf.mxu1  ;;  %v12095_v9 = vpop.f32.mrf.mxu0 }
0x172c   : > { %v12113_v22 = vmul.f32 0.25, %v12095_v9  ;;  %v12142_v56 = vsel %vm8732_vm0, %v20688_v59, -inf  ;;  %v12156_v38 = vsub.f32 %v20621_v35, %v12141_v53  ;;  %17436 = vpow2.f32 %v12166_v44 }
0x172d   : > { %v20690_v40 = vpop.f32.mrf.mxu1  ;;  %12143 = vmax.xlane.f32.xlu1 %v12142_v56  ;;  %v15223_v0 = vpop.f32.mrf.mxu0 }
0x172e   : > { %v20695_v26 = vadd.f32 %v12113_v22, %v21251_v1  ;;  %v12170_v22 = vmul.f32 1.442695, %v12156_v38  ;;  %v12155_v38 = vsub.f32 %v20614_v17, %v20715_v28 }
0x172f   : > { %v15144_v2 = vpop.f32.mrf.mxu1 }
0x1730   : > { %v12145_v24 = vsel %vm8732_vm0, %v20695_v26, -inf  ;;  %17438 = vpow2.f32 %v12170_v22 }
0x1731   : > { %v20697_v25 = vpop.f32.mrf.mxu1  ;;  %12146 = vmax.xlane.f32.xlu0 %v12145_v24  ;;  %v20730_v56 = vpop.eup %17434 }
0x1732   : > { %v15574_v3 = vpack.i.bf16 %v20697_v25, %v20690_v40  ;;  %v12184_v60 = vsel %vm8732_vm0, %v20730_v56, 0.0 }
0x1733   : > { %v15145_v36 = vpop.f32.mrf.mxu1 }
0x1735   : > { %v20703_v6 = vpop.f32.mrf.mxu1 }
0x1737   : > { %v15148_v20 = vpop.f32.mrf.mxu1 }
0x1739   : > { %v20705_v37 = vpop.f32.mrf.mxu1  ;;  %v20734_v0 = vpop.eup %17436 }
0x173a   : > { %v15589_v19 = vpack.i.bf16 %v20705_v37, %v20703_v6  ;;  %v12187_v2 = vsel %vm8732_vm0, %v20734_v0, 0.0 }
0x173b   : > { %v15149_v39 = vpop.f32.mrf.mxu1 }
0x173d   : > { %v20709_v34 = vpop.f32.mrf.mxu1  ;;  %v20738_v24 = vpop.eup %17438 }
0x173e   : > { %15545 = vrot.lane.b32.xlu1 %v15544_v30, %s17810_s26  ;;  %v12193_v35 = vsel %vm8732_vm0, %v20738_v24, 0.0 }
0x173f   : > { %v15152_v13 = vpop.f32.mrf.mxu1 }
0x1741   : > { %v11683_v10 = vpop.f32.mrf.mxu1 }
0x1743   : > { %v15153_v52 = vpop.f32.mrf.mxu1 }
0x1745   : > { %v11971_v32 = vpop.f32.mrf.mxu1 }
0x1747   : > { %v15188_v21 = vpop.f32.mrf.mxu1 }
0x1749   : > { %v11974_v18 = vpop.f32.mrf.mxu1 }
0x174a   : > { %v15549_v63 = vpack.i.bf16 %v11974_v18, %v11971_v32  ;;  %v17082_v18 = vld [vmem:[#allocation11 + $0xe8] ss:$16 sps:$4 sm:$0xff]  }
0x174b   : > { %v15189_v57 = vpop.f32.mrf.mxu1  ;;  %15259 = vmatpush3.bf16.msra.mxu0 %v17082_v18 }
0x174c   : > { %15550 = vrot.lane.b32.xlu0 %v15549_v63, %s17811_s29  ;;  %v17083_v63 = vld [vmem:[#allocation11 + $0xc8] ss:$16 sps:$4 sm:$0xff]   ;;  %15260 = vmatprep.subr.bf16.mxu0 %v21225_v43 }
0x174d   : > { %v20713_v5 = vpop.f32.mrf.mxu1 }
0x174f   : > { %v15192_v51 = vpop.f32.mrf.mxu1  ;;  %15261 = vmatpush3.bf16.msra.mxu0 %v17083_v63 }
0x1750   : > { %15262 = vmatprep.subr.bf16.mxu0 %v21225_v43 }
0x1751   : > { %v20717_v29 = vpop.f32.mrf.mxu1 }
0x1752   : > { %v15564_v62 = vpack.i.bf16 %v20717_v29, %v20713_v5 }
0x1753   : > { %v15193_v55 = vpop.f32.mrf.mxu1  ;;  %15263 = vmatpush3.bf16.msra.mxu0 %v17084_v23 }
0x1754   : > { %15264 = vmatprep.subr.bf16.mxu0 %v21225_v43  ;;  %v17085_v55 = vld [vmem:[#allocation11 + $0x88] ss:$16 sps:$4 sm:$0xff]  }
0x1755   : > { %v20722_v16 = vpop.f32.mrf.mxu1 }
0x1757   : > { %v15196_v7 = vpop.f32.mrf.mxu1  ;;  %15265 = vmatpush3.bf16.msra.mxu0 %v17085_v55 }
0x1758   : > { %15314 = vmatprep.subr.bf16.mxu0 %v21225_v43 }
0x1759   : > { %v20725_v50 = vpop.f32.mrf.mxu1 }
0x175a   : > { %v15579_v49 = vpack.i.bf16 %v20725_v50, %v20722_v16 }
0x175b   : > { %v15197_v9 = vpop.f32.mrf.mxu1 }
0x176b   : > { %12185 = vadd.xlane.f32.xlu0 %v12184_v60 }
0x176f   : > { %12188 = vadd.xlane.f32.xlu0 %v12187_v2  ;;  %v12168_v2 = vmul.f32 1.442695, %v12155_v38 }
0x1773   : > { %12194 = vadd.xlane.f32.xlu0 %v12193_v35 }
0x177a   : > { %v20742_v36 = vpop.f32.mrf.mxu1 }
0x177c   : > { %v15200_v20 = vpop.f32.mrf.mxu1 }
0x177e   : > { %v20744_v39 = vpop.f32.mrf.mxu1 }
0x177f   : > { %v15594_v30 = vpack.i.bf16 %v20744_v39, %v20742_v36 }
0x1780   : > { %v15201_v13 = vpop.f32.mrf.mxu1 }
0x1782   : > { %v20748_v10 = vpop.f32.mrf.mxu1 }
0x1784   : > { %v15204_v52 = vpop.f32.mrf.mxu1 }
0x1786   : > { %v12006_v32 = vpop.f32.mrf.mxu1 }
0x1788   : > { %v15205_v21 = vpop.f32.mrf.mxu1 }
0x1799   : > { %v12100_v57 = vpop.f32.mrf.mxu0 }
0x179a   : > { %v12114_v52 = vmul.f32 0.25, %v12100_v57 }
0x179b   : > { %v15226_v33 = vpop.f32.mrf.mxu0 }
0x179c   : > { %v12123_v32 = vadd.f32 %v12114_v52, %v21251_v1 }
0x179d   : > { %v12103_v51 = vpop.f32.mrf.mxu0 }
0x179e   : > { %v12148_v28 = vsel %vm8732_vm0, %v12123_v32, -inf }
0x179f   : > { %v15227_v58 = vpop.f32.mrf.mxu0 }
0x17a3   : > { %v12294_v42 = vpop.f32.mrf.mxu1 }
0x17a5   : > { %v15240_v11 = vpop.f32.mrf.mxu1 }
0x17a7   : > { %v12297_v53 = vpop.f32.mrf.mxu1 }
0x17a8   : > { %v15554_v7 = vpack.i.bf16 %v12297_v53, %v12294_v42 }
0x17a9   : > { %v15241_v44 = vpop.f32.mrf.mxu1 }
0x17aa   : > { %15555 = vrot.lane.b32.xlu1 %v15554_v7, %s17812_s13 }
0x17b6   : > { %v12144_v9 = vpop.xlane.xlu1 %12143 }
0x17b7   : > { %v12157_v35 = vsub.f32 %v20688_v59, %v12144_v9 }
0x17b9   : > { %v12172_v13 = vmul.f32 1.442695, %v12157_v35 }
0x17ba   : > { %v12147_v22 = vpop.xlane.xlu0 %12146  ;;  %v15546_v11 = vpop.permute.xlu1 %15545 }
0x17bb   : > { %v12158_v60 = vsub.f32 %v20695_v26, %v12147_v22  ;;  %v15548_v53 = vunpack.i.h.bf16 %v15546_v11  ;;  %v15547_v7 = vunpack.i.l.bf16 %v15546_v11 }
0x17bd   : > { %v12174_v20 = vmul.f32 1.442695, %v12158_v60  ;;  %v12441_v22 = vsel %vm8626_vm12, %v20655_v4, %v15548_v53 }
0x17be   : > { %v15551_v23 = vpop.permute.xlu0 %15550 }
0x17bf   : > { %17440 = vpow2.f32 %v12174_v20  ;;  %v15553_v44 = vunpack.i.h.bf16 %v15551_v23  ;;  %v15552_v38 = vunpack.i.l.bf16 %v15551_v23 }
0x17c0   : > { %17442 = vpow2.f32 %v12168_v2 }
0x17c1   : > { %17444 = vpow2.f32 %v12172_v13  ;;  %v12450_v2 = vsel %vm10023_vm1, %v12441_v22, %v15553_v44  ;;  %v20792_v22 = vld [vmem:[#allocation12 + $0x13] ss:$0 sm:$0xff] }
0x17cc   : > { %v20760_v21 = vpop.eup %17440 }
0x17cd   : > { %v12199_v17 = vsel %vm8732_vm0, %v20760_v21, 0.0  ;;  %v17443_v18 = vpop.eup %17442 }
0x17ce   : > { %12200 = vadd.xlane.f32.xlu0 %v12199_v17  ;;  %12149 = vmax.xlane.f32.xlu1 %v12148_v28  ;;  %v12190_v59 = vsel %vm8732_vm0, %v17443_v18, 0.0  ;;  %v17445_v26 = vpop.eup %17444 }
0x17cf   : > { %v12196_v63 = vsel %vm8732_vm0, %v17445_v26, 0.0 }
0x17d2   : > { %12191 = vadd.xlane.f32.xlu1 %v12190_v59 }
0x17d6   : > { %12197 = vadd.xlane.f32.xlu1 %v12196_v63 }
0x17f4   : > { %v12186_v57 = vpop.xlane.xlu0 %12185 }
0x17f5   : > { %17446 = vrcp.f32 %v12186_v57 }
0x17f8   : > { %v12189_v1 = vpop.xlane.xlu0 %12188 }
0x17f9   : > { %17448 = vrcp.f32 %v12189_v1 }
0x17fc   : > { %v12195_v17 = vpop.xlane.xlu0 %12194 }
0x17fd   : > { %17450 = vrcp.f32 %v12195_v17 }
0x1802   : > { %v17447_v33 = vpop.eup %17446 }
0x1803   : > { %v12216_v58 = vmul.f32 %v17447_v33, %v20730_v56  ;;  %v12440_v56 = vsel %vm8626_vm12, %v20653_v45, %v15547_v7 }
0x1804   : > { %v12449_v35 = vsel %vm10023_vm1, %v12440_v56, %v15552_v38 }
0x1806   : > { %v17449_v51 = vpop.eup %17448 }
0x1807   : > { %v12217_v55 = vmul.f32 %v17449_v51, %v20734_v0 }
0x1809   : > { %v12224_v42 = vpack.c.bf16 %v12217_v55, %v12216_v58 }
0x180a   : > { %v17451_v57 = vpop.eup %17450 }
0x180b   : > { %15243 = vmatmul.mubr.msk.bf16.gmra.mxu1 %vm8732_vm0, %v12224_v42  ;;  %v12219_v55 = vmul.f32 %v17451_v57, %v20738_v24 }
0x180c   : > { %15246 = vmatprep.mubr.msk.bf16.mxu1 %vm17809_vm11, %v21225_v43 }
0x181c   : > { %v15556_v9 = vpop.permute.xlu1 %15555 }
0x181d   : > { %v15558_v60 = vunpack.i.h.bf16 %v15556_v9  ;;  %v15557_v0 = vunpack.i.l.bf16 %v15556_v9 }
0x181f   : > { %v12458_v20 = vsel %vm10033_vm2, %v12449_v35, %v15557_v0  ;;  %v12459_v13 = vsel %vm10033_vm2, %v12450_v2, %v15558_v60 }
0x1820   : > { %v12467_v52 = vpack.c.bf16 %v12459_v13, %v12458_v20 }
0x1822   : > { %15267 = vmatmul.mubr.msk.bf16.vlgmr.msra.gmra.mxu0 %vm8247_vm10, %v12467_v52 }
0x1823   : > { %15270 = vmatprep.mubr.msk.bf16.mxu0 %vm17809_vm11, %v21225_v43 }
0x1857   : > { %v12150_v4 = vpop.xlane.xlu1 %12149  ;;  %v12201_v23 = vpop.xlane.xlu0 %12200 }
0x1858   : > { %v12159_v28 = vsub.f32 %v12123_v32, %v12150_v4 }
0x185a   : > { %v12176_v45 = vmul.f32 1.442695, %v12159_v28 }
0x185b   : > { %v12192_v59 = vpop.xlane.xlu1 %12191 }
0x185c   : > { %17452 = vpow2.f32 %v12176_v45 }
0x185d   : > { %17454 = vrcp.f32 %v12192_v59 }
0x185f   : > { %v12198_v63 = vpop.xlane.xlu1 %12197 }
0x1860   : > { %17456 = vrcp.f32 %v12198_v63 }
0x1861   : > { %17458 = vrcp.f32 %v12201_v23 }
0x1869   : > { %v17453_v1 = vpop.eup %17452 }
0x186a   : > { %v17455_v33 = vpop.eup %17454  ;;  %v12202_v51 = vsel %vm8732_vm0, %v17453_v1, 0.0 }
0x186b   : > { %12203 = vadd.xlane.f32.xlu1 %v12202_v51  ;;  %v12218_v58 = vmul.f32 %v17455_v33, %v17443_v18 }
0x186d   : > { %v12225_v42 = vpack.c.bf16 %v12219_v55, %v12218_v58  ;;  %v17457_v32 = vpop.eup %17456 }
0x186e   : > { %v17459_v11 = vpop.eup %17458  ;;  %v12220_v53 = vmul.f32 %v17457_v32, %v17445_v26 }
0x186f   : > { %15247 = vmatmul.mubr.msk.bf16.gmra.mxu1 %vm8732_vm0, %v12225_v42  ;;  %v12221_v7 = vmul.f32 %v17459_v11, %v20760_v21 }
0x1870   : > { %15250 = vmatprep.mubr.msk.bf16.mxu1 %vm17809_vm11, %v21225_v43 }
0x1871   : > { %v12226_v44 = vpack.c.bf16 %v12221_v7, %v12220_v53 }
0x1877   : > { %15251 = vmatmul.mubr.msk.bf16.gmra.mxu1 %vm8732_vm0, %v12226_v44 }
0x1878   : > { %15254 = vmatprep.mubr.msk.bf16.mxu1 %vm17809_vm11, %v21225_v43 }
0x18cb   : > { %v12302_v18 = vpop.f32.mrf.mxu1 }
0x18cd   : > { %v15244_v38 = vpop.f32.mrf.mxu1 }
0x18cf   : > { %v12305_v24 = vpop.f32.mrf.mxu1 }
0x18d1   : > { %v15245_v9 = vpop.f32.mrf.mxu1 }
0x18d2   : > { %v17088_v9 = vld [vmem:[#allocation11 + $0xac] ss:$16 sps:$4 sm:$0xff]  }
0x18e2   : > { %v12553_v56 = vpop.f32.mrf.mxu0 }
0x18e3   : > { %v12554_v60 = vadd.f32 %v12553_v56, %v20792_v22 }
0x18e4   : > { %v15268_v0 = vpop.f32.mrf.mxu0 }
0x18e5   : > { %v20796_v26 = vadd.f32 %v12554_v60, %v19923_v8  ;;  %v15569_v8 = vpack.i.bf16 %v12305_v24, %v12302_v18  ;;  %v17087_v24 = vld [vmem:[#allocation11 + $0xcc] ss:$16 sps:$4 sm:$0xff]  }
0x18e6   : > { %v12556_v21 = vpop.f32.mrf.mxu0 }
0x18e7   : > { %v12557_v2 = vadd.f32 %v12556_v21, %v20792_v22  ;;  %v12600_v35 = vsel %vm8247_vm10, %v20796_v26, 0.0 }
0x18e8   : > { %12601 = vadd.xlane.f32.xlu0 %v12600_v35  ;;  %v15269_v20 = vpop.f32.mrf.mxu0 }
0x18e9   : > { %v12592_v13 = vadd.f32 %v12557_v2, %v19928_v48 }
0x18eb   : > { %v12603_v52 = vsel %vm8247_vm10, %v12592_v13, 0.0 }
0x18ec   : > { %12604 = vadd.xlane.f32.xlu1 %v12603_v52 }
0x18f4   : > { %v12204_v4 = vpop.xlane.xlu1 %12203 }
0x18f5   : > { %17460 = vrcp.f32 %v12204_v4 }
0x18fd   : > { %15565 = vrot.lane.b32.xlu1 %v15564_v62, %s17811_s29 }
0x18fe   : > { %15560 = vrot.lane.b32.xlu0 %v15559_v41, %s17810_s26 }
0x1901   : > { %15570 = vrot.lane.b32.xlu1 %v15569_v8, %s17812_s13 }
0x1902   : > { %v17461_v17 = vpop.eup %17460  ;;  %15580 = vrot.lane.b32.xlu0 %v15579_v49, %s17811_s29 }
0x1903   : > { %v12222_v48 = vmul.f32 %v17461_v17, %v17453_v1 }
0x1905   : > { %15575 = vrot.lane.b32.xlu1 %v15574_v3, %s17810_s26  ;;  %v12227_v5 = vpack.c.bf16 %v12222_v48, %v12222_v48 }
0x1906   : > { %15590 = vrot.lane.b32.xlu0 %v15589_v19, %s17810_s26 }
0x1907   : > { %15255 = vmatmul.mubr.msk.bf16.gmra.mxu1 %vm8732_vm0, %v12227_v5 }
0x1908   : > { %15294 = vmatprep.mubr.msk.bf16.mxu1 %vm17809_vm11, %v21225_v43 }
0x192f   : > { %v12310_v12 = vpop.f32.mrf.mxu1 }
0x1931   : > { %v15248_v54 = vpop.f32.mrf.mxu1 }
0x1933   : > { %v12313_v41 = vpop.f32.mrf.mxu1 }
0x1934   : > { %v15584_v29 = vpack.i.bf16 %v12313_v41, %v12310_v12 }
0x1935   : > { %v15249_v62 = vpop.f32.mrf.mxu1 }
0x1936   : > { %15585 = vrot.lane.b32.xlu1 %v15584_v29, %s17812_s13 }
0x1937   : > { %v12318_v40 = vpop.f32.mrf.mxu1 }
0x1939   : > { %v15252_v25 = vpop.f32.mrf.mxu1 }
0x193a   : > { %15595 = vrot.lane.b32.xlu1 %v15594_v30, %s17811_s29 }
0x193b   : > { %v12321_v3 = vpop.f32.mrf.mxu1 }
0x193c   : > { %v15599_v6 = vpack.i.bf16 %v12321_v3, %v12318_v40 }
0x193d   : > { %v15253_v37 = vpop.f32.mrf.mxu1 }
0x1971   : > { %v12602_v19 = vpop.xlane.xlu0 %12601 }
0x1972   : > { %v12627_v16 = vmul.f32 0.015625, %v12602_v19 }
0x1974   : > { %v20833_v50 = vsub.f32 %v20796_v26, %v12627_v16 }
0x1975   : > { %v12605_v49 = vpop.xlane.xlu1 %12604  ;;  %v15561_v59 = vpop.permute.xlu0 %15560 }
0x1976   : > { %v12628_v28 = vmul.f32 0.015625, %v12605_v49  ;;  %v12645_v45 = vmul.f32 %v20833_v50, %v20833_v50  ;;  %v15563_v39 = vunpack.i.h.bf16 %v15561_v59  ;;  %v15562_v30 = vunpack.i.l.bf16 %v15561_v59 }
0x1978   : > { %v20837_v63 = vsub.f32 %v12592_v13, %v12628_v28  ;;  %v12654_v23 = vsel %vm8247_vm10, %v12645_v45, 0.0  ;;  %v12443_v55 = vsel %vm8626_vm12, %v20660_v61, %v15563_v39  ;;  %v12442_v42 = vsel %vm8626_vm12, %v20657_v46, %v15562_v30  ;;  %v17086_v46 = vld [vmem:[#allocation11 + $0xec] ss:$16 sps:$4 sm:$0xff]  }
0x1979   : > { %12655 = vadd.xlane.f32.xlu0 %v12654_v23  ;;  %v15566_v36 = vpop.permute.xlu1 %15565  ;;  %15287 = vmatpush3.bf16.msra.mxu1 %v17086_v46  ;;  %v15581_v0 = vpop.permute.xlu0 %15580 }
0x197a   : > { %v15568_v57 = vunpack.i.h.bf16 %v15566_v36  ;;  %v15567_v1 = vunpack.i.l.bf16 %v15566_v36  ;;  %v12646_v33 = vmul.f32 %v20837_v63, %v20837_v63  ;;  %15288 = vmatprep.subr.bf16.mxu1 %v21225_v43  ;;  %v15583_v2 = vunpack.i.h.bf16 %v15581_v0 }
0x197b   : > { %v15582_v35 = vunpack.i.l.bf16 %v15581_v0 }
0x197c   : > { %v12657_v51 = vsel %vm8247_vm10, %v12646_v33, 0.0  ;;  %v12452_v53 = vsel %vm10023_vm1, %v12443_v55, %v15568_v57  ;;  %v12451_v7 = vsel %vm10023_vm1, %v12442_v42, %v15567_v1 }
0x197d   : > { %v15571_v58 = vpop.permute.xlu1 %15570  ;;  %12658 = vadd.xlane.f32.xlu1 %v12657_v51  ;;  %15289 = vmatpush3.bf16.msra.mxu1 %v17087_v24  ;;  %v15591_v41 = vpop.permute.xlu0 %15590 }
0x197e   : > { %v15573_v32 = vunpack.i.h.bf16 %v15571_v58  ;;  %v15572_v11 = vunpack.i.l.bf16 %v15571_v58  ;;  %15290 = vmatprep.subr.bf16.mxu1 %v21225_v43  ;;  %v15593_v62 = vunpack.i.h.bf16 %v15591_v41  ;;  %v15592_v25 = vunpack.i.l.bf16 %v15591_v41  ;;  %v20887_v58 = vld [vmem:[#allocation12 + $0x14] ss:$0 sm:$0xff] }
0x1980   : > { %v12460_v44 = vsel %vm10033_vm2, %v12451_v7, %v15572_v11  ;;  %v12461_v18 = vsel %vm10033_vm2, %v12452_v53, %v15573_v32  ;;  %v12447_v16 = vsel %vm8626_vm12, %v20677_v31, %v15593_v62  ;;  %v12446_v28 = vsel %vm8626_vm12, %v20673_v15, %v15592_v25  ;;  %v20891_v11 = vld [vmem:[#allocation12 + $0x15] ss:$0 sm:$0xff]  ;;  %v17091_v25 = vld [vmem:[%s21137_s7 + $0x70] sm:$0xff]  }
0x1981   : > { %v12468_v38 = vpack.c.bf16 %v12461_v18, %v12460_v44  ;;  %v15576_v61 = vpop.permute.xlu1 %15575  ;;  %15291 = vmatpush3.bf16.msra.mxu1 %v17088_v9 }
0x1982   : > { %v15578_v56 = vunpack.i.h.bf16 %v15576_v61  ;;  %v15577_v60 = vunpack.i.l.bf16 %v15576_v61  ;;  %15292 = vmatprep.subr.bf16.mxu1 %v21225_v43 }
0x1983   : > { %15271 = vmatmul.mubr.msk.bf16.gmra.mxu0 %vm8247_vm10, %v12468_v38 }
0x1984   : > { %15274 = vmatprep.mubr.msk.bf16.mxu0 %vm17809_vm11, %v21225_v43  ;;  %v12445_v21 = vsel %vm8626_vm12, %v20670_v27, %v15578_v56 }
0x1985   : > { %v12454_v8 = vsel %vm10023_vm1, %v12445_v21, %v15583_v2 }
0x198e   : > { %12357 = vrot.lane.b32.xlu1 %v20709_v34, %s17810_s26  ;;  %v17089_v34 = vld [vmem:[#allocation11 + $0x8c] ss:$16 sps:$4 sm:$0xff]   ;;  %s17813_s26 = smov [#allocation15]  }
0x198f   : > { %15600 = vrot.lane.b32.xlu0 %v15599_v6, %s17812_s13  ;;  %15293 = vmatpush3.bf16.msra.mxu1 %v17089_v34  ;;  %v21252_v34 = vld [vmem:[#allocation36_spill] sm:$0xff] }
0x1990   : > { %15350 = vmatprep.subr.bf16.mxu1 %v21225_v43 }
0x1993   : > { %12393 = vrot.lane.b32.xlu0 %v20748_v10, %s17811_s29  ;;  %v12444_v10 = vsel %vm8626_vm12, %v20666_v14, %v15577_v60  ;;  %s17720_s29 = sshll.u32 %s17813_s26, 4  ;;  %s17721_s29 = int_to_ptr.vmem [resolvable:$false] %s17720_s29 }
0x1994   : > { %v12453_v4 = vsel %vm10023_vm1, %v12444_v10, %v15582_v35  ;;  %p17723_p1 = scmp.lt.s32.totalorder %s21091_s12, %s17721_s29 }
0x19a8   : > { %v15586_v20 = vpop.permute.xlu1 %15585 }
0x19a9   : > { %v15588_v13 = vunpack.i.h.bf16 %v15586_v20  ;;  %v15587_v52 = vunpack.i.l.bf16 %v15586_v20  ;;  %v21253_v20 = vld [vmem:[#allocation35_spill] sm:$0xff] }
0x19ab   : > { %v12462_v17 = vsel %vm10033_vm2, %v12453_v4, %v15587_v52  ;;  %v12463_v48 = vsel %vm10033_vm2, %v12454_v8, %v15588_v13 }
0x19ac   : > { %v12469_v27 = vpack.c.bf16 %v12463_v48, %v12462_v17  ;;  %v15596_v29 = vpop.permute.xlu1 %15595  ;;  %v21254_v48 = vld [vmem:[#allocation34_spill] sm:$0xff] }
0x19ad   : > { %v15598_v6 = vunpack.i.h.bf16 %v15596_v29  ;;  %v15597_v37 = vunpack.i.l.bf16 %v15596_v29  ;;  %v21255_v29 = vld [vmem:[#allocation38_spill] sm:$0xff] }
0x19ae   : > { %15275 = vmatmul.mubr.msk.bf16.gmra.mxu0 %vm8247_vm10, %v12469_v27 }
0x19af   : > { %15278 = vmatprep.mubr.msk.bf16.mxu0 %vm17809_vm11, %v21225_v43  ;;  %v12456_v36 = vsel %vm10023_vm1, %v12447_v16, %v15598_v6  ;;  %v12455_v39 = vsel %vm10023_vm1, %v12446_v28, %v15597_v37  ;;  %v17093_v6 = vld [vmem:[%s21137_s7 + $0x60] sm:$0xff]   ;;  %v17094_v37 = vld [vmem:[%s21137_s7 + $0x58] sm:$0xff]   ;;  %v17096_v16 = vld [vmem:[%s21137_s7 + $0x48] sm:$0xff]  }
0x19c7   : > { %v12326_v14 = vpop.f32.mrf.mxu1 }
0x19c8   : > { %12429 = vrot.lane.b32.xlu1 %v12326_v14, %s17812_s13  ;;  %s17722_s13 = scalar_lea.vmem %s17721_s29, 32 }
0x19c9   : > { %v15256_v5 = vpop.f32.mrf.mxu1  ;;  %p17724_p9 = scmp.lt.s32.totalorder %s17722_s13, %s17716_s21 }
0x19cb   : > { %v12329_v12 = vpop.f32.mrf.mxu1  ;;  %p17725_p13 = por %p17724_p9, %p17723_p1 }
0x19cd   : > { %v15257_v54 = vpop.f32.mrf.mxu1  ;;  %p17726_p2 = pnand %p17725_p13, %p17719_p0 }
0x19ce   : > { %v17090_v54 = vld [vmem:[%s21137_s7 + $0x78] sm:$0xff]  }
0x19cf   : > { %15315 = vmatpush3.bf16.msra.mxu0 %v17090_v54 }
0x19d0   : > { %15316 = vmatprep.subr.bf16.mxu0 %v21225_v43 }
0x19d3   : > { %15317 = vmatpush3.bf16.msra.mxu0 %v17091_v25 }
0x19d4   : > { %15318 = vmatprep.subr.bf16.mxu0 %v21225_v43 }
0x1a02   : > { %v12656_v40 = vpop.xlane.xlu0 %12655 }
0x1a03   : > { %v12681_v3 = vmul.f32 0.015625, %v12656_v40 }
0x1a05   : > { %v12690_v19 = vadd.f32 1e-05, %v12681_v3  ;;  %v17092_v3 = vld [vmem:[%s21137_s7 + $0x68] sm:$0xff]  }
0x1a06   : > { %v15601_v49 = vpop.permute.xlu0 %15600  ;;  %v12659_v23 = vpop.xlane.xlu1 %12658  ;;  %15319 = vmatpush3.bf16.msra.mxu0 %v17092_v3 }
0x1a07   : > { %17462 = vrsqrt.f32 %v12690_v19  ;;  %v15603_v45 = vunpack.i.h.bf16 %v15601_v49  ;;  %v15602_v59 = vunpack.i.l.bf16 %v15601_v49  ;;  %v12682_v30 = vmul.f32 0.015625, %v12659_v23  ;;  %15320 = vmatprep.subr.bf16.mxu0 %v21225_v43  ;;  %v17095_v19 = vld [vmem:[%s21137_s7 + $0x50] sm:$0xff]   ;;  %v17097_v49 = vld [vmem:[%s21137_s7 + $0x40] sm:$0xff]  }
0x1a08   : > { %v21256_v23 = vld [vmem:[#allocation39_spill] sm:$0xff] }
0x1a09   : > { %v12464_v57 = vsel %vm10033_vm2, %v12455_v39, %v15602_v59  ;;  %v12465_v1 = vsel %vm10033_vm2, %v12456_v36, %v15603_v45  ;;  %v12691_v51 = vadd.f32 1e-05, %v12682_v30 }
0x1a0a   : > { %v12470_v33 = vpack.c.bf16 %v12465_v1, %v12464_v57  ;;  %v12394_v38 = vpop.permute.xlu0 %12393  ;;  %15321 = vmatpush3.bf16.msra.mxu0 %v17093_v6 }
0x1a0b   : > { %17464 = vrsqrt.f32 %v12691_v51  ;;  %15322 = vmatprep.subr.bf16.mxu0 %v21225_v43  ;;  %v21257_v51 = vld [vmem:[#allocation40_spill] sm:$0xff] }
0x1a0c   : > { %15279 = vmatmul.mubr.msk.bf16.gmra.mxu0 %vm8247_vm10, %v12470_v33 }
0x1a0d   : > { %15282 = vmatprep.mubr.msk.bf16.mxu0 %vm17809_vm11, %v21225_v43 }
0x1a0e   : > { %15323 = vmatpush3.bf16.msra.mxu0 %v17094_v37 }
0x1a0f   : > { %15324 = vmatprep.subr.bf16.mxu0 %v21225_v43 }
0x1a12   : > { %15325 = vmatpush3.bf16.msra.mxu0 %v17095_v19 }
0x1a13   : > { %15326 = vmatprep.subr.bf16.mxu0 %v21225_v43 }
0x1a14   : > { %v17463_v15 = vpop.eup %17462 }
0x1a15   : > { %v12708_v31 = vmul.f32 %v17463_v15, %v20833_v50  ;;  %v12358_v50 = vpop.permute.xlu1 %12357 }
0x1a16   : > { %v12448_v46 = vsel %vm8626_vm12, %v20679_v47, %v12358_v50  ;;  %15327 = vmatpush3.bf16.msra.mxu0 %v17096_v16 }
0x1a17   : > { %v12717_v42 = vmul.f32 %v12708_v31, %v20887_v58  ;;  %15328 = vmatprep.subr.bf16.mxu0 %v21225_v43 }
0x1a18   : > { %v17465_v55 = vpop.eup %17464 }
0x1a19   : > { %v12709_v32 = vmul.f32 %v17465_v55, %v20837_v63  ;;  %v12726_v7 = vadd.f32 %v12717_v42, %v20891_v11  ;;  %v12457_v63 = vsel %vm10023_vm1, %v12448_v46, %v12394_v38 }
0x1a1a   : > { %15329 = vmatpush3.bf16.msra.mxu0 %v17097_v49 }
0x1a1b   : > { %v12718_v53 = vmul.f32 %v12709_v32, %v20887_v58 }
0x1a1d   : > { %v12727_v44 = vadd.f32 %v12718_v53, %v20891_v11 }
0x1a1f   : > { %v12735_v18 = vpack.c.bf16 %v12727_v44, %v12726_v7  ;;  %v20975_v7 = vld [vmem:[#allocation12 + $0x16] ss:$0 sm:$0xff] }
0x1a21   : > { %15295 = vmatmul.mubr.msk.bf16.vlgmr.msra.gmra.mxu1 %vm8247_vm10, %v12735_v18 }
0x1a22   : > { %15298 = vmatprep.mubr.msk.bf16.mxu1 %vm17809_vm11, %v21225_v43 }
0x1a3a   : > { %v12430_v61 = vpop.permute.xlu1 %12429 }
0x1a3b   : > { %v12466_v24 = vsel %vm10033_vm2, %v12457_v63, %v12430_v61 }
0x1a3c   : > { %v12471_v9 = vpack.c.bf16 %v12466_v24, %v12466_v24 }
0x1a3e   : > { %15283 = vmatmul.mubr.msk.bf16.gmra.mxu0 %vm8247_vm10, %v12471_v9 }
0x1a3f   : > { %15330 = vmatprep.mubr.msk.bf16.mxu0 %vm17809_vm11, %v21225_v43 }
0x1a43   : > { %v12561_v56 = vpop.f32.mrf.mxu0 }
0x1a44   : > { %v12562_v60 = vadd.f32 %v12561_v56, %v20792_v22 }
0x1a45   : > { %v15272_v0 = vpop.f32.mrf.mxu0 }
0x1a46   : > { %v12593_v21 = vadd.f32 %v12562_v60, %v21252_v34 }
0x1a47   : > { %v12564_v10 = vpop.f32.mrf.mxu0 }
0x1a48   : > { %v12565_v47 = vadd.f32 %v12564_v10, %v20792_v22  ;;  %v12606_v2 = vsel %vm8247_vm10, %v12593_v21, 0.0 }
0x1a49   : > { %12607 = vadd.xlane.f32.xlu0 %v12606_v2  ;;  %v15273_v35 = vpop.f32.mrf.mxu0 }
0x1a4a   : > { %v20911_v13 = vadd.f32 %v12565_v47, %v21253_v20 }
0x1a4c   : > { %v12609_v52 = vsel %vm8247_vm10, %v20911_v13, 0.0 }
0x1a4d   : > { %12610 = vadd.xlane.f32.xlu1 %v12609_v52 }
0x1a6e   : > { %v12569_v4 = vpop.f32.mrf.mxu0 }
0x1a6f   : > { %v12570_v8 = vadd.f32 %v12569_v4, %v20792_v22 }
0x1a70   : > { %v15276_v17 = vpop.f32.mrf.mxu0 }
0x1a71   : > { %v20917_v27 = vadd.f32 %v12570_v8, %v21254_v48 }
0x1a72   : > { %v12572_v14 = vpop.f32.mrf.mxu0 }
0x1a73   : > { %v12573_v5 = vadd.f32 %v12572_v14, %v20792_v22  ;;  %v12612_v12 = vsel %vm8247_vm10, %v20917_v27, 0.0 }
0x1a74   : > { %12613 = vadd.xlane.f32.xlu0 %v12612_v12  ;;  %v15277_v41 = vpop.f32.mrf.mxu0 }
0x1a75   : > { %v20926_v62 = vadd.f32 %v12573_v5, %v21255_v29 }
0x1a77   : > { %v12615_v40 = vsel %vm8247_vm10, %v20926_v62, 0.0 }
0x1a78   : > { %12616 = vadd.xlane.f32.xlu0 %v12615_v40  ;;  %v21258_v40 = vld [vmem:[#allocation37_spill] sm:$0xff] }
0x1acc   : > { %v12577_v28 = vpop.f32.mrf.mxu0 }
0x1acd   : > { %v12578_v45 = vadd.f32 %v12577_v28, %v20792_v22 }
0x1ace   : > { %v15280_v59 = vpop.f32.mrf.mxu0 }
0x1acf   : > { %v20960_v36 = vadd.f32 %v12578_v45, %v21256_v23 }
0x1ad0   : > { %v12580_v39 = vpop.f32.mrf.mxu0 }
0x1ad1   : > { %v12581_v30 = vadd.f32 %v12580_v39, %v20792_v22  ;;  %v12618_v57 = vsel %vm8247_vm10, %v20960_v36, 0.0 }
0x1ad2   : > { %v12608_v1 = vpop.xlane.xlu0 %12607  ;;  %12619 = vadd.xlane.f32.xlu0 %v12618_v57  ;;  %v15281_v33 = vpop.f32.mrf.mxu0 }
0x1ad3   : > { %v20966_v15 = vadd.f32 %v12581_v30, %v21257_v51  ;;  %v12629_v31 = vmul.f32 0.015625, %v12608_v1 }
0x1ad5   : > { %v20968_v55 = vsub.f32 %v12593_v21, %v12629_v31  ;;  %v12621_v42 = vsel %vm8247_vm10, %v20966_v15, 0.0 }
0x1ad6   : > { %12622 = vadd.xlane.f32.xlu1 %v12621_v42  ;;  %v12611_v2 = vpop.xlane.xlu1 %12610 }
0x1ad7   : > { %v12647_v32 = vmul.f32 %v20968_v55, %v20968_v55  ;;  %v12630_v35 = vmul.f32 0.015625, %v12611_v2 }
0x1ad9   : > { %v12660_v53 = vsel %vm8247_vm10, %v12647_v32, 0.0  ;;  %v20980_v48 = vsub.f32 %v20911_v13, %v12630_v35 }
0x1ada   : > { %12661 = vadd.xlane.f32.xlu1 %v12660_v53 }
0x1ae1   : > { %v12821_v44 = vpop.f32.mrf.mxu1 }
0x1ae2   : > { %v12822_v18 = vadd.f32 %v12821_v44, %v20975_v7 }
0x1ae3   : > { %v15296_v50 = vpop.f32.mrf.mxu1 }
0x1ae4   : > { %v12859_v38 = vmul.f32 %v12822_v18, %v12822_v18 }
0x1ae5   : > { %v12824_v46 = vpop.f32.mrf.mxu1 }
0x1ae6   : > { %v12868_v63 = vmul.f32 %v12859_v38, %v12822_v18  ;;  %v12825_v61 = vadd.f32 %v12824_v46, %v20975_v7 }
0x1ae7   : > { %v15297_v24 = vpop.f32.mrf.mxu1 }
0x1ae8   : > { %v12877_v9 = vmul.f32 0.044715, %v12868_v63  ;;  %v12860_v56 = vmul.f32 %v12825_v61, %v12825_v61 }
0x1aea   : > { %v12886_v60 = vadd.f32 %v12877_v9, %v12822_v18  ;;  %v12869_v0 = vmul.f32 %v12860_v56, %v12825_v61 }
0x1aec   : > { %v12895_v34 = vmul.f32 0.7978846, %v12886_v60  ;;  %v12878_v21 = vmul.f32 0.044715, %v12869_v0 }
0x1aee   : > { %17466 = vtanh.f32 %v12895_v34  ;;  %v12887_v10 = vadd.f32 %v12878_v21, %v12825_v61 }
0x1af0   : > { %v12896_v47 = vmul.f32 0.7978846, %v12887_v10 }
0x1af2   : > { %17468 = vtanh.f32 %v12896_v47 }
0x1afb   : > { %v17467_v20 = vpop.eup %17466 }
0x1afc   : > { %v12913_v52 = vadd.f32 1.0, %v17467_v20 }
0x1afd   : > { %v12614_v4 = vpop.xlane.xlu0 %12613 }
0x1afe   : > { %v12631_v8 = vmul.f32 0.015625, %v12614_v4  ;;  %v12585_v17 = vpop.f32.mrf.mxu0  ;;  %v12922_v41 = vmul.f32 0.5, %v12913_v52 }
0x1aff   : > { %v12586_v14 = vadd.f32 %v12585_v17, %v20792_v22  ;;  %v17469_v5 = vpop.eup %17468  ;;  %v12648_v22 = vmul.f32 %v20980_v48, %v20980_v48 }
0x1b00   : > { %v20984_v12 = vsub.f32 %v20917_v27, %v12631_v8  ;;  %v15284_v54 = vpop.f32.mrf.mxu0  ;;  %v12914_v29 = vadd.f32 1.0, %v17469_v5  ;;  %v12931_v45 = vmul.f32 %v12922_v41, %v12822_v18 }
0x1b01   : > { %v12599_v25 = vadd.f32 %v12586_v14, %v21258_v40  ;;  %v12617_v3 = vpop.xlane.xlu0 %12616  ;;  %v12663_v39 = vsel %vm8247_vm10, %v12648_v22, 0.0 }
0x1b02   : > { %v12632_v6 = vmul.f32 0.015625, %v12617_v3  ;;  %v12588_v37 = vpop.f32.mrf.mxu0  ;;  %v12649_v19 = vmul.f32 %v20984_v12, %v20984_v12  ;;  %v12923_v16 = vmul.f32 0.5, %v12914_v29 }
0x1b03   : > { %v12624_v13 = vsel %vm8247_vm10, %v12599_v25, 0.0  ;;  %v10675_v37 = vld [vmem:[#allocation12 + $0x17] ss:$0 sm:$0xff] }
0x1b04   : > { %v12641_v27 = vsub.f32 %v20926_v62, %v12632_v6  ;;  %v12666_v49 = vsel %vm8247_vm10, %v12649_v19, 0.0  ;;  %12625 = vadd.xlane.f32.xlu0 %v12624_v13  ;;  %v15285_v28 = vpop.f32.mrf.mxu0  ;;  %v12932_v59 = vmul.f32 %v12923_v16, %v12825_v61 }
0x1b05   : > { %12667 = vadd.xlane.f32.xlu1 %v12666_v49 }
0x1b06   : > { %v12940_v23 = vpack.c.bf16 %v12932_v59, %v12931_v45  ;;  %v12650_v30 = vmul.f32 %v12641_v27, %v12641_v27 }
0x1b08   : > { %12664 = vadd.xlane.f32.xlu0 %v12663_v39  ;;  %15331 = vmatmul.mubr.bf16.vlgmr.msra.gmra.mxu0 %v12940_v23  ;;  %v12669_v57 = vsel %vm8247_vm10, %v12650_v30, 0.0 }
0x1b09   : > { %15334 = vmatprep.mubr.msk.bf16.mxu0 %vm17809_vm11, %v21225_v43 }
0x1b0c   : > { %12670 = vadd.xlane.f32.xlu0 %v12669_v57 }
0x1b5b   : > { %v12620_v62 = vpop.xlane.xlu0 %12619 }
0x1b5c   : > { %v12633_v1 = vmul.f32 0.015625, %v12620_v62 }
0x1b5e   : > { %v20999_v33 = vsub.f32 %v20960_v36, %v12633_v1 }
0x1b5f   : > { %v12623_v51 = vpop.xlane.xlu1 %12622 }
0x1b60   : > { %v12634_v31 = vmul.f32 0.015625, %v12623_v51  ;;  %v12651_v42 = vmul.f32 %v20999_v33, %v20999_v33 }
0x1b62   : > { %v21004_v32 = vsub.f32 %v20966_v15, %v12634_v31  ;;  %v12672_v53 = vsel %vm8247_vm10, %v12651_v42, 0.0 }
0x1b63   : > { %12673 = vadd.xlane.f32.xlu1 %v12672_v53  ;;  %v12662_v50 = vpop.xlane.xlu1 %12661 }
0x1b64   : > { %v12652_v44 = vmul.f32 %v21004_v32, %v21004_v32  ;;  %v12683_v36 = vmul.f32 0.015625, %v12662_v50 }
0x1b66   : > { %v12675_v18 = vsel %vm8247_vm10, %v12652_v44, 0.0  ;;  %v12692_v38 = vadd.f32 1e-05, %v12683_v36 }
0x1b67   : > { %12676 = vadd.xlane.f32.xlu0 %v12675_v18 }
0x1b68   : > { %17470 = vrsqrt.f32 %v12692_v38 }
0x1b75   : > { %v17471_v35 = vpop.eup %17470 }
0x1b76   : > { %v12710_v20 = vmul.f32 %v17471_v35, %v20968_v55 }
0x1b78   : > { %v12719_v8 = vmul.f32 %v12710_v20, %v20887_v58 }
0x1b7a   : > { %v12728_v29 = vadd.f32 %v12719_v8, %v20891_v11 }
0x1b8d   : > { %v12626_v46 = vpop.xlane.xlu0 %12625 }
0x1b8e   : > { %v12668_v63 = vpop.xlane.xlu1 %12667  ;;  %v12635_v61 = vmul.f32 0.015625, %v12626_v46 }
0x1b8f   : > { %v12685_v24 = vmul.f32 0.015625, %v12668_v63 }
0x1b90   : > { %v21010_v9 = vsub.f32 %v12599_v25, %v12635_v61 }
0x1b91   : > { %v12665_v15 = vpop.xlane.xlu0 %12664  ;;  %v12694_v0 = vadd.f32 1e-05, %v12685_v24 }
0x1b92   : > { %v12684_v56 = vmul.f32 0.015625, %v12665_v15  ;;  %v12653_v60 = vmul.f32 %v21010_v9, %v21010_v9 }
0x1b94   : > { %v12693_v34 = vadd.f32 1e-05, %v12684_v56  ;;  %v12678_v21 = vsel %vm8247_vm10, %v12653_v60, 0.0 }
0x1b95   : > { %12679 = vadd.xlane.f32.xlu1 %v12678_v21  ;;  %v12671_v10 = vpop.xlane.xlu0 %12670 }
0x1b96   : > { %17472 = vrsqrt.f32 %v12693_v34  ;;  %v12686_v47 = vmul.f32 0.015625, %v12671_v10 }
0x1b97   : > { %17474 = vrsqrt.f32 %v12694_v0 }
0x1b98   : > { %v12695_v2 = vadd.f32 1e-05, %v12686_v47 }
0x1b9a   : > { %17476 = vrsqrt.f32 %v12695_v2 }
0x1ba3   : > { %v17473_v52 = vpop.eup %17472 }
0x1ba4   : > { %v12711_v4 = vmul.f32 %v17473_v52, %v20980_v48  ;;  %v17475_v17 = vpop.eup %17474 }
0x1ba5   : > { %v12712_v54 = vmul.f32 %v17475_v17, %v20984_v12 }
0x1ba6   : > { %v12720_v14 = vmul.f32 %v12711_v4, %v20887_v58 }
0x1ba7   : > { %v17477_v5 = vpop.eup %17476  ;;  %v12721_v55 = vmul.f32 %v12712_v54, %v20887_v58 }
0x1ba8   : > { %v12713_v41 = vmul.f32 %v17477_v5, %v12641_v27  ;;  %v12729_v40 = vadd.f32 %v12720_v14, %v20891_v11 }
0x1ba9   : > { %v12730_v6 = vadd.f32 %v12721_v55, %v20891_v11 }
0x1baa   : > { %v12736_v25 = vpack.c.bf16 %v12729_v40, %v12728_v29  ;;  %v12722_v3 = vmul.f32 %v12713_v41, %v20887_v58 }
0x1bac   : > { %15299 = vmatmul.mubr.msk.bf16.gmra.mxu1 %vm8247_vm10, %v12736_v25  ;;  %v12731_v48 = vadd.f32 %v12722_v3, %v20891_v11 }
0x1bad   : > { %15302 = vmatprep.mubr.msk.bf16.mxu1 %vm17809_vm11, %v21225_v43 }
0x1bae   : > { %v12737_v12 = vpack.c.bf16 %v12731_v48, %v12730_v6 }
0x1bb4   : > { %15303 = vmatmul.mubr.msk.bf16.gmra.mxu1 %vm8247_vm10, %v12737_v12 }
0x1bb5   : > { %15306 = vmatprep.mubr.msk.bf16.mxu1 %vm17809_vm11, %v21225_v43 }
0x1bc8   : > { %v13044_v19 = vpop.f32.mrf.mxu0 }
0x1bc9   : > { %v13045_v16 = vadd.f32 %v13044_v19, %v10675_v37 }
0x1bca   : > { %v15332_v13 = vpop.f32.mrf.mxu0 }
0x1bcb   : > { %v13074_v22 = vadd.f32 %v13045_v16, %v20796_v26  ;;  %v17098_v16 = vld [vmem:[%s21140_s10 + $0x18] sm:$0xff]  }
0x1bcc   : > { %v13047_v27 = vpop.f32.mrf.mxu0  ;;  %15351 = vmatpush3.bf16.msra.mxu1 %v17098_v16  ;;  %v13076_v16 = vld [vmem:[#allocation14 + $0x1] sm:$0x1] }
0x1bcd   : > { %v13078_v49 = vsel %vm13077_vm3, %v13074_v22, 0.0  ;;  %15352 = vmatprep.subr.bf16.mxu1 %v21225_v43 }
0x1bce   : > { %13079 = vadd.xlane.f32.xlu0 %v13078_v49  ;;  %v15333_v28 = vpop.f32.mrf.mxu0  ;;  %v17099_v49 = vld [vmem:[%s21140_s10 + $0x10] sm:$0xff]  }
0x1bd0   : > { %15353 = vmatpush3.bf16.msra.mxu1 %v17099_v49 }
0x1bd1   : > { %15354 = vmatprep.subr.bf16.mxu1 %v21225_v43 }
0x1bec   : > { %v12674_v45 = vpop.xlane.xlu1 %12673 }
0x1bed   : > { %v12687_v59 = vmul.f32 0.015625, %v12674_v45 }
0x1bef   : > { %v12696_v23 = vadd.f32 1e-05, %v12687_v59  ;;  %v17100_v59 = vld [vmem:[%s21140_s10 + $0x8] sm:$0xff]  }
0x1bf0   : > { %v12677_v39 = vpop.xlane.xlu0 %12676  ;;  %15355 = vmatpush3.bf16.msra.mxu1 %v17100_v59 }
0x1bf1   : > { %17478 = vrsqrt.f32 %v12696_v23  ;;  %v12688_v30 = vmul.f32 0.015625, %v12677_v39  ;;  %v17101_v39 = vld [vmem:[%s21140_s10] sm:$0xff]   ;;  %15356 = vmatprep.subr.bf16.mxu1 %v21225_v43 }
0x1bf3   : > { %v12697_v57 = vadd.f32 1e-05, %v12688_v30 }
0x1bf4   : > { %15357 = vmatpush3.bf16.msra.mxu1 %v17101_v39 }
0x1bf5   : > { %17480 = vrsqrt.f32 %v12697_v57 }
0x1bfe   : > { %v17479_v62 = vpop.eup %17478 }
0x1bff   : > { %v12714_v1 = vmul.f32 %v17479_v62, %v20999_v33 }
0x1c01   : > { %v12723_v26 = vmul.f32 %v12714_v1, %v20887_v58 }
0x1c02   : > { %v17481_v51 = vpop.eup %17480 }
0x1c03   : > { %v12715_v31 = vmul.f32 %v17481_v51, %v21004_v32  ;;  %v12732_v53 = vadd.f32 %v12723_v26, %v20891_v11 }
0x1c05   : > { %v12724_v42 = vmul.f32 %v12715_v31, %v20887_v58 }
0x1c07   : > { %v12733_v44 = vadd.f32 %v12724_v42, %v20891_v11 }
0x1c09   : > { %v12738_v18 = vpack.c.bf16 %v12733_v44, %v12732_v53 }
0x1c0b   : > { %15307 = vmatmul.mubr.msk.bf16.gmra.mxu1 %vm8247_vm10, %v12738_v18 }
0x1c0c   : > { %15310 = vmatprep.mubr.msk.bf16.mxu1 %vm17809_vm11, %v21225_v43 }
0x1c1e   : > { %v12680_v50 = vpop.xlane.xlu1 %12679 }
0x1c1f   : > { %v12689_v36 = vmul.f32 0.015625, %v12680_v50 }
0x1c21   : > { %v12698_v33 = vadd.f32 1e-05, %v12689_v36 }
0x1c23   : > { %17482 = vrsqrt.f32 %v12698_v33 }
0x1c30   : > { %v17483_v38 = vpop.eup %17482 }
0x1c31   : > { %v12716_v32 = vmul.f32 %v17483_v38, %v21010_v9 }
0x1c33   : > { %v12725_v46 = vmul.f32 %v12716_v32, %v20887_v58 }
0x1c35   : > { %v12734_v63 = vadd.f32 %v12725_v46, %v20891_v11 }
0x1c37   : > { %v12739_v61 = vpack.c.bf16 %v12734_v63, %v12734_v63 }
0x1c39   : > { %15311 = vmatmul.mubr.msk.bf16.gmra.mxu1 %vm8247_vm10, %v12739_v61 }
0x1c3a   : > { %15358 = vmatprep.mubr.msk.bf16.mxu1 %vm17809_vm11, %v21225_v43 }
0x1c57   : > { %v13080_v24 = vpop.xlane.xlu0 %13079 }
0x1c58   : > { %v13081_v15 = vmul.f32 0.015625, %v13080_v24 }
0x1c5a   : > { %v21049_v56 = vsub.f32 %v13074_v22, %v13081_v15 }
0x1c5c   : > { %v13083_v60 = vmul.f32 %v21049_v56, %v21049_v56 }
0x1c5e   : > { %v13084_v0 = vsel %vm13077_vm3, %v13083_v60, 0.0 }
0x1c5f   : > { %13085 = vadd.xlane.f32.xlu1 %v13084_v0 }
0x1c6c   : > { %v12829_v9 = vpop.f32.mrf.mxu1 }
0x1c6d   : > { %v12830_v58 = vadd.f32 %v12829_v9, %v20975_v7 }
0x1c6e   : > { %v15300_v11 = vpop.f32.mrf.mxu1 }
0x1c6f   : > { %v12861_v34 = vmul.f32 %v12830_v58, %v12830_v58 }
0x1c70   : > { %v12832_v21 = vpop.f32.mrf.mxu1 }
0x1c71   : > { %v12870_v10 = vmul.f32 %v12861_v34, %v12830_v58  ;;  %v12833_v47 = vadd.f32 %v12832_v21, %v20975_v7 }
0x1c72   : > { %v15301_v2 = vpop.f32.mrf.mxu1 }
0x1c73   : > { %v12879_v35 = vmul.f32 0.044715, %v12870_v10  ;;  %v12862_v20 = vmul.f32 %v12833_v47, %v12833_v47 }
0x1c74   : > { %v12837_v52 = vpop.f32.mrf.mxu1 }
0x1c75   : > { %v12888_v4 = vadd.f32 %v12879_v35, %v12830_v58  ;;  %v12871_v8 = vmul.f32 %v12862_v20, %v12833_v47  ;;  %v12838_v17 = vadd.f32 %v12837_v52, %v20975_v7 }
0x1c76   : > { %v15304_v14 = vpop.f32.mrf.mxu1 }
0x1c77   : > { %v12897_v5 = vmul.f32 0.7978846, %v12888_v4  ;;  %v12880_v54 = vmul.f32 0.044715, %v12871_v8  ;;  %v12863_v41 = vmul.f32 %v12838_v17, %v12838_v17 }
0x1c78   : > { %v12840_v29 = vpop.f32.mrf.mxu1 }
0x1c79   : > { %17484 = vtanh.f32 %v12897_v5  ;;  %v12889_v40 = vadd.f32 %v12880_v54, %v12833_v47  ;;  %v12872_v25 = vmul.f32 %v12863_v41, %v12838_v17  ;;  %v12841_v3 = vadd.f32 %v12840_v29, %v20975_v7 }
0x1c7a   : > { %v15305_v55 = vpop.f32.mrf.mxu1 }
0x1c7b   : > { %v12898_v48 = vmul.f32 0.7978846, %v12889_v40  ;;  %v12881_v6 = vmul.f32 0.044715, %v12872_v25  ;;  %v12864_v12 = vmul.f32 %v12841_v3, %v12841_v3 }
0x1c7d   : > { %17486 = vtanh.f32 %v12898_v48  ;;  %v12890_v37 = vadd.f32 %v12881_v6, %v12838_v17  ;;  %v12873_v19 = vmul.f32 %v12864_v12, %v12841_v3  ;;  %v13075_v6 = vld [vmem:[#allocation14] sm:$0x1] }
0x1c7f   : > { %v12899_v13 = vmul.f32 0.7978846, %v12890_v37  ;;  %v12882_v22 = vmul.f32 0.044715, %v12873_v19 }
0x1c81   : > { %17488 = vtanh.f32 %v12899_v13  ;;  %v12891_v27 = vadd.f32 %v12882_v22, %v12841_v3 }
0x1c83   : > { %v12900_v28 = vmul.f32 0.7978846, %v12891_v27 }
0x1c85   : > { %17490 = vtanh.f32 %v12900_v28 }
0x1c86   : > { %v17485_v45 = vpop.eup %17484 }
0x1c87   : > { %v12915_v23 = vadd.f32 1.0, %v17485_v45 }
0x1c89   : > { %v12924_v57 = vmul.f32 0.5, %v12915_v23 }
0x1c8a   : > { %v17487_v30 = vpop.eup %17486 }
0x1c8b   : > { %v12916_v62 = vadd.f32 1.0, %v17487_v30  ;;  %v12933_v31 = vmul.f32 %v12924_v57, %v12830_v58 }
0x1c8d   : > { %v12925_v1 = vmul.f32 0.5, %v12916_v62 }
0x1c8e   : > { %v17489_v51 = vpop.eup %17488 }
0x1c8f   : > { %v12934_v26 = vmul.f32 %v12925_v1, %v12833_v47  ;;  %v12917_v42 = vadd.f32 1.0, %v17489_v51 }
0x1c91   : > { %v12941_v53 = vpack.c.bf16 %v12934_v26, %v12933_v31  ;;  %v12926_v18 = vmul.f32 0.5, %v12917_v42 }
0x1c92   : > { %v17491_v44 = vpop.eup %17490 }
0x1c93   : > { %v12918_v50 = vadd.f32 1.0, %v17491_v44  ;;  %15335 = vmatmul.mubr.bf16.gmra.mxu0 %v12941_v53  ;;  %v12935_v33 = vmul.f32 %v12926_v18, %v12838_v17 }
0x1c94   : > { %15338 = vmatprep.mubr.msk.bf16.mxu0 %vm17809_vm11, %v21225_v43 }
0x1c95   : > { %v12927_v36 = vmul.f32 0.5, %v12918_v50 }
0x1c97   : > { %v12936_v38 = vmul.f32 %v12927_v36, %v12841_v3 }
0x1c99   : > { %v12942_v32 = vpack.c.bf16 %v12936_v38, %v12935_v33  ;;  %v13102_v38 = vld [vmem:[#allocation14 + $0x2] sm:$0x1] }
0x1c9b   : > { %15339 = vmatmul.mubr.bf16.gmra.mxu0 %v12942_v32 }
0x1c9c   : > { %15342 = vmatprep.mubr.msk.bf16.mxu0 %vm17809_vm11, %v21225_v43 }
0x1ccb   : > { %v12845_v46 = vpop.f32.mrf.mxu1 }
0x1ccc   : > { %v12846_v63 = vadd.f32 %v12845_v46, %v20975_v7 }
0x1ccd   : > { %v15308_v61 = vpop.f32.mrf.mxu1 }
0x1cce   : > { %v12865_v24 = vmul.f32 %v12846_v63, %v12846_v63 }
0x1ccf   : > { %v12848_v15 = vpop.f32.mrf.mxu1 }
0x1cd0   : > { %v12874_v60 = vmul.f32 %v12865_v24, %v12846_v63  ;;  %v12849_v0 = vadd.f32 %v12848_v15, %v20975_v7 }
0x1cd1   : > { %v15309_v9 = vpop.f32.mrf.mxu1 }
0x1cd2   : > { %v12883_v58 = vmul.f32 0.044715, %v12874_v60  ;;  %v12866_v11 = vmul.f32 %v12849_v0, %v12849_v0 }
0x1cd4   : > { %v12892_v34 = vadd.f32 %v12883_v58, %v12846_v63  ;;  %v12875_v21 = vmul.f32 %v12866_v11, %v12849_v0 }
0x1cd6   : > { %v12901_v10 = vmul.f32 0.7978846, %v12892_v34  ;;  %v12884_v47 = vmul.f32 0.044715, %v12875_v21 }
0x1cd8   : > { %17492 = vtanh.f32 %v12901_v10  ;;  %v12893_v2 = vadd.f32 %v12884_v47, %v12849_v0 }
0x1cda   : > { %v12902_v35 = vmul.f32 0.7978846, %v12893_v2 }
0x1cdc   : > { %17494 = vtanh.f32 %v12902_v35 }
0x1ce5   : > { %v17493_v20 = vpop.eup %17492 }
0x1ce6   : > { %v12919_v52 = vadd.f32 1.0, %v17493_v20 }
0x1ce8   : > { %v13086_v8 = vpop.xlane.xlu1 %13085  ;;  %v12928_v17 = vmul.f32 0.5, %v12919_v52 }
0x1ce9   : > { %v17495_v4 = vpop.eup %17494  ;;  %v13087_v5 = vmul.f32 0.015625, %v13086_v8 }
0x1cea   : > { %v12920_v14 = vadd.f32 1.0, %v17495_v4  ;;  %v12937_v29 = vmul.f32 %v12928_v17, %v12846_v63 }
0x1ceb   : > { %v13088_v41 = vadd.f32 1e-05, %v13087_v5 }
0x1cec   : > { %v12929_v54 = vmul.f32 0.5, %v12920_v14 }
0x1ced   : > { %17496 = vrsqrt.f32 %v13088_v41 }
0x1cee   : > { %v12938_v40 = vmul.f32 %v12929_v54, %v12849_v0 }
0x1cf0   : > { %v12943_v25 = vpack.c.bf16 %v12938_v40, %v12937_v29 }
0x1cf2   : > { %15343 = vmatmul.mubr.bf16.gmra.mxu0 %v12943_v25 }
0x1cf3   : > { %15346 = vmatprep.mubr.msk.bf16.mxu0 %vm17809_vm11, %v21225_v43 }
0x1cf9   : > { %v12853_v3 = vpop.f32.mrf.mxu1 }
0x1cfa   : > { %v12854_v55 = vadd.f32 %v12853_v3, %v20975_v7  ;;  %v17497_v48 = vpop.eup %17496 }
0x1cfb   : > { %v15312_v12 = vpop.f32.mrf.mxu1  ;;  %v13090_v37 = vmul.f32 %v17497_v48, %v21049_v56 }
0x1cfc   : > { %v12867_v19 = vmul.f32 %v12854_v55, %v12854_v55 }
0x1cfd   : > { %v12856_v13 = vpop.f32.mrf.mxu1  ;;  %v13091_v22 = vmul.f32 %v13090_v37, %v13075_v6 }
0x1cfe   : > { %v12876_v27 = vmul.f32 %v12867_v19, %v12854_v55 }
0x1cff   : > { %v15313_v49 = vpop.f32.mrf.mxu1  ;;  %v13092_v28 = vadd.f32 %v13091_v22, %v13076_v16 }
0x1d00   : > { %v12885_v45 = vmul.f32 0.044715, %v12876_v27 }
0x1d01   : > { %v13093_v59 = vpack.c.bf16 %v13092_v28, %v13092_v28 }
0x1d02   : > { %v12894_v23 = vadd.f32 %v12885_v45, %v12854_v55 }
0x1d03   : > { %15359 = vmatmul.mubr.msk.bf16.vlgmr.msra.gmra.mxu1 %vm8247_vm10, %v13093_v59 }
0x1d04   : > { %v12903_v39 = vmul.f32 0.7978846, %v12894_v23 }
0x1d06   : > { %17498 = vtanh.f32 %v12903_v39 }
0x1d13   : > { %v17499_v43 = vpop.eup %17498 }
0x1d14   : > { %v12921_v7 = vadd.f32 1.0, %v17499_v43 }
0x1d16   : > { %v12930_v30 = vmul.f32 0.5, %v12921_v7 }
0x1d18   : > { %v12939_v57 = vmul.f32 %v12930_v30, %v12854_v55 }
0x1d1a   : > { %v12944_v56 = vpack.c.bf16 %v12939_v57, %v12939_v57 }
0x1d1c   : > { %15347 = vmatmul.mubr.bf16.gmra.mxu0 %v12944_v56 }
0x1d53   : > { %v13051_v62 = vpop.f32.mrf.mxu0 }
0x1d55   : > { %v15336_v1 = vpop.f32.mrf.mxu0 }
0x1d57   : > { %v13053_v51 = vpop.f32.mrf.mxu0 }
0x1d59   : > { %v15337_v31 = vpop.f32.mrf.mxu0 }
0x1d5b   : > { %v13057_v26 = vpop.f32.mrf.mxu0 }
0x1d5d   : > { %v15340_v42 = vpop.f32.mrf.mxu0 }
0x1d5f   : > { %v13059_v53 = vpop.f32.mrf.mxu0 }
0x1d61   : > { %v15341_v44 = vpop.f32.mrf.mxu0 }
0x1db2   : > { %v13063_v18 = vpop.f32.mrf.mxu0 }
0x1db4   : > { %v15344_v50 = vpop.f32.mrf.mxu0 }
0x1db6   : > { %v13065_v36 = vpop.f32.mrf.mxu0 }
0x1db8   : > { %v15345_v33 = vpop.f32.mrf.mxu0 }
0x1dc3   : > { %v13164_v32 = vpop.f32.mrf.mxu1 }
0x1dc4   : > { %v13165_v46 = vadd.f32 %v13164_v32, %v13102_v38 }
0x1dc5   : > { %v15360_v63 = vpop.f32.mrf.mxu1 }
0x1dc6   : > { %13171 = vst.msk [vmem:[%s479_s30] sm:$0x1] %vm13170_vm4, %v13165_v46 }
0x1dc7   : > { %v13167_v61 = vpop.f32.mrf.mxu1 }
0x1dc8   : > { %17729 = shalt.err (!%p17726_p2)
}
0x1dc9   : > { %s17730_s22 = scalar_lea.hbm %s21089_s16, 16  ;;  %s17734_s24 = scalar_lea.hbm %s21141_s11, 32 }
0x1dca   : > { %p17731_p5 = scmp.ne.s32.totalorder %s21089_s16, %s17730_s22  ;;  %p17735_p10 = scmp.lt.s32.totalorder %s21089_s16, %s21141_s11 }
0x1dcb   : > { %p17736_p3 = scmp.lt.s32.totalorder %s17734_s24, %s17730_s22 }
0x1dcc   : > { %p17732_p6 = pnand %p17731_p5, %p21259_p8 }
0x1dcd   : > { %p17737_p4 = por %p17736_p3, %p17735_p10 }
0x1dce   : > { %p17733_p12 = pneg %p17732_p6 }
0x1dd0   : > { %p17738_p7 = pnand %p17737_p4, %p17733_p12 }
0x1dd2   : > { %17741 = shalt.err (!%p17738_p7)
}
0x1dd3   : > { %15390 = dma.vmem_to_hbm [thread:$0]  (%p21259_p8), %s21091_s12, 16, %s21089_s16, %s13173_s15   ;;  %v15361_v24 = vpop.f32.mrf.mxu1 }
0x1ddc   : > { %v13069_v15 = vpop.f32.mrf.mxu0 }
0x1dde   : > { %v15348_v60 = vpop.f32.mrf.mxu0 }
0x1de0   : > { %v13071_v0 = vpop.f32.mrf.mxu0 }
0x1de2   : > { %v15349_v9 = vpop.f32.mrf.mxu0 }
0x1de3 PF: > { %p15432_p11 = scmp.ge.s32.totalorder %s17792_s20, 2  ;;  %s13197_s2 = sand.u32 1, %s17780_s17  }
0x1de4   : > { %p21260_p0 = scmp.ne.s32.totalorder %s21181_s28, 0  ;;  %s13198_s19 = scalar_lea.sflag [#allocation5], %s13197_s2 }
0x1de6   : > { %p15415_p1 = pnand %p15432_p11, %p21260_p0 }
0x1de8   : > { %p15416_p9 = pneg %p15415_p1 }
0x1dea   : > { %17775 = dma.done.wait (%p15416_p9), %s13198_s19, 16  }
0x1deb   : > { %17777 = vsyncadd (%p15416_p9), %s13198_s19, 4294967280  ;;  %s21261_s27 = sld [smem:[#allocation21_spill]]  ;;  %p25_p8 = scmp.ge.s32.totalorder %s17899_s23, 4  }
0x1dec   : > { %s21262_s19 = sld [smem:[#allocation22_spill]]  ;;  %s21263_s17 = smov %s17784_s18 }
0x1ded   : > { %s21265_s20 = smov %s17899_s23  ;;  %27 = sbr.rel (!%p25_p8) target bundleno = 10 (0xa), region = 134 }
0x1df1   : > { %s21264_s18 = smov %s21261_s27 }
0x1df2   :  { %13202 = vsyncpa [#allocation4], 1 }
0x1df3   :  { %13204 = vsyncpa [#allocation4 + $0x1], 1 }
0x1df4   :  { %13205 = vsyncpa [#allocation7], 1 }
0x1df5   :  { %13206 = vsyncpa [#allocation10], 1 }
0x1df6   :  { %13207 = vsyncpa [#allocation13], 1 }
0x1df7   :  { %13208 = vsyncpa [#allocation5], 1 }
0x1df8   :  { %13210 = vsyncpa [#allocation5 + $0x1], 1 }

</bundles_post_ra>
